<compile_context>
chip_gen: v7x
topology: tpu7x:2x2x1
jax: 0.10.0
libtpu: 0.0.40
codegen_flags: <defaults>
</compile_context>

<pallas_src>
import functools

import jax
import jax.numpy as jnp
import numpy as np
from jax import lax
from jax.experimental import pallas as pl
from jax.experimental.pallas import tpu as pltpu


def _round_up(x, m):
    return (x + m - 1) // m * m


def _buf_bytes(shape, itemsize):
    """Conservative physical-VMEM size of one buffer: last dim padded to 128
    lanes, second-to-last to the native sublane tile (8 for 4-byte, 16 for
    2-byte elements), leading dims dense."""
    s = list(shape) if len(shape) >= 2 else [1] + list(shape)
    sub = 8 * (4 // itemsize)
    s[-1] = _round_up(s[-1], 128)
    s[-2] = _round_up(s[-2], sub)
    n = 1
    for d in s:
        n *= int(d)
    return n * itemsize


def _make_resblock_kernel(H, W, C, CP, K, TH):
    """Fused per-image kernel: pad -> conv1+BN1+ReLU -> conv2+BN2 -> +x."""
    pad = K // 2
    Hp, Wp = H + 2 * pad, W + 2 * pad
    n_tiles = -(-H // TH)

    def kernel(x_ref, w1_ref, s1_ref, b1_ref, w2_ref, s2_ref, b2_ref,
               o_ref, xpad_ref, ypad_ref):

        def zero_frame(ref):
            # Only the halo frame needs zeroing: the interior is fully
            # overwritten below.  Per-step (not hoisted to program_id==0)
            # because the "parallel" batch axis may be split across cores,
            # each with its own scratch copy.
            if pad == 0:
                return
            ref[0:pad, :, :] = jnp.zeros((pad, Wp, C), ref.dtype)
            ref[pad + H:, :, :] = jnp.zeros((pad, Wp, C), ref.dtype)
            ref[pad:pad + H, 0:pad, :] = jnp.zeros((H, pad, C), ref.dtype)
            ref[pad:pad + H, pad + W:, :] = jnp.zeros((H, pad, C), ref.dtype)

        zero_frame(xpad_ref)
        zero_frame(ypad_ref)

        # Stage x once in bf16 (single cast; all conv1 taps read bf16 directly).
        xpad_ref[pad:pad + H, pad:pad + W, :] = x_ref[0].astype(jnp.bfloat16)

        def conv_tile(src_ref, w_ref, r0, rows):
            """'SAME' KxK conv for output rows [r0, r0+rows): K*K per-tap MXU
            matmuls (bf16 in, f32 accumulate) -- no materialized im2col."""
            m = rows * W
            acc = None
            for dy in range(K):
                for dx in range(K):
                    tap = src_ref[dy + r0:dy + r0 + rows, dx:dx + W, :]
                    part = jnp.dot(tap.reshape(m, C), w_ref[dy * K + dx],
                                   preferred_element_type=jnp.float32)
                    acc = part if acc is None else acc + part
            return acc                                     # (m, CP) f32

        # ---- conv1 + folded BN1 + ReLU (Dropout p=0 == identity) -> ypad ----
        for t in range(n_tiles):
            r0 = t * TH
            rows = min(TH, H - r0)
            acc = conv_tile(xpad_ref, w1_ref, r0, rows)
            y = acc[:, 0:C] * s1_ref[...] + b1_ref[...]
            y = jnp.maximum(y, 0.0)
            ypad_ref[pad + r0:pad + r0 + rows, pad:pad + W, :] = (
                y.astype(jnp.bfloat16).reshape(rows, W, C))

        # ---- conv2 + folded BN2 + residual add -> output (f32, true C) ----
        for t in range(n_tiles):
            r0 = t * TH
            rows = min(TH, H - r0)
            acc = conv_tile(ypad_ref, w2_ref, r0, rows)
            y = acc[:, 0:C] * s2_ref[...] + b2_ref[...]
            y = y + x_ref[0, r0:r0 + rows, :, :].reshape(rows * W, C)  # f32 residual
            o_ref[0, r0:r0 + rows, :, :] = (
                y.reshape(rows, W, C).astype(o_ref.dtype))

    return kernel


def _resblock_pallas(x_nhwc, w1p, s1p, b1p, w2p, s2p, b2p, *, K, CP):
    """One fused pallas_call for the whole ResBlock (grid over batch)."""
    N, H, W, C = x_nhwc.shape
    pad = K // 2
    Hp, Wp = H + 2 * pad, W + 2 * pad

    # Row tile: keep the per-tile f32 accumulator (+taps) modest while keeping
    # >= ~256 rows per matmul so MXU pipeline fill is amortized.
    acc_budget = 2 * 2**20
    th_cap = max(1, acc_budget // max(1, W * CP * 4))
    th_min = max(1, -(-256 // W))
    TH = min(H, max(th_cap, th_min))
    n_tiles = -(-H // TH)
    TH = -(-H // n_tiles)

    kernel = _make_resblock_kernel(H, W, C, CP, K, TH)

    # Explicit scoped-VMEM budget: scratch + double-buffered IO blocks +
    # constant operands, with ~2x headroom for Mosaic internal scratch/spills.
    est = (
        2 * _buf_bytes((Hp, Wp, C), 2)                 # xpad + ypad (bf16)
        + 2 * 2 * _buf_bytes((1, H, W, C), 4)          # x / out blocks, 2x-buffered
        + 2 * 2 * _buf_bytes((K * K, C, CP), 2)        # w1 + w2, 2x-buffered
        + 2 * 4 * _buf_bytes((1, C), 4)                # scales / biases
        + 4 * TH * W * CP * 4                          # f32 accumulator + spill room
    )
    vmem_limit = int(min(max(2 * est, 32 * 2**20), 64 * 2**20))

    return pl.pallas_call(
        kernel,
        out_shape=jax.ShapeDtypeStruct((N, H, W, C), jnp.float32),
        grid=(N,),
        in_specs=[
            pl.BlockSpec((1, H, W, C), lambda n: (n, 0, 0, 0)),   # image n (f32)
            pl.BlockSpec((K * K, C, CP), lambda n: (0, 0, 0)),    # w1 (tap, Cin, Cout_pad)
            pl.BlockSpec((1, C), lambda n: (0, 0)),               # scale1 (folded BN1)
            pl.BlockSpec((1, C), lambda n: (0, 0)),               # bias1
            pl.BlockSpec((K * K, C, CP), lambda n: (0, 0, 0)),    # w2
            pl.BlockSpec((1, C), lambda n: (0, 0)),               # scale2
            pl.BlockSpec((1, C), lambda n: (0, 0)),               # bias2
        ],
        out_specs=pl.BlockSpec((1, H, W, C), lambda n: (n, 0, 0, 0)),
        scratch_shapes=[
            pltpu.VMEM((Hp, Wp, C), jnp.bfloat16),    # halo-padded x (bf16, cast once)
            pltpu.VMEM((Hp, Wp, C), jnp.bfloat16),    # halo-padded y1 (never leaves VMEM)
        ],
        compiler_params=pltpu.CompilerParams(
            dimension_semantics=("parallel",),
            vmem_limit_bytes=vmem_limit,
        ),
    )(x_nhwc, w1p, s1p, b1p, w2p, s2p, b2p)


def _fold_bn(conv_bias, gamma, beta, running_mean, running_var, eps=1e-5):
    """Fold conv bias + eval-mode BatchNorm into per-channel (scale, bias)."""
    inv_std = 1.0 / jnp.sqrt(running_var + eps)
    scale = gamma * inv_std
    bias = (conv_bias - running_mean) * scale + beta
    return scale.astype(jnp.float32), bias.astype(jnp.float32)


@functools.partial(jax.jit, static_argnames=("K",))
def resblock_forward(x_nchw, w1, b1, s1g, s1b, s1m, s1v,
                     w2, b2, s2g, s2b, s2m, s2v, *, K):
    """ResBlock_ forward.  x_nchw: (N, C, H, W) like PyTorch; returns NCHW."""
    N, C, H, W = x_nchw.shape
    CP = _round_up(C, 128)          # MXU output lane width (true C sliced in-kernel)

    # Single NCHW -> NHWC layout pass at the PyTorch boundary.
    x = jnp.transpose(x_nchw, (0, 2, 3, 1))

    def prep_w(w):
        # OIHW -> (kH*kW, Cin, Cout) tap-major; pad Cout to CP with zero columns
        # (padded output lanes stay exactly 0); cast once to bf16 (MXU path).
        wk = jnp.transpose(w, (2, 3, 1, 0)).reshape(K * K, C, C)
        wk = jnp.pad(wk, ((0, 0), (0, 0), (0, CP - C)))
        return wk.astype(jnp.bfloat16)

    def prep_affine(cb, g, be, m, v):
        s, b = _fold_bn(cb, g, be, m, v)
        return s.reshape(1, C), b.reshape(1, C)

    w1p, w2p = prep_w(w1), prep_w(w2)
    s1p, b1p = prep_affine(b1, s1g, s1b, s1m, s1v)
    s2p, b2p = prep_affine(b2, s2g, s2b, s2m, s2v)

    y = _resblock_pallas(x, w1p, s1p, b1p, w2p, s2p, b2p, K=K, CP=CP)

    # NHWC -> NCHW back to the PyTorch interface (no channel slice needed).
    return jnp.transpose(y, (0, 3, 1, 2))


def init_resblock_params(key, n_feats, kernel_size):
    """Deterministic synthetic parameters matching ResBlock_'s shapes."""
    ks = jax.random.split(key, 10)
    C, K = n_feats, kernel_size
    fan = C * K * K
    std = 1.0 / np.sqrt(fan)

    def mk_conv(kw, kb):
        w = jax.random.normal(kw, (C, C, K, K), jnp.float32) * std   # OIHW (PyTorch)
        b = jax.random.normal(kb, (C,), jnp.float32) * std
        return w, b

    w1, b1 = mk_conv(ks[0], ks[1])
    w2, b2 = mk_conv(ks[2], ks[3])
    bn1 = dict(
        gamma=1.0 + 0.1 * jax.random.normal(ks[4], (C,), jnp.float32),
        beta=0.1 * jax.random.normal(ks[5], (C,), jnp.float32),
        mean=0.05 * jax.random.normal(ks[6], (C,), jnp.float32),
        var=1.0 + 0.1 * jax.random.uniform(ks[7], (C,), jnp.float32),
    )
    bn2 = dict(
        gamma=1.0 + 0.1 * jax.random.normal(ks[8], (C,), jnp.float32),
        beta=0.1 * jax.random.normal(ks[9], (C,), jnp.float32),
        mean=0.05 * jax.random.normal(ks[4], (C,), jnp.float32),
        var=1.0 + 0.1 * jax.random.uniform(ks[5], (C,), jnp.float32),
    )
    return dict(w1=w1, b1=b1, bn1=bn1, w2=w2, b2=b2, bn2=bn2, K=K)


def _reference_forward(x_nchw, p):
    """Pure-JAX reference (lax.conv, NCHW end to end).  Matmul operands are
    rounded to bf16 exactly as the kernel feeds the MXU (bf16 inputs, f32
    accumulation); all other math stays f32."""
    eps = 1e-5
    dn = ("NCHW", "OIHW", "NCHW")

    def q(t):  # bf16 rounding of matmul operands, math in f32
        return t.astype(jnp.bfloat16).astype(jnp.float32)

    def conv(x, w, b):
        y = lax.conv_general_dilated(q(x), q(w), window_strides=(1, 1),
                                     padding="SAME", dimension_numbers=dn,
                                     precision=lax.Precision.HIGHEST)
        return y + b[None, :, None, None]

    def bn(x, d):
        inv = 1.0 / jnp.sqrt(d["var"] + eps)
        return (x - d["mean"][None, :, None, None]) * (d["gamma"] * inv)[None, :, None, None] \
               + d["beta"][None, :, None, None]

    r = conv(x_nchw, p["w1"], p["b1"])
    r = bn(r, p["bn1"])
    r = jnp.maximum(r, 0.0)
    r = conv(r, p["w2"], p["b2"])
    r = bn(r, p["bn2"])
    return r + x_nchw


if __name__ == "__main__":
    key = jax.random.PRNGKey(0)
    kx, kp = jax.random.split(key)

    N, C, H, W = 2, 4, 16, 16       # batch, n_feats, spatial
    K = 3                           # kernel_size
    x = jax.random.normal(kx, (N, C, H, W), jnp.float32)

    params = init_resblock_params(kp, n_feats=C, kernel_size=K)

    out = resblock_forward(
        x,
        params["w1"], params["b1"],
        params["bn1"]["gamma"], params["bn1"]["beta"],
        params["bn1"]["mean"], params["bn1"]["var"],
        params["w2"], params["b2"],
        params["bn2"]["gamma"], params["bn2"]["beta"],
        params["bn2"]["mean"], params["bn2"]["var"],
        K=K,
    )
    out = jax.block_until_ready(out)

    ref = jax.block_until_ready(_reference_forward(x, params))
    assert out.shape == (N, C, H, W)
    # Tolerance reflects bf16 MXU inputs (f32 accumulation); any structural bug
    # (tap alignment, BN fold, residual) would show errors orders of magnitude larger.
    np.testing.assert_allclose(np.asarray(out), np.asarray(ref), atol=5e-3, rtol=5e-3)

    print("KERNEL_OK")
</pallas_src>

<mosaic_0001>
module attributes {stable_mosaic.version = 11 : i64} {
  func.func @kernel(%arg0: i32, %arg1: memref<1x16x16x4xf32, #tpu.memory_space<vmem>>, %arg2: memref<9x4x128xbf16, #tpu.memory_space<vmem>>, %arg3: memref<1x4xf32, #tpu.memory_space<vmem>>, %arg4: memref<1x4xf32, #tpu.memory_space<vmem>>, %arg5: memref<9x4x128xbf16, #tpu.memory_space<vmem>>, %arg6: memref<1x4xf32, #tpu.memory_space<vmem>>, %arg7: memref<1x4xf32, #tpu.memory_space<vmem>>, %arg8: memref<1x16x16x4xf32, #tpu.memory_space<vmem>>, %arg9: memref<18x18x4xbf16, #tpu.memory_space<vmem>>, %arg10: memref<18x18x4xbf16, #tpu.memory_space<vmem>>) attributes {dimension_semantics = [#tpu.dimension_semantics<parallel>], iteration_bounds = array<i64: 2>, scalar_prefetch = 0 : i64, scratch_operands = 2 : i64, tpu.core_type = #tpu.core_type<tc>, window_params = [{transform_indices = @transform_0, window_bounds = array<i64: 1, 16, 16, 4>}, {pipeline_mode = #tpu.pipeline_mode<synchronous>, transform_indices = @transform_1, window_bounds = array<i64: 9, 4, 128>}, {pipeline_mode = #tpu.pipeline_mode<synchronous>, transform_indices = @transform_2, window_bounds = array<i64: 1, 4>}, {pipeline_mode = #tpu.pipeline_mode<synchronous>, transform_indices = @transform_3, window_bounds = array<i64: 1, 4>}, {pipeline_mode = #tpu.pipeline_mode<synchronous>, transform_indices = @transform_4, window_bounds = array<i64: 9, 4, 128>}, {pipeline_mode = #tpu.pipeline_mode<synchronous>, transform_indices = @transform_5, window_bounds = array<i64: 1, 4>}, {pipeline_mode = #tpu.pipeline_mode<synchronous>, transform_indices = @transform_6, window_bounds = array<i64: 1, 4>}, {transform_indices = @transform_7, window_bounds = array<i64: 1, 16, 16, 4>}]} {
    %cst = arith.constant 0.000000e+00 : bf16
    %0 = vector.broadcast %cst : bf16 to vector<1x18x4xbf16>
    %c0 = arith.constant 0 : index
    %c0_0 = arith.constant 0 : index
    %c0_1 = arith.constant 0 : index
    %1 = vector.load %arg9[%c0, %c0_0, %c0_1] : memref<18x18x4xbf16, #tpu.memory_space<vmem>>, vector<1x18x4xbf16>
    tpu.vector_store %arg9[%c0, %c0_0, %c0_1], %0 {strides = array<i32>} : memref<18x18x4xbf16, #tpu.memory_space<vmem>>, vector<1x18x4xbf16>,
    %cst_2 = arith.constant 0.000000e+00 : bf16
    %2 = vector.broadcast %cst_2 : bf16 to vector<1x18x4xbf16>
    %c17 = arith.constant 17 : index
    %c0_3 = arith.constant 0 : index
    %c0_4 = arith.constant 0 : index
    %3 = vector.load %arg9[%c17, %c0_3, %c0_4] : memref<18x18x4xbf16, #tpu.memory_space<vmem>>, vector<1x18x4xbf16>
    tpu.vector_store %arg9[%c17, %c0_3, %c0_4], %2 {strides = array<i32>} : memref<18x18x4xbf16, #tpu.memory_space<vmem>>, vector<1x18x4xbf16>,
    %cst_5 = arith.constant 0.000000e+00 : bf16
    %4 = vector.broadcast %cst_5 : bf16 to vector<16x1x4xbf16>
    %c1 = arith.constant 1 : index
    %c0_6 = arith.constant 0 : index
    %c0_7 = arith.constant 0 : index
    %5 = vector.load %arg9[%c1, %c0_6, %c0_7] : memref<18x18x4xbf16, #tpu.memory_space<vmem>>, vector<16x1x4xbf16>
    tpu.vector_store %arg9[%c1, %c0_6, %c0_7], %4 {strides = array<i32>} : memref<18x18x4xbf16, #tpu.memory_space<vmem>>, vector<16x1x4xbf16>,
    %cst_8 = arith.constant 0.000000e+00 : bf16
    %6 = vector.broadcast %cst_8 : bf16 to vector<16x1x4xbf16>
    %c1_9 = arith.constant 1 : index
    %c17_10 = arith.constant 17 : index
    %c0_11 = arith.constant 0 : index
    %7 = vector.load %arg9[%c1_9, %c17_10, %c0_11] : memref<18x18x4xbf16, #tpu.memory_space<vmem>>, vector<16x1x4xbf16>
    tpu.vector_store %arg9[%c1_9, %c17_10, %c0_11], %6 {strides = array<i32>} : memref<18x18x4xbf16, #tpu.memory_space<vmem>>, vector<16x1x4xbf16>,
    %cst_12 = arith.constant 0.000000e+00 : bf16
    %8 = vector.broadcast %cst_12 : bf16 to vector<1x18x4xbf16>
    %c0_13 = arith.constant 0 : index
    %c0_14 = arith.constant 0 : index
    %c0_15 = arith.constant 0 : index
    %9 = vector.load %arg10[%c0_13, %c0_14, %c0_15] : memref<18x18x4xbf16, #tpu.memory_space<vmem>>, vector<1x18x4xbf16>
    tpu.vector_store %arg10[%c0_13, %c0_14, %c0_15], %8 {strides = array<i32>} : memref<18x18x4xbf16, #tpu.memory_space<vmem>>, vector<1x18x4xbf16>,
    %cst_16 = arith.constant 0.000000e+00 : bf16
    %10 = vector.broadcast %cst_16 : bf16 to vector<1x18x4xbf16>
    %c17_17 = arith.constant 17 : index
    %c0_18 = arith.constant 0 : index
    %c0_19 = arith.constant 0 : index
    %11 = vector.load %arg10[%c17_17, %c0_18, %c0_19] : memref<18x18x4xbf16, #tpu.memory_space<vmem>>, vector<1x18x4xbf16>
    tpu.vector_store %arg10[%c17_17, %c0_18, %c0_19], %10 {strides = array<i32>} : memref<18x18x4xbf16, #tpu.memory_space<vmem>>, vector<1x18x4xbf16>,
    %cst_20 = arith.constant 0.000000e+00 : bf16
    %12 = vector.broadcast %cst_20 : bf16 to vector<16x1x4xbf16>
    %c1_21 = arith.constant 1 : index
    %c0_22 = arith.constant 0 : index
    %c0_23 = arith.constant 0 : index
    %13 = vector.load %arg10[%c1_21, %c0_22, %c0_23] : memref<18x18x4xbf16, #tpu.memory_space<vmem>>, vector<16x1x4xbf16>
    tpu.vector_store %arg10[%c1_21, %c0_22, %c0_23], %12 {strides = array<i32>} : memref<18x18x4xbf16, #tpu.memory_space<vmem>>, vector<16x1x4xbf16>,
    %cst_24 = arith.constant 0.000000e+00 : bf16
    %14 = vector.broadcast %cst_24 : bf16 to vector<16x1x4xbf16>
    %c1_25 = arith.constant 1 : index
    %c17_26 = arith.constant 17 : index
    %c0_27 = arith.constant 0 : index
    %15 = vector.load %arg10[%c1_25, %c17_26, %c0_27] : memref<18x18x4xbf16, #tpu.memory_space<vmem>>, vector<16x1x4xbf16>
    tpu.vector_store %arg10[%c1_25, %c17_26, %c0_27], %14 {strides = array<i32>} : memref<18x18x4xbf16, #tpu.memory_space<vmem>>, vector<16x1x4xbf16>,
    %c0_28 = arith.constant 0 : index
    %c0_29 = arith.constant 0 : index
    %c0_30 = arith.constant 0 : index
    %c0_31 = arith.constant 0 : index
    %16 = vector.load %arg1[%c0_28, %c0_29, %c0_30, %c0_31] : memref<1x16x16x4xf32, #tpu.memory_space<vmem>>, vector<1x16x16x4xf32>
    %17 = vector.shape_cast %16 : vector<1x16x16x4xf32> to vector<16x16x4xf32>
    %18 = arith.truncf %17 : vector<16x16x4xf32> to vector<16x16x4xbf16>
    %c1_32 = arith.constant 1 : index
    %c1_33 = arith.constant 1 : index
    %c0_34 = arith.constant 0 : index
    %19 = vector.load %arg9[%c1_32, %c1_33, %c0_34] : memref<18x18x4xbf16, #tpu.memory_space<vmem>>, vector<16x16x4xbf16>
    tpu.vector_store %arg9[%c1_32, %c1_33, %c0_34], %18 {strides = array<i32>} : memref<18x18x4xbf16, #tpu.memory_space<vmem>>, vector<16x16x4xbf16>,
    %c0_35 = arith.constant 0 : index
    %c0_36 = arith.constant 0 : index
    %c0_37 = arith.constant 0 : index
    %20 = vector.load %arg9[%c0_35, %c0_36, %c0_37] : memref<18x18x4xbf16, #tpu.memory_space<vmem>>, vector<16x16x4xbf16>
    %21 = vector.shape_cast %20 : vector<16x16x4xbf16> to vector<256x4xbf16>
    %c0_38 = arith.constant 0 : index
    %c0_39 = arith.constant 0 : index
    %c0_40 = arith.constant 0 : index
    %22 = vector.load %arg2[%c0_38, %c0_39, %c0_40] : memref<9x4x128xbf16, #tpu.memory_space<vmem>>, vector<1x4x128xbf16>
    %23 = vector.shape_cast %22 : vector<1x4x128xbf16> to vector<4x128xbf16>
    %cst_41 = arith.constant dense<0.000000e+00> : vector<256x128xf32>
    %24 = tpu.matmul %21, %23, %cst_41 {dimension_numbers = #tpu.dot_dimension_numbers<[1], [0], [0], [1], [0, 0, 1, 1], [], []>} : vector<256x4xbf16>, vector<4x128xbf16>, vector<256x128xf32> -> vector<256x128xf32>
    %c0_42 = arith.constant 0 : index
    %c1_43 = arith.constant 1 : index
    %c0_44 = arith.constant 0 : index
    %25 = vector.load %arg9[%c0_42, %c1_43, %c0_44] : memref<18x18x4xbf16, #tpu.memory_space<vmem>>, vector<16x16x4xbf16>
    %26 = vector.shape_cast %25 : vector<16x16x4xbf16> to vector<256x4xbf16>
    %c1_45 = arith.constant 1 : index
    %c0_46 = arith.constant 0 : index
    %c0_47 = arith.constant 0 : index
    %27 = vector.load %arg2[%c1_45, %c0_46, %c0_47] : memref<9x4x128xbf16, #tpu.memory_space<vmem>>, vector<1x4x128xbf16>
    %28 = vector.shape_cast %27 : vector<1x4x128xbf16> to vector<4x128xbf16>
    %cst_48 = arith.constant dense<0.000000e+00> : vector<256x128xf32>
    %29 = tpu.matmul %26, %28, %cst_48 {dimension_numbers = #tpu.dot_dimension_numbers<[1], [0], [0], [1], [0, 0, 1, 1], [], []>} : vector<256x4xbf16>, vector<4x128xbf16>, vector<256x128xf32> -> vector<256x128xf32>
    %30 = arith.addf %24, %29 : vector<256x128xf32>
    %c0_49 = arith.constant 0 : index
    %c2 = arith.constant 2 : index
    %c0_50 = arith.constant 0 : index
    %31 = vector.load %arg9[%c0_49, %c2, %c0_50] : memref<18x18x4xbf16, #tpu.memory_space<vmem>>, vector<16x16x4xbf16>
    %32 = vector.shape_cast %31 : vector<16x16x4xbf16> to vector<256x4xbf16>
    %c2_51 = arith.constant 2 : index
    %c0_52 = arith.constant 0 : index
    %c0_53 = arith.constant 0 : index
    %33 = vector.load %arg2[%c2_51, %c0_52, %c0_53] : memref<9x4x128xbf16, #tpu.memory_space<vmem>>, vector<1x4x128xbf16>
    %34 = vector.shape_cast %33 : vector<1x4x128xbf16> to vector<4x128xbf16>
    %cst_54 = arith.constant dense<0.000000e+00> : vector<256x128xf32>
    %35 = tpu.matmul %32, %34, %cst_54 {dimension_numbers = #tpu.dot_dimension_numbers<[1], [0], [0], [1], [0, 0, 1, 1], [], []>} : vector<256x4xbf16>, vector<4x128xbf16>, vector<256x128xf32> -> vector<256x128xf32>
    %36 = arith.addf %30, %35 : vector<256x128xf32>
    %c1_55 = arith.constant 1 : index
    %c0_56 = arith.constant 0 : index
    %c0_57 = arith.constant 0 : index
    %37 = vector.load %arg9[%c1_55, %c0_56, %c0_57] : memref<18x18x4xbf16, #tpu.memory_space<vmem>>, vector<16x16x4xbf16>
    %38 = vector.shape_cast %37 : vector<16x16x4xbf16> to vector<256x4xbf16>
    %c3 = arith.constant 3 : index
    %c0_58 = arith.constant 0 : index
    %c0_59 = arith.constant 0 : index
    %39 = vector.load %arg2[%c3, %c0_58, %c0_59] : memref<9x4x128xbf16, #tpu.memory_space<vmem>>, vector<1x4x128xbf16>
    %40 = vector.shape_cast %39 : vector<1x4x128xbf16> to vector<4x128xbf16>
    %cst_60 = arith.constant dense<0.000000e+00> : vector<256x128xf32>
    %41 = tpu.matmul %38, %40, %cst_60 {dimension_numbers = #tpu.dot_dimension_numbers<[1], [0], [0], [1], [0, 0, 1, 1], [], []>} : vector<256x4xbf16>, vector<4x128xbf16>, vector<256x128xf32> -> vector<256x128xf32>
    %42 = arith.addf %36, %41 : vector<256x128xf32>
    %c1_61 = arith.constant 1 : index
    %c1_62 = arith.constant 1 : index
    %c0_63 = arith.constant 0 : index
    %43 = vector.load %arg9[%c1_61, %c1_62, %c0_63] : memref<18x18x4xbf16, #tpu.memory_space<vmem>>, vector<16x16x4xbf16>
    %44 = vector.shape_cast %43 : vector<16x16x4xbf16> to vector<256x4xbf16>
    %c4 = arith.constant 4 : index
    %c0_64 = arith.constant 0 : index
    %c0_65 = arith.constant 0 : index
    %45 = vector.load %arg2[%c4, %c0_64, %c0_65] : memref<9x4x128xbf16, #tpu.memory_space<vmem>>, vector<1x4x128xbf16>
    %46 = vector.shape_cast %45 : vector<1x4x128xbf16> to vector<4x128xbf16>
    %cst_66 = arith.constant dense<0.000000e+00> : vector<256x128xf32>
    %47 = tpu.matmul %44, %46, %cst_66 {dimension_numbers = #tpu.dot_dimension_numbers<[1], [0], [0], [1], [0, 0, 1, 1], [], []>} : vector<256x4xbf16>, vector<4x128xbf16>, vector<256x128xf32> -> vector<256x128xf32>
    %48 = arith.addf %42, %47 : vector<256x128xf32>
    %c1_67 = arith.constant 1 : index
    %c2_68 = arith.constant 2 : index
    %c0_69 = arith.constant 0 : index
    %49 = vector.load %arg9[%c1_67, %c2_68, %c0_69] : memref<18x18x4xbf16, #tpu.memory_space<vmem>>, vector<16x16x4xbf16>
    %50 = vector.shape_cast %49 : vector<16x16x4xbf16> to vector<256x4xbf16>
    %c5 = arith.constant 5 : index
    %c0_70 = arith.constant 0 : index
    %c0_71 = arith.constant 0 : index
    %51 = vector.load %arg2[%c5, %c0_70, %c0_71] : memref<9x4x128xbf16, #tpu.memory_space<vmem>>, vector<1x4x128xbf16>
    %52 = vector.shape_cast %51 : vector<1x4x128xbf16> to vector<4x128xbf16>
    %cst_72 = arith.constant dense<0.000000e+00> : vector<256x128xf32>
    %53 = tpu.matmul %50, %52, %cst_72 {dimension_numbers = #tpu.dot_dimension_numbers<[1], [0], [0], [1], [0, 0, 1, 1], [], []>} : vector<256x4xbf16>, vector<4x128xbf16>, vector<256x128xf32> -> vector<256x128xf32>
    %54 = arith.addf %48, %53 : vector<256x128xf32>
    %c2_73 = arith.constant 2 : index
    %c0_74 = arith.constant 0 : index
    %c0_75 = arith.constant 0 : index
    %55 = vector.load %arg9[%c2_73, %c0_74, %c0_75] : memref<18x18x4xbf16, #tpu.memory_space<vmem>>, vector<16x16x4xbf16>
    %56 = vector.shape_cast %55 : vector<16x16x4xbf16> to vector<256x4xbf16>
    %c6 = arith.constant 6 : index
    %c0_76 = arith.constant 0 : index
    %c0_77 = arith.constant 0 : index
    %57 = vector.load %arg2[%c6, %c0_76, %c0_77] : memref<9x4x128xbf16, #tpu.memory_space<vmem>>, vector<1x4x128xbf16>
    %58 = vector.shape_cast %57 : vector<1x4x128xbf16> to vector<4x128xbf16>
    %cst_78 = arith.constant dense<0.000000e+00> : vector<256x128xf32>
    %59 = tpu.matmul %56, %58, %cst_78 {dimension_numbers = #tpu.dot_dimension_numbers<[1], [0], [0], [1], [0, 0, 1, 1], [], []>} : vector<256x4xbf16>, vector<4x128xbf16>, vector<256x128xf32> -> vector<256x128xf32>
    %60 = arith.addf %54, %59 : vector<256x128xf32>
    %c2_79 = arith.constant 2 : index
    %c1_80 = arith.constant 1 : index
    %c0_81 = arith.constant 0 : index
    %61 = vector.load %arg9[%c2_79, %c1_80, %c0_81] : memref<18x18x4xbf16, #tpu.memory_space<vmem>>, vector<16x16x4xbf16>
    %62 = vector.shape_cast %61 : vector<16x16x4xbf16> to vector<256x4xbf16>
    %c7 = arith.constant 7 : index
    %c0_82 = arith.constant 0 : index
    %c0_83 = arith.constant 0 : index
    %63 = vector.load %arg2[%c7, %c0_82, %c0_83] : memref<9x4x128xbf16, #tpu.memory_space<vmem>>, vector<1x4x128xbf16>
    %64 = vector.shape_cast %63 : vector<1x4x128xbf16> to vector<4x128xbf16>
    %cst_84 = arith.constant dense<0.000000e+00> : vector<256x128xf32>
    %65 = tpu.matmul %62, %64, %cst_84 {dimension_numbers = #tpu.dot_dimension_numbers<[1], [0], [0], [1], [0, 0, 1, 1], [], []>} : vector<256x4xbf16>, vector<4x128xbf16>, vector<256x128xf32> -> vector<256x128xf32>
    %66 = arith.addf %60, %65 : vector<256x128xf32>
    %c2_85 = arith.constant 2 : index
    %c2_86 = arith.constant 2 : index
    %c0_87 = arith.constant 0 : index
    %67 = vector.load %arg9[%c2_85, %c2_86, %c0_87] : memref<18x18x4xbf16, #tpu.memory_space<vmem>>, vector<16x16x4xbf16>
    %68 = vector.shape_cast %67 : vector<16x16x4xbf16> to vector<256x4xbf16>
    %c8 = arith.constant 8 : index
    %c0_88 = arith.constant 0 : index
    %c0_89 = arith.constant 0 : index
    %69 = vector.load %arg2[%c8, %c0_88, %c0_89] : memref<9x4x128xbf16, #tpu.memory_space<vmem>>, vector<1x4x128xbf16>
    %70 = vector.shape_cast %69 : vector<1x4x128xbf16> to vector<4x128xbf16>
    %cst_90 = arith.constant dense<0.000000e+00> : vector<256x128xf32>
    %71 = tpu.matmul %68, %70, %cst_90 {dimension_numbers = #tpu.dot_dimension_numbers<[1], [0], [0], [1], [0, 0, 1, 1], [], []>} : vector<256x4xbf16>, vector<4x128xbf16>, vector<256x128xf32> -> vector<256x128xf32>
    %72 = arith.addf %66, %71 : vector<256x128xf32>
    %73 = vector.extract_strided_slice %72 {offsets = [0, 0], sizes = [256, 4], strides = [1, 1]} : vector<256x128xf32> to vector<256x4xf32>
    %c0_91 = arith.constant 0 : index
    %c0_92 = arith.constant 0 : index
    %74 = vector.load %arg3[%c0_91, %c0_92] : memref<1x4xf32, #tpu.memory_space<vmem>>, vector<1x4xf32>
    %75 = vector.broadcast %74 : vector<1x4xf32> to vector<256x4xf32>
    %76 = arith.mulf %73, %75 : vector<256x4xf32>
    %c0_93 = arith.constant 0 : index
    %c0_94 = arith.constant 0 : index
    %77 = vector.load %arg4[%c0_93, %c0_94] : memref<1x4xf32, #tpu.memory_space<vmem>>, vector<1x4xf32>
    %78 = vector.broadcast %77 : vector<1x4xf32> to vector<256x4xf32>
    %79 = arith.addf %76, %78 : vector<256x4xf32>
    %cst_95 = arith.constant 0.000000e+00 : f32
    %80 = vector.broadcast %cst_95 : f32 to vector<256x4xf32>
    %81 = arith.maximumf %79, %80 : vector<256x4xf32>
    %82 = arith.truncf %81 : vector<256x4xf32> to vector<256x4xbf16>
    %83 = vector.shape_cast %82 : vector<256x4xbf16> to vector<16x16x4xbf16>
    %c1_96 = arith.constant 1 : index
    %c1_97 = arith.constant 1 : index
    %c0_98 = arith.constant 0 : index
    %84 = vector.load %arg10[%c1_96, %c1_97, %c0_98] : memref<18x18x4xbf16, #tpu.memory_space<vmem>>, vector<16x16x4xbf16>
    tpu.vector_store %arg10[%c1_96, %c1_97, %c0_98], %83 {strides = array<i32>} : memref<18x18x4xbf16, #tpu.memory_space<vmem>>, vector<16x16x4xbf16>,
    %c0_99 = arith.constant 0 : index
    %c0_100 = arith.constant 0 : index
    %c0_101 = arith.constant 0 : index
    %85 = vector.load %arg10[%c0_99, %c0_100, %c0_101] : memref<18x18x4xbf16, #tpu.memory_space<vmem>>, vector<16x16x4xbf16>
    %86 = vector.shape_cast %85 : vector<16x16x4xbf16> to vector<256x4xbf16>
    %c0_102 = arith.constant 0 : index
    %c0_103 = arith.constant 0 : index
    %c0_104 = arith.constant 0 : index
    %87 = vector.load %arg5[%c0_102, %c0_103, %c0_104] : memref<9x4x128xbf16, #tpu.memory_space<vmem>>, vector<1x4x128xbf16>
    %88 = vector.shape_cast %87 : vector<1x4x128xbf16> to vector<4x128xbf16>
    %cst_105 = arith.constant dense<0.000000e+00> : vector<256x128xf32>
    %89 = tpu.matmul %86, %88, %cst_105 {dimension_numbers = #tpu.dot_dimension_numbers<[1], [0], [0], [1], [0, 0, 1, 1], [], []>} : vector<256x4xbf16>, vector<4x128xbf16>, vector<256x128xf32> -> vector<256x128xf32>
    %c0_106 = arith.constant 0 : index
    %c1_107 = arith.constant 1 : index
    %c0_108 = arith.constant 0 : index
    %90 = vector.load %arg10[%c0_106, %c1_107, %c0_108] : memref<18x18x4xbf16, #tpu.memory_space<vmem>>, vector<16x16x4xbf16>
    %91 = vector.shape_cast %90 : vector<16x16x4xbf16> to vector<256x4xbf16>
    %c1_109 = arith.constant 1 : index
    %c0_110 = arith.constant 0 : index
    %c0_111 = arith.constant 0 : index
    %92 = vector.load %arg5[%c1_109, %c0_110, %c0_111] : memref<9x4x128xbf16, #tpu.memory_space<vmem>>, vector<1x4x128xbf16>
    %93 = vector.shape_cast %92 : vector<1x4x128xbf16> to vector<4x128xbf16>
    %cst_112 = arith.constant dense<0.000000e+00> : vector<256x128xf32>
    %94 = tpu.matmul %91, %93, %cst_112 {dimension_numbers = #tpu.dot_dimension_numbers<[1], [0], [0], [1], [0, 0, 1, 1], [], []>} : vector<256x4xbf16>, vector<4x128xbf16>, vector<256x128xf32> -> vector<256x128xf32>
    %95 = arith.addf %89, %94 : vector<256x128xf32>
    %c0_113 = arith.constant 0 : index
    %c2_114 = arith.constant 2 : index
    %c0_115 = arith.constant 0 : index
    %96 = vector.load %arg10[%c0_113, %c2_114, %c0_115] : memref<18x18x4xbf16, #tpu.memory_space<vmem>>, vector<16x16x4xbf16>
    %97 = vector.shape_cast %96 : vector<16x16x4xbf16> to vector<256x4xbf16>
    %c2_116 = arith.constant 2 : index
    %c0_117 = arith.constant 0 : index
    %c0_118 = arith.constant 0 : index
    %98 = vector.load %arg5[%c2_116, %c0_117, %c0_118] : memref<9x4x128xbf16, #tpu.memory_space<vmem>>, vector<1x4x128xbf16>
    %99 = vector.shape_cast %98 : vector<1x4x128xbf16> to vector<4x128xbf16>
    %cst_119 = arith.constant dense<0.000000e+00> : vector<256x128xf32>
    %100 = tpu.matmul %97, %99, %cst_119 {dimension_numbers = #tpu.dot_dimension_numbers<[1], [0], [0], [1], [0, 0, 1, 1], [], []>} : vector<256x4xbf16>, vector<4x128xbf16>, vector<256x128xf32> -> vector<256x128xf32>
    %101 = arith.addf %95, %100 : vector<256x128xf32>
    %c1_120 = arith.constant 1 : index
    %c0_121 = arith.constant 0 : index
    %c0_122 = arith.constant 0 : index
    %102 = vector.load %arg10[%c1_120, %c0_121, %c0_122] : memref<18x18x4xbf16, #tpu.memory_space<vmem>>, vector<16x16x4xbf16>
    %103 = vector.shape_cast %102 : vector<16x16x4xbf16> to vector<256x4xbf16>
    %c3_123 = arith.constant 3 : index
    %c0_124 = arith.constant 0 : index
    %c0_125 = arith.constant 0 : index
    %104 = vector.load %arg5[%c3_123, %c0_124, %c0_125] : memref<9x4x128xbf16, #tpu.memory_space<vmem>>, vector<1x4x128xbf16>
    %105 = vector.shape_cast %104 : vector<1x4x128xbf16> to vector<4x128xbf16>
    %cst_126 = arith.constant dense<0.000000e+00> : vector<256x128xf32>
    %106 = tpu.matmul %103, %105, %cst_126 {dimension_numbers = #tpu.dot_dimension_numbers<[1], [0], [0], [1], [0, 0, 1, 1], [], []>} : vector<256x4xbf16>, vector<4x128xbf16>, vector<256x128xf32> -> vector<256x128xf32>
    %107 = arith.addf %101, %106 : vector<256x128xf32>
    %c1_127 = arith.constant 1 : index
    %c1_128 = arith.constant 1 : index
    %c0_129 = arith.constant 0 : index
    %108 = vector.load %arg10[%c1_127, %c1_128, %c0_129] : memref<18x18x4xbf16, #tpu.memory_space<vmem>>, vector<16x16x4xbf16>
    %109 = vector.shape_cast %108 : vector<16x16x4xbf16> to vector<256x4xbf16>
    %c4_130 = arith.constant 4 : index
    %c0_131 = arith.constant 0 : index
    %c0_132 = arith.constant 0 : index
    %110 = vector.load %arg5[%c4_130, %c0_131, %c0_132] : memref<9x4x128xbf16, #tpu.memory_space<vmem>>, vector<1x4x128xbf16>
    %111 = vector.shape_cast %110 : vector<1x4x128xbf16> to vector<4x128xbf16>
    %cst_133 = arith.constant dense<0.000000e+00> : vector<256x128xf32>
    %112 = tpu.matmul %109, %111, %cst_133 {dimension_numbers = #tpu.dot_dimension_numbers<[1], [0], [0], [1], [0, 0, 1, 1], [], []>} : vector<256x4xbf16>, vector<4x128xbf16>, vector<256x128xf32> -> vector<256x128xf32>
    %113 = arith.addf %107, %112 : vector<256x128xf32>
    %c1_134 = arith.constant 1 : index
    %c2_135 = arith.constant 2 : index
    %c0_136 = arith.constant 0 : index
    %114 = vector.load %arg10[%c1_134, %c2_135, %c0_136] : memref<18x18x4xbf16, #tpu.memory_space<vmem>>, vector<16x16x4xbf16>
    %115 = vector.shape_cast %114 : vector<16x16x4xbf16> to vector<256x4xbf16>
    %c5_137 = arith.constant 5 : index
    %c0_138 = arith.constant 0 : index
    %c0_139 = arith.constant 0 : index
    %116 = vector.load %arg5[%c5_137, %c0_138, %c0_139] : memref<9x4x128xbf16, #tpu.memory_space<vmem>>, vector<1x4x128xbf16>
    %117 = vector.shape_cast %116 : vector<1x4x128xbf16> to vector<4x128xbf16>
    %cst_140 = arith.constant dense<0.000000e+00> : vector<256x128xf32>
    %118 = tpu.matmul %115, %117, %cst_140 {dimension_numbers = #tpu.dot_dimension_numbers<[1], [0], [0], [1], [0, 0, 1, 1], [], []>} : vector<256x4xbf16>, vector<4x128xbf16>, vector<256x128xf32> -> vector<256x128xf32>
    %119 = arith.addf %113, %118 : vector<256x128xf32>
    %c2_141 = arith.constant 2 : index
    %c0_142 = arith.constant 0 : index
    %c0_143 = arith.constant 0 : index
    %120 = vector.load %arg10[%c2_141, %c0_142, %c0_143] : memref<18x18x4xbf16, #tpu.memory_space<vmem>>, vector<16x16x4xbf16>
    %121 = vector.shape_cast %120 : vector<16x16x4xbf16> to vector<256x4xbf16>
    %c6_144 = arith.constant 6 : index
    %c0_145 = arith.constant 0 : index
    %c0_146 = arith.constant 0 : index
    %122 = vector.load %arg5[%c6_144, %c0_145, %c0_146] : memref<9x4x128xbf16, #tpu.memory_space<vmem>>, vector<1x4x128xbf16>
    %123 = vector.shape_cast %122 : vector<1x4x128xbf16> to vector<4x128xbf16>
    %cst_147 = arith.constant dense<0.000000e+00> : vector<256x128xf32>
    %124 = tpu.matmul %121, %123, %cst_147 {dimension_numbers = #tpu.dot_dimension_numbers<[1], [0], [0], [1], [0, 0, 1, 1], [], []>} : vector<256x4xbf16>, vector<4x128xbf16>, vector<256x128xf32> -> vector<256x128xf32>
    %125 = arith.addf %119, %124 : vector<256x128xf32>
    %c2_148 = arith.constant 2 : index
    %c1_149 = arith.constant 1 : index
    %c0_150 = arith.constant 0 : index
    %126 = vector.load %arg10[%c2_148, %c1_149, %c0_150] : memref<18x18x4xbf16, #tpu.memory_space<vmem>>, vector<16x16x4xbf16>
    %127 = vector.shape_cast %126 : vector<16x16x4xbf16> to vector<256x4xbf16>
    %c7_151 = arith.constant 7 : index
    %c0_152 = arith.constant 0 : index
    %c0_153 = arith.constant 0 : index
    %128 = vector.load %arg5[%c7_151, %c0_152, %c0_153] : memref<9x4x128xbf16, #tpu.memory_space<vmem>>, vector<1x4x128xbf16>
    %129 = vector.shape_cast %128 : vector<1x4x128xbf16> to vector<4x128xbf16>
    %cst_154 = arith.constant dense<0.000000e+00> : vector<256x128xf32>
    %130 = tpu.matmul %127, %129, %cst_154 {dimension_numbers = #tpu.dot_dimension_numbers<[1], [0], [0], [1], [0, 0, 1, 1], [], []>} : vector<256x4xbf16>, vector<4x128xbf16>, vector<256x128xf32> -> vector<256x128xf32>
    %131 = arith.addf %125, %130 : vector<256x128xf32>
    %c2_155 = arith.constant 2 : index
    %c2_156 = arith.constant 2 : index
    %c0_157 = arith.constant 0 : index
    %132 = vector.load %arg10[%c2_155, %c2_156, %c0_157] : memref<18x18x4xbf16, #tpu.memory_space<vmem>>, vector<16x16x4xbf16>
    %133 = vector.shape_cast %132 : vector<16x16x4xbf16> to vector<256x4xbf16>
    %c8_158 = arith.constant 8 : index
    %c0_159 = arith.constant 0 : index
    %c0_160 = arith.constant 0 : index
    %134 = vector.load %arg5[%c8_158, %c0_159, %c0_160] : memref<9x4x128xbf16, #tpu.memory_space<vmem>>, vector<1x4x128xbf16>
    %135 = vector.shape_cast %134 : vector<1x4x128xbf16> to vector<4x128xbf16>
    %cst_161 = arith.constant dense<0.000000e+00> : vector<256x128xf32>
    %136 = tpu.matmul %133, %135, %cst_161 {dimension_numbers = #tpu.dot_dimension_numbers<[1], [0], [0], [1], [0, 0, 1, 1], [], []>} : vector<256x4xbf16>, vector<4x128xbf16>, vector<256x128xf32> -> vector<256x128xf32>
    %137 = arith.addf %131, %136 : vector<256x128xf32>
    %138 = vector.extract_strided_slice %137 {offsets = [0, 0], sizes = [256, 4], strides = [1, 1]} : vector<256x128xf32> to vector<256x4xf32>
    %c0_162 = arith.constant 0 : index
    %c0_163 = arith.constant 0 : index
    %139 = vector.load %arg6[%c0_162, %c0_163] : memref<1x4xf32, #tpu.memory_space<vmem>>, vector<1x4xf32>
    %140 = vector.broadcast %139 : vector<1x4xf32> to vector<256x4xf32>
    %141 = arith.mulf %138, %140 : vector<256x4xf32>
    %c0_164 = arith.constant 0 : index
    %c0_165 = arith.constant 0 : index
    %142 = vector.load %arg7[%c0_164, %c0_165] : memref<1x4xf32, #tpu.memory_space<vmem>>, vector<1x4xf32>
    %143 = vector.broadcast %142 : vector<1x4xf32> to vector<256x4xf32>
    %144 = arith.addf %141, %143 : vector<256x4xf32>
    %c0_166 = arith.constant 0 : index
    %c0_167 = arith.constant 0 : index
    %c0_168 = arith.constant 0 : index
    %c0_169 = arith.constant 0 : index
    %145 = vector.load %arg1[%c0_166, %c0_167, %c0_168, %c0_169] : memref<1x16x16x4xf32, #tpu.memory_space<vmem>>, vector<1x16x16x4xf32>
    %146 = vector.shape_cast %145 : vector<1x16x16x4xf32> to vector<16x16x4xf32>
    %147 = vector.shape_cast %146 : vector<16x16x4xf32> to vector<256x4xf32>
    %148 = arith.addf %144, %147 : vector<256x4xf32>
    %149 = vector.shape_cast %148 : vector<256x4xf32> to vector<16x16x4xf32>
    %c0_170 = arith.constant 0 : index
    %c0_171 = arith.constant 0 : index
    %c0_172 = arith.constant 0 : index
    %c0_173 = arith.constant 0 : index
    %150 = vector.load %arg8[%c0_170, %c0_171, %c0_172, %c0_173] : memref<1x16x16x4xf32, #tpu.memory_space<vmem>>, vector<1x16x16x4xf32>
    %151 = vector.shape_cast %150 : vector<1x16x16x4xf32> to vector<16x16x4xf32>
    %152 = vector.shape_cast %149 : vector<16x16x4xf32> to vector<1x16x16x4xf32>
    tpu.vector_store %arg8[%c0_170, %c0_171, %c0_172, %c0_173], %152 {strides = array<i32>} : memref<1x16x16x4xf32, #tpu.memory_space<vmem>>, vector<1x16x16x4xf32>,
    return
  }
  func.func @transform_0(%arg0: i32) -> (i32, i32, i32, i32) {
    %c0_i32 = arith.constant 0 : i32
    %c0_i32_0 = arith.constant 0 : i32
    %c0_i32_1 = arith.constant 0 : i32
    %c0_i32_2 = arith.constant 0 : i32
    return %arg0, %c0_i32, %c0_i32_0, %c0_i32_1 : i32, i32, i32, i32
  }
  func.func @transform_1(%arg0: i32) -> (i32, i32, i32) {
    %c0_i32 = arith.constant 0 : i32
    %c0_i32_0 = arith.constant 0 : i32
    %c0_i32_1 = arith.constant 0 : i32
    %c0_i32_2 = arith.constant 0 : i32
    return %c0_i32, %c0_i32_0, %c0_i32_1 : i32, i32, i32
  }
  func.func @transform_2(%arg0: i32) -> (i32, i32) {
    %c0_i32 = arith.constant 0 : i32
    %c0_i32_0 = arith.constant 0 : i32
    %c0_i32_1 = arith.constant 0 : i32
    return %c0_i32, %c0_i32_0 : i32, i32
  }
  func.func @transform_3(%arg0: i32) -> (i32, i32) {
    %c0_i32 = arith.constant 0 : i32
    %c0_i32_0 = arith.constant 0 : i32
    %c0_i32_1 = arith.constant 0 : i32
    return %c0_i32, %c0_i32_0 : i32, i32
  }
  func.func @transform_4(%arg0: i32) -> (i32, i32, i32) {
    %c0_i32 = arith.constant 0 : i32
    %c0_i32_0 = arith.constant 0 : i32
    %c0_i32_1 = arith.constant 0 : i32
    %c0_i32_2 = arith.constant 0 : i32
    return %c0_i32, %c0_i32_0, %c0_i32_1 : i32, i32, i32
  }
  func.func @transform_5(%arg0: i32) -> (i32, i32) {
    %c0_i32 = arith.constant 0 : i32
    %c0_i32_0 = arith.constant 0 : i32
    %c0_i32_1 = arith.constant 0 : i32
    return %c0_i32, %c0_i32_0 : i32, i32
  }
  func.func @transform_6(%arg0: i32) -> (i32, i32) {
    %c0_i32 = arith.constant 0 : i32
    %c0_i32_0 = arith.constant 0 : i32
    %c0_i32_1 = arith.constant 0 : i32
    return %c0_i32, %c0_i32_0 : i32, i32
  }
  func.func @transform_7(%arg0: i32) -> (i32, i32, i32, i32) {
    %c0_i32 = arith.constant 0 : i32
    %c0_i32_0 = arith.constant 0 : i32
    %c0_i32_1 = arith.constant 0 : i32
    %c0_i32_2 = arith.constant 0 : i32
    return %arg0, %c0_i32, %c0_i32_0, %c0_i32_1 : i32, i32, i32, i32
  }
}

</mosaic_0001>

<bundles_post_ra>
// kernel: resblock_forward.1
= control target key start
LH: loop header
LB: loop body
LE: loop exit
PB: predicated region body
PF: predicated region fallthrough
CT: control target
= control target key end

     0   :  { %s13492_s24 = smov 0   ;;  %s17338_s0 = inlined_call_operand.vmem [shape: f32[2,16,16,4], index: 0, kind: input, shape index: {}]   ;;  %s17339_s1 = inlined_call_operand.vmem [shape: bf16[9,4,128], index: 1, kind: input, shape index: {}]   ;;  %s17340_s2 = inlined_call_operand.vmem [shape: f32[1,4], index: 2, kind: input, shape index: {}]   ;;  %s17341_s3 = inlined_call_operand.vmem [shape: f32[1,4], index: 3, kind: input, shape index: {}]   ;;  %s17342_s4 = inlined_call_operand.vmem [shape: bf16[9,4,128], index: 4, kind: input, shape index: {}]   ;;  %s17343_s5 = inlined_call_operand.vmem [shape: f32[1,4], index: 5, kind: input, shape index: {}]   ;;  %s17344_s6 = inlined_call_operand.vmem [shape: f32[1,4], index: 6, kind: input, shape index: {}]   ;;  %s17345_s7 = inlined_call_operand.vmem [shape: f32[2,16,16,4], index: 7, kind: output, shape index: {}]  }
   0x1 LB: > { %s11034_s25 = sadd.s32 4294967295, %s13449_s24   ;;  %p11038_p0 = scmp.ge.s32.totalorder %s13449_s24, 1  ;;  %s13449_s24 = sphi %s13492_s24, %s17_s24  }
   0x2   : > { %p237_p1 = scmp.lt.s32.totalorder %s13449_s24, 3 }
   0x4   : > { %p238_p2 = pnand %p11038_p0, %p237_p1 }
   0x6   : > { %241 = sbr.rel (%p238_p2) target bundleno = 1739 (0x6cb), region = 48 }
   0xd   : > { %v11075_v0 = vld [vmem:[%s17339_s1 + $0x2] sm:$0x3]  ;;  %vm1594_vm0 = vcmask 1041408   ;;  %vm280_vm1 = vcmask 27648   ;;  %vm283_vm2 = vcmask 24576   ;;  %v13451_v2 = vmov 0  }
   0xe   : > { %13297 = vmatprep.subr.msk.bf16.mxu0 %vm1594_vm0, %v11075_v0  ;;  %v1596_v1 = vsel %vm1594_vm0, %v11075_v0, 0  ;;  %281 = vst.msk [vmem:[#allocation2] sm:$0xf] %vm280_vm1, %v13451_v2  ;;  %282 = vst.msk [vmem:[#allocation2 + $0x4] sm:$0xf] %vm280_vm1, %v13451_v2  ;;  %v17463_v3 = vmov 0 }
   0xf   : > { %284 = vst.msk [vmem:[#allocation2 + $0x8] sm:$0x1] %vm283_vm2, %v13451_v2  ;;  %vm291_vm3 = vsmask.f32 256  ;;  %vm341_vm4 = vsmask.f32 7938  ;;  %12174 = vmatpush3.bf16.msra.mxu0 %v1596_v1 }
  0x10   : > { %286 = vst.msk [vmem:[#allocation2 + $0xcc] sm:$0xf] %vm280_vm1, %v13451_v2  ;;  %287 = vst.msk [vmem:[#allocation2 + $0xd0] sm:$0xf] %vm280_vm1, %v13451_v2  ;;  %v1091_v4 = vld [vmem:[%s17339_s1] sm:$0x3] }
  0x11   : > { %288 = vst.msk [vmem:[#allocation2 + $0xd4] sm:$0x1] %vm283_vm2, %v13451_v2  ;;  %393 = vst.msk [vmem:[#allocation3 + $0x8] sm:$0x1] %vm283_vm2, %v13451_v2  ;;  %v17466_v5 = vmov 0  ;;  %13298 = vmatprep.subr.msk.bf16.mxu0 %vm1594_vm0, %v1091_v4  ;;  %p269_p3 = scmp.lt.s32.totalorder %s11034_s25, 1 }
  0x12   : > { %391 = vst.msk [vmem:[#allocation3] sm:$0xf] %vm280_vm1, %v13451_v2  ;;  %392 = vst.msk [vmem:[#allocation3 + $0x4] sm:$0xf] %vm280_vm1, %v13451_v2  ;;  %v293_v6 = vld [vmem:[#allocation2 + $0xc] sm:$0x1] }
  0x13   : > { %395 = vst.msk [vmem:[#allocation3 + $0xcc] sm:$0xf] %vm280_vm1, %v13451_v2  ;;  %396 = vst.msk [vmem:[#allocation3 + $0xd0] sm:$0xf] %vm280_vm1, %v13451_v2  ;;  %v343_v7 = vld [vmem:[#allocation2 + $0x14] sm:$0x1] }
  0x14   : > { %397 = vst.msk [vmem:[#allocation3 + $0xd4] sm:$0x1] %vm283_vm2, %v13451_v2  ;;  %vm13519_vm5 = vmand %vm283_vm2, %vm291_vm3  ;;  %vm1108_vm7 = vsmask.f32 3328  ;;  %v296_v10 = vld [vmem:[#allocation2 + $0x18] sm:$0x1] }
  0x15   : > { %v17464_v3 = vsel %vm13519_vm5, 4294967295, %v17463_v3  ;;  %vm13528_vm6 = vmand %vm283_vm2, %vm341_vm4  ;;  %v294_v8 = vsel %vm13519_vm5, 0, %v293_v6  ;;  %s17746_s25 = smov (!%p269_p3, %s11034_s25), 1  ;;  %v297_v11 = vsel %vm13519_vm5, 0, %v296_v10  ;;  %v346_v12 = vld [vmem:[#allocation2 + $0x20] sm:$0x1] }
  0x16   : > { %17465 = vst [vmem:[#allocation4_spill] sm:$0xff] %v17464_v3  ;;  %v17467_v5 = vsel %vm13528_vm6, 4294967295, %v17466_v5  ;;  %v344_v9 = vsel %vm13528_vm6, 0, %v343_v7  ;;  %295 = vst [vmem:[#allocation2 + $0xc] sm:$0x1] %v294_v8  ;;  %v347_v14 = vsel %vm13528_vm6, 0, %v346_v12 }
  0x17   : > { %17468 = vst [vmem:[#allocation5_spill] sm:$0xff] %v17467_v5  ;;  %345 = vst [vmem:[#allocation2 + $0x14] sm:$0x1] %v344_v9  ;;  %v299_v13 = vld [vmem:[#allocation2 + $0x24] sm:$0x1]  ;;  %s11801_s30 = sshll.u32 %s17746_s25, 8 }
  0x18   : > { %298 = vst [vmem:[#allocation2 + $0x18] sm:$0x1] %v297_v11  ;;  %v300_v15 = vsel %vm13519_vm5, 0, %v299_v13  ;;  %v349_v16 = vld [vmem:[#allocation2 + $0x2c] sm:$0x1]  ;;  %v13551_v18 = vsel %vm1594_vm0, %v1091_v4, 0  ;;  %s13562_s10 = scalar_lea.vmem %s17338_s0, %s11801_s30  ;;  %vm13583_vm13 = vmand %vm280_vm1, %vm341_vm4  ;;  %s17179_s21 = scalar_lea.vmem %s17345_s7, %s11801_s30 }
  0x19   : > { %v302_v17 = vld [vmem:[#allocation2 + $0x30] sm:$0x1]  ;;  %vm1109_vm8 = vsmask.f32 7440  ;;  %348 = vst [vmem:[#allocation2 + $0x20] sm:$0x1] %v347_v14 }
  0x1a   : > { %301 = vst [vmem:[#allocation2 + $0x24] sm:$0x1] %v300_v15  ;;  %v350_v19 = vsel %vm13528_vm6, 0, %v349_v16  ;;  %v303_v20 = vsel %vm13519_vm5, 0, %v302_v17  ;;  %v1059_v21 = vld [vmem:[#allocation2] sm:$0xf]  ;;  %vm13571_vm11 = vmor %vm1108_vm7, %vm1109_vm8 }
  0x1b   : > { %v1060_v22 = vld [vmem:[#allocation2 + $0x4] sm:$0xf]  ;;  %v1092_v23 = vld [vmem:[#allocation2 + $0x8] sm:$0x1]  ;;  %351 = vst [vmem:[#allocation2 + $0x2c] sm:$0x1] %v350_v19 }
  0x1c   : > { %304 = vst [vmem:[#allocation2 + $0x30] sm:$0x1] %v303_v20  ;;  %v1112_v24 = vshrl.u32 %v1059_v21, 16  ;;  %v1115_v25 = vshll.u32 %v1059_v21, 16  ;;  %v1121_v26 = vshll.u32 %v1060_v22, 16  ;;  %v1125_v27 = vshrl.u32 %v1060_v22, 16 }
  0x1d   : > { %vm1545_vm9 = vcmask 31744   ;;  %v495_v28 = vld [vmem:[%s13562_s10] sm:$0xff]  ;;  %v496_v29 = vld [vmem:[%s13562_s10 + $0x8] sm:$0xff]  ;;  %v1131_v30 = vshll.u32 %v1092_v23, 16  ;;  %vm623_vm10 = vsmask.f32 4368 }
  0x1e   : > { %v11803_v31 = vpack.c.bf16 %v495_v28, %v495_v28  ;;  %v11804_v32 = vpack.c.bf16 %v496_v29, %v496_v29  ;;  %v497_v33 = vld [vmem:[%s13562_s10 + $0x10] sm:$0xff]  ;;  %v1114_v34 = vrot.slane %v1112_v24, 4  ;;  %v1117_v35 = vrot.slane %v1115_v25, 5  ;;  %v498_v38 = vld [vmem:[%s13562_s10 + $0x18] sm:$0xff]  ;;  %v499_v39 = vld [vmem:[%s13562_s10 + $0x20] sm:$0xff] }
  0x1f   : > { %v1123_v36 = vrot.slane %v1121_v26, 5  ;;  %v1127_v37 = vrot.slane %v1125_v27, 4  ;;  %v1133_v40 = vrot.slane %v1131_v30, 5  ;;  %v11805_v48 = vpack.c.bf16 %v497_v33, %v497_v33  ;;  %vm13577_vm12 = vmor %vm291_vm3, %vm623_vm10  ;;  %v947_v52 = vld [vmem:[#allocation2 + $0xc] sm:$0xf]  ;;  %v501_v14 = vld [vmem:[%s13562_s10 + $0x30] sm:$0xff] }
  0x20   : > { %v626_v41 = vshrl.u32 %v11803_v31, 16  ;;  %v629_v42 = vshll.u32 %v11803_v31, 16  ;;  %v634_v43 = vshrl.u32 %v11804_v32, 16  ;;  %v1118_v45 = vor.u32 %v1117_v35, %v1114_v34  ;;  %v951_v58 = vld [vmem:[#allocation2 + $0x14] sm:$0x1]  ;;  %v500_v7 = vld [vmem:[%s13562_s10 + $0x28] sm:$0xff] }
  0x21   : > { %v1128_v46 = vor.u32 %v1127_v37, %v1123_v36  ;;  %v637_v47 = vshll.u32 %v11804_v32, 16  ;;  %v17471_v49 = vmov 0  ;;  %v11806_v53 = vpack.c.bf16 %v498_v38, %v498_v38  ;;  %v352_v8 = vld [vmem:[#allocation2 + $0x38] sm:$0x1]  ;;  %v958_v21 = vld [vmem:[#allocation2 + $0x20] sm:$0x1] }
  0x22   : > { %v17472_v49 = vsel %vm13577_vm12, 4294967295, %v17471_v49  ;;  %v628_v50 = vrot.slane %v626_v41, 7  ;;  %v636_v51 = vrot.slane %v634_v43, 7  ;;  %v11807_v54 = vpack.c.bf16 %v499_v39, %v499_v39  ;;  %v954_v13 = vld [vmem:[#allocation2 + $0x18] sm:$0xf] }
  0x23   : > { %17473 = vst [vmem:[#allocation6_spill] sm:$0xff] %v17472_v49  ;;  %v1119_v55 = vrot.slane %v1118_v45, 4  ;;  %v1129_v56 = vrot.slane %v1128_v46, 4  ;;  %v17474_v57 = vmov 0  ;;  %v643_v59 = vshrl.u32 %v11805_v48, 16  ;;  %v502_v20 = vld [vmem:[%s13562_s10 + $0x38] sm:$0xff] }
  0x24   : > { %v17475_v57 = vsel %vm13583_vm13, 4294967295, %v17474_v57  ;;  %v646_v60 = vshll.u32 %v11805_v48, 16  ;;  %v631_v61 = vor.u32 %v629_v42, %v628_v50  ;;  %v632_v62 = vrot.slane %v628_v50, 4  ;;  %v305_v30 = vld [vmem:[#allocation2 + $0x3c] sm:$0x1] }
  0x25   : > { %17476 = vst [vmem:[#allocation7_spill] sm:$0xff] %v17475_v57  ;;  %v639_v63 = vor.u32 %v637_v47, %v636_v51  ;;  %v641_v0 = vrot.slane %v636_v51, 4  ;;  %v1124_v1 = vsel %vm13571_vm11, %v1119_v55, %v1123_v36  ;;  %v1134_v2 = vsel %vm13571_vm11, %v1129_v56, %v1133_v40  ;;  %v355_v35 = vld [vmem:[#allocation2 + $0x44] sm:$0x1] }
  0x26   : > { %v645_v4 = vrot.slane %v643_v59, 7  ;;  %v651_v6 = vshrl.u32 %v11806_v53, 16  ;;  %v11076_v9 = vcombine.low %v1124_v1, %v1134_v2  ;;  %v948_v11 = vsel %vm13583_vm13, %v631_v61, %v947_v52  ;;  %v961_v38 = vld [vmem:[#allocation2 + $0x24] sm:$0xf]  ;;  %v504_v52 = vld [vmem:[%s13562_s10 + $0x48] sm:$0xff] }
  0x27   : > { %v640_v10 = vsel %vm13577_vm12, %v632_v62, %v639_v63  ;;  %v952_v12 = vsel %vm13519_vm5, %v641_v0, %v951_v58  ;;  %949 = vst [vmem:[#allocation2 + $0xc] sm:$0xf] %v948_v11  ;;  %v654_v19 = vshll.u32 %v11806_v53, 16  ;;  %v11808_v22 = vpack.c.bf16 %v500_v7, %v500_v7  ;;  %v503_v51 = vld [vmem:[%s13562_s10 + $0x40] sm:$0xff] }
  0x28   : > { %950 = vst.msk [vmem:[#allocation2 + $0x10] sm:$0xf] %vm280_vm1, %v640_v10  ;;  %953 = vst [vmem:[#allocation2 + $0x14] sm:$0x1] %v952_v12  ;;  %v648_v15 = vor.u32 %v646_v60, %v645_v4  ;;  %v649_v16 = vrot.slane %v645_v4, 4  ;;  %v653_v17 = vrot.slane %v651_v6, 7  ;;  %12175 = vmatprep.mubr.msk.bf16.mxu0 %vm1545_vm9, %v11076_v9  ;;  %v11809_v29 = vpack.c.bf16 %v501_v14, %v501_v14 }
  0x29   : > { %v660_v23 = vshrl.u32 %v11807_v54, 16  ;;  %v663_v24 = vshll.u32 %v11807_v54, 16  ;;  %v353_v25 = vsel %vm13528_vm6, 0, %v352_v8  ;;  %v668_v32 = vshrl.u32 %v11808_v22, 16  ;;  %v965_v14 = vld [vmem:[#allocation2 + $0x2c] sm:$0x1] }
  0x2a   : > { %v656_v26 = vor.u32 %v654_v19, %v653_v17  ;;  %v658_v27 = vrot.slane %v653_v17, 4  ;;  %v955_v28 = vsel %vm13583_vm13, %v648_v15, %v954_v13  ;;  %354 = vst [vmem:[#allocation2 + $0x38] sm:$0x1] %v353_v25  ;;  %v671_v33 = vshll.u32 %v11808_v22, 16 }
  0x2b   : > { %956 = vst [vmem:[#allocation2 + $0x18] sm:$0xf] %v955_v28  ;;  %v662_v31 = vrot.slane %v660_v23, 7  ;;  %v13606_v34 = vpack.c.bf16 %v502_v20, %v502_v20  ;;  %v677_v39 = vshrl.u32 %v11809_v29, 16  ;;  %v680_v40 = vshll.u32 %v11809_v29, 16 }
  0x2c   : > { %v657_v36 = vsel %vm13577_vm12, %v649_v16, %v656_v26  ;;  %v959_v37 = vsel %vm13519_vm5, %v658_v27, %v958_v21  ;;  %v670_v43 = vrot.slane %v668_v32, 7  ;;  %v306_v48 = vsel %vm13519_vm5, 0, %v305_v30 }
  0x2d   : > { %957 = vst.msk [vmem:[#allocation2 + $0x1c] sm:$0xf] %vm280_vm1, %v657_v36  ;;  %960 = vst [vmem:[#allocation2 + $0x20] sm:$0x1] %v959_v37  ;;  %v665_v41 = vor.u32 %v663_v24, %v662_v31  ;;  %v666_v42 = vrot.slane %v662_v31, 4  ;;  %v685_v45 = vshrl.u32 %v13606_v34, 16  ;;  %v13627_v1 = vpack.c.bf16 %v503_v51, %v503_v51 }
  0x2e   : > { %v13614_v46 = vrot.slane %v677_v39, 7  ;;  %v688_v47 = vshll.u32 %v13606_v34, 16  ;;  %v356_v50 = vsel %vm13528_vm6, 0, %v355_v35  ;;  %v1061_v53 = vld [vmem:[#allocation2 + $0xc] sm:$0xf]  ;;  %v673_v56 = vor.u32 %v671_v33, %v670_v43 }
  0x2f   : > { %v1062_v54 = vld [vmem:[#allocation2 + $0x10] sm:$0xf]  ;;  %v1093_v55 = vld [vmem:[#allocation2 + $0x14] sm:$0x1]  ;;  %v962_v58 = vsel %vm13583_vm13, %v665_v41, %v961_v38  ;;  %307 = vst [vmem:[#allocation2 + $0x3c] sm:$0x1] %v306_v48  ;;  %v13629_v2 = vpack.c.bf16 %v504_v52, %v504_v52 }
  0x30   : > { %357 = vst [vmem:[#allocation2 + $0x44] sm:$0x1] %v356_v50  ;;  %v1136_v59 = vshrl.u32 %v1061_v53, 16  ;;  %v1139_v60 = vshll.u32 %v1061_v53, 16  ;;  %v1145_v61 = vshll.u32 %v1062_v54, 16  ;;  %v1149_v62 = vshrl.u32 %v1062_v54, 16 }
  0x31   : > { %963 = vst [vmem:[#allocation2 + $0x24] sm:$0xf] %v962_v58  ;;  %v1155_v63 = vshll.u32 %v1093_v55, 16  ;;  %v674_v0 = vsel %vm13577_vm12, %v666_v42, %v673_v56  ;;  %v675_v13 = vrot.slane %v670_v43, 4  ;;  %v682_v20 = vor.u32 %v680_v40, %v13614_v46  ;;  %v968_v48 = vld [vmem:[#allocation2 + $0x30] sm:$0xf] }
  0x32   : > { %v1138_v4 = vrot.slane %v1136_v59, 4  ;;  %v1141_v6 = vrot.slane %v1139_v60, 5  ;;  %v1147_v7 = vrot.slane %v1145_v61, 5  ;;  %v1151_v8 = vrot.slane %v1149_v62, 4  ;;  %v1063_v9 = vld [vmem:[#allocation2 + $0x18] sm:$0xf] }
  0x33   : > { %964 = vst.msk [vmem:[#allocation2 + $0x28] sm:$0xf] %vm280_vm1, %v674_v0  ;;  %v1157_v10 = vrot.slane %v1155_v63, 5  ;;  %v1160_v11 = vshrl.u32 %v1063_v9, 16  ;;  %v1163_v12 = vshll.u32 %v1063_v9, 16  ;;  %v683_v21 = vrot.slane %v13614_v46, 4 }
  0x34   : > { %v1142_v15 = vor.u32 %v1141_v6, %v1138_v4  ;;  %v1152_v16 = vor.u32 %v1151_v8, %v1147_v7  ;;  %v1064_v17 = vld [vmem:[#allocation2 + $0x1c] sm:$0xf]  ;;  %v1094_v19 = vld [vmem:[#allocation2 + $0x20] sm:$0x1]  ;;  %v966_v29 = vsel %vm13519_vm5, %v675_v13, %v965_v14  ;;  %v687_v35 = vrot.slane %v685_v45, 7  ;;  %v505_v6 = vld [vmem:[%s13562_s10 + $0x50] sm:$0xff] }
  0x35   : > { %v1162_v22 = vrot.slane %v1160_v11, 4  ;;  %v1165_v23 = vrot.slane %v1163_v12, 5  ;;  %v1169_v24 = vshll.u32 %v1064_v17, 16  ;;  %v1173_v25 = vshrl.u32 %v1064_v17, 16  ;;  %967 = vst [vmem:[#allocation2 + $0x2c] sm:$0x1] %v966_v29 }
  0x36   : > { %v1143_v26 = vrot.slane %v1142_v15, 4  ;;  %v1153_v27 = vrot.slane %v1152_v16, 4  ;;  %v1179_v28 = vshll.u32 %v1094_v19, 16  ;;  %v690_v45 = vor.u32 %v688_v47, %v687_v35  ;;  %v972_v53 = vld [vmem:[#allocation2 + $0x38] sm:$0x1] }
  0x37   : > { %v1166_v30 = vor.u32 %v1165_v23, %v1162_v22  ;;  %v1171_v31 = vrot.slane %v1169_v24, 5  ;;  %v1175_v32 = vrot.slane %v1173_v25, 4  ;;  %v692_v58 = vrot.slane %v687_v35, 4  ;;  %v308_v47 = vld [vmem:[#allocation2 + $0x48] sm:$0x1] }
  0x38   : > { %v1065_v33 = vld [vmem:[#allocation2 + $0x24] sm:$0xf]  ;;  %v1148_v36 = vsel %vm13571_vm11, %v1143_v26, %v1147_v7  ;;  %v1158_v37 = vsel %vm13571_vm11, %v1153_v27, %v1157_v10  ;;  %v1181_v38 = vrot.slane %v1179_v28, 5  ;;  %v691_v61 = vsel %vm13577_vm12, %v683_v21, %v690_v45  ;;  %v358_v4 = vld [vmem:[#allocation2 + $0x50] sm:$0x1]  ;;  %v506_v7 = vld [vmem:[%s13562_s10 + $0x58] sm:$0xff] }
  0x39   : > { %v1184_v39 = vshrl.u32 %v1065_v33, 16  ;;  %v11077_v40 = vcombine.low %v1148_v36, %v1158_v37  ;;  %v1167_v41 = vrot.slane %v1166_v30, 4  ;;  %v1176_v42 = vor.u32 %v1175_v32, %v1171_v31  ;;  %971 = vst.msk [vmem:[#allocation2 + $0x34] sm:$0xf] %vm280_vm1, %v691_v61  ;;  %v975_v13 = vld [vmem:[#allocation2 + $0x3c] sm:$0xf] }
  0x3a   : > { %v1066_v43 = vld [vmem:[#allocation2 + $0x28] sm:$0xf]  ;;  %v1187_v46 = vshll.u32 %v1065_v33, 16  ;;  %v969_v34 = vsel %vm13583_vm13, %v682_v20, %v968_v48  ;;  %v973_v0 = vsel %vm13519_vm5, %v692_v58, %v972_v53  ;;  %v697_v11 = vshll.u32 %v13627_v1, 16  ;;  %v311_v14 = vld [vmem:[#allocation2 + $0x54] sm:$0x1] }
  0x3b   : > { %v1186_v50 = vrot.slane %v1184_v39, 4  ;;  %v1193_v51 = vshll.u32 %v1066_v43, 16  ;;  %v1197_v52 = vshrl.u32 %v1066_v43, 16  ;;  %12176 = vmatmul.mubr.msk.bf16.vlgmr.msra.gmra.mrb[0].mxu0 %vm1545_vm9, %v11077_v40  ;;  %v1172_v54 = vsel %vm13571_vm11, %v1167_v41, %v1171_v31  ;;  %970 = vst [vmem:[#allocation2 + $0x30] sm:$0xf] %v969_v34  ;;  %v508_v53 = vld [vmem:[%s13562_s10 + $0x68] sm:$0xff] }
  0x3c   : > { %v1177_v55 = vrot.slane %v1176_v42, 4  ;;  %v1189_v56 = vrot.slane %v1187_v46, 5  ;;  %12208 = vmatpush3.bf16.msra.mxu0 %v13551_v18  ;;  %v694_v18 = vshrl.u32 %v13627_v1, 16  ;;  %v1095_v9 = vld [vmem:[#allocation2 + $0x2c] sm:$0x1]  ;;  %v702_v12 = vshrl.u32 %v13629_v2, 16 }
  0x3d   : > { %v1195_v59 = vrot.slane %v1193_v51, 5  ;;  %v1199_v60 = vrot.slane %v1197_v52, 4  ;;  %974 = vst [vmem:[#allocation2 + $0x38] sm:$0x1] %v973_v0  ;;  %v361_v15 = vld [vmem:[#allocation2 + $0x5c] sm:$0x1]  ;;  %v11813_v31 = vpack.c.bf16 %v505_v6, %v505_v6  ;;  %v11814_v32 = vpack.c.bf16 %v506_v7, %v506_v7 }
  0x3e   : > { %v1182_v62 = vsel %vm13571_vm11, %v1177_v55, %v1181_v38  ;;  %v1190_v63 = vor.u32 %v1189_v56, %v1186_v50  ;;  %v1203_v17 = vshll.u32 %v1095_v9, 16  ;;  %v696_v19 = vrot.slane %v694_v18, 7  ;;  %v979_v21 = vld [vmem:[#allocation2 + $0x44] sm:$0x1] }
  0x3f   : > { %v11078_v8 = vcombine.low %v1172_v54, %v1182_v62  ;;  %v1200_v10 = vor.u32 %v1199_v60, %v1195_v59  ;;  %v705_v20 = vshll.u32 %v13629_v2, 16  ;;  %v704_v23 = vrot.slane %v702_v12, 7  ;;  %v11156_v25 = vld [vmem:[%s17339_s1 + $0x4] sm:$0x3]  ;;  %v314_v54 = vld [vmem:[#allocation2 + $0x60] sm:$0x1] }
  0x40   : > { %v1191_v16 = vrot.slane %v1190_v63, 4  ;;  %v309_v24 = vsel %vm13519_vm5, 0, %v308_v47  ;;  %v359_v1 = vsel %vm13528_vm6, 0, %v358_v4  ;;  %v1205_v27 = vrot.slane %v1203_v17, 5  ;;  %13299 = vmatprep.subr.msk.bf16.mxu0 %vm1594_vm0, %v11156_v25  ;;  %v1068_v40 = vld [vmem:[#allocation2 + $0x34] sm:$0xf] }
  0x41   : > { %12179 = vmatprep.mubr.msk.bf16.mxu0 %vm1545_vm9, %v11078_v8  ;;  %v1201_v22 = vrot.slane %v1200_v10, 4  ;;  %v699_v2 = vor.u32 %v697_v11, %v696_v19  ;;  %v700_v28 = vrot.slane %v696_v19, 4  ;;  %310 = vst [vmem:[#allocation2 + $0x48] sm:$0x1] %v309_v24  ;;  %360 = vst [vmem:[#allocation2 + $0x50] sm:$0x1] %v359_v1  ;;  %v707_v29 = vor.u32 %v705_v20, %v704_v23 }
  0x42   : > { %v1196_v26 = vsel %vm13571_vm11, %v1191_v16, %v1195_v59  ;;  %v709_v30 = vrot.slane %v704_v23, 4  ;;  %v312_v36 = vsel %vm13519_vm5, 0, %v311_v14  ;;  %v362_v37 = vsel %vm13528_vm6, 0, %v361_v15  ;;  %v1067_v39 = vld [vmem:[#allocation2 + $0x30] sm:$0xf]  ;;  %v507_v46 = vld [vmem:[%s13562_s10 + $0x60] sm:$0xff] }
  0x43   : > { %v1206_v33 = vsel %vm13571_vm11, %v1201_v22, %v1205_v27  ;;  %v976_v35 = vsel %vm13583_vm13, %v699_v2, %v975_v13  ;;  %v708_v41 = vsel %vm13577_vm12, %v700_v28, %v707_v29  ;;  %v711_v43 = vshrl.u32 %v11813_v31, 16  ;;  %313 = vst [vmem:[#allocation2 + $0x54] sm:$0x1] %v312_v36  ;;  %363 = vst [vmem:[#allocation2 + $0x5c] sm:$0x1] %v362_v37  ;;  %v509_v11 = vld [vmem:[%s13562_s10 + $0x70] sm:$0xff] }
  0x44   : > { %v11079_v38 = vcombine.low %v1196_v26, %v1206_v33  ;;  %977 = vst [vmem:[#allocation2 + $0x3c] sm:$0xf] %v976_v35  ;;  %v980_v42 = vsel %vm13519_vm5, %v709_v30, %v979_v21  ;;  %v1096_v48 = vld [vmem:[#allocation2 + $0x38] sm:$0x1]  ;;  %v1208_v50 = vshrl.u32 %v1067_v39, 16  ;;  %v1211_v51 = vshll.u32 %v1067_v39, 16 }
  0x45   : > { %v1217_v52 = vshll.u32 %v1068_v40, 16  ;;  %v1221_v45 = vshrl.u32 %v1068_v40, 16  ;;  %978 = vst.msk [vmem:[#allocation2 + $0x40] sm:$0xf] %vm280_vm1, %v708_v41  ;;  %981 = vst [vmem:[#allocation2 + $0x44] sm:$0x1] %v980_v42  ;;  %v11815_v10 = vpack.c.bf16 %v507_v46, %v507_v46  ;;  %v11816_v14 = vpack.c.bf16 %v508_v53, %v508_v53 }
  0x46   : > { %12180 = vmatmul.mubr.msk.bf16.gmra.mrb[4].mxu0 %vm1545_vm9, %v11079_v38  ;;  %v1227_v55 = vshll.u32 %v1096_v48, 16  ;;  %v713_v56 = vrot.slane %v711_v43, 7  ;;  %v714_v58 = vshll.u32 %v11813_v31, 16  ;;  %v719_v59 = vshrl.u32 %v11814_v32, 16  ;;  %v364_v30 = vld [vmem:[#allocation2 + $0x68] sm:$0x1] }
  0x47   : > { %v1210_v60 = vrot.slane %v1208_v50, 4  ;;  %v1213_v61 = vrot.slane %v1211_v51, 5  ;;  %v1219_v34 = vrot.slane %v1217_v52, 5  ;;  %v1223_v47 = vrot.slane %v1221_v45, 4  ;;  %v510_v41 = vld [vmem:[%s13562_s10 + $0x78] sm:$0xff] }
  0x48   : > { %v1229_v62 = vrot.slane %v1227_v55, 5  ;;  %v716_v63 = vor.u32 %v714_v58, %v713_v56  ;;  %v717_v0 = vrot.slane %v713_v56, 4  ;;  %v721_v18 = vrot.slane %v719_v59, 7  ;;  %v982_v4 = vld [vmem:[#allocation2 + $0x48] sm:$0xf] }
  0x49   : > { %v1214_v6 = vor.u32 %v1213_v61, %v1210_v60  ;;  %v1224_v7 = vor.u32 %v1223_v47, %v1219_v34  ;;  %v722_v8 = vshll.u32 %v11814_v32, 16  ;;  %v986_v9 = vld [vmem:[#allocation2 + $0x50] sm:$0x1]  ;;  %v315_v15 = vsel %vm13519_vm5, 0, %v314_v54 }
  0x4a   : > { %v726_v12 = vrot.slane %v721_v18, 4  ;;  %v983_v13 = vsel %vm13583_vm13, %v716_v63, %v982_v4  ;;  %v728_v21 = vshrl.u32 %v11815_v10, 16  ;;  %316 = vst [vmem:[#allocation2 + $0x60] sm:$0x1] %v315_v15  ;;  %v13695_v26 = vpack.c.bf16 %v509_v11, %v509_v11  ;;  %v989_v40 = vld [vmem:[#allocation2 + $0x54] sm:$0xf] }
  0x4b   : > { %v1215_v16 = vrot.slane %v1214_v6, 4  ;;  %v1225_v17 = vrot.slane %v1224_v7, 4  ;;  %v1069_v19 = vld [vmem:[#allocation2 + $0x3c] sm:$0xf]  ;;  %v724_v20 = vor.u32 %v722_v8, %v721_v18  ;;  %984 = vst [vmem:[#allocation2 + $0x48] sm:$0xf] %v983_v13  ;;  %v11818_v59 = vpack.c.bf16 %v510_v41, %v510_v41 }
  0x4c   : > { %v1070_v22 = vld [vmem:[#allocation2 + $0x40] sm:$0xf]  ;;  %v1097_v23 = vld [vmem:[#allocation2 + $0x44] sm:$0x1]  ;;  %v1232_v24 = vshrl.u32 %v1069_v19, 16  ;;  %v1235_v1 = vshll.u32 %v1069_v19, 16  ;;  %v987_v25 = vsel %vm13519_vm5, %v726_v12, %v986_v9 }
  0x4d   : > { %v1220_v27 = vsel %vm13571_vm11, %v1215_v16, %v1219_v34  ;;  %v1230_v2 = vsel %vm13571_vm11, %v1225_v17, %v1229_v62  ;;  %v1241_v28 = vshll.u32 %v1070_v22, 16  ;;  %v1245_v29 = vshrl.u32 %v1070_v22, 16  ;;  %988 = vst [vmem:[#allocation2 + $0x50] sm:$0x1] %v987_v25  ;;  %v993_v58 = vld [vmem:[#allocation2 + $0x5c] sm:$0x1] }
  0x4e   : > { %v11080_v31 = vcombine.low %v1220_v27, %v1230_v2  ;;  %v1234_v32 = vrot.slane %v1232_v24, 4  ;;  %v1237_v33 = vrot.slane %v1235_v1, 5  ;;  %v1251_v35 = vshll.u32 %v1097_v23, 16  ;;  %v317_v6 = vld [vmem:[#allocation2 + $0x6c] sm:$0x1]  ;;  %v511_v17 = vld [vmem:[%s13562_s10 + $0x80] sm:$0xff] }
  0x4f   : > { %v1243_v36 = vrot.slane %v1241_v28, 5  ;;  %v1247_v37 = vrot.slane %v1245_v29, 4  ;;  %v725_v38 = vsel %vm13577_vm12, %v717_v0, %v724_v20  ;;  %v730_v39 = vrot.slane %v728_v21, 7  ;;  %v367_v11 = vld [vmem:[#allocation2 + $0x74] sm:$0x1]  ;;  %v512_v24 = vld [vmem:[%s13562_s10 + $0x88] sm:$0xff] }
  0x50   : > { %12183 = vmatprep.mubr.msk.bf16.mxu0 %vm1545_vm9, %v11080_v31  ;;  %v1238_v42 = vor.u32 %v1237_v33, %v1234_v32  ;;  %v1253_v43 = vrot.slane %v1251_v35, 5  ;;  %985 = vst.msk [vmem:[#allocation2 + $0x4c] sm:$0xf] %vm280_vm1, %v725_v38  ;;  %v731_v46 = vshll.u32 %v11815_v10, 16  ;;  %v736_v48 = vshrl.u32 %v11816_v14, 16 }
  0x51   : > { %v1248_v50 = vor.u32 %v1247_v37, %v1243_v36  ;;  %v734_v51 = vrot.slane %v730_v39, 4  ;;  %v739_v52 = vshll.u32 %v11816_v14, 16  ;;  %v365_v45 = vsel %vm13528_vm6, 0, %v364_v30  ;;  %v996_v16 = vld [vmem:[#allocation2 + $0x60] sm:$0xf]  ;;  %v513_v37 = vld [vmem:[%s13562_s10 + $0x90] sm:$0xff] }
  0x52   : > { %v1239_v53 = vrot.slane %v1238_v42, 4  ;;  %v1071_v54 = vld [vmem:[#allocation2 + $0x48] sm:$0xf]  ;;  %v733_v55 = vor.u32 %v731_v46, %v730_v39  ;;  %v738_v56 = vrot.slane %v736_v48, 7  ;;  %366 = vst [vmem:[#allocation2 + $0x68] sm:$0x1] %v365_v45  ;;  %v13731_v41 = vpack.c.bf16 %v512_v24, %v512_v24 }
  0x53   : > { %v1249_v60 = vrot.slane %v1248_v50, 4  ;;  %v1256_v61 = vshrl.u32 %v1071_v54, 16  ;;  %v1259_v34 = vshll.u32 %v1071_v54, 16  ;;  %v745_v47 = vshrl.u32 %v13695_v26, 16  ;;  %v514_v42 = vld [vmem:[%s13562_s10 + $0x98] sm:$0xff] }
  0x54   : > { %v1244_v62 = vsel %vm13571_vm11, %v1239_v53, %v1243_v36  ;;  %v1098_v63 = vld [vmem:[#allocation2 + $0x50] sm:$0x1]  ;;  %v741_v0 = vor.u32 %v739_v52, %v738_v56  ;;  %v743_v18 = vrot.slane %v738_v56, 4  ;;  %v990_v4 = vsel %vm13583_vm13, %v733_v55, %v989_v40 }
  0x55   : > { %v1254_v7 = vsel %vm13571_vm11, %v1249_v60, %v1253_v43  ;;  %v1258_v8 = vrot.slane %v1256_v61, 4  ;;  %v1261_v9 = vrot.slane %v1259_v34, 5  ;;  %v1275_v10 = vshll.u32 %v1098_v63, 16  ;;  %991 = vst [vmem:[#allocation2 + $0x54] sm:$0xf] %v990_v4 }
  0x56   : > { %v11081_v12 = vcombine.low %v1244_v62, %v1254_v7  ;;  %v742_v13 = vsel %vm13577_vm12, %v734_v51, %v741_v0  ;;  %v994_v14 = vsel %vm13519_vm5, %v743_v18, %v993_v58  ;;  %v747_v15 = vrot.slane %v745_v47, 7  ;;  %v320_v60 = vld [vmem:[#allocation2 + $0x78] sm:$0x1]  ;;  %v370_v61 = vld [vmem:[#allocation2 + $0x80] sm:$0x1] }
  0x57   : > { %v1072_v19 = vld [vmem:[#allocation2 + $0x4c] sm:$0xf]  ;;  %v1262_v20 = vor.u32 %v1261_v9, %v1258_v8  ;;  %v1277_v21 = vrot.slane %v1275_v10, 5  ;;  %992 = vst.msk [vmem:[#allocation2 + $0x58] sm:$0xf] %vm280_vm1, %v742_v13  ;;  %v748_v22 = vshll.u32 %v13695_v26, 16  ;;  %v11819_v36 = vpack.c.bf16 %v511_v17, %v511_v17 }
  0x58   : > { %995 = vst [vmem:[#allocation2 + $0x5c] sm:$0x1] %v994_v14  ;;  %v753_v23 = vshrl.u32 %v11818_v59, 16  ;;  %12184 = vmatmul.mubr.msk.bf16.gmra.mrb[8].mxu0 %vm1545_vm9, %v11081_v12  ;;  %v1265_v1 = vshll.u32 %v1072_v19, 16  ;;  %v1269_v25 = vshrl.u32 %v1072_v19, 16  ;;  %v751_v27 = vrot.slane %v747_v15, 4 }
  0x59   : > { %v756_v2 = vshll.u32 %v11818_v59, 16  ;;  %v1263_v28 = vrot.slane %v1262_v20, 4  ;;  %v750_v29 = vor.u32 %v748_v22, %v747_v15  ;;  %v1000_v31 = vld [vmem:[#allocation2 + $0x68] sm:$0x1]  ;;  %v318_v32 = vsel %vm13519_vm5, 0, %v317_v6  ;;  %v515_v19 = vld [vmem:[%s13562_s10 + $0xa0] sm:$0xff] }
  0x5a   : > { %v755_v30 = vrot.slane %v753_v23, 7  ;;  %v1267_v33 = vrot.slane %v1265_v1, 5  ;;  %v1271_v35 = vrot.slane %v1269_v25, 4  ;;  %319 = vst [vmem:[#allocation2 + $0x6c] sm:$0x1] %v318_v32  ;;  %v368_v26 = vsel %vm13528_vm6, 0, %v367_v11 }
  0x5b   : > { %v997_v40 = vsel %vm13583_vm13, %v750_v29, %v996_v16  ;;  %369 = vst [vmem:[#allocation2 + $0x74] sm:$0x1] %v368_v26  ;;  %v762_v50 = vshrl.u32 %v11819_v36, 16  ;;  %v765_v51 = vshll.u32 %v11819_v36, 16  ;;  %v13747_v34 = vpack.c.bf16 %v513_v37, %v513_v37 }
  0x5c   : > { %v758_v38 = vor.u32 %v756_v2, %v755_v30  ;;  %v760_v39 = vrot.slane %v755_v30, 4  ;;  %v1268_v43 = vsel %vm13571_vm11, %v1263_v28, %v1267_v33  ;;  %v1272_v46 = vor.u32 %v1271_v35, %v1267_v33  ;;  %v13736_v48 = vld [vmem:[#allocation2 + $0x54] sm:$0xf]  ;;  %998 = vst [vmem:[#allocation2 + $0x60] sm:$0xf] %v997_v40 }
  0x5d   : > { %v1280_v52 = vshrl.u32 %v13736_v48, 16  ;;  %v1283_v45 = vshll.u32 %v13736_v48, 16  ;;  %v764_v59 = vrot.slane %v762_v50, 7  ;;  %v13749_v47 = vpack.c.bf16 %v514_v42, %v514_v42 }
  0x5e   : > { %v759_v53 = vsel %vm13577_vm12, %v751_v27, %v758_v38  ;;  %v1001_v54 = vsel %vm13519_vm5, %v760_v39, %v1000_v31  ;;  %v1273_v55 = vrot.slane %v1272_v46, 4  ;;  %v13744_v56 = vld [vmem:[#allocation2 + $0x58] sm:$0xf]  ;;  %v770_v15 = vshrl.u32 %v13731_v41, 16 }
  0x5f   : > { %v1099_v58 = vld [vmem:[#allocation2 + $0x5c] sm:$0x1]  ;;  %999 = vst.msk [vmem:[#allocation2 + $0x64] sm:$0xf] %vm280_vm1, %v759_v53  ;;  %1002 = vst [vmem:[#allocation2 + $0x68] sm:$0x1] %v1001_v54  ;;  %v767_v7 = vor.u32 %v765_v51, %v764_v59  ;;  %v13775_v35 = vpack.c.bf16 %v515_v19, %v515_v19 }
  0x60   : > { %v1282_v62 = vrot.slane %v1280_v52, 4  ;;  %v1285_v63 = vrot.slane %v1283_v45, 5  ;;  %v1289_v0 = vshll.u32 %v13744_v56, 16  ;;  %v1293_v18 = vshrl.u32 %v13744_v56, 16 }
  0x61   : > { %v1278_v4 = vsel %vm13571_vm11, %v1273_v55, %v1277_v21  ;;  %v1299_v6 = vshll.u32 %v1099_v58, 16  ;;  %v768_v8 = vrot.slane %v764_v59, 4  ;;  %v1003_v13 = vld [vmem:[#allocation2 + $0x6c] sm:$0xf]  ;;  %v773_v16 = vshll.u32 %v13731_v41, 16 }
  0x62   : > { %v11082_v9 = vcombine.low %v1268_v43, %v1278_v4  ;;  %v1286_v10 = vor.u32 %v1285_v63, %v1282_v62  ;;  %v1291_v11 = vrot.slane %v1289_v0, 5  ;;  %v1295_v12 = vrot.slane %v1293_v18, 4  ;;  %v1007_v2 = vld [vmem:[#allocation2 + $0x74] sm:$0x1]  ;;  %v323_v55 = vld [vmem:[#allocation2 + $0x84] sm:$0x1] }
  0x63   : > { %v1301_v14 = vrot.slane %v1299_v6, 5  ;;  %v1004_v17 = vsel %vm13583_vm13, %v767_v7, %v1003_v13  ;;  %v13761_v22 = vld [vmem:[#allocation2 + $0x60] sm:$0xf]  ;;  %v321_v23 = vsel %vm13519_vm5, 0, %v320_v60  ;;  %v371_v24 = vsel %vm13528_vm6, 0, %v370_v61  ;;  %v516_v7 = vld [vmem:[%s13562_s10 + $0xa8] sm:$0xff] }
  0x64   : > { %12187 = vmatprep.mubr.msk.bf16.mxu0 %vm1545_vm9, %v11082_v9  ;;  %v1287_v20 = vrot.slane %v1286_v10, 4  ;;  %v1296_v21 = vor.u32 %v1295_v12, %v1291_v11  ;;  %1005 = vst [vmem:[#allocation2 + $0x6c] sm:$0xf] %v1004_v17  ;;  %v1304_v1 = vshrl.u32 %v13761_v22, 16  ;;  %v1307_v25 = vshll.u32 %v13761_v22, 16 }
  0x65   : > { %v772_v27 = vrot.slane %v770_v15, 7  ;;  %322 = vst [vmem:[#allocation2 + $0x78] sm:$0x1] %v321_v23  ;;  %372 = vst [vmem:[#allocation2 + $0x80] sm:$0x1] %v371_v24  ;;  %v779_v28 = vshrl.u32 %v13747_v34, 16 }
  0x66   : > { %v1292_v29 = vsel %vm13571_vm11, %v1287_v20, %v1291_v11  ;;  %v1297_v30 = vrot.slane %v1296_v21, 4  ;;  %v13772_v31 = vld [vmem:[#allocation2 + $0x64] sm:$0xf]  ;;  %v1100_v32 = vld [vmem:[#allocation2 + $0x68] sm:$0x1]  ;;  %v782_v33 = vshll.u32 %v13747_v34, 16  ;;  %v11824_v20 = vpack.c.bf16 %v516_v7, %v516_v7 }
  0x67   : > { %v1306_v26 = vrot.slane %v1304_v1, 4  ;;  %v1309_v36 = vrot.slane %v1307_v25, 5  ;;  %v1313_v37 = vshll.u32 %v13772_v31, 16  ;;  %v1317_v38 = vshrl.u32 %v13772_v31, 16  ;;  %v373_v58 = vld [vmem:[#allocation2 + $0x8c] sm:$0x1] }
  0x68   : > { %v1302_v39 = vsel %vm13571_vm11, %v1297_v30, %v1301_v14  ;;  %v1323_v40 = vshll.u32 %v1100_v32, 16  ;;  %v775_v41 = vor.u32 %v773_v16, %v772_v27  ;;  %v777_v42 = vrot.slane %v772_v27, 4  ;;  %v517_v21 = vld [vmem:[%s13562_s10 + $0xb0] sm:$0xff]  ;;  %v518_v23 = vld [vmem:[%s13562_s10 + $0xb8] sm:$0xff] }
  0x69   : > { %v11083_v43 = vcombine.low %v1292_v29, %v1302_v39  ;;  %v1310_v46 = vor.u32 %v1309_v36, %v1306_v26  ;;  %v1315_v50 = vrot.slane %v1313_v37, 5  ;;  %v1319_v51 = vrot.slane %v1317_v38, 4  ;;  %v519_v26 = vld [vmem:[%s13562_s10 + $0xc0] sm:$0xff] }
  0x6a   : > { %v1325_v52 = vrot.slane %v1323_v40, 5  ;;  %v776_v45 = vsel %vm13577_vm12, %v768_v8, %v775_v41  ;;  %v1008_v53 = vsel %vm13519_vm5, %v777_v42, %v1007_v2  ;;  %v781_v54 = vrot.slane %v779_v28, 7  ;;  %v326_v2 = vld [vmem:[#allocation2 + $0x90] sm:$0x1] }
  0x6b   : > { %12188 = vmatmul.mubr.msk.bf16.gmra.mrb[12].mxu0 %vm1545_vm9, %v11083_v43  ;;  %v1311_v59 = vrot.slane %v1310_v46, 4  ;;  %v1320_v60 = vor.u32 %v1319_v51, %v1315_v50  ;;  %1006 = vst.msk [vmem:[#allocation2 + $0x70] sm:$0xf] %vm280_vm1, %v776_v45  ;;  %1009 = vst [vmem:[#allocation2 + $0x74] sm:$0x1] %v1008_v53  ;;  %v787_v34 = vshrl.u32 %v13749_v47, 16  ;;  %v11825_v39 = vpack.c.bf16 %v517_v21, %v517_v21 }
  0x6c   : > { %v13787_v61 = vld [vmem:[#allocation2 + $0x6c] sm:$0xf]  ;;  %v790_v62 = vshll.u32 %v13749_v47, 16  ;;  %v784_v18 = vor.u32 %v782_v33, %v781_v54  ;;  %v785_v4 = vrot.slane %v781_v54, 4  ;;  %v1010_v6 = vld [vmem:[#allocation2 + $0x78] sm:$0xf]  ;;  %v13819_v40 = vpack.c.bf16 %v518_v23, %v518_v23 }
  0x6d   : > { %v1328_v63 = vshrl.u32 %v13787_v61, 16  ;;  %v1331_v0 = vshll.u32 %v13787_v61, 16  ;;  %v1316_v8 = vsel %vm13571_vm11, %v1311_v59, %v1315_v50  ;;  %v1321_v9 = vrot.slane %v1320_v60, 4  ;;  %v1014_v11 = vld [vmem:[#allocation2 + $0x80] sm:$0x1]  ;;  %v520_v53 = vld [vmem:[%s13562_s10 + $0xc8] sm:$0xff] }
  0x6e   : > { %v789_v10 = vrot.slane %v787_v34, 7  ;;  %v324_v12 = vsel %vm13519_vm5, 0, %v323_v55  ;;  %v1011_v14 = vsel %vm13583_vm13, %v784_v18, %v1010_v6  ;;  %v374_v15 = vsel %vm13528_vm6, 0, %v373_v58  ;;  %v376_v33 = vld [vmem:[#allocation2 + $0x98] sm:$0x1]  ;;  %v521_v34 = vld [vmem:[%s13562_s10 + $0xd0] sm:$0xff] }
  0x6f   : > { %v1330_v47 = vrot.slane %v1328_v63, 4  ;;  %v1333_v13 = vrot.slane %v1331_v0, 5  ;;  %325 = vst [vmem:[#allocation2 + $0x84] sm:$0x1] %v324_v12  ;;  %v1326_v16 = vsel %vm13571_vm11, %v1321_v9, %v1325_v52  ;;  %1012 = vst [vmem:[#allocation2 + $0x78] sm:$0xf] %v1011_v14  ;;  %v13834_v6 = vpack.c.bf16 %v519_v26, %v519_v26 }
  0x70   : > { %v792_v17 = vor.u32 %v790_v62, %v789_v10  ;;  %v794_v19 = vrot.slane %v789_v10, 4  ;;  %375 = vst [vmem:[#allocation2 + $0x8c] sm:$0x1] %v374_v15  ;;  %v11084_v24 = vcombine.low %v1316_v8, %v1326_v16  ;;  %v796_v25 = vshrl.u32 %v13775_v35, 16 }
  0x71   : > { %v1334_v1 = vor.u32 %v1333_v13, %v1330_v47  ;;  %v799_v27 = vshll.u32 %v13775_v35, 16  ;;  %v804_v30 = vshrl.u32 %v11824_v20, 16  ;;  %v807_v32 = vshll.u32 %v11824_v20, 16 }
  0x72   : > { %v793_v28 = vsel %vm13577_vm12, %v785_v4, %v792_v17  ;;  %v1015_v29 = vsel %vm13519_vm5, %v794_v19, %v1014_v11  ;;  %12191 = vmatprep.mubr.msk.bf16.mxu0 %vm1545_vm9, %v11084_v24  ;;  %v13814_v36 = vld [vmem:[#allocation2 + $0x70] sm:$0xf]  ;;  %v13816_v37 = vld [vmem:[#allocation2 + $0x74] sm:$0x1]  ;;  %v798_v35 = vrot.slane %v796_v25, 7  ;;  %v327_v52 = vsel %vm13519_vm5, 0, %v326_v2 }
  0x73   : > { %v1335_v38 = vrot.slane %v1334_v1, 4  ;;  %1013 = vst.msk [vmem:[#allocation2 + $0x7c] sm:$0xf] %vm280_vm1, %v793_v28  ;;  %1016 = vst [vmem:[#allocation2 + $0x80] sm:$0x1] %v1015_v29  ;;  %v1337_v41 = vshll.u32 %v13814_v36, 16  ;;  %v13849_v20 = vpack.c.bf16 %v520_v53, %v520_v53  ;;  %v13851_v21 = vpack.c.bf16 %v521_v34, %v521_v34 }
  0x74   : > { %v1341_v42 = vshrl.u32 %v13814_v36, 16  ;;  %v1347_v43 = vshll.u32 %v13816_v37, 16  ;;  %v806_v46 = vrot.slane %v804_v30, 7  ;;  %v801_v50 = vor.u32 %v799_v27, %v798_v35  ;;  %328 = vst [vmem:[#allocation2 + $0x90] sm:$0x1] %v327_v52 }
  0x75   : > { %v802_v51 = vrot.slane %v798_v35, 4  ;;  %v377_v45 = vsel %vm13528_vm6, 0, %v376_v33  ;;  %v1339_v54 = vrot.slane %v1337_v41, 5  ;;  %v813_v4 = vshrl.u32 %v11825_v39, 16  ;;  %v329_v19 = vld [vmem:[#allocation2 + $0x9c] sm:$0x1] }
  0x76   : > { %v1343_v55 = vrot.slane %v1341_v42, 4  ;;  %v1349_v58 = vrot.slane %v1347_v43, 5  ;;  %v809_v59 = vor.u32 %v807_v32, %v806_v46  ;;  %v1017_v60 = vld [vmem:[#allocation2 + $0x84] sm:$0xf]  ;;  %378 = vst [vmem:[#allocation2 + $0x98] sm:$0x1] %v377_v45 }
  0x77   : > { %v13830_v62 = vld [vmem:[#allocation2 + $0x78] sm:$0xf]  ;;  %v811_v63 = vrot.slane %v806_v46, 4  ;;  %v1018_v0 = vsel %vm13583_vm13, %v801_v50, %v1017_v60  ;;  %v1021_v18 = vld [vmem:[#allocation2 + $0x8c] sm:$0x1]  ;;  %v1340_v7 = vsel %vm13571_vm11, %v1335_v38, %v1339_v54  ;;  %v815_v47 = vrot.slane %v813_v4, 7 }
  0x78   : > { %v1344_v8 = vor.u32 %v1343_v55, %v1339_v54  ;;  %v1352_v9 = vshrl.u32 %v13830_v62, 16  ;;  %v1355_v10 = vshll.u32 %v13830_v62, 16  ;;  %1019 = vst [vmem:[#allocation2 + $0x84] sm:$0xf] %v1018_v0  ;;  %v810_v11 = vsel %vm13577_vm12, %v802_v51, %v809_v59  ;;  %v379_v30 = vld [vmem:[#allocation2 + $0xa4] sm:$0x1] }
  0x79   : > { %v1022_v12 = vsel %vm13519_vm5, %v811_v63, %v1021_v18  ;;  %v816_v13 = vshll.u32 %v11825_v39, 16  ;;  %1020 = vst.msk [vmem:[#allocation2 + $0x88] sm:$0xf] %vm280_vm1, %v810_v11  ;;  %v819_v28 = vrot.slane %v815_v47, 4  ;;  %v821_v29 = vshrl.u32 %v13819_v40, 16  ;;  %v522_v46 = vld [vmem:[%s13562_s10 + $0xd8] sm:$0xff] }
  0x7a   : > { %v1345_v14 = vrot.slane %v1344_v8, 4  ;;  %v13844_v15 = vld [vmem:[#allocation2 + $0x7c] sm:$0xf]  ;;  %v13846_v16 = vld [vmem:[#allocation2 + $0x80] sm:$0x1]  ;;  %v1354_v17 = vrot.slane %v1352_v9, 4  ;;  %v13879_v4 = vpack.c.bf16 %v522_v46, %v522_v46 }
  0x7b   : > { %1023 = vst [vmem:[#allocation2 + $0x8c] sm:$0x1] %v1022_v12  ;;  %v1357_v23 = vrot.slane %v1355_v10, 5  ;;  %v1361_v24 = vshll.u32 %v13844_v15, 16  ;;  %v1365_v1 = vshrl.u32 %v13844_v15, 16  ;;  %v1371_v25 = vshll.u32 %v13846_v16, 16 }
  0x7c   : > { %v1350_v27 = vsel %vm13571_vm11, %v1345_v14, %v1349_v58  ;;  %v818_v2 = vor.u32 %v816_v13, %v815_v47  ;;  %v1024_v35 = vld [vmem:[#allocation2 + $0x90] sm:$0xf]  ;;  %v823_v41 = vrot.slane %v821_v29, 7  ;;  %v824_v42 = vshll.u32 %v13819_v40, 16  ;;  %v332_v11 = vld [vmem:[#allocation2 + $0xa8] sm:$0x1] }
  0x7d   : > { %v11085_v32 = vcombine.low %v1340_v7, %v1350_v27  ;;  %v1358_v33 = vor.u32 %v1357_v23, %v1354_v17  ;;  %v1363_v26 = vrot.slane %v1361_v24, 5  ;;  %v1367_v38 = vrot.slane %v1365_v1, 4  ;;  %v1028_v59 = vld [vmem:[#allocation2 + $0x98] sm:$0x1]  ;;  %v382_v29 = vld [vmem:[#allocation2 + $0xb0] sm:$0x1] }
  0x7e   : > { %v1373_v39 = vrot.slane %v1371_v25, 5  ;;  %v1025_v43 = vsel %vm13583_vm13, %v818_v2, %v1024_v35  ;;  %v330_v45 = vsel %vm13519_vm5, 0, %v329_v19  ;;  %v380_v53 = vsel %vm13528_vm6, 0, %v379_v30 }
  0x7f   : > { %12192 = vmatmul.mubr.msk.bf16.gmra.mrb[16].mxu0 %vm1545_vm9, %v11085_v32  ;;  %v1359_v50 = vrot.slane %v1358_v33, 4  ;;  %v1368_v51 = vor.u32 %v1367_v38, %v1363_v26  ;;  %v13864_v52 = vld [vmem:[#allocation2 + $0x84] sm:$0xf]  ;;  %1026 = vst [vmem:[#allocation2 + $0x90] sm:$0xf] %v1025_v43  ;;  %v826_v55 = vor.u32 %v824_v42, %v823_v41  ;;  %v828_v58 = vrot.slane %v823_v41, 4 }
  0x80   : > { %v1376_v54 = vshrl.u32 %v13864_v52, 16  ;;  %v1379_v40 = vshll.u32 %v13864_v52, 16  ;;  %331 = vst [vmem:[#allocation2 + $0x9c] sm:$0x1] %v330_v45  ;;  %381 = vst [vmem:[#allocation2 + $0xa4] sm:$0x1] %v380_v53 }
  0x81   : > { %v1364_v60 = vsel %vm13571_vm11, %v1359_v50, %v1363_v26  ;;  %v1369_v34 = vrot.slane %v1368_v51, 4  ;;  %v13874_v63 = vld [vmem:[#allocation2 + $0x88] sm:$0xf]  ;;  %v830_v18 = vshrl.u32 %v13834_v6, 16  ;;  %v827_v13 = vsel %vm13577_vm12, %v819_v28, %v826_v55 }
  0x82   : > { %v13876_v0 = vld [vmem:[#allocation2 + $0x8c] sm:$0x1]  ;;  %v1378_v7 = vrot.slane %v1376_v54, 4  ;;  %v1381_v8 = vrot.slane %v1379_v40, 5  ;;  %v1385_v9 = vshll.u32 %v13874_v63, 16  ;;  %v1389_v10 = vshrl.u32 %v13874_v63, 16 }
  0x83   : > { %v1374_v12 = vsel %vm13571_vm11, %v1369_v34, %v1373_v39  ;;  %v1395_v47 = vshll.u32 %v13876_v0, 16  ;;  %v1029_v14 = vsel %vm13519_vm5, %v828_v58, %v1028_v59  ;;  %1027 = vst.msk [vmem:[#allocation2 + $0x94] sm:$0xf] %vm280_vm1, %v827_v13  ;;  %v832_v25 = vrot.slane %v830_v18, 7  ;;  %v385_v34 = vld [vmem:[#allocation2 + $0xbc] sm:$0x1] }
  0x84   : > { %v11086_v17 = vcombine.low %v1364_v60, %v1374_v12  ;;  %v1382_v19 = vor.u32 %v1381_v8, %v1378_v7  ;;  %v1387_v23 = vrot.slane %v1385_v9, 5  ;;  %v1391_v24 = vrot.slane %v1389_v10, 4  ;;  %1030 = vst [vmem:[#allocation2 + $0x98] sm:$0x1] %v1029_v14  ;;  %v335_v60 = vld [vmem:[#allocation2 + $0xb4] sm:$0x1] }
  0x85   : > { %v1397_v1 = vrot.slane %v1395_v47, 5  ;;  %v833_v27 = vshll.u32 %v13834_v6, 16  ;;  %v838_v2 = vshrl.u32 %v13849_v20, 16  ;;  %v841_v33 = vshll.u32 %v13849_v20, 16  ;;  %v523_v14 = vld [vmem:[%s13562_s10 + $0xe0] sm:$0xff] }
  0x86   : > { %12195 = vmatprep.mubr.msk.bf16.mxu0 %vm1545_vm9, %v11086_v17  ;;  %v1383_v28 = vrot.slane %v1382_v19, 4  ;;  %v1392_v30 = vor.u32 %v1391_v24, %v1387_v23  ;;  %v13894_v32 = vld [vmem:[#allocation2 + $0x90] sm:$0xf]  ;;  %v333_v26 = vsel %vm13519_vm5, 0, %v332_v11  ;;  %v836_v6 = vrot.slane %v832_v25, 4  ;;  %v524_v24 = vld [vmem:[%s13562_s10 + $0xe8] sm:$0xff] }
  0x87   : > { %v1400_v38 = vshrl.u32 %v13894_v32, 16  ;;  %v1403_v35 = vshll.u32 %v13894_v32, 16  ;;  %v835_v39 = vor.u32 %v833_v27, %v832_v25  ;;  %v1031_v41 = vld [vmem:[#allocation2 + $0x9c] sm:$0xf]  ;;  %334 = vst [vmem:[#allocation2 + $0xa8] sm:$0x1] %v333_v26 }
  0x88   : > { %v1388_v42 = vsel %vm13571_vm11, %v1383_v28, %v1387_v23  ;;  %v1393_v43 = vrot.slane %v1392_v30, 4  ;;  %v840_v46 = vrot.slane %v838_v2, 7  ;;  %v383_v50 = vsel %vm13528_vm6, 0, %v382_v29  ;;  %v1035_v58 = vld [vmem:[#allocation2 + $0xa4] sm:$0x1] }
  0x89   : > { %v1402_v20 = vrot.slane %v1400_v38, 4  ;;  %v1405_v51 = vrot.slane %v1403_v35, 5  ;;  %v1032_v45 = vsel %vm13583_vm13, %v835_v39, %v1031_v41  ;;  %384 = vst [vmem:[#allocation2 + $0xb0] sm:$0x1] %v383_v50  ;;  %v847_v53 = vshrl.u32 %v13851_v21, 16 }
  0x8a   : > { %v1398_v54 = vsel %vm13571_vm11, %v1393_v43, %v1397_v1  ;;  %v843_v40 = vor.u32 %v841_v33, %v840_v46  ;;  %v845_v55 = vrot.slane %v840_v46, 4  ;;  %1033 = vst [vmem:[#allocation2 + $0x9c] sm:$0xf] %v1032_v45  ;;  %v850_v59 = vshll.u32 %v13851_v21, 16  ;;  %v13911_v7 = vld [vmem:[#allocation2 + $0x94] sm:$0xf] }
  0x8b   : > { %v11087_v18 = vcombine.low %v1388_v42, %v1398_v54  ;;  %v13913_v8 = vld [vmem:[#allocation2 + $0x98] sm:$0x1]  ;;  %v1406_v9 = vor.u32 %v1405_v51, %v1402_v20  ;;  %v849_v10 = vrot.slane %v847_v53, 7  ;;  %v855_v11 = vshrl.u32 %v13879_v4, 16 }
  0x8c   : > { %v1409_v12 = vshll.u32 %v13911_v7, 16  ;;  %v1413_v47 = vshrl.u32 %v13911_v7, 16  ;;  %v1419_v13 = vshll.u32 %v13913_v8, 16  ;;  %v844_v21 = vsel %vm13577_vm12, %v836_v6, %v843_v40 }
  0x8d   : > { %12196 = vmatmul.mubr.msk.bf16.gmra.mrb[20].mxu0 %vm1545_vm9, %v11087_v18  ;;  %v1407_v17 = vrot.slane %v1406_v9, 4  ;;  %1034 = vst.msk [vmem:[#allocation2 + $0xa0] sm:$0xf] %vm280_vm1, %v844_v21  ;;  %v1036_v19 = vsel %vm13519_vm5, %v845_v55, %v1035_v58  ;;  %v852_v23 = vor.u32 %v850_v59, %v849_v10  ;;  %v853_v27 = vrot.slane %v849_v10, 4 }
  0x8e   : > { %v1411_v1 = vrot.slane %v1409_v12, 5  ;;  %v1415_v25 = vrot.slane %v1413_v47, 4  ;;  %1037 = vst [vmem:[#allocation2 + $0xa4] sm:$0x1] %v1036_v19  ;;  %v857_v2 = vrot.slane %v855_v11, 7  ;;  %v858_v28 = vshll.u32 %v13879_v4, 16 }
  0x8f   : > { %v1038_v29 = vld [vmem:[#allocation2 + $0xa8] sm:$0xf]  ;;  %v336_v33 = vsel %vm13519_vm5, 0, %v335_v60  ;;  %v386_v26 = vsel %vm13528_vm6, 0, %v385_v34  ;;  %v1421_v35 = vrot.slane %v1419_v13, 5  ;;  %v11831_v41 = vpack.c.bf16 %v523_v14, %v523_v14 }
  0x90   : > { %v1039_v30 = vsel %vm13583_vm13, %v852_v23, %v1038_v29  ;;  %v1416_v38 = vor.u32 %v1415_v25, %v1411_v1  ;;  %v862_v39 = vrot.slane %v857_v2, 4  ;;  %v1042_v6 = vld [vmem:[#allocation2 + $0xb0] sm:$0x1]  ;;  %337 = vst [vmem:[#allocation2 + $0xb4] sm:$0x1] %v336_v33  ;;  %v1412_v4 = vsel %vm13571_vm11, %v1407_v17, %v1411_v1 }
  0x91   : > { %1040 = vst [vmem:[#allocation2 + $0xa8] sm:$0xf] %v1039_v30  ;;  %387 = vst [vmem:[#allocation2 + $0xbc] sm:$0x1] %v386_v26  ;;  %v13936_v42 = vld [vmem:[#allocation2 + $0x9c] sm:$0xf]  ;;  %v860_v43 = vor.u32 %v858_v28, %v857_v2  ;;  %v11832_v46 = vpack.c.bf16 %v524_v24, %v524_v24 }
  0x92   : > { %v1417_v50 = vrot.slane %v1416_v38, 4  ;;  %v1424_v20 = vshrl.u32 %v13936_v42, 16  ;;  %v1427_v51 = vshll.u32 %v13936_v42, 16  ;;  %v1043_v45 = vsel %vm13519_vm5, %v862_v39, %v1042_v6 }
  0x93   : > { %v861_v53 = vsel %vm13577_vm12, %v853_v27, %v860_v43  ;;  %1044 = vst [vmem:[#allocation2 + $0xb0] sm:$0x1] %v1043_v45  ;;  %v864_v54 = vshrl.u32 %v11831_v41, 16  ;;  %v867_v40 = vshll.u32 %v11831_v41, 16  ;;  %v872_v55 = vshrl.u32 %v11832_v46, 16 }
  0x94   : > { %v1422_v58 = vsel %vm13571_vm11, %v1417_v50, %v1421_v35  ;;  %v13946_v59 = vld [vmem:[#allocation2 + $0xa0] sm:$0xf]  ;;  %v1426_v60 = vrot.slane %v1424_v20, 4  ;;  %v1429_v34 = vrot.slane %v1427_v51, 5  ;;  %1041 = vst.msk [vmem:[#allocation2 + $0xac] sm:$0xf] %vm280_vm1, %v861_v53 }
  0x95   : > { %v875_v18 = vshll.u32 %v11832_v46, 16  ;;  %v11088_v9 = vcombine.low %v1412_v4, %v1422_v58  ;;  %v13949_v10 = vld [vmem:[#allocation2 + $0xa4] sm:$0x1]  ;;  %v1433_v11 = vshll.u32 %v13946_v59, 16  ;;  %v1437_v12 = vshrl.u32 %v13946_v59, 16 }
  0x96   : > { %v866_v47 = vrot.slane %v864_v54, 7  ;;  %v1430_v13 = vor.u32 %v1429_v34, %v1426_v60  ;;  %v1443_v21 = vshll.u32 %v13949_v10, 16  ;;  %v874_v14 = vrot.slane %v872_v55, 7 }
  0x97   : > { %12199 = vmatprep.mubr.msk.bf16.mxu0 %vm1545_vm9, %v11088_v9  ;;  %v1435_v17 = vrot.slane %v1433_v11, 5  ;;  %v1439_v19 = vrot.slane %v1437_v12, 4  ;;  %v1045_v28 = vld [vmem:[#allocation2 + $0xb4] sm:$0xf]  ;;  %v11118_v11 = vcombine.low %v13830_v62, %v13844_v15  ;;  %v11119_v12 = vcombine.low %v13864_v52, %v13874_v63 }
  0x98   : > { %v13955_v23 = vld [vmem:[#allocation2 + $0xa8] sm:$0xf]  ;;  %v869_v24 = vor.u32 %v867_v40, %v866_v47  ;;  %v870_v1 = vrot.slane %v866_v47, 4  ;;  %v1431_v25 = vrot.slane %v1430_v13, 4  ;;  %v1445_v27 = vrot.slane %v1443_v21, 5 }
  0x99   : > { %v1448_v2 = vshrl.u32 %v13955_v23, 16  ;;  %v1451_v29 = vshll.u32 %v13955_v23, 16  ;;  %v1440_v30 = vor.u32 %v1439_v19, %v1435_v17  ;;  %v877_v33 = vor.u32 %v875_v18, %v874_v14  ;;  %v1049_v35 = vld [vmem:[#allocation2 + $0xbc] sm:$0x1] }
  0x9a   : > { %v879_v26 = vrot.slane %v874_v14, 4  ;;  %v1046_v38 = vsel %vm13583_vm13, %v869_v24, %v1045_v28  ;;  %v1436_v39 = vsel %vm13571_vm11, %v1431_v25, %v1435_v17  ;;  %v13963_v6 = vld [vmem:[#allocation2 + $0xb0] sm:$0x1]  ;;  %v11120_v13 = vcombine.low %v13894_v32, %v13911_v7 }
  0x9b   : > { %v1450_v41 = vrot.slane %v1448_v2, 4  ;;  %v1453_v4 = vrot.slane %v1451_v29, 5  ;;  %1047 = vst [vmem:[#allocation2 + $0xb4] sm:$0xf] %v1046_v38  ;;  %v1441_v43 = vrot.slane %v1440_v30, 4  ;;  %v1467_v50 = vshll.u32 %v13963_v6, 16 }
  0x9c   : > { %v13965_v46 = vld [vmem:[#allocation2 + $0xac] sm:$0xf]  ;;  %v878_v20 = vsel %vm13577_vm12, %v870_v1, %v877_v33  ;;  %v1050_v51 = vsel %vm13519_vm5, %v879_v26, %v1049_v35  ;;  %v11121_v21 = vcombine.low %v13936_v42, %v13946_v59  ;;  %vm2099_vm14 = vcmask 1042432   ;;  %v13414_v42 = vld [vmem:[#allocation2 + $0x14] sm:$0x1] }
  0x9d   : > { %v1454_v45 = vor.u32 %v1453_v4, %v1450_v41  ;;  %v1457_v53 = vshll.u32 %v13965_v46, 16  ;;  %v1461_v54 = vshrl.u32 %v13965_v46, 16  ;;  %1048 = vst.msk [vmem:[#allocation2 + $0xb8] sm:$0xf] %vm280_vm1, %v878_v20  ;;  %1051 = vst [vmem:[#allocation2 + $0xbc] sm:$0x1] %v1050_v51  ;;  %v1446_v40 = vsel %vm13571_vm11, %v1441_v43, %v1445_v27 }
  0x9e   : > { %v11089_v55 = vcombine.low %v1436_v39, %v1446_v40  ;;  %v1469_v9 = vrot.slane %v1467_v50, 5  ;;  %v11122_v14 = vcombine.low %v13955_v23, %v13965_v46  ;;  %v14010_v40 = vld [vmem:[#allocation2 + $0x4] sm:$0xf]  ;;  %vm2100_vm15 = vcmask 1046532   ;;  %v13415_v23 = vld [vmem:[#allocation2 + $0x20] sm:$0x1] }
  0x9f   : > { %v1455_v58 = vrot.slane %v1454_v45, 4  ;;  %v1459_v60 = vrot.slane %v1457_v53, 5  ;;  %v1463_v34 = vrot.slane %v1461_v54, 4  ;;  %v13398_v54 = vld [vmem:[#allocation2] sm:$0xf]  ;;  %vm14037_vm2 = vmor %vm2099_vm14, %vm2100_vm15  ;;  %v2104_v62 = vrot.slane %v14010_v40, 5 }
  0xa0   : > { %12200 = vmatmul.mubr.msk.bf16.gmra.mrb[24].mxu0 %vm1545_vm9, %v11089_v55  ;;  %v11108_v55 = vcombine.low %v13398_v54, %v14010_v40  ;;  %v13338_v5 = vld [vmem:[#allocation2 + $0xa8] sm:$0xff]  }
  0xa1   : > { %v1464_v18 = vor.u32 %v1463_v34, %v1459_v60  ;;  %v1460_v17 = vsel %vm13571_vm11, %v1455_v58, %v1459_v60  ;;  %v13400_v60 = vld [vmem:[#allocation2 + $0xc] sm:$0xf]  ;;  %v14015_v34 = vld [vmem:[#allocation2 + $0x10] sm:$0xf] }
  0xa2   : > { %v13982_v47 = vld [vmem:[#allocation2 + $0xb4] sm:$0xf] }
  0xa3   : > { %v1465_v19 = vrot.slane %v1464_v18, 4  ;;  %v1472_v24 = vshrl.u32 %v13982_v47, 16  ;;  %v1475_v1 = vshll.u32 %v13982_v47, 16  ;;  %v11109_v18 = vcombine.low %v13400_v60, %v14015_v34 }
  0xa4   : > { %v13994_v25 = vld [vmem:[#allocation2 + $0xb8] sm:$0xf]  ;;  %v13996_v27 = vld [vmem:[#allocation2 + $0xbc] sm:$0x1] }
  0xa5   : > { %v1470_v2 = vsel %vm13571_vm11, %v1465_v19, %v1469_v9  ;;  %v1474_v29 = vrot.slane %v1472_v24, 4  ;;  %v1477_v28 = vrot.slane %v1475_v1, 5  ;;  %v1481_v30 = vshll.u32 %v13994_v25, 16  ;;  %v13402_v9 = vld [vmem:[#allocation2 + $0x18] sm:$0xf] }
  0xa6   : > { %v11090_v33 = vcombine.low %v1460_v17, %v1470_v2  ;;  %v1485_v26 = vshrl.u32 %v13994_v25, 16  ;;  %v1491_v38 = vshll.u32 %v13996_v27, 16  ;;  %v11123_v35 = vcombine.low %v13982_v47, %v13994_v25  ;;  %v14018_v17 = vld [vmem:[#allocation2 + $0x1c] sm:$0xf]  ;;  %v2061_v24 = vld [vmem:[#allocation2 + $0x78] sm:$0xe] }
  0xa7   : > { %v1478_v39 = vor.u32 %v1477_v28, %v1474_v29  ;;  %v1483_v41 = vrot.slane %v1481_v30, 5  ;;  %v11110_v19 = vcombine.low %v13402_v9, %v14018_v17  ;;  %v13404_v1 = vld [vmem:[%s17339_s1 + $0x4] sm:$0x3]  ;;  %v14028_v28 = vld [vmem:[%s17339_s1 + $0x6] sm:$0x3]  ;;  %v11150_v30 = vrot.slane %v2061_v24, 9 }
  0xa8   : > { %12203 = vmatprep.mubr.msk.bf16.mxu0 %vm1545_vm9, %v11090_v33  ;;  %v1487_v4 = vrot.slane %v1485_v26, 4  ;;  %v1493_v20 = vrot.slane %v1491_v38, 5  ;;  %v2313_v2 = vsel %vm1594_vm0, %v13404_v1, 0  ;;  %v2062_v29 = vld [vmem:[#allocation2 + $0x84] sm:$0xe]  ;;  %v2174_v33 = vrot.slane %v13844_v15, 5 }
  0xa9   : > { %v1479_v43 = vrot.slane %v1478_v39, 4  ;;  %v2177_v26 = vrot.slane %v13846_v16, 5  ;;  %v2063_v38 = vld [vmem:[#allocation2 + $0x90] sm:$0xe]  ;;  %v13405_v39 = vld [vmem:[#allocation2 + $0x24] sm:$0xf] }
  0xaa   : > { %v1488_v50 = vor.u32 %v1487_v4, %v1483_v41  ;;  %v14049_v54 = vsel %vm14037_vm2, %v11150_v30, %v2174_v33  ;;  %v11152_v9 = vrot.slane %v2063_v38, 9  ;;  %v2191_v1 = vrot.slane %v13913_v8, 5  ;;  %v2065_v30 = vld [vmem:[#allocation2 + $0xa8] sm:$0xe] }
  0xab   : > { %v1484_v51 = vsel %vm13571_vm11, %v1479_v43, %v1483_v41  ;;  %v14034_v41 = vld [vmem:[#allocation2 + $0x28] sm:$0xf] }
  0xac   : > { %v1489_v45 = vrot.slane %v1488_v50, 4  ;;  %v11111_v4 = vcombine.low %v13405_v39, %v14034_v41  ;;  %v11151_v50 = vrot.slane %v2062_v29, 9  ;;  %v2195_v29 = vrot.slane %v13946_v59, 5 }
  0xad   : > { %v2114_v59 = vrot.slane %v13414_v42, 5 }
  0xae   : > { %v1494_v53 = vsel %vm13571_vm11, %v1489_v45, %v1493_v20  ;;  %v2181_v20 = vrot.slane %v13874_v63, 5  ;;  %v13407_v45 = vld [vmem:[#allocation2 + $0x30] sm:$0xf]  ;;  %v13413_v63 = vld [vmem:[#allocation2 + $0x8] sm:$0x1] }
  0xaf   : > { %v11091_v58 = vcombine.low %v1484_v51, %v1494_v53  ;;  %v2064_v51 = vld [vmem:[#allocation2 + $0x9c] sm:$0xe]  ;;  %v14042_v53 = vld [vmem:[#allocation2 + $0x34] sm:$0xf] }
  0xb0   : > { %v11112_v16 = vcombine.low %v13407_v45, %v14042_v53  ;;  %v14054_v60 = vsel %vm14037_vm2, %v11151_v50, %v2181_v20  ;;  %v2132_v47 = vrot.slane %v14042_v53, 5 }
  0xb1   : > { %12204 = vmatmul.mubr.msk.bf16.gmra.mrb[28].mxu0 %vm1545_vm9, %v11091_v58  ;;  %v2184_v58 = vrot.slane %v13876_v0, 5 }
  0xb2   : > { %12209 = vmatprep.mubr.msk.bf16.mxu0 %vm1545_vm9, %v11108_v55  ;;  %v2176_v55 = vrot.slane %v2174_v33, 4 }
  0xb4   : > { %v14059_v24 = vsel %vm14037_vm2, %v2176_v55, %v2177_v26  ;;  %v2066_v26 = vld [vmem:[#allocation2 + $0xb4] sm:$0xe]  ;;  %v11154_v55 = vrot.slane %v2065_v30, 9 }
  0xb5   : > { %v11167_v0 = vcombine.low %v14049_v54, %v14059_v24 }
  0xb9   : > { %12210 = vmatmul.mubr.msk.bf16.vlgmr.msra.gmra.mrb[0].mxu0 %vm1545_vm9, %v11109_v18  ;;  %v2183_v18 = vrot.slane %v2181_v20, 4  ;;  %v2197_v20 = vrot.slane %v2195_v29, 4 }
  0xba   : > { %12242 = vmatpush3.bf16.msra.mxu0 %v2313_v2  ;;  %12213 = vmatprep.mubr.msk.bf16.mxu0 %vm1545_vm9, %v11110_v19  ;;  %v2188_v19 = vrot.slane %v13911_v7, 5  ;;  %v11153_v2 = vrot.slane %v2064_v51, 9  ;;  %v2198_v51 = vrot.slane %v13949_v10, 5  ;;  %v2209_v10 = vrot.slane %v13994_v25, 5  ;;  %v2055_v25 = vld [vmem:[#allocation2 + $0x30] sm:$0xe] }
  0xbb   : > { %13300 = vmatprep.subr.msk.bf16.mxu0 %vm1594_vm0, %v14028_v28  ;;  %v14067_v33 = vsel %vm14037_vm2, %v2183_v18, %v2184_v58  ;;  %v2202_v58 = vrot.slane %v13965_v46, 5  ;;  %v2205_v18 = vrot.slane %v13963_v6, 5  ;;  %v2121_v46 = vrot.slane %v13415_v23, 5 }
  0xbc   : > { %v14071_v38 = vsel %vm14037_vm2, %v11152_v9, %v2188_v19  ;;  %v2190_v39 = vrot.slane %v2188_v19, 4  ;;  %v11168_v8 = vcombine.low %v14054_v60, %v14067_v33  ;;  %v14077_v50 = vsel %vm14037_vm2, %v11153_v2, %v2195_v29  ;;  %v13325_v60 = vld [vmem:[#allocation2 + $0xc] sm:$0xff]   ;;  %v13326_v33 = vld [vmem:[#allocation2 + $0x18] sm:$0xff]  }
  0xbd   : > { %v14091_v19 = vsel %vm14037_vm2, %v2197_v20, %v2198_v51  ;;  %v11155_v2 = vrot.slane %v2066_v26, 9  ;;  %v14099_v6 = vsel %vm14037_vm2, %v11154_v55, %v2202_v58  ;;  %v2212_v29 = vrot.slane %v13996_v27, 5  ;;  %v14110_v20 = vld [vmem:[#allocation2 + $0x40] sm:$0xf] }
  0xbe   : > { %v14082_v45 = vsel %vm14037_vm2, %v2190_v39, %v2191_v1  ;;  %v11170_v1 = vcombine.low %v14077_v50, %v14091_v19  ;;  %v2211_v39 = vrot.slane %v2209_v10, 4  ;;  %v14280_v19 = vld [vmem:[#allocation2 + $0x38] sm:$0x1] }
  0xbf   : > { %v11169_v9 = vcombine.low %v14071_v38, %v14082_v45  ;;  %v14104_v30 = vsel %vm14037_vm2, %v11155_v2, %v2209_v10  ;;  %v14119_v2 = vld [vmem:[#allocation2 + $0x4c] sm:$0xf]  ;;  %v14274_v45 = vld [vmem:[%s17339_s1 + $0xa] sm:$0x3] }
  0xc0   : > { %v14117_v27 = vsel %vm14037_vm2, %v2211_v39, %v2212_v29  ;;  %v11116_v29 = vcombine.low %v13761_v22, %v13772_v31  ;;  %v11117_v39 = vcombine.low %v13787_v61, %v13814_v36  ;;  %v526_v22 = vld [vmem:[%s13562_s10 + $0xf8] sm:$0xff]  ;;  %v2146_v42 = vrot.slane %v14119_v2, 5 }
  0xc1   : > { %12214 = vmatmul.mubr.msk.bf16.gmra.mrb[4].mxu0 %vm1545_vm9, %v11111_v4  ;;  %v2204_v4 = vrot.slane %v2202_v58, 4  ;;  %v13411_v58 = vld [vmem:[#allocation2 + $0x48] sm:$0xf]  ;;  %v11172_v10 = vcombine.low %v14104_v30, %v14117_v27  ;;  %v13328_v27 = vld [vmem:[#allocation2 + $0x30] sm:$0xff]  }
  0xc2   : > { %12217 = vmatprep.mubr.msk.bf16.mxu0 %vm1545_vm9, %v11112_v16  ;;  %v13409_v16 = vld [vmem:[#allocation2 + $0x3c] sm:$0xf] }
  0xc3   : > { %v14108_v26 = vsel %vm14037_vm2, %v2204_v4, %v2205_v18  ;;  %v11113_v51 = vcombine.low %v13409_v16, %v14110_v20  ;;  %v11114_v18 = vcombine.low %v13411_v58, %v14119_v2  ;;  %v11115_v4 = vcombine.low %v13736_v48, %v13744_v56  ;;  %v338_v16 = vld [vmem:[#allocation2 + $0xc0] sm:$0x1]  ;;  %v525_v56 = vld [vmem:[%s13562_s10 + $0xf0] sm:$0xff] }
  0xc4   : > { %v11171_v55 = vcombine.low %v14099_v6, %v14108_v26  ;;  %v339_v48 = vsel %vm13519_vm5, 0, %v338_v16  ;;  %v11833_v31 = vpack.c.bf16 %v525_v56, %v525_v56  ;;  %v3682_v26 = vrot.slane %v14280_v19, 5 }
  0xc5   : > { %340 = vst [vmem:[#allocation2 + $0xc0] sm:$0x1] %v339_v48 }
  0xc6   : > { %v881_v61 = vshrl.u32 %v11833_v31, 16 }
  0xc8   : > { %v883_v15 = vrot.slane %v881_v61, 7  ;;  %v2053_v61 = vld [vmem:[#allocation2 + $0x18] sm:$0xe] }
  0xc9   : > { %12218 = vmatmul.mubr.msk.bf16.gmra.mrb[8].mxu0 %vm1545_vm9, %v11113_v51  ;;  %v11834_v51 = vpack.c.bf16 %v526_v22, %v526_v22  ;;  %v2106_v22 = vrot.slane %v2104_v62, 4 }
  0xca   : > { %12221 = vmatprep.mubr.msk.bf16.mxu0 %vm1545_vm9, %v11114_v18  ;;  %v887_v16 = vrot.slane %v883_v15, 4 }
  0xcb   : > { %v889_v58 = vshrl.u32 %v11834_v51, 16 }
  0xcc   : > { %v1052_v48 = vld [vmem:[#allocation2 + $0xc0] sm:$0xf] }
  0xcd   : > { %v14152_v18 = vrot.slane %v889_v58, 7  ;;  %v2118_v58 = vrot.slane %v14018_v17, 5 }
  0xcf   : > { %v896_v24 = vrot.slane %v14152_v18, 4 }
  0xd1   : > { %12222 = vmatmul.mubr.msk.bf16.gmra.mrb[12].mxu0 %vm1545_vm9, %v11115_v4  ;;  %v892_v4 = vshll.u32 %v11834_v51, 16  ;;  %v2052_v51 = vld [vmem:[#allocation2 + $0xc] sm:$0xe] }
  0xd2   : > { %12225 = vmatprep.mubr.msk.bf16.mxu0 %vm1545_vm9, %v11116_v29  ;;  %v2051_v29 = vld [vmem:[#allocation2] sm:$0xe] }
  0xd3   : > { %v894_v52 = vor.u32 %v892_v4, %v14152_v18  ;;  %v11140_v56 = vrot.slane %v2051_v29, 9  ;;  %v2120_v4 = vrot.slane %v2118_v58, 4  ;;  %v13329_v18 = vld [vmem:[#allocation2 + $0x3c] sm:$0xff]  }
  0xd5   : > { %v895_v32 = vsel %vm13577_vm12, %v887_v16, %v894_v52  ;;  %v2105_v40 = vsel %vm14037_vm2, %v11140_v56, %v2104_v62  ;;  %v2125_v62 = vrot.slane %v14034_v41, 5  ;;  %v2054_v16 = vld [vmem:[#allocation2 + $0x24] sm:$0xe]  ;;  %v11144_v41 = vrot.slane %v2055_v25, 9  ;;  %v2058_v25 = vld [vmem:[#allocation2 + $0x54] sm:$0xe] }
  0xd6   : > { %1055 = vst.msk [vmem:[#allocation2 + $0xc4] sm:$0xf] %vm280_vm1, %v895_v32  ;;  %v2134_v32 = vrot.slane %v2132_v47, 4 }
  0xd9   : > { %12226 = vmatmul.mubr.msk.bf16.gmra.mrb[16].mxu0 %vm1545_vm9, %v11117_v39 }
  0xda   : > { %12229 = vmatprep.mubr.msk.bf16.mxu0 %vm1545_vm9, %v11118_v11  ;;  %v884_v11 = vshll.u32 %v11833_v31, 16 }
  0xdc   : > { %v886_v39 = vor.u32 %v884_v11, %v883_v15  ;;  %v11141_v15 = vrot.slane %v2052_v51, 9  ;;  %v11142_v11 = vrot.slane %v2053_v61, 9  ;;  %v2133_v51 = vsel %vm14037_vm2, %v11144_v41, %v2132_v47  ;;  %v13422_v41 = vld [vmem:[#allocation2 + $0x5c] sm:$0x1] }
  0xde   : > { %v1053_v7 = vsel %vm13583_vm13, %v886_v39, %v1052_v48  ;;  %v2119_v29 = vsel %vm14037_vm2, %v11142_v11, %v2118_v58  ;;  %v2122_v39 = vsel %vm14037_vm2, %v2120_v4, %v2121_v46  ;;  %v13416_v48 = vld [vmem:[#allocation2 + $0x2c] sm:$0x1]  ;;  %v2056_v58 = vld [vmem:[#allocation2 + $0x3c] sm:$0xe]  ;;  %v13418_v4 = vld [vmem:[#allocation2 + $0x44] sm:$0x1] }
  0xdf   : > { %1054 = vst [vmem:[#allocation2 + $0xc0] sm:$0xf] %v1053_v7  ;;  %v11159_v52 = vcombine.low %v2119_v29, %v2122_v39  ;;  %v2128_v56 = vrot.slane %v13416_v48, 5  ;;  %v13417_v7 = vld [vmem:[#allocation2 + $0x38] sm:$0x1]  ;;  %v2142_v23 = vrot.slane %v13418_v4, 5 }
  0xe0   : > { %v2148_v46 = vrot.slane %v2146_v42, 4  ;;  %v13420_v29 = vld [vmem:[#allocation2 + $0x58] sm:$0xf]  ;;  %v2170_v4 = vrot.slane %v13816_v37, 5  ;;  %v388_v37 = vld [vmem:[#allocation2 + $0xc8] sm:$0x1] }
  0xe1   : > { %12230 = vmatmul.mubr.msk.bf16.gmra.mrb[20].mxu0 %vm1545_vm9, %v11119_v12  ;;  %v2107_v12 = vrot.slane %v13413_v63, 5  ;;  %v11143_v63 = vrot.slane %v2054_v16, 9  ;;  %v2153_v39 = vrot.slane %v13420_v29, 5  ;;  %v389_v54 = vsel %vm13528_vm6, 0, %v388_v37 }
  0xe2   : > { %12233 = vmatprep.mubr.msk.bf16.mxu0 %vm1545_vm9, %v11120_v13  ;;  %v2111_v13 = vrot.slane %v14015_v34, 5  ;;  %390 = vst [vmem:[#allocation2 + $0xc8] sm:$0x1] %v389_v54 }
  0xe3   : > { %v2108_v31 = vsel %vm14037_vm2, %v2106_v22, %v2107_v12  ;;  %v2127_v12 = vrot.slane %v2125_v62, 4  ;;  %v2671_v22 = vsel %vm1594_vm0, %v14028_v28, 0  ;;  %v2126_v53 = vsel %vm14037_vm2, %v11143_v63, %v2125_v62  ;;  %v2059_v63 = vld [vmem:[#allocation2 + $0x60] sm:$0xe] }
  0xe4   : > { %v2113_v34 = vrot.slane %v2111_v13, 4 }
  0xe5   : > { %v2129_v28 = vsel %vm14037_vm2, %v2127_v12, %v2128_v56  ;;  %v11147_v56 = vrot.slane %v2058_v25, 9  ;;  %v2866_v25 = vld [vmem:[#allocation2 + $0xc] sm:$0xf] }
  0xe6   : > { %v2115_v17 = vsel %vm14037_vm2, %v2113_v34, %v2114_v59  ;;  %v2057_v59 = vld [vmem:[#allocation2 + $0x48] sm:$0xe]  ;;  %v11145_v34 = vrot.slane %v2056_v58, 9 }
  0xe9   : > { %12234 = vmatmul.mubr.msk.bf16.gmra.mrb[24].mxu0 %vm1545_vm9, %v11121_v21  ;;  %v11157_v21 = vcombine.low %v2105_v40, %v2108_v31  ;;  %v14194_v40 = vld [vmem:[%s17339_s1 + $0x8] sm:$0x3]  ;;  %v2139_v31 = vrot.slane %v14110_v20, 5  ;;  %v11146_v20 = vrot.slane %v2057_v59, 9  ;;  %v2060_v59 = vld [vmem:[#allocation2 + $0x6c] sm:$0xe] }
  0xea   : > { %12237 = vmatprep.mubr.msk.bf16.mxu0 %vm1545_vm9, %v11122_v14  ;;  %v2112_v14 = vsel %vm14037_vm2, %v11141_v15, %v2111_v13  ;;  %v2135_v13 = vrot.slane %v13417_v7, 5  ;;  %v11148_v7 = vrot.slane %v2059_v63, 9  ;;  %v3397_v50 = vsel %vm1594_vm0, %v14194_v40, 0  ;;  %v14308_v63 = vld [vmem:[#allocation2 + $0x10] sm:$0xf] }
  0xeb   : > { %v2141_v11 = vrot.slane %v2139_v31, 4  ;;  %v2140_v2 = vsel %vm14037_vm2, %v11145_v34, %v2139_v31  ;;  %v2147_v16 = vsel %vm14037_vm2, %v11146_v20, %v2146_v42  ;;  %v2154_v31 = vsel %vm14037_vm2, %v11147_v56, %v2153_v39 }
  0xec   : > { %v2136_v61 = vsel %vm14037_vm2, %v2134_v32, %v2135_v13  ;;  %v2156_v32 = vrot.slane %v13422_v41, 5  ;;  %v11149_v34 = vrot.slane %v2060_v59, 9  ;;  %v2915_v56 = vshrl.u32 %v2866_v25, 16 }
  0xed   : > { %v11161_v15 = vcombine.low %v2133_v51, %v2136_v61  ;;  %v2143_v62 = vsel %vm14037_vm2, %v2141_v11, %v2142_v23  ;;  %v2167_v61 = vrot.slane %v13814_v36, 5  ;;  %v2924_v41 = vshll.u32 %v14308_v63, 16 }
  0xee   : > { %v11162_v12 = vcombine.low %v2140_v2, %v2143_v62  ;;  %v3597_v2 = vld [vmem:[#allocation2 + $0x48] sm:$0xe] }
  0xef   : > { %v2169_v11 = vrot.slane %v2167_v61, 4  ;;  %v2168_v36 = vsel %vm14037_vm2, %v11149_v34, %v2167_v61  ;;  %v2917_v61 = vrot.slane %v2915_v56, 4 }
  0xf1   : > { %12238 = vmatmul.mubr.msk.bf16.gmra.mrb[28].mxu0 %vm1545_vm9, %v11123_v35  ;;  %v11158_v35 = vcombine.low %v2112_v14, %v2115_v17  ;;  %v13419_v14 = vld [vmem:[#allocation2 + $0x50] sm:$0x1]  ;;  %v2171_v23 = vsel %vm14037_vm2, %v2169_v11, %v2170_v4  ;;  %v14330_v11 = vrot.slane %v2924_v41, 5 }
  0xf2   : > { %12243 = vmatprep.mubr.msk.bf16.mxu0 %vm1545_vm9, %v11157_v21  ;;  %v11160_v21 = vcombine.low %v2126_v53, %v2129_v28  ;;  %v2149_v17 = vrot.slane %v13419_v14, 5  ;;  %v13423_v53 = vld [vmem:[#allocation2 + $0x68] sm:$0x1]  ;;  %v11166_v20 = vcombine.low %v2168_v36, %v2171_v23  ;;  %v14297_v14 = vld [vmem:[#allocation2 + $0x4c] sm:$0xf] }
  0xf3   : > { %v2163_v28 = vrot.slane %v13423_v53, 5  ;;  %v3693_v62 = vrot.slane %v14297_v14, 5  ;;  %v3599_v53 = vld [vmem:[#allocation2 + $0x60] sm:$0xe]  ;;  %v13333_v23 = vld [vmem:[#allocation2 + $0x6c] sm:$0xff]  }
  0xf4   : > { %v2150_v47 = vsel %vm14037_vm2, %v2148_v46, %v2149_v17  ;;  %v14299_v17 = vld [vmem:[#allocation2 + $0x50] sm:$0x1] }
  0xf5   : > { %v11163_v48 = vcombine.low %v2147_v16, %v2150_v47  ;;  %v3696_v29 = vrot.slane %v14299_v17, 5  ;;  %v3695_v16 = vrot.slane %v3693_v62, 4  ;;  %v13330_v47 = vld [vmem:[#allocation2 + $0x48] sm:$0xff]  }
  0xf9   : > { %12244 = vmatmul.mubr.msk.bf16.vlgmr.msra.gmra.mrb[0].mxu0 %vm1545_vm9, %v11158_v35  ;;  %v13421_v35 = vld [vmem:[#allocation2 + $0x64] sm:$0xf] }
  0xfa   : > { %12276 = vmatpush3.bf16.msra.mxu0 %v2671_v22  ;;  %12247 = vmatprep.mubr.msk.bf16.mxu0 %vm1545_vm9, %v11159_v52  ;;  %v2160_v52 = vrot.slane %v13421_v35, 5  ;;  %v2155_v22 = vrot.slane %v2153_v39, 4  ;;  %v11260_v39 = vrot.slane %v3597_v2, 9 }
  0xfb   : > { %13301 = vmatprep.subr.msk.bf16.mxu0 %vm1594_vm0, %v14194_v40 }
  0xfc   : > { %v2162_v13 = vrot.slane %v2160_v52, 4  ;;  %v2157_v51 = vsel %vm14037_vm2, %v2155_v22, %v2156_v32  ;;  %v2161_v58 = vsel %vm14037_vm2, %v11148_v7, %v2160_v52  ;;  %v14306_v35 = vsel %vm14037_vm2, %v11260_v39, %v3693_v62  ;;  %v13331_v52 = vld [vmem:[#allocation2 + $0x54] sm:$0xff]   ;;  %v14319_v7 = vld [vmem:[#allocation2 + $0x64] sm:$0xf]  ;;  %v14356_v62 = vld [vmem:[#allocation2 + $0x28] sm:$0xf] }
  0xfd   : > { %17481 = vst [vmem:[#allocation10_spill] sm:$0xff] %v14306_v35  ;;  %v2918_v22 = vshll.u32 %v2866_v25, 16  ;;  %v2928_v32 = vshrl.u32 %v14308_v63, 16  ;;  %v14501_v35 = vld [vmem:[#allocation2 + $0x58] sm:$0xf] }
  0xfe   : > { %v2164_v42 = vsel %vm14037_vm2, %v2162_v13, %v2163_v28  ;;  %v14321_v13 = vld [vmem:[#allocation2 + $0x68] sm:$0x1]  ;;  %v3707_v28 = vrot.slane %v14319_v7, 5 }
  0xff   : > { %v2920_v34 = vrot.slane %v2918_v22, 5  ;;  %v2930_v4 = vrot.slane %v2928_v32, 4  ;;  %v13334_v22 = vld [vmem:[#allocation2 + $0x78] sm:$0xff]  }
 0x100   : > { %v3709_v59 = vrot.slane %v3707_v28, 4 }
 0x101   : > { %12248 = vmatmul.mubr.msk.bf16.gmra.mrb[4].mxu0 %vm1545_vm9, %v11160_v21  ;;  %v11164_v21 = vcombine.low %v2154_v31, %v2157_v51  ;;  %v3710_v31 = vrot.slane %v14321_v13, 5  ;;  %v11262_v51 = vrot.slane %v3599_v53, 9 }
 0x102   : > { %12251 = vmatprep.mubr.msk.bf16.mxu0 %vm1545_vm9, %v11161_v15  ;;  %v11165_v15 = vcombine.low %v2161_v58, %v2164_v42  ;;  %v2869_v58 = vld [vmem:[#allocation2 + $0x18] sm:$0xf]  ;;  %v14326_v42 = vld [vmem:[#allocation2 + $0x1c] sm:$0xf] }
 0x103   : > { %v14334_v36 = vsel %vm14037_vm2, %v11262_v51, %v3707_v28  ;;  %v2939_v37 = vshrl.u32 %v2869_v58, 16  ;;  %v2942_v54 = vshll.u32 %v2869_v58, 16  ;;  %v2976_v58 = vshrl.u32 %v14356_v62, 16 }
 0x104   : > { %17483 = vst [vmem:[#allocation12_spill] sm:$0xff] %v14334_v36 }
 0x105   : > { %v2944_v2 = vrot.slane %v2942_v54, 5  ;;  %v14385_v54 = vld [vmem:[#allocation2 + $0x8c] sm:$0x1] }
 0x109   : > { %12252 = vmatmul.mubr.msk.bf16.gmra.mrb[8].mxu0 %vm1545_vm9, %v11162_v12  ;;  %v14312_v12 = vsel %vm14037_vm2, %v3695_v16, %v3696_v29 }
 0x10a   : > { %12255 = vmatprep.mubr.msk.bf16.mxu0 %vm1545_vm9, %v11163_v48  ;;  %17482 = vst [vmem:[#allocation11_spill] sm:$0xff] %v14312_v12 }
 0x111   : > { %12256 = vmatmul.mubr.msk.bf16.gmra.mrb[12].mxu0 %vm1545_vm9, %v11164_v21  ;;  %v13332_v21 = vld [vmem:[#allocation2 + $0x60] sm:$0xff]  }
 0x112   : > { %12259 = vmatprep.mubr.msk.bf16.mxu0 %vm1545_vm9, %v11165_v15  ;;  %v14328_v15 = vld [vmem:[#allocation2 + $0x14] sm:$0x1] }
 0x119   : > { %12260 = vmatmul.mubr.msk.bf16.gmra.mrb[16].mxu0 %vm1545_vm9, %v11166_v20  ;;  %v14338_v20 = vsel %vm14037_vm2, %v3709_v59, %v3710_v31  ;;  %v13335_v31 = vld [vmem:[#allocation2 + $0x84] sm:$0xff]  }
 0x11a   : > { %12263 = vmatprep.mubr.msk.bf16.mxu0 %vm1545_vm9, %v11167_v0  ;;  %v1056_v0 = vld [vmem:[#allocation2 + $0xc8] sm:$0x1]  ;;  %17484 = vst [vmem:[#allocation13_spill] sm:$0xff] %v14338_v20 }
 0x11b   : > { %v1057_v38 = vsel %vm13519_vm5, %v896_v24, %v1056_v0  ;;  %v2934_v24 = vshll.u32 %v14328_v15, 16  ;;  %v14343_v0 = vld [vmem:[#allocation2 + $0x20] sm:$0x1] }
 0x11c   : > { %1058 = vst [vmem:[#allocation2 + $0xc8] sm:$0x1] %v1057_v38  ;;  %v2872_v38 = vld [vmem:[#allocation2 + $0x24] sm:$0xf]  ;;  %v2958_v25 = vshll.u32 %v14343_v0, 16 }
 0x11d   : > { %v2963_v29 = vshrl.u32 %v2872_v38, 16  ;;  %v14358_v16 = vrot.slane %v2934_v24, 5  ;;  %v2966_v51 = vshll.u32 %v2872_v38, 16  ;;  %v14387_v24 = vld [vmem:[#allocation2 + $0x94] sm:$0xf] }
 0x11e   : > { %v14390_v38 = vld [vmem:[#allocation2 + $0x98] sm:$0x1] }
 0x121   : > { %12264 = vmatmul.mubr.msk.bf16.gmra.mrb[20].mxu0 %vm1545_vm9, %v11168_v8  ;;  %v13327_v8 = vld [vmem:[#allocation2 + $0x24] sm:$0xff]  }
 0x122   : > { %12267 = vmatprep.mubr.msk.bf16.mxu0 %vm1545_vm9, %v11169_v9  ;;  %v14277_v9 = vld [vmem:[#allocation2 + $0x34] sm:$0xf] }
 0x123   : > { %v3679_v6 = vrot.slane %v14277_v9, 5  ;;  %v3000_v46 = vshrl.u32 %v14277_v9, 16 }
 0x129   : > { %12268 = vmatmul.mubr.msk.bf16.gmra.mrb[24].mxu0 %vm1545_vm9, %v11170_v1  ;;  %v3595_v1 = vld [vmem:[#allocation2 + $0x30] sm:$0xe] }
 0x12a   : > { %12271 = vmatprep.mubr.msk.bf16.mxu0 %vm1545_vm9, %v11171_v55  ;;  %v11258_v30 = vrot.slane %v3595_v1, 9  ;;  %v3681_v55 = vrot.slane %v3679_v6, 4  ;;  %v2952_v1 = vshrl.u32 %v14326_v42, 16 }
 0x12c   : > { %v14292_v40 = vsel %vm14037_vm2, %v3681_v55, %v3682_v26  ;;  %v3601_v26 = vld [vmem:[#allocation2 + $0x78] sm:$0xe]  ;;  %v14367_v53 = vrot.slane %v2952_v1, 4  ;;  %v3731_v1 = vrot.slane %v14385_v54, 5 }
 0x12d   : > { %17480 = vst [vmem:[#allocation9_spill] sm:$0xff] %v14292_v40  ;;  %v11264_v39 = vrot.slane %v3601_v26, 9  ;;  %v2968_v26 = vrot.slane %v2966_v51, 5  ;;  %v14403_v51 = vld [vmem:[#allocation2 + $0x2c] sm:$0x1] }
 0x131   : > { %12272 = vmatmul.mubr.msk.bf16.gmra.mrb[28].mxu0 %vm1545_vm9, %v11172_v10  ;;  %v14288_v10 = vsel %vm14037_vm2, %v11258_v30, %v3679_v6  ;;  %v14349_v6 = vld [vmem:[#allocation2 + $0x7c] sm:$0xf]  ;;  %v14351_v30 = vld [vmem:[#allocation2 + $0x80] sm:$0x1] }
 0x132   : > { %12277 = vmatprep.mubr.msk.bf16.mxu0 %vm1545_vm9, %v13325_v60  ;;  %17479 = vst [vmem:[#allocation8_spill] sm:$0xff] %v14288_v10  ;;  %v3721_v55 = vrot.slane %v14349_v6, 5  ;;  %v3044_v10 = vshll.u32 %v14297_v14, 16 }
 0x134   : > { %v3723_v56 = vrot.slane %v3721_v55, 4  ;;  %v14371_v28 = vsel %vm14037_vm2, %v11264_v39, %v3721_v55  ;;  %v3738_v39 = vrot.slane %v14390_v38, 5 }
 0x135   : > { %17485 = vst [vmem:[#allocation14_spill] sm:$0xff] %v14371_v28  ;;  %v14482_v28 = vld [vmem:[#allocation2 + $0xb8] sm:$0xf] }
 0x139   : > { %12278 = vmatmul.mubr.msk.bf16.vlgmr.msra.gmra.mrb[0].mxu0 %vm1545_vm9, %v13326_v33  ;;  %v2948_v33 = vshll.u32 %v14326_v42, 16 }
 0x13a   : > { %12310 = vmatpush3.bf16.msra.mxu0 %v3397_v50  ;;  %12281 = vmatprep.mubr.msk.bf16.mxu0 %vm1545_vm9, %v13327_v8  ;;  %v2921_v8 = vor.u32 %v2920_v34, %v2917_v61  ;;  %v2931_v50 = vor.u32 %v2930_v4, %v14330_v11  ;;  %v2972_v61 = vshll.u32 %v14356_v62, 16 }
 0x13b   : > { %13302 = vmatprep.subr.msk.bf16.mxu0 %vm1594_vm0, %v14274_v45 }
 0x13c   : > { %v14363_v41 = vrot.slane %v2921_v8, 4  ;;  %v14365_v32 = vrot.slane %v2931_v50, 4  ;;  %v3602_v8 = vld [vmem:[#allocation2 + $0x84] sm:$0xe] }
 0x13d   : > { %v11265_v55 = vrot.slane %v3602_v8, 9  ;;  %v2996_v8 = vshll.u32 %v14277_v9, 16 }
 0x13e   : > { %v2927_v9 = vsel %vm13571_vm11, %v14363_v41, %v14330_v11  ;;  %v2937_v11 = vsel %vm13571_vm11, %v14365_v32, %v14358_v16 }
 0x141   : > { %12282 = vmatmul.mubr.msk.bf16.gmra.mrb[4].mxu0 %vm1545_vm9, %v13328_v27  ;;  %v3724_v27 = vrot.slane %v14351_v30, 5 }
 0x142   : > { %12285 = vmatprep.mubr.msk.bf16.mxu0 %vm1545_vm9, %v13329_v18  ;;  %v2941_v18 = vrot.slane %v2939_v37, 4  ;;  %v14383_v37 = vld [vmem:[#allocation2 + $0x88] sm:$0xf] }
 0x143   : > { %v14377_v59 = vsel %vm14037_vm2, %v3723_v56, %v3724_v27  ;;  %v3728_v50 = vrot.slane %v14383_v37, 5  ;;  %v3603_v27 = vld [vmem:[#allocation2 + $0x90] sm:$0xe]  ;;  %v2978_v56 = vrot.slane %v2976_v58, 4 }
 0x144   : > { %17486 = vst [vmem:[#allocation15_spill] sm:$0xff] %v14377_v59 }
 0x145   : > { %v14401_v60 = vsel %vm14037_vm2, %v11265_v55, %v3728_v50 }
 0x146   : > { %17487 = vst [vmem:[#allocation16_spill] sm:$0xff] %v14401_v60 }
 0x149   : > { %12286 = vmatmul.mubr.msk.bf16.gmra.mrb[8].mxu0 %vm1545_vm9, %v13330_v47  ;;  %v14360_v47 = vrot.slane %v2948_v33, 5  ;;  %v2945_v33 = vor.u32 %v2944_v2, %v2941_v18  ;;  %v3730_v18 = vrot.slane %v3728_v50, 4  ;;  %v11266_v2 = vrot.slane %v3603_v27, 9  ;;  %v14437_v50 = vld [vmem:[#allocation2 + $0x40] sm:$0xf] }
 0x14a   : > { %12289 = vmatprep.mubr.msk.bf16.mxu0 %vm1545_vm9, %v13331_v52  ;;  %v2875_v52 = vld [vmem:[#allocation2 + $0x30] sm:$0xf]  ;;  %v3020_v16 = vshll.u32 %v14437_v50, 16  ;;  %v3024_v32 = vshrl.u32 %v14437_v50, 16 }
 0x14b   : > { %v2987_v34 = vshrl.u32 %v2875_v52, 16  ;;  %v2990_v4 = vshll.u32 %v2875_v52, 16  ;;  %v14397_v52 = vrot.slane %v2972_v61, 5  ;;  %v14409_v61 = vsel %vm14037_vm2, %v3730_v18, %v3731_v1 }
 0x14c   : > { %17488 = vst [vmem:[#allocation17_spill] sm:$0xff] %v14409_v61  ;;  %v14427_v1 = vrot.slane %v2945_v33, 4  ;;  %v2955_v27 = vor.u32 %v14367_v53, %v14360_v47  ;;  %v14444_v53 = vrot.slane %v2996_v8, 5  ;;  %v3002_v33 = vrot.slane %v3000_v46, 4  ;;  %v2881_v46 = vld [vmem:[#allocation2 + $0x48] sm:$0xf] }
 0x14d   : > { %v13339_v61 = vld [vmem:[#allocation2 + $0xb4] sm:$0xff]   ;;  %v3035_v60 = vshrl.u32 %v2881_v46, 16  ;;  %v3026_v59 = vrot.slane %v3024_v32, 4 }
 0x14e   : > { %v14453_v57 = vrot.slane %v2955_v27, 4  ;;  %v3606_v32 = vld [vmem:[#allocation2 + $0xb4] sm:$0xe] }
 0x14f   : > { %v3037_v36 = vrot.slane %v3035_v60, 4 }
 0x151   : > { %12290 = vmatmul.mubr.msk.bf16.gmra.mrb[12].mxu0 %vm1545_vm9, %v13332_v21  ;;  %v14379_v21 = vrot.slane %v2963_v29, 4  ;;  %v3735_v29 = vrot.slane %v14387_v24, 5 }
 0x152   : > { %12293 = vmatprep.mubr.msk.bf16.mxu0 %vm1545_vm9, %v13333_v23  ;;  %v2992_v23 = vrot.slane %v2990_v4, 5  ;;  %v14415_v4 = vrot.slane %v2958_v25, 5  ;;  %v3605_v25 = vld [vmem:[#allocation2 + $0xa8] sm:$0xe] }
 0x153   : > { %v3737_v48 = vrot.slane %v3735_v29, 4  ;;  %v14413_v58 = vsel %vm14037_vm2, %v11266_v2, %v3735_v29  ;;  %v2878_v29 = vld [vmem:[#allocation2 + $0x3c] sm:$0xf]  ;;  %v2969_v18 = vor.u32 %v2968_v26, %v14379_v21  ;;  %v2979_v2 = vor.u32 %v2978_v56, %v14397_v52  ;;  %v14446_v21 = vld [vmem:[#allocation2 + $0xac] sm:$0xf] }
 0x154   : > { %17489 = vst [vmem:[#allocation18_spill] sm:$0xff] %v14413_v58  ;;  %v14448_v26 = vld [vmem:[#allocation2 + $0xb0] sm:$0x1]  ;;  %v3014_v56 = vshll.u32 %v2878_v29, 16 }
 0x155   : > { %v14421_v55 = vsel %vm14037_vm2, %v3737_v48, %v3738_v39  ;;  %v2982_v48 = vshll.u32 %v14403_v51, 16  ;;  %v3006_v39 = vshll.u32 %v14280_v19, 16  ;;  %v3011_v19 = vshrl.u32 %v2878_v29, 16 }
 0x156   : > { %17490 = vst [vmem:[#allocation19_spill] sm:$0xff] %v14421_v55  ;;  %v3752_v49 = vrot.slane %v14448_v26, 5  ;;  %v14459_v8 = vrot.slane %v2979_v2, 4  ;;  %v3003_v55 = vor.u32 %v3002_v33, %v14444_v53  ;;  %v3038_v33 = vshll.u32 %v2881_v46, 16 }
 0x157   : > { %v14466_v27 = vrot.slane %v3006_v39, 5  ;;  %v3756_v46 = vrot.slane %v14482_v28, 5  ;;  %v11269_v39 = vrot.slane %v3606_v32, 9  ;;  %v13340_v32 = vld [vmem:[#allocation2 + $0xc0] sm:$0xff]  }
 0x158   : > { %v3040_v12 = vrot.slane %v3038_v33, 5 }
 0x159   : > { %12294 = vmatmul.mubr.msk.bf16.gmra.mrb[16].mxu0 %vm1545_vm9, %v13334_v22  ;;  %v2989_v22 = vrot.slane %v2987_v34, 4  ;;  %v13337_v34 = vld [vmem:[#allocation2 + $0x9c] sm:$0xff]  }
 0x15a   : > { %12297 = vmatprep.mubr.msk.bf16.mxu0 %vm1545_vm9, %v13335_v31  ;;  %v13336_v31 = vld [vmem:[#allocation2 + $0x90] sm:$0xff]  }
 0x15b   : > { %v2993_v41 = vor.u32 %v2992_v23, %v2989_v22  ;;  %v11268_v23 = vrot.slane %v3605_v25, 9  ;;  %v14457_v22 = vrot.slane %v2969_v18, 4  ;;  %v3013_v25 = vrot.slane %v3011_v19, 4  ;;  %v14486_v19 = vld [vmem:[#allocation2 + $0xc4] sm:$0xf] }
 0x15c   : > { %v3016_v18 = vrot.slane %v3014_v56, 5  ;;  %v11223_v56 = vcombine.low %v2927_v9, %v2937_v11 }
 0x15d   : > { %v14463_v3 = vrot.slane %v2993_v41, 4  ;;  %v14478_v41 = vrot.slane %v3020_v16, 5  ;;  %v14493_v16 = vld [vmem:[#allocation2 + $0xc8] sm:$0x1] }
 0x15e   : > { %v3766_v9 = vrot.slane %v14493_v16, 5  ;;  %v3017_v11 = vor.u32 %v3016_v18, %v3013_v25  ;;  %v3048_v18 = vshrl.u32 %v14297_v14, 16  ;;  %v2961_v14 = vsel %vm13571_vm11, %v14453_v57, %v14415_v4 }
 0x15f   : > { %v3027_v40 = vor.u32 %v3026_v59, %v14478_v41 }
 0x160   : > { %v3018_v4 = vrot.slane %v3017_v11, 4 }
 0x161   : > { %12298 = vmatmul.mubr.msk.bf16.gmra.mrb[20].mxu0 %vm1545_vm9, %v13336_v31  ;;  %v3749_v31 = vrot.slane %v14446_v21, 5 }
 0x162   : > { %12301 = vmatprep.mubr.msk.bf16.mxu0 %vm1545_vm9, %v13337_v34  ;;  %v14461_v34 = vrot.slane %v2982_v48, 5  ;;  %v14476_v48 = vld [vmem:[#allocation2 + $0x44] sm:$0x1] }
 0x163   : > { %v3751_v29 = vrot.slane %v3749_v31, 4  ;;  %v14470_v58 = vsel %vm14037_vm2, %v11268_v23, %v3749_v31  ;;  %v14484_v31 = vld [vmem:[#allocation2 + $0xbc] sm:$0x1] }
 0x164   : > { %17491 = vst [vmem:[#allocation20_spill] sm:$0xff] %v14470_v58  ;;  %v3759_v23 = vrot.slane %v14484_v31, 5  ;;  %v3030_v58 = vshll.u32 %v14476_v48, 16 }
 0x165   : > { %v14474_v2 = vsel %vm14037_vm2, %v3751_v29, %v3752_v49  ;;  %v2951_v49 = vsel %vm13571_vm11, %v14427_v1, %v14360_v47  ;;  %v3004_v29 = vrot.slane %v3003_v55, 4  ;;  %v2884_v47 = vld [vmem:[#allocation2 + $0x54] sm:$0xf]  ;;  %v3758_v1 = vrot.slane %v3756_v46, 4 }
 0x166   : > { %17492 = vst [vmem:[#allocation21_spill] sm:$0xff] %v14474_v2  ;;  %v3607_v2 = vld [vmem:[#allocation2 + $0xc0] sm:$0xe]  ;;  %v3062_v59 = vshll.u32 %v2884_v47, 16 }
 0x167   : > { %v11270_v20 = vrot.slane %v3607_v2, 9  ;;  %v14511_v25 = vsel %vm14037_vm2, %v3758_v1, %v3759_v23  ;;  %v3059_v2 = vshrl.u32 %v2884_v47, 16  ;;  %v3072_v23 = vshrl.u32 %v14501_v35, 16 }
 0x168   : > { %v3009_v57 = vsel %vm13571_vm11, %v3004_v29, %v14466_v27  ;;  %v3032_v47 = vrot.slane %v3030_v58, 5  ;;  %v14549_v1 = vrot.slane %v3044_v10, 5  ;;  %v11224_v58 = vcombine.low %v2951_v49, %v2961_v14  ;;  %v2893_v14 = vld [vmem:[#allocation2 + $0x78] sm:$0xf] }
 0x169   : > { %12302 = vmatmul.mubr.msk.bf16.gmra.mrb[24].mxu0 %vm1545_vm9, %v13338_v5  ;;  %v3763_v5 = vrot.slane %v14486_v19, 5  ;;  %v3061_v33 = vrot.slane %v3059_v2, 4  ;;  %v3867_v10 = vsel %vm1594_vm0, %v14274_v45, 0 }
 0x16a   : > { %12305 = vmatprep.mubr.msk.bf16.mxu0 %vm1545_vm9, %v13339_v61  ;;  %v14505_v61 = vsel %vm14037_vm2, %v11269_v39, %v3756_v46  ;;  %v3068_v46 = vshll.u32 %v14501_v35, 16 }
 0x16b   : > { %v3765_v55 = vrot.slane %v3763_v5, 4  ;;  %v14515_v60 = vsel %vm14037_vm2, %v11270_v20, %v3763_v5  ;;  %v2975_v20 = vsel %vm13571_vm11, %v14457_v22, %v14397_v52  ;;  %v2985_v5 = vsel %vm13571_vm11, %v14459_v8, %v14461_v34  ;;  %v2887_v52 = vld [vmem:[#allocation2 + $0x60] sm:$0xf] }
 0x16c   : > { %v3028_v22 = vrot.slane %v3027_v40, 4  ;;  %v3050_v8 = vrot.slane %v3048_v18, 4  ;;  %v3054_v34 = vshll.u32 %v14299_v17, 16  ;;  %v3083_v27 = vshrl.u32 %v2887_v52, 16 }
 0x16d   : > { %v14522_v39 = vsel %vm14037_vm2, %v3765_v55, %v3766_v9  ;;  %v2999_v9 = vsel %vm13571_vm11, %v14463_v3, %v14444_v53  ;;  %v3041_v55 = vor.u32 %v3040_v12, %v3037_v36  ;;  %v3064_v3 = vrot.slane %v3062_v59, 5  ;;  %v2890_v59 = vld [vmem:[#allocation2 + $0x6c] sm:$0xf] }
 0x16e   : > { %17493 = vst [vmem:[#allocation22_spill] sm:$0xff] %v14522_v39  ;;  %v14552_v53 = vrot.slane %v3068_v46, 5  ;;  %v14554_v39 = vld [vmem:[#allocation2 + $0x5c] sm:$0x1]  ;;  %v3086_v29 = vshll.u32 %v2887_v52, 16  ;;  %v3092_v12 = vshll.u32 %v14319_v7, 16  ;;  %v11225_v40 = vcombine.low %v2975_v20, %v2985_v5 }
 0x16f   : > { %v3096_v36 = vshrl.u32 %v14319_v7, 16  ;;  %v3023_v17 = vsel %vm13571_vm11, %v3018_v4, %v14478_v41  ;;  %v14563_v11 = vrot.slane %v3041_v55, 4  ;;  %v3051_v18 = vor.u32 %v3050_v8, %v14549_v1  ;;  %v14568_v46 = vld [vmem:[#allocation2 + $0x70] sm:$0xf] }
 0x170   : > { %v14566_v2 = vrot.slane %v3054_v34, 5  ;;  %v3033_v7 = vsel %vm13571_vm11, %v3028_v22, %v3032_v47  ;;  %v3065_v49 = vor.u32 %v3064_v3, %v3061_v33  ;;  %v3085_v20 = vrot.slane %v3083_v27, 4 }
 0x171   : > { %12306 = vmatmul.mubr.msk.bf16.gmra.mrb[28].mxu0 %vm1545_vm9, %v13340_v32  ;;  %v3074_v32 = vrot.slane %v3072_v23, 4  ;;  %v3078_v23 = vshll.u32 %v14554_v39, 16  ;;  %v3088_v41 = vrot.slane %v3086_v29, 5  ;;  %v14574_v5 = vrot.slane %v3092_v12, 5 }
 0x172   : > { %12311 = vmatprep.mubr.msk.bf16.mxu0 %vm1545_vm9, %v11223_v56  ;;  %v11226_v56 = vcombine.low %v2999_v9, %v3009_v57  ;;  %v3098_v9 = vrot.slane %v3096_v36, 4  ;;  %v14579_v57 = vld [vmem:[%s17339_s1 + $0xc] sm:$0x3]  ;;  %v3107_v4 = vshrl.u32 %v2890_v59, 16  ;;  %v3110_v47 = vshll.u32 %v2890_v59, 16 }
 0x173   : > { %v3075_v45 = vor.u32 %v3074_v32, %v14552_v53  ;;  %v3116_v33 = vshll.u32 %v14568_v46, 16  ;;  %v3120_v55 = vshrl.u32 %v14568_v46, 16  ;;  %v11227_v52 = vcombine.low %v3023_v17, %v3033_v7 }
 0x174   : > { %v3052_v22 = vrot.slane %v3051_v18, 4  ;;  %v3131_v8 = vshrl.u32 %v2893_v14, 16  ;;  %v3134_v34 = vshll.u32 %v2893_v14, 16  ;;  %v3066_v3 = vrot.slane %v3065_v49, 4 }
 0x175   : > { %v3080_v32 = vrot.slane %v3078_v23, 5  ;;  %v3140_v27 = vshll.u32 %v14349_v6, 16  ;;  %v3144_v29 = vshrl.u32 %v14349_v6, 16  ;;  %v3076_v12 = vrot.slane %v3075_v45, 4  ;;  %v14600_v45 = vld [vmem:[#allocation2 + $0x74] sm:$0x1] }
 0x176   : > { %v3089_v36 = vor.u32 %v3088_v41, %v3085_v20  ;;  %v3109_v17 = vrot.slane %v3107_v4, 4  ;;  %v3112_v18 = vrot.slane %v3110_v47, 5  ;;  %v14591_v59 = vrot.slane %v3116_v33, 5 }
 0x177   : > { %v3122_v7 = vrot.slane %v3120_v55, 4  ;;  %v3047_v6 = vsel %vm13571_vm11, %v14563_v11, %v14549_v1  ;;  %v3057_v49 = vsel %vm13571_vm11, %v3052_v22, %v14566_v2  ;;  %v3133_v23 = vrot.slane %v3131_v8, 4 }
 0x178   : > { %v3136_v14 = vrot.slane %v3134_v34, 5  ;;  %v3146_v20 = vrot.slane %v3144_v29, 4  ;;  %v3071_v4 = vsel %vm13571_vm11, %v3066_v3, %v14552_v53  ;;  %v3081_v1 = vsel %vm13571_vm11, %v3076_v12, %v3080_v32 }
 0x179   : > { %12312 = vmatmul.mubr.msk.bf16.vlgmr.msra.gmra.mrb[0].mxu0 %vm1545_vm9, %v11224_v58  ;;  %v3099_v58 = vor.u32 %v3098_v9, %v14574_v5  ;;  %v3090_v11 = vrot.slane %v3089_v36, 4  ;;  %v3113_v33 = vor.u32 %v3112_v18, %v3109_v17  ;;  %v3123_v55 = vor.u32 %v3122_v7, %v14591_v59  ;;  %v2902_v17 = vld [vmem:[#allocation2 + $0x9c] sm:$0xf] }
 0x17a   : > { %12344 = vmatpush3.bf16.msra.mxu0 %v3867_v10  ;;  %12315 = vmatprep.mubr.msk.bf16.mxu0 %vm1545_vm9, %v11225_v40  ;;  %v3102_v10 = vshll.u32 %v14321_v13, 16  ;;  %v2896_v40 = vld [vmem:[#allocation2 + $0x84] sm:$0xf]  ;;  %v14602_v13 = vrot.slane %v3140_v27, 5  ;;  %v3126_v22 = vshll.u32 %v14600_v45, 16  ;;  %v3150_v8 = vshll.u32 %v14351_v30, 16 }
 0x17b   : > { %13303 = vmatprep.subr.msk.bf16.mxu0 %vm1594_vm0, %v14579_v57  ;;  %v3155_v41 = vshrl.u32 %v2896_v40, 16  ;;  %v3158_v9 = vshll.u32 %v2896_v40, 16  ;;  %v3100_v2 = vrot.slane %v3099_v58, 4  ;;  %v3164_v34 = vshll.u32 %v14383_v37, 16 }
 0x17c   : > { %v3104_v47 = vrot.slane %v3102_v10, 5  ;;  %v3168_v53 = vshrl.u32 %v14383_v37, 16  ;;  %v3137_v3 = vor.u32 %v3136_v14, %v3133_v23  ;;  %v3147_v32 = vor.u32 %v3146_v20, %v14602_v13  ;;  %v14624_v14 = vld [vmem:[#allocation2 + $0xa0] sm:$0xf] }
 0x17d   : > { %v3157_v27 = vrot.slane %v3155_v41, 4  ;;  %v3160_v29 = vrot.slane %v3158_v9, 5  ;;  %v11228_v12 = vcombine.low %v3047_v6, %v3057_v49  ;;  %v11229_v36 = vcombine.low %v3071_v4, %v3081_v1 }
 0x17e   : > { %v3095_v58 = vsel %vm13571_vm11, %v3090_v11, %v14574_v5  ;;  %v3114_v30 = vrot.slane %v3113_v33, 4  ;;  %v3124_v10 = vrot.slane %v3123_v55, 4  ;;  %v3128_v40 = vrot.slane %v3126_v22, 5 }
 0x17f   : > { %v14622_v37 = vrot.slane %v3164_v34, 5  ;;  %v3170_v18 = vrot.slane %v3168_v53, 4  ;;  %v3138_v6 = vrot.slane %v3137_v3, 4  ;;  %v3148_v49 = vrot.slane %v3147_v32, 4 }
 0x180   : > { %v3152_v20 = vrot.slane %v3150_v8, 5  ;;  %v3161_v41 = vor.u32 %v3160_v29, %v3157_v27  ;;  %v3188_v5 = vshll.u32 %v14387_v24, 16  ;;  %v3192_v9 = vshrl.u32 %v14387_v24, 16 }
 0x181   : > { %12316 = vmatmul.mubr.msk.bf16.gmra.mrb[4].mxu0 %vm1545_vm9, %v11226_v56  ;;  %v2899_v56 = vld [vmem:[#allocation2 + $0x90] sm:$0xf]  ;;  %v3203_v4 = vshrl.u32 %v2902_v17, 16  ;;  %v3206_v1 = vshll.u32 %v2902_v17, 16  ;;  %v3119_v11 = vsel %vm13571_vm11, %v3114_v30, %v14591_v59  ;;  %v3216_v33 = vshrl.u32 %v14624_v14, 16 }
 0x182   : > { %12319 = vmatprep.mubr.msk.bf16.mxu0 %vm1545_vm9, %v11227_v52  ;;  %v3105_v52 = vsel %vm13571_vm11, %v3100_v2, %v3104_v47  ;;  %v3179_v7 = vshrl.u32 %v2899_v56, 16  ;;  %v3182_v23 = vshll.u32 %v2899_v56, 16  ;;  %v3129_v47 = vsel %vm13571_vm11, %v3124_v10, %v3128_v40  ;;  %v2905_v10 = vld [vmem:[#allocation2 + $0xa8] sm:$0xf] }
 0x183   : > { %v3212_v2 = vshll.u32 %v14624_v14, 16  ;;  %v3171_v55 = vor.u32 %v3170_v18, %v14622_v37  ;;  %v3174_v24 = vshll.u32 %v14385_v54, 16  ;;  %v3143_v34 = vsel %vm13571_vm11, %v3138_v6, %v14602_v13 }
 0x184   : > { %v3181_v22 = vrot.slane %v3179_v7, 4  ;;  %v3184_v8 = vrot.slane %v3182_v23, 5  ;;  %v3153_v59 = vsel %vm13571_vm11, %v3148_v49, %v3152_v20  ;;  %v3162_v53 = vrot.slane %v3161_v41, 4  ;;  %v2908_v41 = vld [vmem:[#allocation2 + $0xb4] sm:$0xf] }
 0x185   : > { %v14644_v3 = vrot.slane %v3188_v5, 5  ;;  %v3194_v32 = vrot.slane %v3192_v9, 4  ;;  %v3205_v27 = vrot.slane %v3203_v4, 4  ;;  %v3208_v29 = vrot.slane %v3206_v1, 5 }
 0x186   : > { %v11230_v56 = vcombine.low %v3095_v58, %v3105_v52  ;;  %v3214_v54 = vrot.slane %v3212_v2, 5  ;;  %v3218_v30 = vrot.slane %v3216_v33, 4  ;;  %v3172_v40 = vrot.slane %v3171_v55, 4 }
 0x187   : > { %v3176_v17 = vrot.slane %v3174_v24, 5  ;;  %v3185_v18 = vor.u32 %v3184_v8, %v3181_v22  ;;  %v3198_v13 = vshll.u32 %v14390_v38, 16  ;;  %v11232_v7 = vcombine.low %v3143_v34, %v3153_v59 }
 0x188   : > { %v3195_v23 = vor.u32 %v3194_v32, %v14644_v3  ;;  %v3209_v6 = vor.u32 %v3208_v29, %v3205_v27  ;;  %v3227_v20 = vshrl.u32 %v2905_v10, 16  ;;  %v3219_v58 = vor.u32 %v3218_v30, %v3214_v54  ;;  %v2911_v30 = vld [vmem:[#allocation2 + $0xc0] sm:$0xf] }
 0x189   : > { %12320 = vmatmul.mubr.msk.bf16.gmra.mrb[8].mxu0 %vm1545_vm9, %v11228_v12  ;;  %v11231_v12 = vcombine.low %v3119_v11, %v3129_v47  ;;  %v3230_v52 = vshll.u32 %v2905_v10, 16  ;;  %v3236_v5 = vshll.u32 %v14446_v21, 16  ;;  %v3240_v9 = vshrl.u32 %v14446_v21, 16 }
 0x18a   : > { %12323 = vmatprep.mubr.msk.bf16.mxu0 %vm1545_vm9, %v11229_v36  ;;  %v14646_v36 = vld [vmem:[#allocation2 + $0xa4] sm:$0x1]  ;;  %v3167_v38 = vsel %vm13571_vm11, %v3162_v53, %v14622_v37  ;;  %v3177_v4 = vsel %vm13571_vm11, %v3172_v40, %v3176_v17  ;;  %v3186_v1 = vrot.slane %v3185_v18, 4  ;;  %v3200_v11 = vrot.slane %v3198_v13, 5 }
 0x18b   : > { %v3222_v49 = vshll.u32 %v14646_v36, 16  ;;  %v3251_v47 = vshrl.u32 %v2908_v41, 16  ;;  %v3254_v2 = vshll.u32 %v2908_v41, 16  ;;  %v3260_v33 = vshll.u32 %v14482_v28, 16 }
 0x18c   : > { %v3264_v55 = vshrl.u32 %v14482_v28, 16  ;;  %v3196_v24 = vrot.slane %v3195_v23, 4  ;;  %v3210_v22 = vrot.slane %v3209_v6, 4  ;;  %v3229_v8 = vrot.slane %v3227_v20, 4 }
 0x18d   : > { %v3224_v21 = vrot.slane %v3222_v49, 5  ;;  %v3220_v34 = vrot.slane %v3219_v58, 4  ;;  %v3232_v59 = vrot.slane %v3230_v52, 5  ;;  %v3238_v32 = vrot.slane %v3236_v5, 5 }
 0x18e   : > { %v3242_v27 = vrot.slane %v3240_v9, 4  ;;  %v11233_v37 = vcombine.low %v3167_v38, %v3177_v4  ;;  %v3253_v53 = vrot.slane %v3251_v47, 4  ;;  %v3256_v29 = vrot.slane %v3254_v2, 5 }
 0x18f   : > { %v3191_v10 = vsel %vm13571_vm11, %v3186_v1, %v14644_v3  ;;  %v3201_v28 = vsel %vm13571_vm11, %v3196_v24, %v3200_v11  ;;  %v3246_v40 = vshll.u32 %v14448_v26, 16  ;;  %v3215_v17 = vsel %vm13571_vm11, %v3210_v22, %v3214_v54 }
 0x190   : > { %v3225_v18 = vsel %vm13571_vm11, %v3220_v34, %v3224_v21  ;;  %v3233_v13 = vor.u32 %v3232_v59, %v3229_v8  ;;  %v3243_v23 = vor.u32 %v3242_v27, %v3238_v32  ;;  %v3275_v6 = vshrl.u32 %v2911_v30, 16  ;;  %v3592_v59 = vld [vmem:[#allocation2 + $0xc] sm:$0xe] }
 0x191   : > { %12324 = vmatmul.mubr.msk.bf16.gmra.mrb[12].mxu0 %vm1545_vm9, %v11230_v56  ;;  %v3262_v56 = vrot.slane %v3260_v33, 5  ;;  %v3278_v49 = vshll.u32 %v2911_v30, 16  ;;  %v3284_v3 = vshll.u32 %v14486_v19, 16  ;;  %v3288_v20 = vshrl.u32 %v14486_v19, 16 }
 0x192   : > { %12327 = vmatprep.mubr.msk.bf16.mxu0 %vm1545_vm9, %v11231_v12  ;;  %v3266_v12 = vrot.slane %v3264_v55, 4  ;;  %v3257_v41 = vor.u32 %v3256_v29, %v3253_v53  ;;  %v11234_v58 = vcombine.low %v3191_v10, %v3201_v28  ;;  %v11235_v52 = vcombine.low %v3215_v17, %v3225_v18  ;;  %v3593_v17 = vld [vmem:[#allocation2 + $0x18] sm:$0xe]  ;;  %v3594_v18 = vld [vmem:[#allocation2 + $0x24] sm:$0xe] }
 0x193   : > { %v3234_v54 = vrot.slane %v3233_v13, 4  ;;  %v3244_v5 = vrot.slane %v3243_v23, 4  ;;  %v3248_v9 = vrot.slane %v3246_v40, 5  ;;  %v3277_v38 = vrot.slane %v3275_v6, 4 }
 0x194   : > { %v3267_v26 = vor.u32 %v3266_v12, %v3262_v56  ;;  %v3280_v4 = vrot.slane %v3278_v49, 5  ;;  %v3286_v1 = vrot.slane %v3284_v3, 5  ;;  %v3290_v11 = vrot.slane %v3288_v20, 4 }
 0x195   : > { %v3258_v47 = vrot.slane %v3257_v41, 4  ;;  %v3239_v19 = vsel %vm13571_vm11, %v3234_v54, %v3238_v32  ;;  %v3294_v22 = vshll.u32 %v14493_v16, 16  ;;  %v3658_v34 = vrot.slane %v14308_v63, 5 }
 0x196   : > { %v3268_v2 = vrot.slane %v3267_v26, 4  ;;  %v3281_v55 = vor.u32 %v3280_v4, %v3277_v38  ;;  %v3291_v24 = vor.u32 %v3290_v11, %v3286_v1  ;;  %v11255_v12 = vrot.slane %v3592_v59, 9 }
 0x197   : > { %v3263_v21 = vsel %vm13571_vm11, %v3258_v47, %v3262_v56  ;;  %v3296_v29 = vrot.slane %v3294_v22, 5  ;;  %v3660_v30 = vrot.slane %v3658_v34, 4  ;;  %v3661_v10 = vrot.slane %v14328_v15, 5 }
 0x198   : > { %v3292_v53 = vrot.slane %v3291_v24, 4  ;;  %v3665_v56 = vrot.slane %v14326_v42, 5  ;;  %v3659_v28 = vsel %vm14037_vm2, %v11255_v12, %v3658_v34  ;;  %v3672_v15 = vrot.slane %v14356_v62, 5 }
 0x199   : > { %12328 = vmatmul.mubr.msk.bf16.gmra.mrb[16].mxu0 %vm1545_vm9, %v11232_v7  ;;  %v3270_v7 = vshll.u32 %v14484_v31, 16  ;;  %v3249_v31 = vsel %vm13571_vm11, %v3244_v5, %v3248_v9  ;;  %v3662_v40 = vsel %vm14037_vm2, %v3660_v30, %v3661_v10  ;;  %v11256_v6 = vrot.slane %v3593_v17, 9  ;;  %v17500_v30 = vld [vmem:[#allocation12_spill] sm:$0xff]  ;;  %v17501_v10 = vld [vmem:[#allocation13_spill] sm:$0xff]  ;;  %v17503_v17 = vld [vmem:[#allocation14_spill] sm:$0xff] }
 0x19a   : > { %12331 = vmatprep.mubr.msk.bf16.mxu0 %vm1545_vm9, %v11233_v37  ;;  %v11236_v27 = vcombine.low %v3239_v19, %v3249_v31  ;;  %v3282_v37 = vrot.slane %v3281_v55, 4  ;;  %v3297_v63 = vsel %vm13571_vm11, %v3292_v53, %v3296_v29  ;;  %v11272_v23 = vcombine.low %v3659_v28, %v3662_v40  ;;  %v17494_v31 = vld [vmem:[#allocation8_spill] sm:$0xff]  ;;  %v17495_v55 = vld [vmem:[#allocation9_spill] sm:$0xff] }
 0x19b   : > { %v3272_v33 = vrot.slane %v3270_v7, 5  ;;  %v3667_v49 = vrot.slane %v3665_v56, 4  ;;  %v3668_v3 = vrot.slane %v14343_v0, 5  ;;  %v11257_v20 = vrot.slane %v3594_v18, 9 }
 0x19c   : > { %v3287_v16 = vsel %vm13571_vm11, %v3282_v37, %v3286_v1  ;;  %v3674_v41 = vrot.slane %v3672_v15, 4  ;;  %v3675_v42 = vrot.slane %v14403_v51, 5  ;;  %v3666_v26 = vsel %vm14037_vm2, %v11256_v6, %v3665_v56  ;;  %v11337_v1 = vld [vmem:[%s17339_s1 + $0xe] sm:$0x3] }
 0x19d   : > { %v3273_v8 = vsel %vm13571_vm11, %v3268_v2, %v3272_v33  ;;  %v11238_v13 = vcombine.low %v3287_v16, %v3297_v63  ;;  %v3669_v62 = vsel %vm14037_vm2, %v3667_v49, %v3668_v3  ;;  %v3673_v7 = vsel %vm14037_vm2, %v11257_v20, %v3672_v15  ;;  %v17498_v37 = vld [vmem:[#allocation11_spill] sm:$0xff]  ;;  %v3604_v63 = vld [vmem:[#allocation2 + $0x9c] sm:$0xe]  ;;  %v17509_v20 = vld [vmem:[#allocation18_spill] sm:$0xff] }
 0x19e   : > { %v11237_v32 = vcombine.low %v3263_v21, %v3273_v8  ;;  %v3676_v0 = vsel %vm14037_vm2, %v3674_v41, %v3675_v42  ;;  %v11273_v51 = vcombine.low %v3666_v26, %v3669_v62  ;;  %v4226_v5 = vsel %vm1594_vm0, %v14579_v57, 0  ;;  %v3600_v8 = vld [vmem:[#allocation2 + $0x6c] sm:$0xe]  ;;  %v17512_v42 = vld [vmem:[#allocation20_spill] sm:$0xff]  ;;  %v17513_v26 = vld [vmem:[#allocation21_spill] sm:$0xff] }
 0x19f   : > { %v11274_v54 = vcombine.low %v3673_v7, %v3676_v0  ;;  %v3689_v4 = vrot.slane %v14476_v48, 5  ;;  %v3700_v57 = vrot.slane %v14501_v35, 5  ;;  %v3598_v48 = vld [vmem:[#allocation2 + $0x54] sm:$0xe]  ;;  %v3703_v19 = vrot.slane %v14554_v39, 5  ;;  %v17504_v15 = vld [vmem:[#allocation15_spill] sm:$0xff] }
 0x1a0   : > { %v11261_v2 = vrot.slane %v3598_v48, 9  ;;  %v17496_v24 = vcombine.low %v17494_v31, %v17495_v55  ;;  %v3714_v21 = vrot.slane %v14568_v46, 5  ;;  %v11263_v59 = vrot.slane %v3600_v8, 9  ;;  %v17510_v41 = vld [vmem:[#allocation19_spill] sm:$0xff]  ;;  %v13341_v0 = vld [vmem:[#allocation2 + $0x18] sm:$0xff]  }
 0x1a1   : > { %12332 = vmatmul.mubr.msk.bf16.gmra.mrb[20].mxu0 %vm1545_vm9, %v11234_v58  ;;  %v3686_v58 = vrot.slane %v14437_v50, 5  ;;  %v3702_v33 = vrot.slane %v3700_v57, 4  ;;  %v3717_v39 = vrot.slane %v14600_v45, 5  ;;  %v17502_v16 = vcombine.low %v17500_v30, %v17501_v10  ;;  %v13346_v48 = vld [vmem:[#allocation2 + $0x54] sm:$0xff]   ;;  %v14816_v31 = vld [vmem:[#allocation2 + $0x70] sm:$0xf] }
 0x1a2   : > { %12335 = vmatprep.mubr.msk.bf16.mxu0 %vm1545_vm9, %v11235_v52  ;;  %v3596_v52 = vld [vmem:[#allocation2 + $0x3c] sm:$0xe]  ;;  %v3701_v22 = vsel %vm14037_vm2, %v11261_v2, %v3700_v57  ;;  %v3715_v29 = vsel %vm14037_vm2, %v11263_v59, %v3714_v21  ;;  %v3742_v45 = vrot.slane %v14624_v14, 5  ;;  %v11267_v56 = vrot.slane %v3604_v63, 9  ;;  %v13347_v2 = vld [vmem:[#allocation2 + $0x60] sm:$0xff]  }
 0x1a3   : > { %v11259_v9 = vrot.slane %v3596_v52, 9  ;;  %v3688_v38 = vrot.slane %v3686_v58, 4  ;;  %v3704_v35 = vsel %vm14037_vm2, %v3702_v33, %v3703_v19  ;;  %v3745_v40 = vrot.slane %v14646_v36, 5  ;;  %v14818_v55 = vld [vmem:[#allocation2 + $0x74] sm:$0x1] }
 0x1a4   : > { %v11278_v34 = vcombine.low %v3701_v22, %v3704_v35  ;;  %v3744_v28 = vrot.slane %v3742_v45, 4  ;;  %v17505_v18 = vcombine.low %v17503_v17, %v17504_v15  ;;  %v3743_v49 = vsel %vm14037_vm2, %v11267_v56, %v3742_v45  ;;  %v4421_v59 = vld [vmem:[#allocation2 + $0x18] sm:$0xf]  ;;  %v14838_v63 = vld [vmem:[#allocation2 + $0x88] sm:$0xf] }
 0x1a5   : > { %v3687_v50 = vsel %vm14037_vm2, %v11259_v9, %v3686_v58  ;;  %v3690_v11 = vsel %vm14037_vm2, %v3688_v38, %v3689_v4  ;;  %v17511_v36 = vcombine.low %v17509_v20, %v17510_v41  ;;  %v17514_v62 = vcombine.low %v17512_v42, %v17513_v26  ;;  %v17516_v58 = vld [vmem:[#allocation22_spill] sm:$0xff]  ;;  %v14791_v9 = vld [vmem:[%s17339_s1 + $0x10] sm:$0x3]  ;;  %v14800_v38 = vld [vmem:[#allocation2 + $0x5c] sm:$0x1] }
 0x1a6   : > { %v11276_v47 = vcombine.low %v3687_v50, %v3690_v11  ;;  %v3746_v14 = vsel %vm14037_vm2, %v3744_v28, %v3745_v40  ;;  %v17515_v7 = vcombine.low %v14505_v61, %v14511_v25  ;;  %v17517_v52 = vcombine.low %v14515_v60, %v17516_v58  ;;  %v13344_v61 = vld [vmem:[#allocation2 + $0x3c] sm:$0xff]   ;;  %v13345_v25 = vld [vmem:[#allocation2 + $0x48] sm:$0xff]   ;;  %v14798_v60 = vld [vmem:[#allocation2 + $0x58] sm:$0xf] }
 0x1a7   : > { %v11284_v3 = vcombine.low %v3743_v49, %v3746_v14  ;;  %v5152_v4 = vld [vmem:[#allocation2 + $0x54] sm:$0xe]  ;;  %v5251_v50 = vrot.slane %v14800_v38, 5  ;;  %v5262_v22 = vrot.slane %v14816_v31, 5  ;;  %v5265_v35 = vrot.slane %v14818_v55, 5  ;;  %v13350_v14 = vld [vmem:[#allocation2 + $0x84] sm:$0xff]  }
 0x1a8   : > { %v11375_v11 = vrot.slane %v5152_v4, 9  ;;  %v14840_v56 = vld [vmem:[#allocation2 + $0x8c] sm:$0x1]  ;;  %v5156_v28 = vld [vmem:[#allocation2 + $0x84] sm:$0xe]  ;;  %v5276_v40 = vrot.slane %v14838_v63, 5 }
 0x1a9   : > { %12336 = vmatmul.mubr.msk.bf16.gmra.mrb[24].mxu0 %vm1545_vm9, %v11236_v27  ;;  %v3716_v27 = vrot.slane %v3714_v21, 4  ;;  %v5264_v8 = vrot.slane %v5262_v22, 4  ;;  %v5279_v17 = vrot.slane %v14840_v56, 5  ;;  %v14845_v15 = vld [vmem:[#allocation2 + $0x28] sm:$0xf]  ;;  %v13351_v26 = vld [vmem:[#allocation2 + $0x90] sm:$0xff]  }
 0x1aa   : > { %12339 = vmatprep.mubr.msk.bf16.mxu0 %vm1545_vm9, %v11237_v32  ;;  %v17497_v32 = vld [vmem:[#allocation10_spill] sm:$0xff]  ;;  %v5278_v49 = vrot.slane %v5276_v40, 4  ;;  %v14868_v4 = vld [vmem:[#allocation2 + $0x34] sm:$0xf]  ;;  %v13356_v58 = vld [vmem:[#allocation2 + $0xcc] sm:$0xff]  }
 0x1ab   : > { %v17499_v53 = vcombine.low %v17497_v32, %v17498_v37  ;;  %v3718_v12 = vsel %vm14037_vm2, %v3716_v27, %v3717_v39  ;;  %v14823_v27 = vld [vmem:[#allocation2 + $0x1c] sm:$0xf]  ;;  %v4424_v37 = vld [vmem:[#allocation2 + $0x24] sm:$0xf] }
 0x1ac   : > { %v11280_v46 = vcombine.low %v3715_v29, %v3718_v12  ;;  %v13349_v32 = vld [vmem:[#allocation2 + $0x78] sm:$0xff]   ;;  %v4470_v12 = vshrl.u32 %v4421_v59, 16  ;;  %v4479_v30 = vshll.u32 %v14823_v27, 16  ;;  %v4483_v10 = vshrl.u32 %v14823_v27, 16 }
 0x1ad   : > { %v4497_v45 = vshll.u32 %v4424_v37, 16 }
 0x1ae   : > { %v4485_v20 = vrot.slane %v4483_v10, 4  ;;  %v14882_v10 = vld [vmem:[#allocation2 + $0x40] sm:$0xf] }
 0x1b1   : > { %12340 = vmatmul.mubr.msk.bf16.gmra.mrb[28].mxu0 %vm1545_vm9, %v11238_v13  ;;  %v17506_v13 = vld [vmem:[#allocation16_spill] sm:$0xff] }
 0x1b2   : > { %12345 = vmatprep.mubr.msk.bf16.mxu0 %vm1545_vm9, %v11272_v23  ;;  %v17507_v23 = vld [vmem:[#allocation17_spill] sm:$0xff] }
 0x1b3   : > { %v17508_v6 = vcombine.low %v17506_v13, %v17507_v23  ;;  %v4472_v13 = vrot.slane %v4470_v12, 4 }
 0x1b9   : > { %12346 = vmatmul.mubr.msk.bf16.vlgmr.msra.gmra.mrb[0].mxu0 %vm1545_vm9, %v11273_v51  ;;  %v13342_v51 = vld [vmem:[#allocation2 + $0x24] sm:$0xff]  }
 0x1ba   : > { %12378 = vmatpush3.bf16.msra.mxu0 %v4226_v5  ;;  %12349 = vmatprep.mubr.msk.bf16.mxu0 %vm1545_vm9, %v11274_v54  ;;  %v13343_v54 = vld [vmem:[#allocation2 + $0x30] sm:$0xff]   ;;  %v4952_v5 = vsel %vm1594_vm0, %v11337_v1, 0 }
 0x1bb   : > { %13304 = vmatprep.subr.msk.bf16.mxu0 %vm1594_vm0, %v11337_v1  ;;  %v5248_v1 = vrot.slane %v14798_v60, 5 }
 0x1bd   : > { %v5250_v57 = vrot.slane %v5248_v1, 4 }
 0x1bf   : > { %v14811_v33 = vsel %vm14037_vm2, %v5250_v57, %v5251_v50  ;;  %v14872_v50 = vld [vmem:[#allocation2 + $0xa4] sm:$0x1] }
 0x1c1   : > { %12350 = vmatmul.mubr.msk.bf16.gmra.mrb[4].mxu0 %vm1545_vm9, %v17496_v24  ;;  %v5154_v24 = vld [vmem:[#allocation2 + $0x6c] sm:$0xe] }
 0x1c2   : > { %12353 = vmatprep.mubr.msk.bf16.mxu0 %vm1545_vm9, %v11276_v47  ;;  %v14807_v47 = vsel %vm14037_vm2, %v11375_v11, %v5248_v1  ;;  %v11377_v21 = vrot.slane %v5154_v24, 9  ;;  %v14870_v1 = vld [vmem:[#allocation2 + $0xa0] sm:$0xf]  ;;  %v5293_v24 = vrot.slane %v14872_v50, 5 }
 0x1c4   : > { %v14827_v39 = vsel %vm14037_vm2, %v11377_v21, %v5262_v22 }
 0x1c9   : > { %12354 = vmatmul.mubr.msk.bf16.gmra.mrb[8].mxu0 %vm1545_vm9, %v17499_v53  ;;  %v14831_v53 = vsel %vm14037_vm2, %v5264_v8, %v5265_v35 }
 0x1ca   : > { %12357 = vmatprep.mubr.msk.bf16.mxu0 %vm1545_vm9, %v11278_v34  ;;  %v13348_v34 = vld [vmem:[#allocation2 + $0x6c] sm:$0xff]   ;;  %17518 = vst [vmem:[#allocation8_spill] sm:$0xff] %v14831_v53 }
 0x1d1   : > { %12358 = vmatmul.mubr.msk.bf16.gmra.mrb[12].mxu0 %vm1545_vm9, %v17502_v16  ;;  %v4494_v16 = vshrl.u32 %v4424_v37, 16 }
 0x1d2   : > { %12361 = vmatprep.mubr.msk.bf16.mxu0 %vm1545_vm9, %v11280_v46  ;;  %v4473_v46 = vshll.u32 %v4421_v59, 16 }
 0x1d3   : > { %v4496_v41 = vrot.slane %v4494_v16, 4 }
 0x1d4   : > { %v4475_v23 = vrot.slane %v4473_v46, 5  ;;  %v4531_v46 = vshrl.u32 %v14868_v4, 16 }
 0x1d9   : > { %12362 = vmatmul.mubr.msk.bf16.gmra.mrb[16].mxu0 %vm1545_vm9, %v17505_v18  ;;  %v11379_v18 = vrot.slane %v5156_v28, 9 }
 0x1da   : > { %12365 = vmatprep.mubr.msk.bf16.mxu0 %vm1545_vm9, %v17508_v6  ;;  %v14847_v6 = vrot.slane %v4479_v30, 5  ;;  %v4430_v30 = vld [vmem:[#allocation2 + $0x3c] sm:$0xf] }
 0x1db   : > { %v14853_v42 = vsel %vm14037_vm2, %v11379_v18, %v5276_v40 }
 0x1dc   : > { %17519 = vst [vmem:[#allocation9_spill] sm:$0xff] %v14853_v42 }
 0x1e1   : > { %12366 = vmatmul.mubr.msk.bf16.gmra.mrb[20].mxu0 %vm1545_vm9, %v17511_v36  ;;  %v4499_v36 = vrot.slane %v4497_v45, 5  ;;  %v13353_v45 = vld [vmem:[#allocation2 + $0xa8] sm:$0xff]  }
 0x1e2   : > { %12369 = vmatprep.mubr.msk.bf16.mxu0 %vm1545_vm9, %v11284_v3  ;;  %v14849_v3 = vld [vmem:[#allocation2 + $0x20] sm:$0x1] }
 0x1e9   : > { %12370 = vmatmul.mubr.msk.bf16.gmra.mrb[24].mxu0 %vm1545_vm9, %v17514_v62  ;;  %v4503_v62 = vshll.u32 %v14845_v15, 16 }
 0x1ea   : > { %12373 = vmatprep.mubr.msk.bf16.mxu0 %vm1545_vm9, %v17515_v7  ;;  %v4507_v7 = vshrl.u32 %v14845_v15, 16 }
 0x1eb   : > { %v14875_v11 = vrot.slane %v4503_v62, 5  ;;  %v4551_v62 = vshll.u32 %v14882_v10, 16 }
 0x1ec   : > { %v4509_v57 = vrot.slane %v4507_v7, 4  ;;  %v4533_v7 = vrot.slane %v4531_v46, 4  ;;  %v13354_v46 = vld [vmem:[#allocation2 + $0xb4] sm:$0xff]  }
 0x1f1   : > { %12374 = vmatmul.mubr.msk.bf16.gmra.mrb[28].mxu0 %vm1545_vm9, %v17517_v52  ;;  %v4476_v52 = vor.u32 %v4475_v23, %v4472_v13 }
 0x1f2   : > { %12379 = vmatprep.mubr.msk.bf16.mxu0 %vm1545_vm9, %v13341_v0  ;;  %v14859_v0 = vsel %vm14037_vm2, %v5278_v49, %v5279_v17  ;;  %v4510_v17 = vor.u32 %v4509_v57, %v14875_v11  ;;  %v5160_v57 = vld [vmem:[#allocation2 + $0xb4] sm:$0xe] }
 0x1f3   : > { %17520 = vst [vmem:[#allocation10_spill] sm:$0xff] %v14859_v0  ;;  %v4477_v59 = vrot.slane %v4476_v52, 4  ;;  %v4555_v52 = vshrl.u32 %v14882_v10, 16  ;;  %v4448_v0 = vld [vmem:[#allocation2 + $0x84] sm:$0xf] }
 0x1f4   : > { %v4689_v53 = vshll.u32 %v4448_v0, 16 }
 0x1f9   : > { %12380 = vmatmul.mubr.msk.bf16.vlgmr.msra.gmra.mrb[0].mxu0 %vm1545_vm9, %v13342_v51  ;;  %v4489_v51 = vshll.u32 %v14849_v3, 16 }
 0x1fa   : > { %12412 = vmatpush3.bf16.msra.mxu0 %v4952_v5  ;;  %12383 = vmatprep.mubr.msk.bf16.mxu0 %vm1545_vm9, %v13343_v54  ;;  %v14864_v54 = vld [vmem:[#allocation2 + $0x2c] sm:$0x1]  ;;  %v4427_v5 = vld [vmem:[#allocation2 + $0x30] sm:$0xf] }
 0x1fb   : > { %13305 = vmatprep.subr.msk.bf16.mxu0 %vm1594_vm0, %v14791_v9  ;;  %v4513_v22 = vshll.u32 %v14864_v54, 16  ;;  %v4518_v35 = vshrl.u32 %v4427_v5, 16  ;;  %v4521_v21 = vshll.u32 %v4427_v5, 16  ;;  %v4491_v28 = vrot.slane %v4489_v51, 5  ;;  %v14902_v51 = vld [vmem:[#allocation2 + $0xb8] sm:$0xf] }
 0x1fc   : > { %v14904_v5 = vld [vmem:[#allocation2 + $0xbc] sm:$0x1] }
 0x1fd   : > { %v4515_v13 = vrot.slane %v4513_v22, 5  ;;  %v4520_v23 = vrot.slane %v4518_v35, 4  ;;  %v4523_v49 = vrot.slane %v4521_v21, 5  ;;  %v4433_v21 = vld [vmem:[#allocation2 + $0x48] sm:$0xf] }
 0x1ff   : > { %v4524_v35 = vor.u32 %v4523_v49, %v4520_v23  ;;  %v4566_v23 = vshrl.u32 %v4433_v21, 16  ;;  %v4569_v49 = vshll.u32 %v4433_v21, 16 }
 0x201   : > { %12384 = vmatmul.mubr.msk.bf16.gmra.mrb[4].mxu0 %vm1545_vm9, %v13344_v61  ;;  %v4486_v61 = vor.u32 %v4485_v20, %v14847_v6  ;;  %v14895_v20 = vld [vmem:[#allocation2 + $0x38] sm:$0x1] }
 0x202   : > { %12387 = vmatprep.mubr.msk.bf16.mxu0 %vm1545_vm9, %v13345_v25  ;;  %v4500_v25 = vor.u32 %v4499_v36, %v4496_v41  ;;  %v4542_v36 = vshrl.u32 %v4430_v30, 16 }
 0x203   : > { %v4487_v12 = vrot.slane %v4486_v61, 4  ;;  %v4482_v61 = vsel %vm13571_vm11, %v4477_v59, %v14847_v6  ;;  %v14918_v59 = vld [vmem:[#allocation2 + $0x4c] sm:$0xf] }
 0x204   : > { %v4501_v40 = vrot.slane %v4500_v25, 4  ;;  %v4511_v25 = vrot.slane %v4510_v17, 4 }
 0x206   : > { %v4506_v22 = vsel %vm13571_vm11, %v4501_v40, %v14875_v11  ;;  %v13355_v40 = vld [vmem:[#allocation2 + $0xc0] sm:$0xff]   ;;  %v4516_v17 = vsel %vm13571_vm11, %v4511_v25, %v4515_v13 }
 0x207   : > { %v14941_v25 = vcombine.low %v4506_v22, %v4516_v17 }
 0x209   : > { %12388 = vmatmul.mubr.msk.bf16.gmra.mrb[8].mxu0 %vm1545_vm9, %v13346_v48  ;;  %v5158_v48 = vld [vmem:[#allocation2 + $0x9c] sm:$0xe] }
 0x20a   : > { %12391 = vmatprep.mubr.msk.bf16.mxu0 %vm1545_vm9, %v13347_v2  ;;  %v5290_v2 = vrot.slane %v14870_v1, 5  ;;  %v11381_v8 = vrot.slane %v5158_v48, 9  ;;  %v5304_v48 = vrot.slane %v14902_v51, 5 }
 0x20c   : > { %v5292_v37 = vrot.slane %v5290_v2, 4  ;;  %v14886_v16 = vsel %vm14037_vm2, %v11381_v8, %v5290_v2  ;;  %v5307_v2 = vrot.slane %v14904_v5, 5  ;;  %v11383_v8 = vrot.slane %v5160_v57, 9 }
 0x20d   : > { %17521 = vst [vmem:[#allocation11_spill] sm:$0xff] %v14886_v16  ;;  %v4568_v57 = vrot.slane %v4566_v23, 4 }
 0x20e   : > { %v14891_v18 = vsel %vm14037_vm2, %v5292_v37, %v5293_v24  ;;  %v4492_v24 = vsel %vm13571_vm11, %v4487_v12, %v4491_v28  ;;  %v5306_v37 = vrot.slane %v5304_v48, 4  ;;  %v14923_v12 = vrot.slane %v4551_v62, 5 }
 0x20f   : > { %17522 = vst [vmem:[#allocation12_spill] sm:$0xff] %v14891_v18  ;;  %v4557_v28 = vrot.slane %v4555_v52, 4  ;;  %v14927_v11 = vsel %vm14037_vm2, %v11383_v8, %v5304_v48  ;;  %v4575_v62 = vshll.u32 %v14918_v59, 16  ;;  %v4579_v52 = vshrl.u32 %v14918_v59, 16 }
 0x210   : > { %17523 = vst [vmem:[#allocation13_spill] sm:$0xff] %v14927_v11  ;;  %v4525_v48 = vrot.slane %v4524_v35, 4  ;;  %v4571_v35 = vrot.slane %v4569_v49, 5  ;;  %v4445_v11 = vld [vmem:[#allocation2 + $0x78] sm:$0xf] }
 0x211   : > { %12392 = vmatmul.mubr.msk.bf16.gmra.mrb[12].mxu0 %vm1545_vm9, %v13348_v34  ;;  %v13352_v34 = vld [vmem:[#allocation2 + $0x9c] sm:$0xff]   ;;  %v14953_v22 = vrot.slane %v4575_v62, 5  ;;  %v4603_v62 = vshrl.u32 %v14798_v60, 16 }
 0x212   : > { %12395 = vmatprep.mubr.msk.bf16.mxu0 %vm1545_vm9, %v13349_v32  ;;  %v4527_v32 = vshll.u32 %v14868_v4, 16 }
 0x214   : > { %v14897_v41 = vrot.slane %v4527_v32, 5  ;;  %v4544_v32 = vrot.slane %v4542_v36, 4  ;;  %v4436_v36 = vld [vmem:[#allocation2 + $0x54] sm:$0xf] }
 0x216   : > { %v4530_v29 = vsel %vm13571_vm11, %v4525_v48, %v14897_v41 }
 0x219   : > { %12396 = vmatmul.mubr.msk.bf16.gmra.mrb[16].mxu0 %vm1545_vm9, %v13350_v14 }
 0x21a   : > { %12399 = vmatprep.mubr.msk.bf16.mxu0 %vm1545_vm9, %v13351_v26  ;;  %v4545_v26 = vshll.u32 %v4430_v30, 16  ;;  %v4534_v30 = vor.u32 %v4533_v7, %v14897_v41  ;;  %v11338_v7 = vcombine.low %v4482_v61, %v4492_v24  ;;  %v4590_v61 = vshrl.u32 %v4436_v36, 16  ;;  %v14944_v24 = vld [vmem:[#allocation2 + $0xd0] sm:$0xf] }
 0x21c   : > { %v4547_v6 = vrot.slane %v4545_v26, 5  ;;  %v14933_v26 = vsel %vm14037_vm2, %v5306_v37, %v5307_v2  ;;  %v4535_v21 = vrot.slane %v4534_v30, 4  ;;  %v4558_v2 = vor.u32 %v4557_v28, %v14923_v12  ;;  %v14946_v37 = vld [vmem:[#allocation2 + $0xd4] sm:$0x1] }
 0x21d   : > { %17524 = vst [vmem:[#allocation14_spill] sm:$0xff] %v14933_v26  ;;  %v4581_v30 = vrot.slane %v4579_v52, 4  ;;  %v4593_v28 = vshll.u32 %v4436_v36, 16  ;;  %v4599_v26 = vshll.u32 %v14798_v60, 16  ;;  %v4439_v52 = vld [vmem:[#allocation2 + $0x60] sm:$0xf] }
 0x21e   : > { %v4548_v14 = vor.u32 %v4547_v6, %v4544_v32  ;;  %v5318_v32 = vrot.slane %v14944_v24, 5  ;;  %v5321_v6 = vrot.slane %v14946_v37, 5  ;;  %v14966_v36 = vld [vmem:[#allocation2 + $0x64] sm:$0xf]  ;;  %v14972_v41 = vrot.slane %v4558_v2, 4 }
 0x21f   : > { %v4595_v60 = vrot.slane %v4593_v28, 5  ;;  %v4614_v18 = vshrl.u32 %v4439_v52, 16  ;;  %v4617_v16 = vshll.u32 %v4439_v52, 16  ;;  %v4627_v2 = vshrl.u32 %v14966_v36, 16 }
 0x220   : > { %v5320_v49 = vrot.slane %v5318_v32, 4  ;;  %v4609_v52 = vshll.u32 %v14800_v38, 16  ;;  %v4662_v38 = vshrl.u32 %v4445_v11, 16 }
 0x221   : > { %12400 = vmatmul.mubr.msk.bf16.gmra.mrb[20].mxu0 %vm1545_vm9, %v13352_v34  ;;  %v4537_v34 = vshll.u32 %v14895_v20, 16 }
 0x222   : > { %12403 = vmatprep.mubr.msk.bf16.mxu0 %vm1545_vm9, %v13353_v45  ;;  %v14921_v45 = vld [vmem:[#allocation2 + $0x44] sm:$0x1] }
 0x223   : > { %v4539_v8 = vrot.slane %v4537_v34, 5  ;;  %v4561_v13 = vshll.u32 %v14921_v45, 16  ;;  %v5162_v34 = vld [vmem:[#allocation2 + $0xcc] sm:$0xe] }
 0x224   : > { %v11385_v17 = vrot.slane %v5162_v34, 9 }
 0x225   : > { %v14960_v23 = vrot.slane %v4561_v13, 5  ;;  %v4540_v19 = vsel %vm13571_vm11, %v4535_v21, %v4539_v8  ;;  %v14977_v13 = vsel %vm14037_vm2, %v5320_v49, %v5321_v6  ;;  %v4582_v8 = vor.u32 %v4581_v30, %v14953_v22  ;;  %v14998_v49 = vld [vmem:[#allocation2 + $0x68] sm:$0x1] }
 0x226   : > { %v14970_v34 = vsel %vm14037_vm2, %v11385_v17, %v5318_v32  ;;  %17526 = vst [vmem:[#allocation16_spill] sm:$0xff] %v14977_v13  ;;  %v4592_v21 = vrot.slane %v4590_v61, 4  ;;  %v4623_v32 = vshll.u32 %v14966_v36, 16  ;;  %v14987_v6 = vrot.slane %v4599_v26, 5  ;;  %v402_v61 = vld [vmem:[#allocation3 + $0x18] sm:$0x1] }
 0x227   : > { %17525 = vst [vmem:[#allocation15_spill] sm:$0xff] %v14970_v34  ;;  %v4605_v30 = vrot.slane %v4603_v62, 4  ;;  %v4583_v62 = vrot.slane %v4582_v8, 4  ;;  %v4629_v34 = vrot.slane %v4627_v2, 4  ;;  %v4651_v8 = vshrl.u32 %v14816_v31, 16 }
 0x228   : > { %v15003_v13 = vrot.slane %v4623_v32, 5 }
 0x229   : > { %12404 = vmatmul.mubr.msk.bf16.gmra.mrb[24].mxu0 %vm1545_vm9, %v13354_v46  ;;  %v14951_v46 = vld [vmem:[#allocation2 + $0x50] sm:$0x1] }
 0x22a   : > { %12407 = vmatprep.mubr.msk.bf16.mxu0 %vm1545_vm9, %v13355_v40  ;;  %v14958_v40 = vrot.slane %v4548_v14, 4  ;;  %v4572_v14 = vor.u32 %v4571_v35, %v4568_v57  ;;  %v4585_v48 = vshll.u32 %v14951_v46, 16  ;;  %v5422_v57 = vsel %vm1594_vm0, %v14791_v9, 0  ;;  %v4442_v9 = vld [vmem:[#allocation2 + $0x6c] sm:$0xf] }
 0x22b   : > { %v11340_v35 = vcombine.low %v4530_v29, %v4540_v19  ;;  %v403_v29 = vsel %vm13519_vm5, 0, %v402_v61  ;;  %v4638_v19 = vshrl.u32 %v4442_v9, 16  ;;  %v4641_v61 = vshll.u32 %v4442_v9, 16 }
 0x22c   : > { %v4554_v28 = vsel %vm13571_vm11, %v14958_v40, %v14923_v12  ;;  %v4587_v17 = vrot.slane %v4585_v48, 5  ;;  %v4573_v26 = vrot.slane %v4572_v14, 4  ;;  %404 = vst [vmem:[#allocation3 + $0x18] sm:$0x1] %v403_v29  ;;  %v4616_v12 = vrot.slane %v4614_v18, 4 }
 0x22d   : > { %v4619_v40 = vrot.slane %v4617_v16, 5  ;;  %v4633_v48 = vshll.u32 %v14998_v49, 16  ;;  %v4647_v14 = vshll.u32 %v14816_v31, 16  ;;  %v4630_v29 = vor.u32 %v4629_v34, %v15003_v13 }
 0x22e   : > { %v4578_v16 = vsel %vm13571_vm11, %v4573_v26, %v14953_v22  ;;  %v4588_v18 = vsel %vm13571_vm11, %v4583_v62, %v4587_v17  ;;  %v4640_v42 = vrot.slane %v4638_v19, 4  ;;  %v4643_v22 = vrot.slane %v4641_v61, 5 }
 0x22f   : > { %v4620_v9 = vor.u32 %v4619_v40, %v4616_v12  ;;  %v15022_v17 = vrot.slane %v4647_v14, 5  ;;  %v4653_v26 = vrot.slane %v4651_v8, 4  ;;  %v4664_v62 = vrot.slane %v4662_v38, 4 }
 0x230   : > { %v4686_v40 = vshrl.u32 %v4448_v0, 16  ;;  %v4695_v19 = vshll.u32 %v14838_v63, 16  ;;  %v4644_v8 = vor.u32 %v4643_v22, %v4640_v42  ;;  %v4657_v0 = vshll.u32 %v14818_v55, 16 }
 0x231   : > { %12408 = vmatmul.mubr.msk.bf16.gmra.mrb[28].mxu0 %vm1545_vm9, %v13356_v58  ;;  %v4564_v58 = vsel %vm13571_vm11, %v14972_v41, %v14960_v23  ;;  %v15005_v23 = vld [vmem:[#allocation2 + $0x7c] sm:$0xf]  ;;  %v4606_v41 = vor.u32 %v4605_v30, %v14987_v6  ;;  %v4611_v30 = vrot.slane %v4609_v52, 5  ;;  %v15024_v52 = vld [vmem:[#allocation2 + $0x80] sm:$0x1]  ;;  %v4654_v38 = vor.u32 %v4653_v26, %v15022_v17 }
 0x232   : > { %12413 = vmatprep.mubr.msk.bf16.mxu0 %vm1545_vm9, %v11338_v7  ;;  %v4596_v7 = vor.u32 %v4595_v60, %v4592_v21  ;;  %v4665_v21 = vshll.u32 %v4445_v11, 16  ;;  %v4671_v60 = vshll.u32 %v15005_v23, 16  ;;  %v4675_v32 = vshrl.u32 %v15005_v23, 16 }
 0x233   : > { %v4607_v31 = vrot.slane %v4606_v41, 4  ;;  %v4635_v11 = vrot.slane %v4633_v48, 5  ;;  %v4631_v41 = vrot.slane %v4630_v29, 4  ;;  %v11341_v48 = vcombine.low %v4554_v28, %v4564_v58 }
 0x234   : > { %v4597_v2 = vrot.slane %v4596_v7, 4  ;;  %v4667_v7 = vrot.slane %v4665_v21, 5  ;;  %v15026_v12 = vrot.slane %v4671_v60, 5  ;;  %v4677_v34 = vrot.slane %v4675_v32, 4  ;;  %v4451_v60 = vld [vmem:[#allocation2 + $0x90] sm:$0xf] }
 0x235   : > { %v4612_v14 = vsel %vm13571_vm11, %v4607_v31, %v4611_v30  ;;  %v4681_v21 = vshll.u32 %v15024_v52, 16  ;;  %v15038_v32 = vld [vmem:[#allocation2 + $0x94] sm:$0xf]  ;;  %v4688_v58 = vrot.slane %v4686_v40, 4  ;;  %v4636_v42 = vsel %vm13571_vm11, %v4631_v41, %v4635_v11 }
 0x236   : > { %v4602_v61 = vsel %vm13571_vm11, %v4597_v2, %v14987_v6  ;;  %v4678_v28 = vor.u32 %v4677_v34, %v15026_v12  ;;  %v4710_v2 = vshrl.u32 %v4451_v60, 16  ;;  %v4713_v30 = vshll.u32 %v4451_v60, 16  ;;  %v4454_v34 = vld [vmem:[#allocation2 + $0x9c] sm:$0xf] }
 0x237   : > { %v4723_v29 = vshrl.u32 %v15038_v32, 16  ;;  %v4655_v31 = vrot.slane %v4654_v38, 4  ;;  %v4659_v22 = vrot.slane %v4657_v0, 5  ;;  %v11343_v40 = vcombine.low %v4602_v61, %v4612_v14  ;;  %v4457_v61 = vld [vmem:[#allocation2 + $0xa8] sm:$0xf] }
 0x238   : > { %v4737_v0 = vshll.u32 %v4454_v34, 16  ;;  %v15063_v14 = vld [vmem:[#allocation2 + $0xac] sm:$0xf] }
 0x239   : > { %12414 = vmatmul.mubr.msk.bf16.vlgmr.msra.gmra.mrb[0].mxu0 %vm1545_vm9, %v14941_v25  ;;  %v4621_v25 = vrot.slane %v4620_v9, 4  ;;  %v4719_v9 = vshll.u32 %v15038_v32, 16  ;;  %v4660_v38 = vsel %vm13571_vm11, %v4655_v31, %v4659_v22 }
 0x23a   : > { %12446 = vmatpush3.bf16.msra.mxu0 %v5422_v57  ;;  %12417 = vmatprep.mubr.msk.bf16.mxu0 %vm1545_vm9, %v11340_v35  ;;  %v4699_v57 = vshrl.u32 %v14838_v63, 16  ;;  %v11342_v35 = vcombine.low %v4578_v16, %v4588_v18  ;;  %v4668_v63 = vor.u32 %v4667_v7, %v4664_v62  ;;  %v4691_v16 = vrot.slane %v4689_v53, 5 }
 0x23b   : > { %v4626_v6 = vsel %vm13571_vm11, %v4621_v25, %v15003_v13  ;;  %v15046_v18 = vrot.slane %v4695_v19, 5  ;;  %v4645_v53 = vrot.slane %v4644_v8, 4  ;;  %v4683_v13 = vrot.slane %v4681_v21, 5  ;;  %v15054_v19 = vld [vmem:[#allocation2 + $0x98] sm:$0x1] }
 0x23c   : > { %v4701_v55 = vrot.slane %v4699_v57, 4  ;;  %v4669_v26 = vrot.slane %v4668_v63, 4  ;;  %v4679_v62 = vrot.slane %v4678_v28, 4  ;;  %v4692_v11 = vor.u32 %v4691_v16, %v4688_v58 }
 0x23d   : > { %v4705_v7 = vshll.u32 %v14840_v56, 16  ;;  %v11344_v25 = vcombine.low %v4626_v6, %v4636_v42  ;;  %v4712_v57 = vrot.slane %v4710_v2, 4  ;;  %v15056_v60 = vrot.slane %v4719_v9, 5 }
 0x23e   : > { %v4702_v41 = vor.u32 %v4701_v55, %v15046_v18  ;;  %v4650_v8 = vsel %vm13571_vm11, %v4645_v53, %v15022_v17  ;;  %v4734_v56 = vshrl.u32 %v4454_v34, 16  ;;  %v4674_v21 = vsel %vm13571_vm11, %v4669_v26, %v15026_v12  ;;  %v15085_v34 = vld [vmem:[#allocation2 + $0xb0] sm:$0x1] }
 0x23f   : > { %v4684_v63 = vsel %vm13571_vm11, %v4679_v62, %v4683_v13  ;;  %v4693_v28 = vrot.slane %v4692_v11, 4  ;;  %v4707_v58 = vrot.slane %v4705_v7, 5  ;;  %v4729_v17 = vshll.u32 %v15054_v19, 16 }
 0x240   : > { %v4703_v16 = vrot.slane %v4702_v41, 4  ;;  %v4743_v6 = vshll.u32 %v14870_v1, 16  ;;  %v4747_v42 = vshrl.u32 %v14870_v1, 16  ;;  %v4758_v55 = vshrl.u32 %v4457_v61, 16 }
 0x241   : > { %12418 = vmatmul.mubr.msk.bf16.gmra.mrb[4].mxu0 %vm1545_vm9, %v11341_v48  ;;  %v4715_v48 = vrot.slane %v4713_v30, 5  ;;  %v4761_v2 = vshll.u32 %v4457_v61, 16  ;;  %v4767_v30 = vshll.u32 %v15063_v14, 16  ;;  %v4771_v12 = vshrl.u32 %v15063_v14, 16 }
 0x242   : > { %12421 = vmatprep.mubr.msk.bf16.mxu0 %vm1545_vm9, %v11342_v35  ;;  %v4725_v35 = vrot.slane %v4723_v29, 4  ;;  %v4736_v53 = vrot.slane %v4734_v56, 4  ;;  %v4739_v31 = vrot.slane %v4737_v0, 5  ;;  %v11345_v22 = vcombine.low %v4650_v8, %v4660_v38 }
 0x243   : > { %v4716_v9 = vor.u32 %v4715_v48, %v4712_v57  ;;  %v11346_v13 = vcombine.low %v4674_v21, %v4684_v63  ;;  %v4698_v1 = vsel %vm13571_vm11, %v4693_v28, %v15046_v18  ;;  %v4708_v26 = vsel %vm13571_vm11, %v4703_v16, %v4707_v58  ;;  %v4460_v48 = vld [vmem:[#allocation2 + $0xb4] sm:$0xf]  ;;  %v4463_v28 = vld [vmem:[#allocation2 + $0xc0] sm:$0xf]  ;;  %v15090_v58 = vld [vmem:[#allocation2 + $0xc4] sm:$0xf] }
 0x244   : > { %v4726_v29 = vor.u32 %v4725_v35, %v15056_v60  ;;  %v4731_v62 = vrot.slane %v4729_v17, 5  ;;  %v15083_v11 = vrot.slane %v4743_v6, 5  ;;  %v4749_v7 = vrot.slane %v4747_v42, 4 }
 0x245   : > { %v4769_v41 = vrot.slane %v4767_v30, 5  ;;  %v4773_v57 = vrot.slane %v4771_v12, 4  ;;  %v4717_v35 = vrot.slane %v4716_v9, 4  ;;  %v4740_v38 = vor.u32 %v4739_v31, %v4736_v53 }
 0x246   : > { %v4727_v8 = vrot.slane %v4726_v29, 4  ;;  %v4753_v56 = vshll.u32 %v14872_v50, 16  ;;  %v4777_v18 = vshll.u32 %v15085_v34, 16  ;;  %v11347_v0 = vcombine.low %v4698_v1, %v4708_v26 }
 0x247   : > { %v4750_v61 = vor.u32 %v4749_v7, %v15083_v11  ;;  %v4782_v21 = vshrl.u32 %v4460_v48, 16  ;;  %v4785_v63 = vshll.u32 %v4460_v48, 16  ;;  %v4774_v17 = vor.u32 %v4773_v57, %v4769_v41 }
 0x248   : > { %v4791_v6 = vshll.u32 %v14902_v51, 16  ;;  %v4795_v42 = vshrl.u32 %v14902_v51, 16  ;;  %v4722_v50 = vsel %vm13571_vm11, %v4717_v35, %v15056_v60  ;;  %v4755_v30 = vrot.slane %v4753_v56, 5  ;;  %v4466_v35 = vld [vmem:[#allocation2 + $0xcc] sm:$0xf] }
 0x249   : > { %12422 = vmatmul.mubr.msk.bf16.gmra.mrb[8].mxu0 %vm1545_vm9, %v11343_v40  ;;  %v4760_v40 = vrot.slane %v4758_v55, 4  ;;  %v4732_v55 = vsel %vm13571_vm11, %v4727_v8, %v4731_v62  ;;  %v4806_v12 = vshrl.u32 %v4463_v28, 16  ;;  %v4809_v9 = vshll.u32 %v4463_v28, 16 }
 0x24a   : > { %12425 = vmatprep.mubr.msk.bf16.mxu0 %vm1545_vm9, %v11344_v25  ;;  %v4763_v25 = vrot.slane %v4761_v2, 5  ;;  %v4741_v2 = vrot.slane %v4740_v38, 4  ;;  %v4815_v29 = vshll.u32 %v15090_v58, 16  ;;  %v4819_v53 = vshrl.u32 %v15090_v58, 16 }
 0x24b   : > { %v4751_v31 = vrot.slane %v4750_v61, 4  ;;  %v4784_v51 = vrot.slane %v4782_v21, 4  ;;  %v4787_v1 = vrot.slane %v4785_v63, 5  ;;  %v4775_v26 = vrot.slane %v4774_v17, 4 }
 0x24c   : > { %v4764_v16 = vor.u32 %v4763_v25, %v4760_v40  ;;  %v4793_v7 = vrot.slane %v4791_v6, 5  ;;  %v4797_v40 = vrot.slane %v4795_v42, 4  ;;  %v11348_v60 = vcombine.low %v4722_v50, %v4732_v55 }
 0x24d   : > { %v4808_v25 = vrot.slane %v4806_v12, 4  ;;  %v4811_v57 = vrot.slane %v4809_v9, 5  ;;  %v4817_v62 = vrot.slane %v4815_v29, 5  ;;  %v4821_v48 = vrot.slane %v4819_v53, 4 }
 0x24e   : > { %v4746_v8 = vsel %vm13571_vm11, %v4741_v2, %v15083_v11  ;;  %v4756_v38 = vsel %vm13571_vm11, %v4751_v31, %v4755_v30  ;;  %v4788_v56 = vor.u32 %v4787_v1, %v4784_v51  ;;  %v4798_v63 = vor.u32 %v4797_v40, %v4793_v7 }
 0x24f   : > { %v4801_v28 = vshll.u32 %v14904_v5, 16  ;;  %v4830_v11 = vshrl.u32 %v4466_v35, 16  ;;  %v4839_v17 = vshll.u32 %v14944_v24, 16  ;;  %v4843_v6 = vshrl.u32 %v14944_v24, 16 }
 0x250   : > { %v4812_v42 = vor.u32 %v4811_v57, %v4808_v25  ;;  %v4822_v50 = vor.u32 %v4821_v48, %v4817_v62  ;;  %v11349_v55 = vcombine.low %v4746_v8, %v4756_v38  ;;  %v4789_v2 = vrot.slane %v4788_v56, 4  ;;  %v5147_v48 = vld [vmem:[#allocation2 + $0x18] sm:$0xe] }
 0x251   : > { %12426 = vmatmul.mubr.msk.bf16.gmra.mrb[12].mxu0 %vm1545_vm9, %v11345_v22  ;;  %v4779_v22 = vrot.slane %v4777_v18, 5  ;;  %v15108_v18 = vld [vmem:[#allocation2 + $0xc8] sm:$0x1]  ;;  %v4799_v30 = vrot.slane %v4798_v63, 4  ;;  %v4803_v12 = vrot.slane %v4801_v28, 5  ;;  %v4832_v9 = vrot.slane %v4830_v11, 4 }
 0x252   : > { %12429 = vmatprep.mubr.msk.bf16.mxu0 %vm1545_vm9, %v11346_v13  ;;  %v4765_v13 = vrot.slane %v4764_v16, 4  ;;  %v4833_v16 = vshll.u32 %v4466_v35, 16  ;;  %v4841_v5 = vrot.slane %v4839_v17, 5  ;;  %v4845_v53 = vrot.slane %v4843_v6, 4  ;;  %v5149_v17 = vld [vmem:[#allocation2 + $0x30] sm:$0xe] }
 0x253   : > { %v4780_v21 = vsel %vm13571_vm11, %v4775_v26, %v4779_v22  ;;  %v4813_v31 = vrot.slane %v4812_v42, 4  ;;  %v4823_v22 = vrot.slane %v4822_v50, 4  ;;  %v4794_v24 = vsel %vm13571_vm11, %v4789_v2, %v4793_v7 }
 0x254   : > { %v4770_v61 = vsel %vm13571_vm11, %v4765_v13, %v4769_v41  ;;  %v4835_v29 = vrot.slane %v4833_v16, 5  ;;  %v4804_v1 = vsel %vm13571_vm11, %v4799_v30, %v4803_v12  ;;  %v4846_v26 = vor.u32 %v4845_v53, %v4841_v5  ;;  %v5148_v16 = vld [vmem:[#allocation2 + $0x24] sm:$0xe] }
 0x255   : > { %v11350_v41 = vcombine.low %v4770_v61, %v4780_v21  ;;  %v4849_v40 = vshll.u32 %v14946_v37, 16  ;;  %v5213_v57 = vrot.slane %v14823_v27, 5  ;;  %v11351_v35 = vcombine.low %v4794_v24, %v4804_v1 }
 0x256   : > { %v4836_v13 = vor.u32 %v4835_v29, %v4832_v9  ;;  %v4847_v38 = vrot.slane %v4846_v26, 4  ;;  %v11370_v61 = vrot.slane %v5147_v48, 9  ;;  %v5216_v63 = vrot.slane %v14849_v3, 5  ;;  %v5150_v29 = vld [vmem:[#allocation2 + $0x3c] sm:$0xe] }
 0x257   : > { %v4851_v56 = vrot.slane %v4849_v40, 5  ;;  %v5215_v21 = vrot.slane %v5213_v57, 4  ;;  %v5227_v3 = vrot.slane %v14868_v4, 5  ;;  %v11371_v50 = vrot.slane %v5148_v16, 9 }
 0x258   : > { %v4837_v8 = vrot.slane %v4836_v13, 4  ;;  %v5214_v28 = vsel %vm14037_vm2, %v11370_v61, %v5213_v57  ;;  %v5234_v12 = vrot.slane %v14882_v10, 5  ;;  %v5237_v24 = vrot.slane %v14921_v45, 5 }
 0x259   : > { %12430 = vmatmul.mubr.msk.bf16.gmra.mrb[16].mxu0 %vm1545_vm9, %v11347_v0  ;;  %v4825_v0 = vshll.u32 %v15108_v18, 16  ;;  %v4852_v27 = vsel %vm13571_vm11, %v4847_v38, %v4851_v56  ;;  %v5217_v11 = vsel %vm14037_vm2, %v5215_v21, %v5216_v63  ;;  %v5229_v2 = vrot.slane %v5227_v3, 4 }
 0x25a   : > { %12433 = vmatprep.mubr.msk.bf16.mxu0 %vm1545_vm9, %v11348_v60  ;;  %v4818_v60 = vsel %vm13571_vm11, %v4813_v31, %v4817_v62  ;;  %v4842_v37 = vsel %vm13571_vm11, %v4837_v8, %v4841_v5  ;;  %v5220_v62 = vrot.slane %v14845_v15, 5  ;;  %v11387_v42 = vcombine.low %v5214_v28, %v5217_v11  ;;  %v5151_v5 = vld [vmem:[#allocation2 + $0x48] sm:$0xe]  ;;  %v5157_v28 = vld [vmem:[#allocation2 + $0x90] sm:$0xe] }
 0x25b   : > { %v4827_v51 = vrot.slane %v4825_v0, 5  ;;  %v11353_v6 = vcombine.low %v4842_v37, %v4852_v27  ;;  %v5230_v15 = vrot.slane %v14895_v20, 5  ;;  %v5241_v20 = vrot.slane %v14918_v59, 5 }
 0x25c   : > { %v5222_v0 = vrot.slane %v5220_v62, 4  ;;  %v5221_v30 = vsel %vm14037_vm2, %v11371_v50, %v5220_v62  ;;  %v11374_v1 = vrot.slane %v5151_v5, 9  ;;  %v5244_v10 = vrot.slane %v14951_v46, 5 }
 0x25d   : > { %v4828_v25 = vsel %vm13571_vm11, %v4823_v22, %v4827_v51  ;;  %v11373_v22 = vrot.slane %v5150_v29, 9  ;;  %v5236_v51 = vrot.slane %v5234_v12, 4  ;;  %v5243_v13 = vrot.slane %v5241_v20, 4  ;;  %v17534_v29 = vld [vmem:[#allocation11_spill] sm:$0xff] }
 0x25e   : > { %v11352_v7 = vcombine.low %v4818_v60, %v4828_v25  ;;  %v5242_v40 = vsel %vm14037_vm2, %v11374_v1, %v5241_v20  ;;  %v5255_v60 = vrot.slane %v14966_v36, 5  ;;  %v5153_v25 = vld [vmem:[#allocation2 + $0x60] sm:$0xe]  ;;  %v5269_v56 = vrot.slane %v15005_v23, 5  ;;  %v5155_v36 = vld [vmem:[#allocation2 + $0x78] sm:$0xe] }
 0x25f   : > { %v5235_v26 = vsel %vm14037_vm2, %v11373_v22, %v5234_v12  ;;  %v5238_v59 = vsel %vm14037_vm2, %v5236_v51, %v5237_v24  ;;  %v5245_v45 = vsel %vm14037_vm2, %v5243_v13, %v5244_v10  ;;  %v11376_v48 = vrot.slane %v5153_v25, 9  ;;  %v17535_v20 = vld [vmem:[#allocation12_spill] sm:$0xff]  ;;  %v17537_v22 = vld [vmem:[#allocation13_spill] sm:$0xff]  ;;  %v17538_v51 = vld [vmem:[#allocation14_spill] sm:$0xff] }
 0x260   : > { %v11390_v46 = vcombine.low %v5235_v26, %v5238_v59  ;;  %v11391_v57 = vcombine.low %v5242_v40, %v5245_v45  ;;  %v11378_v21 = vrot.slane %v5155_v36, 9  ;;  %v5271_v63 = vrot.slane %v5269_v56, 4  ;;  %v17541_v1 = vld [vmem:[#allocation16_spill] sm:$0xff]  ;;  %v399_v10 = vld [vmem:[#allocation3 + $0xc] sm:$0x1] }
 0x261   : > { %12434 = vmatmul.mubr.msk.bf16.gmra.mrb[20].mxu0 %vm1545_vm9, %v11349_v55  ;;  %v5223_v55 = vrot.slane %v14864_v54, 5  ;;  %v5231_v54 = vsel %vm14037_vm2, %v5229_v2, %v5230_v15  ;;  %v5256_v8 = vsel %vm14037_vm2, %v11376_v48, %v5255_v60  ;;  %v5272_v37 = vrot.slane %v15024_v52, 5  ;;  %v450_v40 = vld [vmem:[#allocation3 + $0x20] sm:$0x1]  ;;  %v447_v25 = vld [vmem:[#allocation3 + $0x14] sm:$0x1] }
 0x262   : > { %12437 = vmatprep.mubr.msk.bf16.mxu0 %vm1545_vm9, %v11350_v41  ;;  %v11372_v41 = vrot.slane %v5149_v17, 9  ;;  %v5270_v27 = vsel %vm14037_vm2, %v11378_v21, %v5269_v56  ;;  %v5283_v23 = vrot.slane %v15038_v32, 5  ;;  %v11380_v16 = vrot.slane %v5157_v28, 9  ;;  %v453_v56 = vld [vmem:[#allocation3 + $0x2c] sm:$0x1] }
 0x263   : > { %v5224_v4 = vsel %vm14037_vm2, %v5222_v0, %v5223_v55  ;;  %v5273_v62 = vsel %vm14037_vm2, %v5271_v63, %v5272_v37  ;;  %v5286_v52 = vrot.slane %v15054_v19, 5  ;;  %v5297_v32 = vrot.slane %v15063_v14, 5  ;;  %v411_v63 = vld [vmem:[#allocation3 + $0x3c] sm:$0x1]  ;;  %v420_v28 = vld [vmem:[#allocation3 + $0x60] sm:$0x1] }
 0x264   : > { %v5228_v9 = vsel %vm14037_vm2, %v11372_v41, %v5227_v3  ;;  %v11388_v53 = vcombine.low %v5221_v30, %v5224_v4  ;;  %v11395_v11 = vcombine.low %v5270_v27, %v5273_v62  ;;  %v5285_v3 = vrot.slane %v5283_v23, 4  ;;  %v17531_v41 = vld [vmem:[#allocation9_spill] sm:$0xff]  ;;  %v5161_v4 = vld [vmem:[#allocation2 + $0xc0] sm:$0xe] }
 0x265   : > { %v11389_v31 = vcombine.low %v5228_v9, %v5231_v54  ;;  %v5284_v17 = vsel %vm14037_vm2, %v11380_v16, %v5283_v23  ;;  %v5299_v55 = vrot.slane %v5297_v32, 4  ;;  %v5300_v19 = vrot.slane %v15085_v34, 5  ;;  %v459_v62 = vld [vmem:[#allocation3 + $0x44] sm:$0x1]  ;;  %v417_v16 = vld [vmem:[#allocation3 + $0x54] sm:$0x1] }
 0x266   : > { %v5311_v14 = vrot.slane %v15090_v58, 5  ;;  %v11384_v9 = vrot.slane %v5161_v4, 9  ;;  %v5314_v34 = vrot.slane %v15108_v18, 5  ;;  %v17536_v5 = vcombine.low %v17534_v29, %v17535_v20  ;;  %v17540_v18 = vld [vmem:[#allocation15_spill] sm:$0xff] }
 0x267   : > { %v5301_v30 = vsel %vm14037_vm2, %v5299_v55, %v5300_v19  ;;  %v17539_v24 = vcombine.low %v17537_v22, %v17538_v51  ;;  %v17542_v13 = vcombine.low %v17540_v18, %v17541_v1  ;;  %v400_v59 = vsel %vm13519_vm5, 0, %v399_v10  ;;  %v471_v1 = vld [vmem:[#allocation3 + $0x74] sm:$0x1]  ;;  %v15283_v10 = vld [vmem:[%s17342_s4] sm:$0x3] }
 0x268   : > { %v5313_v54 = vrot.slane %v5311_v14, 4  ;;  %401 = vst [vmem:[#allocation3 + $0xc] sm:$0x1] %v400_v59  ;;  %v454_v36 = vsel %vm13528_vm6, 0, %v453_v56  ;;  %v412_v37 = vsel %vm13519_vm5, 0, %v411_v63  ;;  %v460_v23 = vsel %vm13528_vm6, 0, %v459_v62 }
 0x269   : > { %12438 = vmatmul.mubr.msk.bf16.gmra.mrb[24].mxu0 %vm1545_vm9, %v11351_v35  ;;  %v5257_v35 = vrot.slane %v5255_v60, 4  ;;  %v451_v60 = vsel %vm13528_vm6, 0, %v450_v40  ;;  %455 = vst [vmem:[#allocation3 + $0x2c] sm:$0x1] %v454_v36  ;;  %413 = vst [vmem:[#allocation3 + $0x3c] sm:$0x1] %v412_v37 }
 0x26a   : > { %12441 = vmatprep.mubr.msk.bf16.mxu0 %vm1545_vm9, %v11352_v7  ;;  %v5258_v7 = vrot.slane %v14998_v49, 5  ;;  %v17528_v49 = vcombine.low %v14807_v47, %v14811_v33  ;;  %v17529_v47 = vld [vmem:[#allocation8_spill] sm:$0xff]  ;;  %452 = vst [vmem:[#allocation3 + $0x20] sm:$0x1] %v451_v60  ;;  %461 = vst [vmem:[#allocation3 + $0x44] sm:$0x1] %v460_v23 }
 0x26b   : > { %v17530_v33 = vcombine.low %v14827_v39, %v17529_v47  ;;  %v17532_v39 = vld [vmem:[#allocation10_spill] sm:$0xff]  ;;  %v432_v59 = vld [vmem:[#allocation3 + $0x90] sm:$0x1]  ;;  %v429_v60 = vld [vmem:[#allocation3 + $0x84] sm:$0x1] }
 0x26c   : > { %v5259_v38 = vsel %vm14037_vm2, %v5257_v35, %v5258_v7  ;;  %v17533_v2 = vcombine.low %v17531_v41, %v17532_v39  ;;  %v405_v35 = vld [vmem:[#allocation3 + $0x24] sm:$0x1]  ;;  %v11453_v41 = vld [vmem:[%s17342_s4 + $0x2] sm:$0x3]  ;;  %v433_v40 = vsel %vm13519_vm5, 0, %v432_v59 }
 0x26d   : > { %v11393_v61 = vcombine.low %v5256_v8, %v5259_v38  ;;  %v406_v7 = vsel %vm13519_vm5, 0, %v405_v35  ;;  %v456_v8 = vld [vmem:[#allocation3 + $0x38] sm:$0x1]  ;;  %13306 = vmatprep.subr.msk.bf16.mxu1 %vm1594_vm0, %v11453_v41  ;;  %434 = vst [vmem:[#allocation3 + $0x90] sm:$0x1] %v433_v40 }
 0x26e   : > { %407 = vst [vmem:[#allocation3 + $0x24] sm:$0x1] %v406_v7  ;;  %v457_v38 = vsel %vm13528_vm6, 0, %v456_v8  ;;  %v438_v7 = vld [vmem:[#allocation3 + $0xa8] sm:$0x1] }
 0x26f   : > { %458 = vst [vmem:[#allocation3 + $0x38] sm:$0x1] %v457_v38  ;;  %v439_v8 = vsel %vm13519_vm5, 0, %v438_v7  ;;  %v435_v38 = vld [vmem:[#allocation3 + $0x9c] sm:$0x1] }
 0x270   : > { %440 = vst [vmem:[#allocation3 + $0xa8] sm:$0x1] %v439_v8  ;;  %v436_v56 = vsel %vm13519_vm5, 0, %v435_v38  ;;  %v486_v36 = vld [vmem:[#allocation3 + $0xb0] sm:$0x1] }
 0x271   : > { %12442 = vmatmul.mubr.msk.bf16.gmra.mrb[28].mxu0 %vm1545_vm9, %v11353_v6  ;;  %v5287_v6 = vsel %vm14037_vm2, %v5285_v3, %v5286_v52  ;;  %v418_v3 = vsel %vm13519_vm5, 0, %v417_v16  ;;  %v468_v52 = vld [vmem:[#allocation3 + $0x68] sm:$0x1]  ;;  %437 = vst [vmem:[#allocation3 + $0x9c] sm:$0x1] %v436_v56 }
 0x272   : > { %12447 = vmatprep.mubr.msk.bf16.mxu0 %vm1545_vm9, %v11387_v42  ;;  %v5159_v42 = vld [vmem:[#allocation2 + $0xa8] sm:$0xe]  ;;  %v11397_v50 = vcombine.low %v5284_v17, %v5287_v6  ;;  %419 = vst [vmem:[#allocation3 + $0x54] sm:$0x1] %v418_v3  ;;  %v469_v47 = vsel %vm13528_vm6, 0, %v468_v52 }
 0x273   : > { %v11382_v0 = vrot.slane %v5159_v42, 9  ;;  %470 = vst [vmem:[#allocation3 + $0x68] sm:$0x1] %v469_v47  ;;  %v6256_v17 = vld [vmem:[#allocation3 + $0x4] sm:$0xf] }
 0x274   : > { %v465_v42 = vld [vmem:[#allocation3 + $0x5c] sm:$0x1]  ;;  %v6318_v55 = vshrl.u32 %v6256_v17, 16  ;;  %v444_v37 = vld [vmem:[#allocation3 + $0xc0] sm:$0x1] }
 0x275   : > { %v5298_v15 = vsel %vm14037_vm2, %v11382_v0, %v5297_v32  ;;  %v6314_v0 = vshll.u32 %v6256_v17, 16  ;;  %v466_v19 = vsel %vm13528_vm6, 0, %v465_v42  ;;  %v492_v23 = vld [vmem:[#allocation3 + $0xc8] sm:$0x1]  ;;  %v6150_v59 = vld [vmem:[#allocation3 + $0x18] sm:$0xf] }
 0x276   : > { %v11399_v12 = vcombine.low %v5298_v15, %v5301_v30  ;;  %467 = vst [vmem:[#allocation3 + $0x5c] sm:$0x1] %v466_v19  ;;  %v15314_v3 = vld [vmem:[%s17340_s2] ss:$0 sm:$0xff] }
 0x277   : > { %v6316_v30 = vrot.slane %v6314_v0, 5  ;;  %v15319_v47 = vld [vmem:[%s17341_s3] ss:$0 sm:$0xff] }
 0x279   : > { %12448 = vmatmul.mubr.msk.bf16.vlgmr.msra.gmra.mrb[0].mxu0 %vm1545_vm9, %v11388_v53  ;;  %v5312_v53 = vsel %vm14037_vm2, %v11384_v9, %v5311_v14  ;;  %v6320_v14 = vrot.slane %v6318_v55, 4 }
 0x27a   : > { %12451 = vmatprep.mubr.msk.bf16.mxu0 %vm1545_vm9, %v11389_v31  ;;  %v5315_v31 = vsel %vm14037_vm2, %v5313_v54, %v5314_v34  ;;  %v426_v34 = vld [vmem:[#allocation3 + $0x78] sm:$0x1] }
 0x27b   : > { %v11401_v58 = vcombine.low %v5312_v53, %v5315_v31  ;;  %v6321_v9 = vor.u32 %v6320_v14, %v6316_v30  ;;  %v427_v20 = vsel %vm13519_vm5, 0, %v426_v34 }
 0x27c   : > { %428 = vst [vmem:[#allocation3 + $0x78] sm:$0x1] %v427_v20 }
 0x27d   : > { %v6322_v53 = vrot.slane %v6321_v9, 4 }
 0x281   : > { %12452 = vmatmul.mubr.msk.bf16.gmra.mrb[4].mxu0 %vm1545_vm9, %v11390_v46  ;;  %v448_v46 = vsel %vm13528_vm6, 0, %v447_v25  ;;  %v430_v25 = vsel %vm13519_vm5, 0, %v429_v60 }
 0x282   : > { %12455 = vmatprep.mubr.msk.bf16.mxu0 %vm1545_vm9, %v11391_v57  ;;  %449 = vst [vmem:[#allocation3 + $0x14] sm:$0x1] %v448_v46  ;;  %v408_v57 = vld [vmem:[#allocation3 + $0x30] sm:$0x1]  ;;  %v480_v46 = vld [vmem:[#allocation3 + $0x98] sm:$0x1] }
 0x283   : > { %v409_v48 = vsel %vm13519_vm5, 0, %v408_v57  ;;  %v477_v57 = vld [vmem:[#allocation3 + $0x8c] sm:$0x1]  ;;  %431 = vst [vmem:[#allocation3 + $0x84] sm:$0x1] %v430_v25 }
 0x284   : > { %410 = vst [vmem:[#allocation3 + $0x30] sm:$0x1] %v409_v48  ;;  %v481_v48 = vsel %vm13528_vm6, 0, %v480_v46  ;;  %v478_v35 = vsel %vm13528_vm6, 0, %v477_v57 }
 0x285   : > { %482 = vst [vmem:[#allocation3 + $0x98] sm:$0x1] %v481_v48  ;;  %479 = vst [vmem:[#allocation3 + $0x8c] sm:$0x1] %v478_v35  ;;  %v6143_v35 = vld [vmem:[#allocation3 + $0xc] sm:$0xf] }
 0x289   : > { %12456 = vmatmul.mubr.msk.bf16.gmra.mrb[8].mxu0 %vm1545_vm9, %v17528_v49  ;;  %v462_v49 = vld [vmem:[#allocation3 + $0x50] sm:$0x1] }
 0x28a   : > { %12459 = vmatprep.mubr.msk.bf16.mxu0 %vm1545_vm9, %v11393_v61  ;;  %v414_v61 = vld [vmem:[#allocation3 + $0x48] sm:$0x1]  ;;  %v463_v27 = vsel %vm13528_vm6, 0, %v462_v49  ;;  %v445_v49 = vsel %vm13519_vm5, 0, %v444_v37 }
 0x28b   : > { %v415_v21 = vsel %vm13519_vm5, 0, %v414_v61  ;;  %464 = vst [vmem:[#allocation3 + $0x50] sm:$0x1] %v463_v27  ;;  %v487_v61 = vsel %vm13528_vm6, 0, %v486_v36  ;;  %446 = vst [vmem:[#allocation3 + $0xc0] sm:$0x1] %v445_v49 }
 0x28c   : > { %416 = vst [vmem:[#allocation3 + $0x48] sm:$0x1] %v415_v21  ;;  %v483_v21 = vld [vmem:[#allocation3 + $0xa4] sm:$0x1]  ;;  %488 = vst [vmem:[#allocation3 + $0xb0] sm:$0x1] %v487_v61 }
 0x28d   : > { %v484_v63 = vsel %vm13528_vm6, 0, %v483_v21  ;;  %v441_v27 = vld [vmem:[#allocation3 + $0xb4] sm:$0x1]  ;;  %v6154_v36 = vld [vmem:[#allocation3 + $0x20] sm:$0x1] }
 0x28e   : > { %485 = vst [vmem:[#allocation3 + $0xa4] sm:$0x1] %v484_v63  ;;  %v442_v62 = vsel %vm13519_vm5, 0, %v441_v27 }
 0x28f   : > { %443 = vst [vmem:[#allocation3 + $0xb4] sm:$0x1] %v442_v62  ;;  %v6147_v62 = vld [vmem:[#allocation3 + $0x14] sm:$0x1] }
 0x291   : > { %12460 = vmatmul.mubr.msk.bf16.gmra.mrb[12].mxu0 %vm1545_vm9, %v17530_v33  ;;  %v6255_v33 = vld [vmem:[#allocation3] sm:$0xf] }
 0x292   : > { %12463 = vmatprep.mubr.msk.bf16.mxu0 %vm1545_vm9, %v11395_v11  ;;  %v421_v11 = vsel %vm13519_vm5, 0, %v420_v28  ;;  %v6305_v6 = vshrl.u32 %v6255_v33, 16  ;;  %v6308_v32 = vshll.u32 %v6255_v33, 16  ;;  %v489_v28 = vld [vmem:[#allocation3 + $0xbc] sm:$0x1] }
 0x293   : > { %422 = vst [vmem:[#allocation3 + $0x60] sm:$0x1] %v421_v11  ;;  %v493_v11 = vsel %vm13528_vm6, 0, %v492_v23  ;;  %v490_v16 = vsel %vm13528_vm6, 0, %v489_v28 }
 0x294   : > { %v6307_v39 = vrot.slane %v6305_v6, 4  ;;  %494 = vst [vmem:[#allocation3 + $0xc8] sm:$0x1] %v493_v11  ;;  %491 = vst [vmem:[#allocation3 + $0xbc] sm:$0x1] %v490_v16 }
 0x299   : > { %12464 = vmatmul.mubr.msk.bf16.gmra.mrb[16].mxu0 %vm1545_vm9, %v17533_v2  ;;  %v6310_v2 = vrot.slane %v6308_v32, 5 }
 0x29a   : > { %12467 = vmatprep.mubr.msk.bf16.mxu0 %vm1545_vm9, %v11397_v50  ;;  %v6288_v50 = vld [vmem:[#allocation3 + $0x8] sm:$0x1] }
 0x29b   : > { %v6324_v15 = vshll.u32 %v6288_v50, 16  ;;  %v6311_v4 = vor.u32 %v6310_v2, %v6307_v39 }
 0x29d   : > { %v6326_v54 = vrot.slane %v6324_v15, 5  ;;  %v6312_v29 = vrot.slane %v6311_v4, 4 }
 0x29f   : > { %v6317_v22 = vsel %vm13571_vm11, %v6312_v29, %v6316_v30 }
 0x2a1   : > { %12468 = vmatmul.mubr.msk.bf16.gmra.mrb[20].mxu0 %vm1545_vm9, %v17536_v5  ;;  %v423_v5 = vld [vmem:[#allocation3 + $0x6c] sm:$0x1] }
 0x2a2   : > { %12471 = vmatprep.mubr.msk.bf16.mxu0 %vm1545_vm9, %v11399_v12  ;;  %v6787_v12 = vsel %vm1594_vm0, %v11453_v41, 0  ;;  %v424_v31 = vsel %vm13519_vm5, 0, %v423_v5 }
 0x2a3   : > { %12480 = vmatpush3.bf16.msra.mxu1 %v6787_v12  ;;  %425 = vst [vmem:[#allocation3 + $0x6c] sm:$0x1] %v424_v31 }
 0x2a4   : > { %13307 = vmatprep.subr.msk.bf16.mxu1 %vm1594_vm0, %v15283_v10 }
 0x2a9   : > { %12472 = vmatmul.mubr.msk.bf16.gmra.mrb[24].mxu0 %vm1545_vm9, %v17539_v24  ;;  %v6327_v24 = vsel %vm13571_vm11, %v6322_v53, %v6326_v54 }
 0x2aa   : > { %12475 = vmatprep.mubr.msk.bf16.mxu0 %vm1545_vm9, %v11401_v58  ;;  %v474_v58 = vld [vmem:[#allocation3 + $0x80] sm:$0x1]  ;;  %v11454_v18 = vcombine.low %v6317_v22, %v6327_v24 }
 0x2ab   : > { %v475_v51 = vsel %vm13528_vm6, 0, %v474_v58 }
 0x2ac   : > { %476 = vst [vmem:[#allocation3 + $0x80] sm:$0x1] %v475_v51  ;;  %12481 = vmatprep.mubr.msk.bf16.mxu1 %vm1545_vm9, %v11454_v18 }
 0x2b1   : > { %12476 = vmatmul.mubr.msk.bf16.gmra.mrb[28].mxu0 %vm1545_vm9, %v17542_v13  ;;  %v472_v13 = vsel %vm13528_vm6, 0, %v471_v1 }
 0x2b2   : > { %473 = vst [vmem:[#allocation3 + $0x74] sm:$0x1] %v472_v13 }
 0x34c   : > { %v12449_v52 = vpop.f32.mrb[0].mxu0 }
 0x34d   : > { %v5626_v33 = vmul.f32 %v12449_v52, %v15314_v3  ;;  %v5458_v17 = vpop.f32.mrb[1].mxu0 }
 0x34e   : > { %v5624_v6 = vmul.f32 %v15314_v3, %v5458_v17  ;;  %v12450_v45 = vpop.f32.mrb[2].mxu0 }
 0x34f   : > { %v5665_v32 = vadd.f32 %v15319_v47, %v5626_v33  ;;  %v5627_v42 = vmul.f32 %v12450_v45, %v15314_v3  ;;  %v5461_v50 = vpop.f32.mrb[3].mxu0 }
 0x350   : > { %v5663_v0 = vadd.f32 %v15319_v47, %v5624_v6  ;;  %v5625_v55 = vmul.f32 %v15314_v3, %v5461_v50 }
 0x351   : > { %v5697_v19 = vmax.f32 %v5665_v32, 0.0  ;;  %v5666_v41 = vadd.f32 %v15319_v47, %v5627_v42 }
 0x352   : > { %v5695_v39 = vmax.f32 %v5663_v0, 0.0  ;;  %v5664_v2 = vadd.f32 %v15319_v47, %v5625_v55 }
 0x353   : > { %v11837_v15 = vpack.c.bf16 %v5697_v19, %v5697_v19  ;;  %v5698_v30 = vmax.f32 %v5666_v41, 0.0 }
 0x354   : > { %v11835_v14 = vpack.c.bf16 %v5695_v39, %v5695_v39  ;;  %v5696_v4 = vmax.f32 %v5664_v2, 0.0  ;;  %v12453_v12 = vpop.f32.mrb[4].mxu0 }
 0x355   : > { %v5841_v9 = vshrl.u32 %v11837_v15, 16  ;;  %v5844_v54 = vshll.u32 %v11837_v15, 16  ;;  %v11838_v34 = vpack.c.bf16 %v5698_v30, %v5698_v30  ;;  %v5630_v29 = vmul.f32 %v12453_v12, %v15314_v3  ;;  %v5474_v20 = vpop.f32.mrb[5].mxu0  ;;  %v6164_v12 = vld [vmem:[#allocation3 + $0x30] sm:$0xf] }
 0x356   : > { %v5824_v5 = vshrl.u32 %v11835_v14, 16  ;;  %v5827_v53 = vshll.u32 %v11835_v14, 16  ;;  %v11836_v31 = vpack.c.bf16 %v5696_v4, %v5696_v4  ;;  %v5628_v58 = vmul.f32 %v15314_v3, %v5474_v20  ;;  %v12454_v22 = vpop.f32.mrb[6].mxu0 }
 0x357   : > { %v5843_v51 = vrot.slane %v5841_v9, 7  ;;  %v5849_v24 = vshrl.u32 %v11838_v34, 16  ;;  %v5852_v18 = vshll.u32 %v11838_v34, 16  ;;  %v5669_v1 = vadd.f32 %v15319_v47, %v5630_v29  ;;  %v5477_v13 = vpop.f32.mrb[7].mxu0 }
 0x358   : > { %v5826_v40 = vrot.slane %v5824_v5, 7  ;;  %v5832_v60 = vshrl.u32 %v11836_v31, 16  ;;  %v5835_v25 = vshll.u32 %v11836_v31, 16  ;;  %v5667_v46 = vadd.f32 %v15319_v47, %v5628_v58 }
 0x359   : > { %v5846_v57 = vor.u32 %v5844_v54, %v5843_v51  ;;  %v5847_v48 = vrot.slane %v5843_v51, 4  ;;  %v5851_v7 = vrot.slane %v5849_v24, 7  ;;  %v5701_v8 = vmax.f32 %v5669_v1, 0.0 }
 0x35a   : > { %v5829_v38 = vor.u32 %v5827_v53, %v5826_v40  ;;  %v5830_v56 = vrot.slane %v5826_v40, 4  ;;  %v5834_v61 = vrot.slane %v5832_v60, 7  ;;  %v5699_v21 = vmax.f32 %v5667_v46, 0.0  ;;  %v6157_v53 = vld [vmem:[#allocation3 + $0x24] sm:$0xf] }
 0x35b   : > { %v6151_v37 = vsel %vm13583_vm13, %v5846_v57, %v6150_v59  ;;  %v5854_v49 = vor.u32 %v5852_v18, %v5851_v7  ;;  %v5856_v27 = vrot.slane %v5851_v7, 4  ;;  %v11841_v23 = vpack.c.bf16 %v5701_v8, %v5701_v8 }
 0x35c   : > { %6152 = vst [vmem:[#allocation3 + $0x18] sm:$0xf] %v6151_v37  ;;  %v6144_v28 = vsel %vm13583_vm13, %v5829_v38, %v6143_v35  ;;  %v5837_v11 = vor.u32 %v5835_v25, %v5834_v61  ;;  %v5839_v16 = vrot.slane %v5834_v61, 4  ;;  %v11839_v52 = vpack.c.bf16 %v5699_v21, %v5699_v21  ;;  %v12457_v33 = vpop.f32.mrb[8].mxu0 }
 0x35d   : > { %6145 = vst [vmem:[#allocation3 + $0xc] sm:$0xf] %v6144_v28  ;;  %v5855_v6 = vsel %vm13577_vm12, %v5847_v48, %v5854_v49  ;;  %v6155_v45 = vsel %vm13519_vm5, %v5856_v27, %v6154_v36  ;;  %v5875_v32 = vshrl.u32 %v11841_v23, 16  ;;  %v5878_v42 = vshll.u32 %v11841_v23, 16  ;;  %v5490_v50 = vpop.f32.mrb[9].mxu0 }
 0x35e   : > { %6153 = vst.msk [vmem:[#allocation3 + $0x1c] sm:$0xf] %vm280_vm1, %v5855_v6  ;;  %6156 = vst [vmem:[#allocation3 + $0x20] sm:$0x1] %v6155_v45  ;;  %v5838_v0 = vsel %vm13577_vm12, %v5830_v56, %v5837_v11  ;;  %v6148_v55 = vsel %vm13519_vm5, %v5839_v16, %v6147_v62  ;;  %v5858_v19 = vshrl.u32 %v11839_v52, 16  ;;  %v5861_v41 = vshll.u32 %v11839_v52, 16 }
 0x35f   : > { %v12458_v39 = vpop.f32.mrb[10].mxu0  ;;  %6146 = vst.msk [vmem:[#allocation3 + $0x10] sm:$0xf] %vm280_vm1, %v5838_v0  ;;  %6149 = vst [vmem:[#allocation3 + $0x14] sm:$0x1] %v6148_v55  ;;  %v15347_v2 = vrot.slane %v5875_v32, 7  ;;  %v5631_v15 = vmul.f32 %v12454_v22, %v15314_v3  ;;  %v5629_v30 = vmul.f32 %v15314_v3, %v5477_v13  ;;  %v5634_v14 = vmul.f32 %v12457_v33, %v15314_v3 }
 0x360   : > { %v5493_v4 = vpop.f32.mrb[11].mxu0  ;;  %v15352_v9 = vrot.slane %v5858_v19, 7  ;;  %v5632_v54 = vmul.f32 %v15314_v3, %v5490_v50  ;;  %v5635_v34 = vmul.f32 %v12458_v39, %v15314_v3  ;;  %v6168_v16 = vld [vmem:[#allocation3 + $0x38] sm:$0x1]  ;;  %v6161_v52 = vld [vmem:[#allocation3 + $0x2c] sm:$0x1] }
 0x361   : > { %v5633_v29 = vmul.f32 %v15314_v3, %v5493_v4  ;;  %v5880_v20 = vor.u32 %v5878_v42, %v15347_v2  ;;  %v5881_v5 = vrot.slane %v15347_v2, 4  ;;  %v5670_v31 = vadd.f32 %v15319_v47, %v5631_v15  ;;  %v6178_v0 = vld [vmem:[#allocation3 + $0x48] sm:$0xf] }
 0x362   : > { %v5668_v58 = vadd.f32 %v15319_v47, %v5629_v30  ;;  %v5863_v22 = vor.u32 %v5861_v41, %v15352_v9  ;;  %v5864_v51 = vrot.slane %v15352_v9, 4  ;;  %v5673_v24 = vadd.f32 %v15319_v47, %v5634_v14  ;;  %v6171_v9 = vld [vmem:[#allocation3 + $0x3c] sm:$0xf] }
 0x363   : > { %v5671_v18 = vadd.f32 %v15319_v47, %v5632_v54  ;;  %v6165_v1 = vsel %vm13583_vm13, %v5880_v20, %v6164_v12  ;;  %v5702_v13 = vmax.f32 %v5670_v31, 0.0  ;;  %v5674_v40 = vadd.f32 %v15319_v47, %v5635_v34 }
 0x364   : > { %v5700_v59 = vmax.f32 %v5668_v58, 0.0  ;;  %6166 = vst [vmem:[#allocation3 + $0x30] sm:$0xf] %v6165_v1  ;;  %v6158_v60 = vsel %vm13583_vm13, %v5863_v22, %v6157_v53  ;;  %v5705_v25 = vmax.f32 %v5673_v24, 0.0  ;;  %v5672_v57 = vadd.f32 %v15319_v47, %v5633_v29  ;;  %v12461_v48 = vpop.f32.mrb[12].mxu0 }
 0x365   : > { %v5703_v46 = vmax.f32 %v5671_v18, 0.0  ;;  %6159 = vst [vmem:[#allocation3 + $0x24] sm:$0xf] %v6158_v60  ;;  %v11842_v35 = vpack.c.bf16 %v5702_v13, %v5702_v13  ;;  %v5706_v8 = vmax.f32 %v5674_v40, 0.0  ;;  %v5638_v38 = vmul.f32 %v12461_v48, %v15314_v3  ;;  %v5506_v56 = vpop.f32.mrb[13].mxu0 }
 0x366   : > { %v11840_v7 = vpack.c.bf16 %v5700_v59, %v5700_v59  ;;  %v11845_v36 = vpack.c.bf16 %v5705_v25, %v5705_v25  ;;  %v5704_v21 = vmax.f32 %v5672_v57, 0.0  ;;  %v5636_v37 = vmul.f32 %v15314_v3, %v5506_v56  ;;  %v12462_v49 = vpop.f32.mrb[14].mxu0 }
 0x367   : > { %v11843_v61 = vpack.c.bf16 %v5703_v46, %v5703_v46  ;;  %v5883_v27 = vshrl.u32 %v11842_v35, 16  ;;  %v5886_v62 = vshll.u32 %v11842_v35, 16  ;;  %v5509_v11 = vpop.f32.mrb[15].mxu0  ;;  %v11846_v55 = vpack.c.bf16 %v5706_v8, %v5706_v8  ;;  %v6182_v35 = vld [vmem:[#allocation3 + $0x50] sm:$0x1] }
 0x368   : > { %v5866_v23 = vshrl.u32 %v11840_v7, 16  ;;  %v5869_v28 = vshll.u32 %v11840_v7, 16  ;;  %v5909_v33 = vshrl.u32 %v11845_v36, 16  ;;  %v5912_v6 = vshll.u32 %v11845_v36, 16 }
 0x369   : > { %v5892_v45 = vshrl.u32 %v11843_v61, 16  ;;  %v5895_v32 = vshll.u32 %v11843_v61, 16  ;;  %v5885_v42 = vrot.slane %v5883_v27, 7  ;;  %v11844_v19 = vpack.c.bf16 %v5704_v21, %v5704_v21 }
 0x36a   : > { %v5868_v50 = vrot.slane %v5866_v23, 7  ;;  %v5911_v41 = vrot.slane %v5909_v33, 7  ;;  %v5677_v2 = vadd.f32 %v15319_v47, %v5638_v38  ;;  %v5675_v15 = vadd.f32 %v15319_v47, %v5636_v37 }
 0x36b   : > { %v5894_v39 = vrot.slane %v5892_v45, 7  ;;  %v5888_v30 = vor.u32 %v5886_v62, %v5885_v42  ;;  %v5890_v14 = vrot.slane %v5885_v42, 4  ;;  %v5917_v13 = vshrl.u32 %v11846_v55, 16  ;;  %v6175_v62 = vld [vmem:[#allocation3 + $0x44] sm:$0x1] }
 0x36c   : > { %v5871_v4 = vor.u32 %v5869_v28, %v5868_v50  ;;  %v5873_v12 = vrot.slane %v5868_v50, 4  ;;  %v5914_v54 = vor.u32 %v5912_v6, %v5911_v41  ;;  %v5915_v34 = vrot.slane %v5911_v41, 4  ;;  %v12465_v53 = vpop.f32.mrb[16].mxu0 }
 0x36d   : > { %v5897_v29 = vor.u32 %v5895_v32, %v5894_v39  ;;  %v5898_v20 = vrot.slane %v5894_v39, 4  ;;  %v5889_v31 = vsel %vm13577_vm12, %v5881_v5, %v5888_v30  ;;  %v6169_v58 = vsel %vm13519_vm5, %v5890_v14, %v6168_v16  ;;  %v5522_v18 = vpop.f32.mrb[17].mxu0  ;;  %v6192_v39 = vld [vmem:[#allocation3 + $0x60] sm:$0xf] }
 0x36e   : > { %v5872_v22 = vsel %vm13577_vm12, %v5864_v51, %v5871_v4  ;;  %v6162_v24 = vsel %vm13519_vm5, %v5873_v12, %v6161_v52  ;;  %6167 = vst.msk [vmem:[#allocation3 + $0x34] sm:$0xf] %vm280_vm1, %v5889_v31  ;;  %6170 = vst [vmem:[#allocation3 + $0x38] sm:$0x1] %v6169_v58  ;;  %v6179_v1 = vsel %vm13583_vm13, %v5914_v54, %v6178_v0  ;;  %v5920_v59 = vshll.u32 %v11846_v55, 16  ;;  %v12466_v40 = vpop.f32.mrb[18].mxu0 }
 0x36f   : > { %6160 = vst.msk [vmem:[#allocation3 + $0x28] sm:$0xf] %vm280_vm1, %v5872_v22  ;;  %6163 = vst [vmem:[#allocation3 + $0x2c] sm:$0x1] %v6162_v24  ;;  %v6172_v5 = vsel %vm13583_vm13, %v5897_v29, %v6171_v9  ;;  %v5900_v51 = vshrl.u32 %v11844_v19, 16  ;;  %v5903_v60 = vshll.u32 %v11844_v19, 16  ;;  %v5639_v7 = vmul.f32 %v12462_v49, %v15314_v3 }
 0x370   : > { %6180 = vst [vmem:[#allocation3 + $0x48] sm:$0xf] %v6179_v1  ;;  %6173 = vst [vmem:[#allocation3 + $0x3c] sm:$0xf] %v6172_v5  ;;  %v5709_v25 = vmax.f32 %v5677_v2, 0.0  ;;  %v5707_v46 = vmax.f32 %v5675_v15, 0.0  ;;  %v5637_v8 = vmul.f32 %v15314_v3, %v5509_v11  ;;  %v5642_v38 = vmul.f32 %v12465_v53, %v15314_v3 }
 0x371   : > { %v15389_v57 = vpop.f32.mrb[19].mxu0  ;;  %v5919_v48 = vrot.slane %v5917_v13, 7  ;;  %v5902_v56 = vrot.slane %v5900_v51, 7  ;;  %v5640_v21 = vmul.f32 %v15314_v3, %v5522_v18  ;;  %v5678_v23 = vadd.f32 %v15319_v47, %v5639_v7  ;;  %v6185_v54 = vld [vmem:[#allocation3 + $0x54] sm:$0xf] }
 0x372   : > { %v11849_v36 = vpack.c.bf16 %v5709_v25, %v5709_v25  ;;  %v11847_v61 = vpack.c.bf16 %v5707_v46, %v5707_v46  ;;  %v5676_v28 = vadd.f32 %v15319_v47, %v5637_v8  ;;  %v5681_v30 = vadd.f32 %v15319_v47, %v5642_v38  ;;  %v15418_v24 = vld [vmem:[#allocation3 + $0xc] sm:$0xf]  ;;  %v6196_v46 = vld [vmem:[#allocation3 + $0x68] sm:$0x1] }
 0x373   : > { %v5922_v37 = vor.u32 %v5920_v59, %v5919_v48  ;;  %v5924_v27 = vrot.slane %v5919_v48, 4  ;;  %v5905_v16 = vor.u32 %v5903_v60, %v5902_v56  ;;  %v5907_v52 = vrot.slane %v5902_v56, 4 }
 0x374   : > { %v5943_v33 = vshrl.u32 %v11849_v36, 16  ;;  %v5946_v49 = vshll.u32 %v11849_v36, 16  ;;  %v5926_v45 = vshrl.u32 %v11847_v61, 16  ;;  %v5929_v32 = vshll.u32 %v11847_v61, 16  ;;  %v15401_v42 = vpop.f32.mrb[20].mxu0 }
 0x375   : > { %v5923_v11 = vsel %vm13577_vm12, %v5915_v34, %v5922_v37  ;;  %v6183_v6 = vsel %vm13519_vm5, %v5924_v27, %v6182_v35  ;;  %v5906_v50 = vsel %vm13577_vm12, %v5898_v20, %v5905_v16  ;;  %v6176_v0 = vsel %vm13519_vm5, %v5907_v52, %v6175_v62  ;;  %v15408_v41 = vpop.f32.mrb[21].mxu0  ;;  %v6189_v27 = vld [vmem:[#allocation3 + $0x5c] sm:$0x1] }
 0x376   : > { %6181 = vst.msk [vmem:[#allocation3 + $0x4c] sm:$0xf] %vm280_vm1, %v5923_v11  ;;  %6184 = vst [vmem:[#allocation3 + $0x50] sm:$0x1] %v6183_v6  ;;  %v5945_v55 = vrot.slane %v5943_v33, 7  ;;  %v5710_v19 = vmax.f32 %v5678_v23, 0.0  ;;  %v5679_v14 = vadd.f32 %v15319_v47, %v5640_v21  ;;  %v5643_v29 = vmul.f32 %v12466_v40, %v15314_v3 }
 0x377   : > { %6174 = vst.msk [vmem:[#allocation3 + $0x40] sm:$0xf] %vm280_vm1, %v5906_v50  ;;  %6177 = vst [vmem:[#allocation3 + $0x44] sm:$0x1] %v6176_v0  ;;  %v5928_v2 = vrot.slane %v5926_v45, 7  ;;  %v5708_v15 = vmax.f32 %v5676_v28, 0.0  ;;  %v5641_v7 = vmul.f32 %v15314_v3, %v15389_v57 }
 0x378   : > { %v15413_v4 = vpop.f32.mrb[22].mxu0  ;;  %v5948_v12 = vor.u32 %v5946_v49, %v5945_v55  ;;  %v5949_v9 = vrot.slane %v5945_v55, 4  ;;  %v11850_v34 = vpack.c.bf16 %v5710_v19, %v5710_v19  ;;  %v5713_v22 = vmax.f32 %v5681_v30, 0.0  ;;  %v6206_v45 = vld [vmem:[#allocation3 + $0x78] sm:$0xf] }
 0x379   : > { %v15416_v20 = vpop.f32.mrb[23].mxu0  ;;  %v5931_v53 = vor.u32 %v5929_v32, %v5928_v2  ;;  %v5932_v31 = vrot.slane %v5928_v2, 4  ;;  %v11848_v58 = vpack.c.bf16 %v5708_v15, %v5708_v15  ;;  %v5711_v13 = vmax.f32 %v5679_v14, 0.0  ;;  %v6258_v0 = vld [vmem:[#allocation3 + $0x10] sm:$0xf] }
 0x37a   : > { %v6193_v18 = vsel %vm13583_vm13, %v5948_v12, %v6192_v39  ;;  %v5951_v1 = vshrl.u32 %v11850_v34, 16  ;;  %v5954_v5 = vshll.u32 %v11850_v34, 16  ;;  %v11853_v60 = vpack.c.bf16 %v5713_v22, %v5713_v22  ;;  %v6199_v15 = vld [vmem:[#allocation3 + $0x6c] sm:$0xf] }
 0x37b   : > { %6194 = vst [vmem:[#allocation3 + $0x60] sm:$0xf] %v6193_v18  ;;  %v6186_v59 = vsel %vm13583_vm13, %v5931_v53, %v6185_v54  ;;  %v5934_v51 = vshrl.u32 %v11848_v58, 16  ;;  %v5937_v40 = vshll.u32 %v11848_v58, 16  ;;  %v11851_v48 = vpack.c.bf16 %v5711_v13, %v5711_v13  ;;  %v6260_v13 = vld [vmem:[#allocation3 + $0x1c] sm:$0xf] }
 0x37c   : > { %6187 = vst [vmem:[#allocation3 + $0x54] sm:$0xf] %v6186_v59  ;;  %v5953_v25 = vrot.slane %v5951_v1, 7  ;;  %v5682_v35 = vadd.f32 %v15319_v47, %v5643_v29  ;;  %v5977_v38 = vshrl.u32 %v11853_v60, 16  ;;  %v5980_v56 = vshll.u32 %v11853_v60, 16  ;;  %v15428_v61 = vpop.f32.mrb[24].mxu0 }
 0x37d   : > { %v5936_v8 = vrot.slane %v5934_v51, 7  ;;  %v6329_v36 = vshrl.u32 %v15418_v24, 16  ;;  %v5960_v62 = vshrl.u32 %v11851_v48, 16  ;;  %v5963_v23 = vshll.u32 %v11851_v48, 16  ;;  %v15430_v28 = vpop.f32.mrb[25].mxu0 }
 0x37e   : > { %v5956_v21 = vor.u32 %v5954_v5, %v5953_v25  ;;  %v5958_v37 = vrot.slane %v5953_v25, 4  ;;  %v15432_v33 = vrot.slane %v5977_v38, 7  ;;  %v5714_v49 = vmax.f32 %v5682_v35, 0.0  ;;  %v15434_v57 = vpop.f32.mrb[26].mxu0  ;;  %v6259_v5 = vld [vmem:[#allocation3 + $0x18] sm:$0xf] }
 0x37f   : > { %v5939_v16 = vor.u32 %v5937_v40, %v5936_v8  ;;  %v5941_v52 = vrot.slane %v5936_v8, 4  ;;  %v15440_v32 = vrot.slane %v5960_v62, 7  ;;  %v5680_v50 = vadd.f32 %v15319_v47, %v5641_v7  ;;  %v15443_v55 = vpop.f32.mrb[27].mxu0 }
 0x380   : > { %v5957_v11 = vsel %vm13577_vm12, %v5949_v9, %v5956_v21  ;;  %v6197_v6 = vsel %vm13519_vm5, %v5958_v37, %v6196_v46  ;;  %v5982_v2 = vor.u32 %v5980_v56, %v15432_v33  ;;  %v11854_v14 = vpack.c.bf16 %v5714_v49, %v5714_v49  ;;  %v6289_v9 = vld [vmem:[#allocation3 + $0x14] sm:$0x1] }
 0x381   : > { %6195 = vst.msk [vmem:[#allocation3 + $0x64] sm:$0xf] %vm280_vm1, %v5957_v11  ;;  %6198 = vst [vmem:[#allocation3 + $0x68] sm:$0x1] %v6197_v6  ;;  %v5940_v19 = vsel %vm13577_vm12, %v5932_v31, %v5939_v16  ;;  %v6190_v39 = vsel %vm13519_vm5, %v5941_v52, %v6189_v27  ;;  %v5965_v30 = vor.u32 %v5963_v23, %v15440_v32  ;;  %v5712_v12 = vmax.f32 %v5680_v50, 0.0 }
 0x382   : > { %6188 = vst.msk [vmem:[#allocation3 + $0x58] sm:$0xf] %vm280_vm1, %v5940_v19  ;;  %6191 = vst [vmem:[#allocation3 + $0x5c] sm:$0x1] %v6190_v39  ;;  %v15455_v54 = vsel %vm1594_vm0, %v15283_v10, 0  ;;  %v6207_v34 = vsel %vm13583_vm13, %v5982_v2, %v6206_v45  ;;  %v6331_v29 = vrot.slane %v6329_v36, 4 }
 0x383   : > { %v6332_v53 = vshll.u32 %v15418_v24, 16  ;;  %v6338_v31 = vshll.u32 %v6258_v0, 16  ;;  %v5983_v58 = vrot.slane %v15432_v33, 4  ;;  %6208 = vst [vmem:[#allocation3 + $0x78] sm:$0xf] %v6207_v34  ;;  %v6200_v22 = vsel %vm13583_vm13, %v5965_v30, %v6199_v15 }
 0x384   : > { %v5985_v18 = vshrl.u32 %v11854_v14, 16  ;;  %v11852_v1 = vpack.c.bf16 %v5712_v12, %v5712_v12  ;;  %6201 = vst [vmem:[#allocation3 + $0x6c] sm:$0xf] %v6200_v22  ;;  %v6210_v10 = vld [vmem:[#allocation3 + $0x80] sm:$0x1]  ;;  %v6342_v40 = vshrl.u32 %v6258_v0, 16  ;;  %v5646_v22 = vmul.f32 %v15401_v42, %v15314_v3 }
 0x385   : > { %v6334_v59 = vrot.slane %v6332_v53, 5  ;;  %v6340_v51 = vrot.slane %v6338_v31, 5  ;;  %v6348_v60 = vshll.u32 %v6289_v9, 16  ;;  %v15463_v25 = vpop.f32.mrb[28].mxu0  ;;  %v5966_v24 = vrot.slane %v15440_v32, 4 }
 0x386   : > { %v5987_v46 = vrot.slane %v5985_v18, 7  ;;  %v5988_v48 = vshll.u32 %v11854_v14, 16  ;;  %v5968_v35 = vshrl.u32 %v11852_v1, 16  ;;  %v15466_v7 = vpop.f32.mrb[29].mxu0  ;;  %v5971_v8 = vshll.u32 %v11852_v1, 16 }
 0x387   : > { %v6335_v38 = vor.u32 %v6334_v59, %v6331_v29  ;;  %v6344_v56 = vrot.slane %v6342_v40, 4  ;;  %v6350_v36 = vrot.slane %v6348_v60, 5  ;;  %v15468_v21 = vpop.f32.mrb[30].mxu0  ;;  %v6353_v23 = vshrl.u32 %v6259_v5, 16  ;;  %v6203_v52 = vld [vmem:[#allocation3 + $0x74] sm:$0x1] }
 0x388   : > { %v5990_v37 = vor.u32 %v5988_v48, %v5987_v46  ;;  %v5992_v27 = vrot.slane %v5987_v46, 4  ;;  %v5970_v62 = vrot.slane %v5968_v35, 7  ;;  %v15470_v16 = vpop.f32.mrb[31].mxu0  ;;  %v6356_v11 = vshll.u32 %v6259_v5, 16  ;;  %v6290_v19 = vld [vmem:[#allocation3 + $0x20] sm:$0x1] }
 0x389   : > { %v6336_v33 = vrot.slane %v6335_v38, 4  ;;  %v6345_v49 = vor.u32 %v6344_v56, %v6340_v51  ;;  %v6362_v6 = vshll.u32 %v6260_v13, 16  ;;  %v6355_v15 = vrot.slane %v6353_v23, 4  ;;  %v6261_v29 = vld [vmem:[#allocation3 + $0x24] sm:$0xf] }
 0x38a   : > { %v5991_v45 = vsel %vm13577_vm12, %v5983_v58, %v5990_v37  ;;  %v6211_v32 = vsel %vm13519_vm5, %v5992_v27, %v6210_v10  ;;  %v5973_v50 = vor.u32 %v5971_v8, %v5970_v62  ;;  %v5975_v0 = vrot.slane %v5970_v62, 4  ;;  %v15491_v18 = vld [vmem:[%s17342_s4 + $0x4] sm:$0x3]  ;;  %v15503_v48 = vld [vmem:[#allocation3 + $0x28] sm:$0xf] }
 0x38b   : > { %6209 = vst.msk [vmem:[#allocation3 + $0x7c] sm:$0xf] %vm280_vm1, %v5991_v45  ;;  %6212 = vst [vmem:[#allocation3 + $0x80] sm:$0x1] %v6211_v32  ;;  %v6341_v39 = vsel %vm13571_vm11, %v6336_v33, %v6340_v51  ;;  %v6346_v2 = vrot.slane %v6345_v49, 4  ;;  %v6358_v30 = vrot.slane %v6356_v11, 5  ;;  %v5647_v10 = vmul.f32 %v15413_v4, %v15314_v3 }
 0x38c   : > { %v5974_v14 = vsel %vm13577_vm12, %v5966_v24, %v5973_v50  ;;  %v6204_v12 = vsel %vm13519_vm5, %v5975_v0, %v6203_v52  ;;  %v6364_v9 = vrot.slane %v6362_v6, 5  ;;  %v6366_v34 = vshrl.u32 %v6260_v13, 16  ;;  %v6220_v0 = vld [vmem:[#allocation3 + $0x90] sm:$0xf] }
 0x38d   : > { %6202 = vst.msk [vmem:[#allocation3 + $0x70] sm:$0xf] %vm280_vm1, %v5974_v14  ;;  %6205 = vst [vmem:[#allocation3 + $0x74] sm:$0x1] %v6204_v12  ;;  %v6351_v53 = vsel %vm13571_vm11, %v6346_v2, %v6350_v36  ;;  %v6359_v31 = vor.u32 %v6358_v30, %v6355_v15  ;;  %v6372_v58 = vshll.u32 %v6290_v19, 16  ;;  %v5644_v13 = vmul.f32 %v15314_v3, %v15408_v41 }
 0x38e   : > { %v11455_v1 = vcombine.low %v6341_v39, %v6351_v53  ;;  %v6368_v5 = vrot.slane %v6366_v34, 4  ;;  %v5685_v40 = vadd.f32 %v15319_v47, %v5646_v22  ;;  %v5645_v42 = vmul.f32 %v15314_v3, %v15416_v20  ;;  %v6213_v14 = vld [vmem:[#allocation3 + $0x84] sm:$0xf] }
 0x38f   : > { %v6360_v59 = vrot.slane %v6359_v31, 4  ;;  %v6374_v51 = vrot.slane %v6372_v58, 5  ;;  %v5683_v24 = vadd.f32 %v15319_v47, %v5644_v13  ;;  %v5686_v46 = vadd.f32 %v15319_v47, %v5647_v10  ;;  %v6224_v31 = vld [vmem:[#allocation3 + $0x98] sm:$0x1]  ;;  %v6217_v10 = vld [vmem:[#allocation3 + $0x8c] sm:$0x1] }
 0x390   : > { %12482 = vmatmul.mubr.msk.bf16.vlgmr.msra.gmra.mrb[0].mxu1 %vm1545_vm9, %v11455_v1  ;;  %v6369_v60 = vor.u32 %v6368_v5, %v6364_v9  ;;  %v6377_v41 = vshrl.u32 %v6261_v29, 16  ;;  %v5717_v35 = vmax.f32 %v5685_v40, 0.0  ;;  %v5684_v8 = vadd.f32 %v15319_v47, %v5645_v42 }
 0x391   : > { %12514 = vmatpush3.bf16.msra.mxu1 %v15455_v54  ;;  %v6365_v4 = vsel %vm13571_vm11, %v6360_v59, %v6364_v9  ;;  %v6380_v38 = vshll.u32 %v6261_v29, 16  ;;  %v5715_v56 = vmax.f32 %v5683_v24, 0.0  ;;  %v5718_v36 = vmax.f32 %v5686_v46, 0.0  ;;  %v6291_v24 = vld [vmem:[#allocation3 + $0x2c] sm:$0x1] }
 0x392   : > { %v6370_v20 = vrot.slane %v6369_v60, 4  ;;  %v6379_v37 = vrot.slane %v6377_v41, 4  ;;  %13308 = vmatprep.subr.msk.bf16.mxu1 %vm1594_vm0, %v15491_v18  ;;  %v11857_v27 = vpack.c.bf16 %v5717_v35, %v5717_v35  ;;  %v5716_v62 = vmax.f32 %v5684_v8, 0.0  ;;  %v15516_v46 = vld [vmem:[#allocation3 + $0x30] sm:$0xf] }
 0x393   : > { %v6382_v23 = vrot.slane %v6380_v38, 5  ;;  %v6386_v52 = vshll.u32 %v15503_v48, 16  ;;  %v11855_v33 = vpack.c.bf16 %v5715_v56, %v5715_v56  ;;  %v11858_v49 = vpack.c.bf16 %v5718_v36, %v5718_v36  ;;  %v15522_v38 = vld [vmem:[#allocation3 + $0x34] sm:$0xf] }
 0x394   : > { %v6375_v54 = vsel %vm13571_vm11, %v6370_v20, %v6374_v51  ;;  %v6390_v11 = vshrl.u32 %v15503_v48, 16  ;;  %v6011_v45 = vshrl.u32 %v11857_v27, 16  ;;  %v6014_v32 = vshll.u32 %v11857_v27, 16  ;;  %v6292_v27 = vld [vmem:[#allocation3 + $0x38] sm:$0x1] }
 0x395   : > { %v11456_v6 = vcombine.low %v6365_v4, %v6375_v54  ;;  %v11856_v50 = vpack.c.bf16 %v5716_v62, %v5716_v62  ;;  %v5994_v19 = vshrl.u32 %v11855_v33, 16  ;;  %v5997_v39 = vshll.u32 %v11855_v33, 16 }
 0x396   : > { %v6019_v2 = vshrl.u32 %v11858_v49, 16  ;;  %v6022_v15 = vshll.u32 %v11858_v49, 16  ;;  %v6013_v30 = vrot.slane %v6011_v45, 7  ;;  %v6383_v34 = vor.u32 %v6382_v23, %v6379_v37  ;;  %v15540_v45 = vld [vmem:[#allocation3 + $0x3c] sm:$0xf] }
 0x397   : > { %12485 = vmatprep.mubr.msk.bf16.mxu1 %vm1545_vm9, %v11456_v6  ;;  %v6002_v12 = vshrl.u32 %v11856_v50, 16  ;;  %v6005_v9 = vshll.u32 %v11856_v50, 16  ;;  %v5996_v29 = vrot.slane %v5994_v19, 7  ;;  %v6388_v58 = vrot.slane %v6386_v52, 5 }
 0x398   : > { %v6021_v53 = vrot.slane %v6019_v2, 7  ;;  %v6392_v22 = vrot.slane %v6390_v11, 4  ;;  %v6016_v1 = vor.u32 %v6014_v32, %v6013_v30  ;;  %v6017_v5 = vrot.slane %v6013_v30, 4 }
 0x399   : > { %v6004_v13 = vrot.slane %v6002_v12, 7  ;;  %v6384_v59 = vrot.slane %v6383_v34, 4  ;;  %v5999_v51 = vor.u32 %v5997_v39, %v5996_v29  ;;  %v6000_v40 = vrot.slane %v5996_v29, 4 }
 0x39a   : > { %v6024_v42 = vor.u32 %v6022_v15, %v6021_v53  ;;  %v6026_v60 = vrot.slane %v6021_v53, 4  ;;  %v6221_v41 = vsel %vm13583_vm13, %v6016_v1, %v6220_v0  ;;  %v6393_v37 = vor.u32 %v6392_v22, %v6388_v58 }
 0x39b   : > { %v6007_v4 = vor.u32 %v6005_v9, %v6004_v13  ;;  %v6009_v35 = vrot.slane %v6004_v13, 4  ;;  %v6389_v8 = vsel %vm13571_vm11, %v6384_v59, %v6388_v58  ;;  %6222 = vst [vmem:[#allocation3 + $0x90] sm:$0xf] %v6221_v41  ;;  %v6214_v20 = vsel %vm13583_vm13, %v5999_v51, %v6213_v14 }
 0x39c   : > { %v6025_v56 = vsel %vm13577_vm12, %v6017_v5, %v6024_v42  ;;  %v6225_v36 = vsel %vm13519_vm5, %v6026_v60, %v6224_v31  ;;  %6215 = vst [vmem:[#allocation3 + $0x84] sm:$0xf] %v6214_v20  ;;  %v6396_v52 = vshll.u32 %v6291_v24, 16  ;;  %v6401_v54 = vshrl.u32 %v15516_v46, 16  ;;  %v15563_v24 = vld [vmem:[#allocation3 + $0x40] sm:$0xf] }
 0x39d   : > { %6223 = vst.msk [vmem:[#allocation3 + $0x94] sm:$0xf] %vm280_vm1, %v6025_v56  ;;  %6226 = vst [vmem:[#allocation3 + $0x98] sm:$0x1] %v6225_v36  ;;  %v6008_v62 = vsel %vm13577_vm12, %v6000_v40, %v6007_v4  ;;  %v6218_v23 = vsel %vm13519_vm5, %v6009_v35, %v6217_v10  ;;  %v6394_v33 = vrot.slane %v6393_v37, 4  ;;  %v6404_v49 = vshll.u32 %v15516_v46, 16 }
 0x39e   : > { %6216 = vst.msk [vmem:[#allocation3 + $0x88] sm:$0xf] %vm280_vm1, %v6008_v62  ;;  %6219 = vst [vmem:[#allocation3 + $0x8c] sm:$0x1] %v6218_v23  ;;  %v6410_v11 = vshll.u32 %v15522_v38, 16  ;;  %v6414_v6 = vshrl.u32 %v15522_v38, 16  ;;  %v5650_v19 = vmul.f32 %v15428_v61, %v15314_v3  ;;  %v5648_v30 = vmul.f32 %v15314_v3, %v15430_v28 }
 0x39f   : > { %v6398_v32 = vrot.slane %v6396_v52, 5  ;;  %v6403_v50 = vrot.slane %v6401_v54, 4  ;;  %v6420_v0 = vshll.u32 %v6292_v27, 16  ;;  %v6406_v39 = vrot.slane %v6404_v49, 5  ;;  %v6234_v56 = vld [vmem:[#allocation3 + $0xa8] sm:$0xf] }
 0x3a0   : > { %v6412_v2 = vrot.slane %v6410_v11, 5  ;;  %v6416_v15 = vrot.slane %v6414_v6, 4  ;;  %v5689_v9 = vadd.f32 %v15319_v47, %v5650_v19  ;;  %v5651_v34 = vmul.f32 %v15434_v57, %v15314_v3  ;;  %v6227_v23 = vld [vmem:[#allocation3 + $0x9c] sm:$0xf]  ;;  %v6238_v11 = vld [vmem:[#allocation3 + $0xb0] sm:$0x1] }
 0x3a1   : > { %v6399_v14 = vsel %vm13571_vm11, %v6394_v33, %v6398_v32  ;;  %v6422_v12 = vrot.slane %v6420_v0, 5  ;;  %v6407_v53 = vor.u32 %v6406_v39, %v6403_v50  ;;  %v5687_v61 = vadd.f32 %v15319_v47, %v5648_v30 }
 0x3a2   : > { %v11457_v29 = vcombine.low %v6389_v8, %v6399_v14  ;;  %v6417_v31 = vor.u32 %v6416_v15, %v6412_v2  ;;  %v5721_v58 = vmax.f32 %v5689_v9, 0.0  ;;  %v5690_v22 = vadd.f32 %v15319_v47, %v5651_v34  ;;  %v15570_v34 = vld [vmem:[#allocation3 + $0x48] sm:$0xf] }
 0x3a3   : > { %v5649_v28 = vmul.f32 %v15314_v3, %v15443_v55  ;;  %v6425_v1 = vshrl.u32 %v15540_v45, 16  ;;  %v6408_v5 = vrot.slane %v6407_v53, 4  ;;  %v5719_v10 = vmax.f32 %v5687_v61, 0.0 }
 0x3a4   : > { %12486 = vmatmul.mubr.msk.bf16.gmra.mrb[4].mxu1 %vm1545_vm9, %v11457_v29  ;;  %v6418_v13 = vrot.slane %v6417_v31, 4  ;;  %v6428_v57 = vshll.u32 %v15540_v45, 16  ;;  %v11861_v59 = vpack.c.bf16 %v5721_v58, %v5721_v58  ;;  %v5722_v51 = vmax.f32 %v5690_v22, 0.0 }
 0x3a5   : > { %v5688_v40 = vadd.f32 %v15319_v47, %v5649_v28  ;;  %v6427_v42 = vrot.slane %v6425_v1, 4  ;;  %v6413_v60 = vsel %vm13571_vm11, %v6408_v5, %v6412_v2  ;;  %v11859_v55 = vpack.c.bf16 %v5719_v10, %v5719_v10  ;;  %v15568_v2 = vld [vmem:[#allocation3 + $0x44] sm:$0x1]  ;;  %v15579_v5 = vld [vmem:[#allocation3 + $0x4c] sm:$0xf] }
 0x3a6   : > { %v6423_v3 = vsel %vm13571_vm11, %v6418_v13, %v6422_v12  ;;  %v6430_v41 = vrot.slane %v6428_v57, 5  ;;  %v6045_v35 = vshrl.u32 %v11861_v59, 16  ;;  %v6048_v8 = vshll.u32 %v11861_v59, 16  ;;  %v6231_v57 = vld [vmem:[#allocation3 + $0xa4] sm:$0x1] }
 0x3a7   : > { %v11458_v4 = vcombine.low %v6413_v60, %v6423_v3  ;;  %v11862_v20 = vpack.c.bf16 %v5722_v51, %v5722_v51  ;;  %v6028_v36 = vshrl.u32 %v11859_v55, 16  ;;  %v6031_v37 = vshll.u32 %v11859_v55, 16  ;;  %v15585_v59 = vld [vmem:[#allocation3 + $0x50] sm:$0x1] }
 0x3a8   : > { %v5720_v27 = vmax.f32 %v5688_v40, 0.0  ;;  %v6431_v47 = vor.u32 %v6430_v41, %v6427_v42  ;;  %v6047_v62 = vrot.slane %v6045_v35, 7  ;;  %v6434_v33 = vshll.u32 %v15563_v24, 16 }
 0x3a9   : > { %12489 = vmatprep.mubr.msk.bf16.mxu1 %vm1545_vm9, %v11458_v4  ;;  %v6053_v52 = vshrl.u32 %v11862_v20, 16  ;;  %v6056_v54 = vshll.u32 %v11862_v20, 16  ;;  %v6030_v49 = vrot.slane %v6028_v36, 7  ;;  %v6438_v50 = vshrl.u32 %v15563_v24, 16 }
 0x3aa   : > { %v11860_v6 = vpack.c.bf16 %v5720_v27, %v5720_v27  ;;  %v6432_v32 = vrot.slane %v6431_v47, 4  ;;  %v6050_v0 = vor.u32 %v6048_v8, %v6047_v62  ;;  %v6051_v19 = vrot.slane %v6047_v62, 4 }
 0x3ab   : > { %v6055_v39 = vrot.slane %v6053_v52, 7  ;;  %v6436_v15 = vrot.slane %v6434_v33, 5  ;;  %v6033_v30 = vor.u32 %v6031_v37, %v6030_v49  ;;  %v6034_v14 = vrot.slane %v6030_v49, 4 }
 0x3ac   : > { %v6036_v12 = vshrl.u32 %v11860_v6, 16  ;;  %v6039_v9 = vshll.u32 %v11860_v6, 16  ;;  %v6235_v29 = vsel %vm13583_vm13, %v6050_v0, %v6234_v56  ;;  %v6440_v28 = vrot.slane %v6438_v50, 4 }
 0x3ad   : > { %v6058_v53 = vor.u32 %v6056_v54, %v6055_v39  ;;  %v6060_v31 = vrot.slane %v6055_v39, 4  ;;  %v6437_v61 = vsel %vm13571_vm11, %v6432_v32, %v6436_v15  ;;  %6236 = vst [vmem:[#allocation3 + $0xa8] sm:$0xf] %v6235_v29  ;;  %v6228_v58 = vsel %vm13583_vm13, %v6033_v30, %v6227_v23  ;;  %v13424_v23 = vld [vmem:[%s17340_s2] ss:$0 sm:$0xff] }
 0x3ae   : > { %v6038_v22 = vrot.slane %v6036_v12, 7  ;;  %v6444_v1 = vshll.u32 %v15568_v2, 16  ;;  %6229 = vst [vmem:[#allocation3 + $0x9c] sm:$0xf] %v6228_v58  ;;  %v6449_v51 = vshrl.u32 %v15570_v34, 16  ;;  %v6452_v40 = vshll.u32 %v15570_v34, 16 }
 0x3af   : > { %v6059_v13 = vsel %vm13577_vm12, %v6051_v19, %v6058_v53  ;;  %v6239_v10 = vsel %vm13519_vm5, %v6060_v31, %v6238_v11  ;;  %v6441_v3 = vor.u32 %v6440_v28, %v6436_v15  ;;  %v6458_v35 = vshll.u32 %v15579_v5, 16  ;;  %v15602_v54 = vld [vmem:[#allocation3 + $0x54] sm:$0xf]  ;;  %v13425_v19 = vld [vmem:[%s17341_s3] ss:$0 sm:$0xff] }
 0x3b0   : > { %6237 = vst.msk [vmem:[#allocation3 + $0xac] sm:$0xf] %vm280_vm1, %v6059_v13  ;;  %6240 = vst [vmem:[#allocation3 + $0xb0] sm:$0x1] %v6239_v10  ;;  %v6041_v42 = vor.u32 %v6039_v9, %v6038_v22  ;;  %v6043_v60 = vrot.slane %v6038_v22, 4  ;;  %v6446_v55 = vrot.slane %v6444_v1, 5  ;;  %v5654_v52 = vmul.f32 %v13424_v23, %v15463_v25 }
 0x3b1   : > { %v6451_v41 = vrot.slane %v6449_v51, 4  ;;  %v6454_v4 = vrot.slane %v6452_v40, 5  ;;  %v6462_v8 = vshrl.u32 %v15579_v5, 16  ;;  %v6442_v36 = vrot.slane %v6441_v3, 4  ;;  %v15622_v40 = vld [vmem:[#allocation3 + $0x5c] sm:$0x1] }
 0x3b2   : > { %v6042_v20 = vsel %vm13577_vm12, %v6034_v14, %v6041_v42  ;;  %v6232_v56 = vsel %vm13519_vm5, %v6043_v60, %v6231_v57  ;;  %v6468_v37 = vshll.u32 %v15585_v59, 16  ;;  %v6460_v47 = vrot.slane %v6458_v35, 5  ;;  %v15612_v14 = vld [vmem:[#allocation3 + $0x58] sm:$0xf]  ;;  %v15624_v42 = vld [vmem:[#allocation3 + $0x60] sm:$0xf] }
 0x3b3   : > { %6230 = vst.msk [vmem:[#allocation3 + $0xa0] sm:$0xf] %vm280_vm1, %v6042_v20  ;;  %6233 = vst [vmem:[#allocation3 + $0xa4] sm:$0x1] %v6232_v56  ;;  %v6455_v27 = vor.u32 %v6454_v4, %v6451_v41  ;;  %v6464_v62 = vrot.slane %v6462_v8, 4  ;;  %v6447_v33 = vsel %vm13571_vm11, %v6442_v36, %v6446_v55  ;;  %v5652_v11 = vmul.f32 %v13424_v23, %v15466_v7 }
 0x3b4   : > { %v6470_v49 = vrot.slane %v6468_v37, 5  ;;  %v5655_v6 = vmul.f32 %v13424_v23, %v15468_v21  ;;  %v11459_v32 = vcombine.low %v6437_v61, %v6447_v33  ;;  %v5693_v39 = vadd.f32 %v13425_v19, %v5654_v52  ;;  %v6248_v36 = vld [vmem:[#allocation3 + $0xc0] sm:$0xf] }
 0x3b5   : > { %v6456_v50 = vrot.slane %v6455_v27, 4  ;;  %v6465_v0 = vor.u32 %v6464_v62, %v6460_v47  ;;  %v5691_v15 = vadd.f32 %v13425_v19, %v5652_v11  ;;  %v5653_v30 = vmul.f32 %v13424_v23, %v15470_v16  ;;  %v6241_v23 = vld [vmem:[#allocation3 + $0xb4] sm:$0xf] }
 0x3b6   : > { %v5694_v25 = vadd.f32 %v13425_v19, %v5655_v6  ;;  %v6473_v12 = vshrl.u32 %v15602_v54, 16  ;;  %12490 = vmatmul.mubr.msk.bf16.gmra.mrb[8].mxu1 %vm1545_vm9, %v11459_v32  ;;  %v5725_v9 = vmax.f32 %v5693_v39, 0.0  ;;  %v6476_v29 = vshll.u32 %v15602_v54, 16  ;;  %v6252_v32 = vld [vmem:[#allocation3 + $0xc8] sm:$0x1] }
 0x3b7   : > { %v6461_v7 = vsel %vm13571_vm11, %v6456_v50, %v6460_v47  ;;  %v6466_v21 = vrot.slane %v6465_v0, 4  ;;  %v5723_v53 = vmax.f32 %v5691_v15, 0.0  ;;  %v5692_v61 = vadd.f32 %v13425_v19, %v5653_v30  ;;  %v6245_v30 = vld [vmem:[#allocation3 + $0xbc] sm:$0x1] }
 0x3b8   : > { %v5726_v31 = vmax.f32 %v5694_v25, 0.0  ;;  %v6475_v58 = vrot.slane %v6473_v12, 4  ;;  %v11865_v22 = vpack.c.bf16 %v5725_v9, %v5725_v9  ;;  %v6478_v28 = vrot.slane %v6476_v29, 5  ;;  %v15637_v29 = vld [vmem:[#allocation3 + $0x64] sm:$0xf] }
 0x3b9   : > { %v6471_v16 = vsel %vm13571_vm11, %v6466_v21, %v6470_v49  ;;  %v6482_v1 = vshll.u32 %v15612_v14, 16  ;;  %v11863_v10 = vpack.c.bf16 %v5723_v53, %v5723_v53  ;;  %v5724_v51 = vmax.f32 %v5692_v61, 0.0  ;;  %v15639_v53 = vld [vmem:[#allocation3 + $0x68] sm:$0x1] }
 0x3ba   : > { %v11460_v13 = vcombine.low %v6461_v7, %v6471_v16  ;;  %v11866_v57 = vpack.c.bf16 %v5726_v31, %v5726_v31  ;;  %v6079_v60 = vshrl.u32 %v11865_v22, 16  ;;  %v6082_v3 = vshll.u32 %v11865_v22, 16  ;;  %v15647_v22 = vld [vmem:[#allocation3 + $0x6c] sm:$0xf] }
 0x3bb   : > { %v6479_v55 = vor.u32 %v6478_v28, %v6475_v58  ;;  %v15626_v41 = vrot.slane %v6482_v1, 5  ;;  %v6062_v4 = vshrl.u32 %v11863_v10, 16  ;;  %v6065_v35 = vshll.u32 %v11863_v10, 16  ;;  %v15649_v28 = vld [vmem:[#allocation3 + $0x70] sm:$0xf] }
 0x3bc   : > { %12493 = vmatprep.mubr.msk.bf16.mxu1 %vm1545_vm9, %v11460_v13  ;;  %v6087_v8 = vshrl.u32 %v11866_v57, 16  ;;  %v6090_v20 = vshll.u32 %v11866_v57, 16  ;;  %v6081_v56 = vrot.slane %v6079_v60, 7  ;;  %v11864_v37 = vpack.c.bf16 %v5724_v51, %v5724_v51 }
 0x3bd   : > { %v6480_v27 = vrot.slane %v6479_v55, 4  ;;  %v6486_v47 = vshrl.u32 %v15612_v14, 16  ;;  %v6064_v62 = vrot.slane %v6062_v4, 7  ;;  %v6492_v33 = vshll.u32 %v15622_v40, 16  ;;  %v15657_v55 = vld [vmem:[#allocation3 + $0x78] sm:$0xf] }
 0x3be   : > { %v6089_v52 = vrot.slane %v6087_v8, 7  ;;  %v6497_v49 = vshrl.u32 %v15624_v42, 16  ;;  %v6084_v11 = vor.u32 %v6082_v3, %v6081_v56  ;;  %v6085_v6 = vrot.slane %v6081_v56, 4 }
 0x3bf   : > { %v6070_v50 = vshrl.u32 %v11864_v37, 16  ;;  %v6073_v0 = vshll.u32 %v11864_v37, 16  ;;  %v6067_v19 = vor.u32 %v6065_v35, %v6064_v62  ;;  %v6068_v39 = vrot.slane %v6064_v62, 4 }
 0x3c0   : > { %v6092_v15 = vor.u32 %v6090_v20, %v6089_v52  ;;  %v6094_v25 = vrot.slane %v6089_v52, 4  ;;  %v6249_v12 = vsel %vm13583_vm13, %v6084_v11, %v6248_v36  ;;  %v6485_v21 = vsel %vm13571_vm11, %v6480_v27, %v15626_v41  ;;  %v15665_v27 = vld [vmem:[#allocation3 + $0x74] sm:$0x1] }
 0x3c1   : > { %v6072_v7 = vrot.slane %v6070_v50, 7  ;;  %v6488_v9 = vrot.slane %v6486_v47, 4  ;;  %6250 = vst [vmem:[#allocation3 + $0xc0] sm:$0xf] %v6249_v12  ;;  %v6242_v31 = vsel %vm13583_vm13, %v6067_v19, %v6241_v23  ;;  %v6494_v16 = vrot.slane %v6492_v33, 5 }
 0x3c2   : > { %v6093_v61 = vsel %vm13577_vm12, %v6085_v6, %v6092_v15  ;;  %v6253_v58 = vsel %vm13519_vm5, %v6094_v25, %v6252_v32  ;;  %6243 = vst [vmem:[#allocation3 + $0xb4] sm:$0xf] %v6242_v31  ;;  %v6499_v10 = vrot.slane %v6497_v49, 4  ;;  %v6500_v57 = vshll.u32 %v15624_v42, 16  ;;  %v15667_v47 = vld [vmem:[#allocation3 + $0x7c] sm:$0xf] }
 0x3c3   : > { %6251 = vst.msk [vmem:[#allocation3 + $0xc4] sm:$0xf] %vm280_vm1, %v6093_v61  ;;  %6254 = vst [vmem:[#allocation3 + $0xc8] sm:$0x1] %v6253_v58  ;;  %v6075_v1 = vor.u32 %v6073_v0, %v6072_v7  ;;  %v6077_v13 = vrot.slane %v6072_v7, 4  ;;  %v6489_v63 = vor.u32 %v6488_v9, %v15626_v41  ;;  %v6506_v51 = vshll.u32 %v15637_v29, 16 }
 0x3c4   : > { %v6510_v60 = vshrl.u32 %v15637_v29, 16  ;;  %v6516_v3 = vshll.u32 %v15639_v53, 16  ;;  %v6521_v41 = vshrl.u32 %v15647_v22, 16  ;;  %v6502_v20 = vrot.slane %v6500_v57, 5  ;;  %v15675_v0 = vld [vmem:[#allocation3 + $0x80] sm:$0x1] }
 0x3c5   : > { %v6076_v4 = vsel %vm13577_vm12, %v6068_v39, %v6075_v1  ;;  %v6246_v35 = vsel %vm13519_vm5, %v6077_v13, %v6245_v30  ;;  %v6490_v8 = vrot.slane %v6489_v63, 4  ;;  %v6508_v56 = vrot.slane %v6506_v51, 5  ;;  %v15680_v12 = vld [vmem:[#allocation3 + $0x84] sm:$0xf]  ;;  %v15683_v61 = vld [vmem:[#allocation3 + $0x88] sm:$0xf] }
 0x3c6   : > { %6244 = vst.msk [vmem:[#allocation3 + $0xb8] sm:$0xf] %vm280_vm1, %v6076_v4  ;;  %6247 = vst [vmem:[#allocation3 + $0xbc] sm:$0x1] %v6246_v35  ;;  %v6512_v36 = vrot.slane %v6510_v60, 4  ;;  %v6518_v37 = vrot.slane %v6516_v3, 5  ;;  %v6503_v33 = vor.u32 %v6502_v20, %v6499_v10 }
 0x3c7   : > { %v6495_v17 = vsel %vm13571_vm11, %v6490_v8, %v6494_v16  ;;  %v6523_v62 = vrot.slane %v6521_v41, 4  ;;  %v6524_v26 = vshll.u32 %v15647_v22, 16  ;;  %v6530_v23 = vshll.u32 %v15649_v28, 16  ;;  %v15690_v60 = vld [vmem:[#allocation3 + $0x90] sm:$0xf] }
 0x3c8   : > { %v11461_v52 = vcombine.low %v6485_v21, %v6495_v17  ;;  %v6513_v49 = vor.u32 %v6512_v36, %v6508_v56  ;;  %v6534_v11 = vshrl.u32 %v15649_v28, 16  ;;  %v6540_v50 = vshll.u32 %v15665_v27, 16  ;;  %v15693_v8 = vld [vmem:[#allocation3 + $0x8c] sm:$0x1] }
 0x3c9   : > { %v6526_v6 = vrot.slane %v6524_v26, 5  ;;  %v6532_v32 = vrot.slane %v6530_v23, 5  ;;  %v6545_v19 = vshrl.u32 %v15657_v55, 16  ;;  %v6504_v39 = vrot.slane %v6503_v33, 4 }
 0x3ca   : > { %12494 = vmatmul.mubr.msk.bf16.gmra.mrb[12].mxu1 %vm1545_vm9, %v11461_v52  ;;  %v6514_v15 = vrot.slane %v6513_v49, 4  ;;  %v6536_v25 = vrot.slane %v6534_v11, 4  ;;  %v6548_v30 = vshll.u32 %v15657_v55, 16  ;;  %v6542_v21 = vrot.slane %v6540_v50, 5  ;;  %v15703_v52 = vld [vmem:[#allocation3 + $0x94] sm:$0xf] }
 0x3cb   : > { %v6527_v7 = vor.u32 %v6526_v6, %v6523_v62  ;;  %v6547_v9 = vrot.slane %v6545_v19, 4  ;;  %v6554_v31 = vshll.u32 %v15667_v47, 16  ;;  %v6509_v58 = vsel %vm13571_vm11, %v6504_v39, %v6508_v56 }
 0x3cc   : > { %v6519_v16 = vsel %vm13571_vm11, %v6514_v15, %v6518_v37  ;;  %v6537_v1 = vor.u32 %v6536_v25, %v6532_v32  ;;  %v6550_v13 = vrot.slane %v6548_v30, 5  ;;  %v6558_v51 = vshrl.u32 %v15667_v47, 16  ;;  %v15711_v30 = vld [vmem:[#allocation3 + $0x98] sm:$0x1] }
 0x3cd   : > { %v11462_v63 = vcombine.low %v6509_v58, %v6519_v16  ;;  %v6528_v10 = vrot.slane %v6527_v7, 4  ;;  %v6556_v57 = vrot.slane %v6554_v31, 5  ;;  %v6564_v35 = vshll.u32 %v15675_v0, 16 }
 0x3ce   : > { %v6538_v3 = vrot.slane %v6537_v1, 4  ;;  %v6551_v4 = vor.u32 %v6550_v13, %v6547_v9  ;;  %v6569_v41 = vshrl.u32 %v15680_v12, 16  ;;  %v6560_v56 = vrot.slane %v6558_v51, 4  ;;  %v15716_v1 = vld [vmem:[#allocation3 + $0x9c] sm:$0xf] }
 0x3cf   : > { %12497 = vmatprep.mubr.msk.bf16.mxu1 %vm1545_vm9, %v11462_v63  ;;  %v6533_v20 = vsel %vm13571_vm11, %v6528_v10, %v6532_v32  ;;  %v6572_v36 = vshll.u32 %v15680_v12, 16  ;;  %v6578_v37 = vshll.u32 %v15683_v61, 16  ;;  %v6566_v26 = vrot.slane %v6564_v35, 5  ;;  %v15720_v51 = vld [vmem:[#allocation3 + $0xa0] sm:$0xf] }
 0x3d0   : > { %v6543_v17 = vsel %vm13571_vm11, %v6538_v3, %v6542_v21  ;;  %v6552_v62 = vrot.slane %v6551_v4, 4  ;;  %v6571_v23 = vrot.slane %v6569_v41, 4  ;;  %v6561_v49 = vor.u32 %v6560_v56, %v6556_v57 }
 0x3d1   : > { %v11463_v33 = vcombine.low %v6533_v20, %v6543_v17  ;;  %v6574_v11 = vrot.slane %v6572_v36, 5  ;;  %v6580_v6 = vrot.slane %v6578_v37, 5  ;;  %v6582_v50 = vshrl.u32 %v15683_v61, 16  ;;  %v15723_v20 = vld [vmem:[#allocation3 + $0xa4] sm:$0x1] }
 0x3d2   : > { %v6557_v32 = vsel %vm13571_vm11, %v6552_v62, %v6556_v57  ;;  %v6588_v19 = vshll.u32 %v15693_v8, 16  ;;  %v6593_v39 = vshrl.u32 %v15690_v60, 16  ;;  %v6562_v15 = vrot.slane %v6561_v49, 4  ;;  %v15729_v62 = vld [vmem:[#allocation3 + $0xa8] sm:$0xf] }
 0x3d3   : > { %12498 = vmatmul.mubr.msk.bf16.gmra.mrb[16].mxu1 %vm1545_vm9, %v11463_v33  ;;  %v6575_v25 = vor.u32 %v6574_v11, %v6571_v23  ;;  %v6596_v7 = vshll.u32 %v15690_v60, 16  ;;  %v6602_v21 = vshll.u32 %v15703_v52, 16  ;;  %v6584_v9 = vrot.slane %v6582_v50, 4 }
 0x3d4   : > { %v6590_v31 = vrot.slane %v6588_v19, 5  ;;  %v6595_v58 = vrot.slane %v6593_v39, 4  ;;  %v6606_v16 = vshrl.u32 %v15703_v52, 16  ;;  %v6567_v13 = vsel %vm13571_vm11, %v6562_v15, %v6566_v26 }
 0x3d5   : > { %v6576_v63 = vrot.slane %v6575_v25, 4  ;;  %v6598_v10 = vrot.slane %v6596_v7, 5  ;;  %v6604_v57 = vrot.slane %v6602_v21, 5  ;;  %v11464_v3 = vcombine.low %v6557_v32, %v6567_v13  ;;  %v15739_v21 = vld [vmem:[#allocation3 + $0xb0] sm:$0x1] }
 0x3d6   : > { %v6585_v4 = vor.u32 %v6584_v9, %v6580_v6  ;;  %v6608_v35 = vrot.slane %v6606_v16, 4  ;;  %v6612_v41 = vshll.u32 %v15711_v30, 16  ;;  %v6617_v37 = vshrl.u32 %v15716_v1, 16  ;;  %v15741_v9 = vld [vmem:[#allocation3 + $0xb4] sm:$0xf] }
 0x3d7   : > { %v6581_v56 = vsel %vm13571_vm11, %v6576_v63, %v6580_v6  ;;  %v6599_v36 = vor.u32 %v6598_v10, %v6595_v58  ;;  %v6620_v17 = vshll.u32 %v15716_v1, 16  ;;  %12501 = vmatprep.mubr.msk.bf16.mxu1 %vm1545_vm9, %v11464_v3  ;;  %v6626_v49 = vshll.u32 %v15720_v51, 16  ;;  %v15734_v6 = vld [vmem:[#allocation3 + $0xac] sm:$0xf] }
 0x3d8   : > { %v6586_v26 = vrot.slane %v6585_v4, 4  ;;  %v6609_v23 = vor.u32 %v6608_v35, %v6604_v57  ;;  %v6614_v33 = vrot.slane %v6612_v41, 5  ;;  %v6619_v32 = vrot.slane %v6617_v37, 4  ;;  %v15749_v4 = vld [vmem:[#allocation3 + $0xb8] sm:$0xf] }
 0x3d9   : > { %v6600_v11 = vrot.slane %v6599_v36, 4  ;;  %v6622_v50 = vrot.slane %v6620_v17, 5  ;;  %v6630_v19 = vshrl.u32 %v15720_v51, 16  ;;  %v6628_v25 = vrot.slane %v6626_v49, 5 }
 0x3da   : > { %v6591_v39 = vsel %vm13571_vm11, %v6586_v26, %v6590_v31  ;;  %v6610_v15 = vrot.slane %v6609_v23, 4  ;;  %v6636_v7 = vshll.u32 %v15723_v20, 16  ;;  %v6641_v3 = vshrl.u32 %v15729_v62, 16 }
 0x3db   : > { %v11465_v58 = vcombine.low %v6581_v56, %v6591_v39  ;;  %v6623_v16 = vor.u32 %v6622_v50, %v6619_v32  ;;  %v6632_v13 = vrot.slane %v6630_v19, 4  ;;  %v6605_v63 = vsel %vm13571_vm11, %v6600_v11, %v6604_v57  ;;  %v15759_v39 = vld [vmem:[#allocation3 + $0xbc] sm:$0x1] }
 0x3dc   : > { %v6615_v10 = vsel %vm13571_vm11, %v6610_v15, %v6614_v33  ;;  %v6644_v31 = vshll.u32 %v15729_v62, 16  ;;  %v6650_v56 = vshll.u32 %v15734_v6, 16  ;;  %v6638_v37 = vrot.slane %v6636_v7, 5 }
 0x3dd   : > { %12502 = vmatmul.mubr.msk.bf16.gmra.mrb[20].mxu1 %vm1545_vm9, %v11465_v58  ;;  %v11466_v35 = vcombine.low %v6605_v63, %v6615_v10  ;;  %v6624_v41 = vrot.slane %v6623_v16, 4  ;;  %v6633_v36 = vor.u32 %v6632_v13, %v6628_v25  ;;  %v6643_v17 = vrot.slane %v6641_v3, 4 }
 0x3de   : > { %v6646_v26 = vrot.slane %v6644_v31, 5  ;;  %v6654_v57 = vshrl.u32 %v15734_v6, 16  ;;  %v6652_v33 = vrot.slane %v6650_v56, 5  ;;  %v6660_v49 = vshll.u32 %v15739_v21, 16 }
 0x3df   : > { %12505 = vmatprep.mubr.msk.bf16.mxu1 %vm1545_vm9, %v11466_v35  ;;  %v6634_v23 = vrot.slane %v6633_v36, 4  ;;  %v6665_v11 = vshrl.u32 %v15741_v9, 16  ;;  %v6629_v32 = vsel %vm13571_vm11, %v6624_v41, %v6628_v25  ;;  %v6668_v15 = vshll.u32 %v15741_v9, 16 }
 0x3e0   : > { %v6647_v50 = vor.u32 %v6646_v26, %v6643_v17  ;;  %v6656_v19 = vrot.slane %v6654_v57, 4  ;;  %v6674_v16 = vshll.u32 %v15749_v4, 16  ;;  %v6678_v13 = vshrl.u32 %v15749_v4, 16 }
 0x3e1   : > { %v6639_v7 = vsel %vm13571_vm11, %v6634_v23, %v6638_v37  ;;  %v6667_v58 = vrot.slane %v6665_v11, 4  ;;  %v6670_v31 = vrot.slane %v6668_v15, 5  ;;  %v6684_v41 = vshll.u32 %v15759_v39, 16  ;;  %v15772_v15 = vld [vmem:[#allocation3 + $0x4] sm:$0xf] }
 0x3e2   : > { %v11467_v63 = vcombine.low %v6629_v32, %v6639_v7  ;;  %v6648_v10 = vrot.slane %v6647_v50, 4  ;;  %v6657_v3 = vor.u32 %v6656_v19, %v6652_v33  ;;  %v6676_v35 = vrot.slane %v6674_v16, 5  ;;  %v13426_v19 = vld [vmem:[#allocation3] sm:$0xf] }
 0x3e3   : > { %v6680_v25 = vrot.slane %v6678_v13, 4  ;;  %v6662_v56 = vrot.slane %v6660_v49, 5  ;;  %v6671_v17 = vor.u32 %v6670_v31, %v6667_v58  ;;  %v6686_v50 = vrot.slane %v6684_v41, 5  ;;  %v7252_v41 = vld [vmem:[#allocation3 + $0x78] sm:$0xe] }
 0x3e4   : > { %v6658_v36 = vrot.slane %v6657_v3, 4  ;;  %v6653_v37 = vsel %vm13571_vm11, %v6648_v10, %v6652_v33  ;;  %v11486_v7 = vcombine.low %v13426_v19, %v15772_v15  ;;  %v11493_v58 = vcombine.low %v15602_v54, %v15612_v14 }
 0x3e5   : > { %12506 = vmatmul.mubr.msk.bf16.gmra.mrb[24].mxu1 %vm1545_vm9, %v11467_v63  ;;  %v6681_v26 = vor.u32 %v6680_v25, %v6676_v35  ;;  %v6672_v23 = vrot.slane %v6671_v17, 4  ;;  %v11494_v33 = vcombine.low %v15624_v42, %v15637_v29  ;;  %v11495_v16 = vcombine.low %v15647_v22, %v15649_v28  ;;  %v13433_v22 = vld [vmem:[#allocation3 + $0x8] sm:$0x1] }
 0x3e6   : > { %v6663_v57 = vsel %vm13571_vm11, %v6658_v36, %v6662_v56  ;;  %v11496_v63 = vcombine.low %v15657_v55, %v15667_v47  ;;  %v13428_v36 = vld [vmem:[#allocation3 + $0xc] sm:$0xf]  ;;  %v15800_v56 = vld [vmem:[#allocation3 + $0x10] sm:$0xf]  ;;  %v7341_v19 = vrot.slane %v15612_v14, 5  ;;  %v7386_v3 = vrot.slane %v15723_v20, 5 }
 0x3e7   : > { %v11468_v11 = vcombine.low %v6653_v37, %v6663_v57  ;;  %v6682_v32 = vrot.slane %v6681_v26, 4  ;;  %v6677_v49 = vsel %vm13571_vm11, %v6672_v23, %v6676_v35  ;;  %v11487_v17 = vcombine.low %v13428_v36, %v15800_v56  ;;  %v13430_v37 = vld [vmem:[#allocation3 + $0x18] sm:$0xf]  ;;  %v15805_v57 = vld [vmem:[#allocation3 + $0x1c] sm:$0xf] }
 0x3e8   : > { %v7501_v26 = vsel %vm1594_vm0, %v15491_v18, 0  ;;  %v11488_v23 = vcombine.low %v13430_v37, %v15805_v57  ;;  %v7251_v18 = vld [vmem:[#allocation3 + $0x6c] sm:$0xe]  ;;  %v7348_v36 = vrot.slane %v15637_v29, 5  ;;  %v7253_v35 = vld [vmem:[#allocation3 + $0x84] sm:$0xe]  ;;  %v17547_v54 = vcombine.low %v15680_v12, %v15683_v61 }
 0x3e9   : > { %12509 = vmatprep.mubr.msk.bf16.mxu1 %vm1545_vm9, %v11468_v11  ;;  %v6687_v13 = vsel %vm13571_vm11, %v6682_v32, %v6686_v50  ;;  %v15811_v11 = vld [vmem:[%s17342_s4 + $0x6] sm:$0x3]  ;;  %v7249_v32 = vld [vmem:[#allocation3 + $0x54] sm:$0xe]  ;;  %v7250_v50 = vld [vmem:[#allocation3 + $0x60] sm:$0xe]  ;;  %v17548_v14 = vcombine.low %v15690_v60, %v15703_v52  ;;  %v17549_v55 = vcombine.low %v15716_v1, %v15720_v51  ;;  %v17551_v1 = vcombine.low %v15741_v9, %v15749_v4 }
 0x3ea   : > { %v11469_v31 = vcombine.low %v6677_v49, %v6687_v13  ;;  %v11490_v13 = vcombine.low %v15516_v46, %v15522_v38  ;;  %v11526_v37 = vrot.slane %v7250_v50, 9  ;;  %v7355_v46 = vrot.slane %v15649_v28, 5  ;;  %v7242_v29 = vld [vmem:[#allocation3] sm:$0xe] }
 0x3eb   : > { %v7397_v20 = vrot.slane %v15749_v4, 5  ;;  %v7292_v42 = vrot.slane %v15772_v15, 5  ;;  %v7295_v28 = vrot.slane %v13433_v22, 5  ;;  %v7299_v60 = vrot.slane %v15800_v56, 5  ;;  %v13437_v4 = vld [vmem:[#allocation3 + $0x34] sm:$0xf] }
 0x3ec   : > { %v7245_v22 = vld [vmem:[#allocation3 + $0x24] sm:$0xe] }
 0x3ed   : > { %12510 = vmatmul.mubr.msk.bf16.gmra.mrb[28].mxu1 %vm1545_vm9, %v11469_v31  ;;  %v11525_v31 = vrot.slane %v7249_v32, 9  ;;  %v15835_v32 = vsel %vm14037_vm2, %v11526_v37, %v7348_v36  ;;  %v7254_v37 = vld [vmem:[#allocation3 + $0x90] sm:$0xe] }
 0x3ee   : > { %12515 = vmatprep.mubr.msk.bf16.mxu1 %vm1545_vm9, %v11486_v7  ;;  %v13432_v7 = vld [vmem:[#allocation3 + $0x24] sm:$0xf] }
 0x3ef   : > { %v11489_v49 = vcombine.low %v13432_v7, %v15503_v48  ;;  %v15826_v25 = vsel %vm14037_vm2, %v11525_v31, %v7341_v19  ;;  %v7350_v48 = vrot.slane %v7348_v36, 4  ;;  %v11527_v7 = vrot.slane %v7251_v18, 9 }
 0x3f0   : > { %v7357_v18 = vrot.slane %v7355_v46, 4  ;;  %v11528_v31 = vrot.slane %v7252_v41, 9  ;;  %v7379_v36 = vrot.slane %v15711_v30, 5 }
 0x3f1   : > { %v15853_v50 = vsel %vm14037_vm2, %v11527_v7, %v7355_v46  ;;  %v7376_v7 = vrot.slane %v15703_v52, 5  ;;  %v7255_v46 = vld [vmem:[#allocation3 + $0x9c] sm:$0xe]  ;;  %v7306_v52 = vrot.slane %v15805_v57, 5  ;;  %v13436_v57 = vld [vmem:[#allocation3 + $0x28] sm:$0xf] }
 0x3f5   : > { %12516 = vmatmul.mubr.msk.bf16.vlgmr.msra.gmra.mrb[0].mxu1 %vm1545_vm9, %v11487_v17  ;;  %v7343_v17 = vrot.slane %v7341_v19, 4 }
 0x3f6   : > { %12548 = vmatpush3.bf16.msra.mxu1 %v7501_v26  ;;  %12519 = vmatprep.mubr.msk.bf16.mxu1 %vm1545_vm9, %v11488_v23  ;;  %v7344_v26 = vrot.slane %v15622_v40, 5  ;;  %v7351_v23 = vrot.slane %v15639_v53, 5  ;;  %v7358_v40 = vrot.slane %v15665_v27, 5  ;;  %v7362_v53 = vrot.slane %v15667_v47, 5 }
 0x3f7   : > { %13309 = vmatprep.subr.msk.bf16.mxu1 %vm1594_vm0, %v15811_v11  ;;  %v7365_v27 = vrot.slane %v15675_v0, 5  ;;  %v7378_v0 = vrot.slane %v7376_v7, 4  ;;  %v17550_v47 = vcombine.low %v15729_v62, %v15734_v6  ;;  %v7308_v62 = vrot.slane %v7306_v52, 4 }
 0x3f8   : > { %v15831_v38 = vsel %vm14037_vm2, %v7343_v17, %v7344_v26  ;;  %v15843_v19 = vsel %vm14037_vm2, %v7350_v48, %v7351_v23  ;;  %v11491_v17 = vcombine.low %v15540_v45, %v15563_v24  ;;  %v7364_v26 = vrot.slane %v7362_v53, 4 }
 0x3f9   : > { %v15857_v41 = vsel %vm14037_vm2, %v7357_v18, %v7358_v40  ;;  %v15861_v45 = vsel %vm14037_vm2, %v11528_v31, %v7362_v53  ;;  %v7369_v23 = vrot.slane %v15683_v61, 5  ;;  %v11529_v48 = vrot.slane %v7253_v35, 9  ;;  %v7256_v35 = vld [vmem:[#allocation3 + $0xa8] sm:$0xe] }
 0x3fa   : > { %v7372_v18 = vrot.slane %v15693_v8, 5  ;;  %v11530_v31 = vrot.slane %v7254_v37, 9  ;;  %v11531_v8 = vrot.slane %v7255_v46, 9  ;;  %v7390_v37 = vrot.slane %v15734_v6, 5  ;;  %v7257_v46 = vld [vmem:[#allocation3 + $0xb4] sm:$0xe] }
 0x3fb   : > { %v7371_v53 = vrot.slane %v7369_v23, 4  ;;  %v15894_v30 = vsel %vm14037_vm2, %v7378_v0, %v7379_v36  ;;  %v13434_v6 = vld [vmem:[#allocation3 + $0x14] sm:$0x1] }
 0x3fc   : > { %v15887_v40 = vsel %vm14037_vm2, %v11530_v31, %v7376_v7  ;;  %v7392_v10 = vrot.slane %v7390_v37, 4  ;;  %v7393_v7 = vrot.slane %v15739_v21, 5  ;;  %v11492_v31 = vcombine.low %v15570_v34, %v15579_v5 }
 0x3fd   : > { %12520 = vmatmul.mubr.msk.bf16.gmra.mrb[4].mxu1 %vm1545_vm9, %v11489_v49  ;;  %v15869_v49 = vsel %vm14037_vm2, %v7364_v26, %v7365_v27  ;;  %v7383_v26 = vrot.slane %v15720_v51, 5  ;;  %v15883_v27 = vsel %vm14037_vm2, %v7371_v53, %v7372_v18  ;;  %v11532_v18 = vrot.slane %v7256_v35, 9  ;;  %v7243_v51 = vld [vmem:[#allocation3 + $0xc] sm:$0xe] }
 0x3fe   : > { %12523 = vmatprep.mubr.msk.bf16.mxu1 %vm1545_vm9, %v11490_v13  ;;  %v15877_v13 = vsel %vm14037_vm2, %v11529_v48, %v7369_v23  ;;  %v15920_v34 = vsel %vm14037_vm2, %v7392_v10, %v7393_v7  ;;  %v7399_v35 = vrot.slane %v7397_v20, 4  ;;  %v11519_v7 = vrot.slane %v7243_v51, 9 }
 0x3ff   : > { %v7385_v48 = vrot.slane %v7383_v26, 4  ;;  %v15904_v23 = vsel %vm14037_vm2, %v11531_v8, %v7383_v26  ;;  %v15916_v21 = vsel %vm14037_vm2, %v11532_v18, %v7390_v37  ;;  %v11533_v26 = vrot.slane %v7257_v46, 9 }
 0x400   : > { %v7313_v46 = vrot.slane %v13436_v57, 5  ;;  %v17570_v0 = vcombine.low %v15877_v13, %v15883_v27 }
 0x401   : > { %v15908_v36 = vsel %vm14037_vm2, %v7385_v48, %v7386_v3  ;;  %v15928_v8 = vsel %vm14037_vm2, %v11533_v26, %v7397_v20  ;;  %v13435_v48 = vld [vmem:[#allocation3 + $0x20] sm:$0x1]  ;;  %v7320_v20 = vrot.slane %v13437_v4, 5  ;;  %v7300_v26 = vsel %vm14037_vm2, %v11519_v7, %v7299_v60  ;;  %v8792_v3 = vld [vmem:[#allocation3 + $0x9c] sm:$0xe] }
 0x402   : > { %v7309_v18 = vrot.slane %v13435_v48, 5 }
 0x404   : > { %v7310_v9 = vsel %vm14037_vm2, %v7308_v62, %v7309_v18  ;;  %v7248_v18 = vld [vmem:[#allocation3 + $0x48] sm:$0xe] }
 0x405   : > { %12524 = vmatmul.mubr.msk.bf16.gmra.mrb[8].mxu1 %vm1545_vm9, %v11491_v17  ;;  %v7400_v17 = vrot.slane %v15759_v39, 5  ;;  %v11518_v39 = vrot.slane %v7242_v29, 9  ;;  %v15993_v29 = vld [vmem:[%s17342_s4 + $0x8] sm:$0x3]  ;;  %v11524_v57 = vrot.slane %v7248_v18, 9 }
 0x406   : > { %12527 = vmatprep.mubr.msk.bf16.mxu1 %vm1545_vm9, %v11492_v31  ;;  %v16071_v18 = vld [vmem:[#allocation3 + $0x64] sm:$0xf] }
 0x407   : > { %v15932_v37 = vsel %vm14037_vm2, %v7399_v35, %v7400_v17  ;;  %v7293_v12 = vsel %vm14037_vm2, %v11518_v39, %v7292_v42  ;;  %v7859_v17 = vsel %vm1594_vm0, %v15811_v11, 0  ;;  %v13438_v39 = vld [vmem:[#allocation3 + $0x2c] sm:$0x1]  ;;  %v7246_v11 = vld [vmem:[#allocation3 + $0x30] sm:$0xe] }
 0x40d   : > { %12528 = vmatmul.mubr.msk.bf16.gmra.mrb[12].mxu1 %vm1545_vm9, %v11493_v58  ;;  %v7294_v58 = vrot.slane %v7292_v42, 4  ;;  %v7315_v42 = vrot.slane %v7313_v46, 4 }
 0x40e   : > { %12531 = vmatprep.mubr.msk.bf16.mxu1 %vm1545_vm9, %v11494_v33  ;;  %v7301_v33 = vrot.slane %v7299_v60, 4  ;;  %v7327_v60 = vrot.slane %v15563_v24, 5  ;;  %v7330_v24 = vrot.slane %v15568_v2, 5  ;;  %v16023_v2 = vld [vmem:[#allocation3 + $0x28] sm:$0xf] }
 0x40f   : > { %v7296_v61 = vsel %vm14037_vm2, %v7294_v58, %v7295_v28  ;;  %v7322_v28 = vrot.slane %v7320_v20, 4  ;;  %v7316_v58 = vrot.slane %v13438_v39, 5 }
 0x410   : > { %v11535_v15 = vcombine.low %v7293_v12, %v7296_v61  ;;  %v11521_v12 = vrot.slane %v7245_v22, 9  ;;  %v17553_v22 = vcombine.low %v15835_v32, %v15843_v19 }
 0x411   : > { %v7317_v61 = vsel %vm14037_vm2, %v7315_v42, %v7316_v58  ;;  %v8783_v42 = vld [vmem:[#allocation3 + $0x30] sm:$0xe] }
 0x412   : > { %v11636_v19 = vrot.slane %v8783_v42, 9  ;;  %v8791_v42 = vld [vmem:[#allocation3 + $0x90] sm:$0xe] }
 0x413   : > { %v11644_v53 = vrot.slane %v8791_v42, 9 }
 0x415   : > { %12532 = vmatmul.mubr.msk.bf16.gmra.mrb[16].mxu1 %vm1545_vm9, %v11495_v16  ;;  %v7302_v16 = vrot.slane %v13434_v6, 5 }
 0x416   : > { %12535 = vmatprep.mubr.msk.bf16.mxu1 %vm1545_vm9, %v11496_v63  ;;  %v7244_v63 = vld [vmem:[#allocation3 + $0x18] sm:$0xe] }
 0x417   : > { %v7303_v56 = vsel %vm14037_vm2, %v7301_v33, %v7302_v16  ;;  %v11520_v31 = vrot.slane %v7244_v63, 9  ;;  %v7334_v33 = vrot.slane %v15579_v5, 5  ;;  %v7329_v16 = vrot.slane %v7327_v60, 4  ;;  %v7247_v63 = vld [vmem:[#allocation3 + $0x3c] sm:$0xe] }
 0x418   : > { %v11536_v35 = vcombine.low %v7300_v26, %v7303_v56  ;;  %v7337_v5 = vrot.slane %v15585_v59, 5  ;;  %v11523_v7 = vrot.slane %v7247_v63, 9  ;;  %v8782_v59 = vld [vmem:[#allocation3 + $0x24] sm:$0xe]  ;;  %v16025_v26 = vld [vmem:[#allocation3 + $0x2c] sm:$0x1] }
 0x419   : > { %v7336_v48 = vrot.slane %v7334_v33, 4  ;;  %v7331_v56 = vsel %vm14037_vm2, %v7329_v16, %v7330_v24  ;;  %v7335_v4 = vsel %vm14037_vm2, %v11524_v57, %v7334_v33  ;;  %v11635_v39 = vrot.slane %v8782_v59, 9  ;;  %v8786_v24 = vld [vmem:[#allocation3 + $0x54] sm:$0xe] }
 0x41d   : > { %12536 = vmatmul.mubr.msk.bf16.gmra.mrb[20].mxu1 %vm1545_vm9, %v17547_v54  ;;  %v7307_v54 = vsel %vm14037_vm2, %v11520_v31, %v7306_v52  ;;  %v11522_v52 = vrot.slane %v7246_v11, 9  ;;  %v7328_v31 = vsel %vm14037_vm2, %v11523_v7, %v7327_v60  ;;  %v8784_v11 = vld [vmem:[#allocation3 + $0x3c] sm:$0xe]  ;;  %v8785_v60 = vld [vmem:[#allocation3 + $0x48] sm:$0xe] }
 0x41e   : > { %12539 = vmatprep.mubr.msk.bf16.mxu1 %vm1545_vm9, %v17548_v14  ;;  %v11537_v14 = vcombine.low %v7307_v54, %v7310_v9  ;;  %v11540_v9 = vcombine.low %v7328_v31, %v7331_v56  ;;  %v17552_v54 = vcombine.low %v15826_v25, %v15831_v38  ;;  %v8863_v25 = vrot.slane %v16025_v26, 5  ;;  %v16082_v31 = vld [vmem:[#allocation3 + $0x68] sm:$0x1] }
 0x41f   : > { %v7321_v62 = vsel %vm14037_vm2, %v11522_v52, %v7320_v20  ;;  %v16055_v52 = vld [vmem:[#allocation3 + $0x58] sm:$0xf]  ;;  %v11638_v56 = vrot.slane %v8785_v60, 9  ;;  %v16112_v60 = vld [vmem:[#allocation3 + $0x7c] sm:$0xf] }
 0x425   : > { %12540 = vmatmul.mubr.msk.bf16.gmra.mrb[24].mxu1 %vm1545_vm9, %v17549_v55  ;;  %v13439_v55 = vld [vmem:[#allocation3 + $0x38] sm:$0x1] }
 0x426   : > { %12543 = vmatprep.mubr.msk.bf16.mxu1 %vm1545_vm9, %v17550_v47  ;;  %v7323_v47 = vrot.slane %v13439_v55, 5  ;;  %v16042_v55 = vld [vmem:[#allocation3 + $0x44] sm:$0x1] }
 0x42d   : > { %12544 = vmatmul.mubr.msk.bf16.gmra.mrb[28].mxu1 %vm1545_vm9, %v17551_v1  ;;  %v7314_v1 = vsel %vm14037_vm2, %v11521_v12, %v7313_v46  ;;  %v7338_v46 = vsel %vm14037_vm2, %v7336_v48, %v7337_v5  ;;  %v16048_v12 = vld [vmem:[#allocation3 + $0x50] sm:$0x1]  ;;  %v8877_v48 = vrot.slane %v16042_v55, 5 }
 0x42e   : > { %12549 = vmatprep.mubr.msk.bf16.mxu1 %vm1545_vm9, %v11535_v15  ;;  %v7324_v15 = vsel %vm14037_vm2, %v7322_v28, %v7323_v47  ;;  %v11538_v51 = vcombine.low %v7314_v1, %v7317_v61  ;;  %v11541_v20 = vcombine.low %v7335_v4, %v7338_v46  ;;  %v16040_v28 = vld [vmem:[#allocation3 + $0x38] sm:$0x1]  ;;  %v16044_v47 = vld [vmem:[#allocation3 + $0x4c] sm:$0xf]  ;;  %v8787_v46 = vld [vmem:[#allocation3 + $0x60] sm:$0xe] }
 0x42f   : > { %v11539_v6 = vcombine.low %v7321_v62, %v7324_v15  ;;  %v8870_v1 = vrot.slane %v16040_v28, 5  ;;  %v16062_v62 = vld [vmem:[#allocation3 + $0x5c] sm:$0x1]  ;;  %v8881_v57 = vrot.slane %v16044_v47, 5  ;;  %v8884_v59 = vrot.slane %v16048_v12, 5 }
 0x430   : > { %v16173_v4 = vld [vmem:[#allocation3 + $0xa4] sm:$0x1] }
 0x435   : > { %12550 = vmatmul.mubr.msk.bf16.vlgmr.msra.gmra.mrb[0].mxu1 %vm1545_vm9, %v11536_v35  ;;  %v16027_v35 = vld [vmem:[#allocation3 + $0x34] sm:$0xf] }
 0x436   : > { %12582 = vmatpush3.bf16.msra.mxu1 %v7859_v17  ;;  %12553 = vmatprep.mubr.msk.bf16.mxu1 %vm1545_vm9, %v11537_v14  ;;  %v8860_v17 = vrot.slane %v16023_v2, 5  ;;  %v16034_v14 = vld [vmem:[#allocation3 + $0x40] sm:$0xf]  ;;  %v8867_v38 = vrot.slane %v16027_v35, 5 }
 0x437   : > { %13310 = vmatprep.subr.msk.bf16.mxu1 %vm1594_vm0, %v15993_v29  ;;  %v8874_v61 = vrot.slane %v16034_v14, 5 }
 0x438   : > { %v8862_v58 = vrot.slane %v8860_v17, 4  ;;  %v16052_v32 = vsel %vm14037_vm2, %v11635_v39, %v8860_v17  ;;  %v8869_v33 = vrot.slane %v8867_v38, 4  ;;  %v16068_v16 = vsel %vm14037_vm2, %v11636_v19, %v8867_v38  ;;  %v16105_v38 = vld [vmem:[#allocation3 + $0x74] sm:$0x1] }
 0x439   : > { %17554 = vst [vmem:[#allocation17_spill] sm:$0xff] %v16052_v32  ;;  %17556 = vst [vmem:[#allocation19_spill] sm:$0xff] %v16068_v16  ;;  %v8876_v63 = vrot.slane %v8874_v61, 4  ;;  %v8888_v17 = vrot.slane %v16055_v52, 5  ;;  %v11639_v39 = vrot.slane %v8786_v24, 9  ;;  %v11640_v19 = vrot.slane %v8787_v46, 9 }
 0x43a   : > { %v16059_v15 = vsel %vm14037_vm2, %v8862_v58, %v8863_v25  ;;  %v16075_v5 = vsel %vm14037_vm2, %v8869_v33, %v8870_v1  ;;  %v8891_v58 = vrot.slane %v16062_v62, 5  ;;  %v17561_v25 = vcombine.low %v15861_v45, %v15869_v49  ;;  %v16143_v24 = vld [vmem:[#allocation3 + $0x94] sm:$0xf]  ;;  %v13375_v32 = vld [vmem:[#allocation3 + $0x78] sm:$0xff]  }
 0x43b   : > { %17555 = vst [vmem:[#allocation18_spill] sm:$0xff] %v16059_v15  ;;  %17557 = vst [vmem:[#allocation20_spill] sm:$0xff] %v16075_v5  ;;  %v16120_v45 = vsel %vm14037_vm2, %v11639_v39, %v8888_v17  ;;  %v8898_v49 = vrot.slane %v16082_v31, 5  ;;  %v8905_v39 = vrot.slane %v16105_v38, 5 }
 0x43c   : > { %17564 = vst [vmem:[#allocation10_spill] sm:$0xff] %v16120_v45  ;;  %v8160_v45 = vshll.u32 %v16023_v2, 16 }
 0x43d   : > { %12554 = vmatmul.mubr.msk.bf16.gmra.mrb[4].mxu1 %vm1545_vm9, %v11538_v51  ;;  %v11637_v51 = vrot.slane %v8784_v11, 9  ;;  %v8788_v11 = vld [vmem:[#allocation3 + $0x6c] sm:$0xe] }
 0x43e   : > { %12557 = vmatprep.mubr.msk.bf16.mxu1 %vm1545_vm9, %v11539_v6  ;;  %v11641_v46 = vrot.slane %v8788_v11, 9 }
 0x43f   : > { %v16079_v7 = vsel %vm14037_vm2, %v11637_v51, %v8874_v61  ;;  %v8895_v61 = vrot.slane %v16071_v18, 5  ;;  %v8789_v51 = vld [vmem:[#allocation3 + $0x78] sm:$0xe] }
 0x440   : > { %17558 = vst [vmem:[#allocation21_spill] sm:$0xff] %v16079_v7 }
 0x445   : > { %12558 = vmatmul.mubr.msk.bf16.gmra.mrb[8].mxu1 %vm1545_vm9, %v11540_v9  ;;  %v16084_v9 = vld [vmem:[#allocation3 + $0x70] sm:$0xf] }
 0x446   : > { %12561 = vmatprep.mubr.msk.bf16.mxu1 %vm1545_vm9, %v11541_v20  ;;  %v16090_v20 = vsel %vm14037_vm2, %v8876_v63, %v8877_v48  ;;  %v8902_v1 = vrot.slane %v16084_v9, 5  ;;  %v16124_v63 = vld [vmem:[#allocation3 + $0x80] sm:$0x1]  ;;  %v16126_v48 = vld [vmem:[#allocation3 + $0x88] sm:$0xf] }
 0x447   : > { %17559 = vst [vmem:[#allocation22_spill] sm:$0xff] %v16090_v20  ;;  %v16318_v20 = vrot.slane %v8160_v45, 5 }
 0x448   : > { %v16151_v11 = vsel %vm14037_vm2, %v11641_v46, %v8902_v1 }
 0x449   : > { %17568 = vst [vmem:[#allocation14_spill] sm:$0xff] %v16151_v11  ;;  %v8933_v11 = vrot.slane %v16173_v4, 5 }
 0x44d   : > { %12562 = vmatmul.mubr.msk.bf16.gmra.mrb[12].mxu1 %vm1545_vm9, %v17552_v54  ;;  %v17560_v54 = vcombine.low %v15853_v50, %v15857_v41  ;;  %v16109_v50 = vsel %vm14037_vm2, %v11638_v56, %v8881_v57  ;;  %v8890_v41 = vrot.slane %v8888_v17, 4  ;;  %v8909_v17 = vrot.slane %v16112_v60, 5 }
 0x44e   : > { %12565 = vmatprep.mubr.msk.bf16.mxu1 %vm1545_vm9, %v17553_v22  ;;  %v8883_v22 = vrot.slane %v8881_v57, 4  ;;  %17562 = vst [vmem:[#allocation8_spill] sm:$0xff] %v16109_v50  ;;  %v8897_v57 = vrot.slane %v8895_v61, 4 }
 0x44f   : > { %v16132_v56 = vsel %vm14037_vm2, %v8890_v41, %v8891_v58  ;;  %v11642_v41 = vrot.slane %v8789_v51, 9  ;;  %v8923_v51 = vrot.slane %v16143_v24, 5 }
 0x450   : > { %v16116_v33 = vsel %vm14037_vm2, %v8883_v22, %v8884_v59  ;;  %17565 = vst [vmem:[#allocation11_spill] sm:$0xff] %v16132_v56  ;;  %v16134_v59 = vld [vmem:[#allocation3 + $0x8c] sm:$0x1]  ;;  %v8904_v22 = vrot.slane %v8902_v1, 4  ;;  %v16147_v58 = vsel %vm14037_vm2, %v8897_v57, %v8898_v49  ;;  %v8912_v49 = vrot.slane %v16124_v63, 5 }
 0x451   : > { %17563 = vst [vmem:[#allocation9_spill] sm:$0xff] %v16116_v33  ;;  %17567 = vst [vmem:[#allocation13_spill] sm:$0xff] %v16147_v58  ;;  %v8916_v1 = vrot.slane %v16126_v48, 5  ;;  %v8911_v57 = vrot.slane %v8909_v17, 4  ;;  %v8919_v10 = vrot.slane %v16134_v59, 5 }
 0x452   : > { %v16162_v6 = vsel %vm14037_vm2, %v8904_v22, %v8905_v39  ;;  %v16177_v22 = vsel %vm14037_vm2, %v11642_v41, %v8909_v17  ;;  %v16196_v17 = vld [vmem:[#allocation3 + $0xb8] sm:$0xf]  ;;  %v8925_v41 = vrot.slane %v8923_v51, 4  ;;  %v8794_v58 = vld [vmem:[#allocation3 + $0xb4] sm:$0xe] }
 0x453   : > { %17569 = vst [vmem:[#allocation15_spill] sm:$0xff] %v16162_v6  ;;  %17571 = vst [vmem:[#allocation16_spill] sm:$0xff] %v16177_v22  ;;  %v8918_v39 = vrot.slane %v8916_v1, 4  ;;  %v16184_v6 = vld [vmem:[#allocation3 + $0xac] sm:$0xf]  ;;  %v16188_v13 = vsel %vm14037_vm2, %v8911_v57, %v8912_v49  ;;  %v11645_v49 = vrot.slane %v8792_v3, 9 }
 0x454   : > { %17573 = vst [vmem:[#allocation4_spill] sm:$0xff] %v16188_v13  ;;  %v8793_v57 = vld [vmem:[#allocation3 + $0xa8] sm:$0xe]  ;;  %v16211_v56 = vld [vmem:[#allocation3 + $0xc4] sm:$0xf] }
 0x455   : > { %12566 = vmatmul.mubr.msk.bf16.gmra.mrb[16].mxu1 %vm1545_vm9, %v17560_v54  ;;  %v16140_v54 = vsel %vm14037_vm2, %v11640_v19, %v8895_v61  ;;  %v16154_v19 = vld [vmem:[#allocation3 + $0x98] sm:$0x1]  ;;  %v16156_v61 = vld [vmem:[#allocation3 + $0xa0] sm:$0xf]  ;;  %v16233_v13 = vld [vmem:[#allocation3 + $0xc8] sm:$0x1] }
 0x456   : > { %12569 = vmatprep.mubr.msk.bf16.mxu1 %vm1545_vm9, %v17561_v25  ;;  %17566 = vst [vmem:[#allocation12_spill] sm:$0xff] %v16140_v54  ;;  %v8790_v25 = vld [vmem:[#allocation3 + $0x84] sm:$0xe]  ;;  %v8930_v42 = vrot.slane %v16156_v61, 5  ;;  %v16209_v54 = vld [vmem:[#allocation3 + $0xbc] sm:$0x1] }
 0x457   : > { %v11643_v46 = vrot.slane %v8790_v25, 9  ;;  %v17572_v25 = vcombine.low %v15887_v40, %v15894_v30  ;;  %v16202_v30 = vsel %vm14037_vm2, %v8918_v39, %v8919_v10  ;;  %v16215_v10 = vsel %vm14037_vm2, %v11644_v53, %v8923_v51  ;;  %v8795_v51 = vld [vmem:[#allocation3 + $0xc0] sm:$0xe]  ;;  %17580 = vst [vmem:[#allocation26_spill] sm:$0xff] %v16233_v13 }
 0x458   : > { %17575 = vst [vmem:[#allocation7_spill] sm:$0xff] %v16202_v30  ;;  %17576 = vst [vmem:[#allocation6_spill] sm:$0xff] %v16215_v10  ;;  %v16223_v39 = vsel %vm14037_vm2, %v11645_v49, %v8930_v42  ;;  %v8944_v53 = vrot.slane %v16196_v17, 5  ;;  %v11647_v49 = vrot.slane %v8794_v58, 9  ;;  %v8947_v40 = vrot.slane %v16209_v54, 5 }
 0x459   : > { %v16192_v27 = vsel %vm14037_vm2, %v11643_v46, %v8916_v1  ;;  %v8932_v46 = vrot.slane %v8930_v42, 4  ;;  %17578 = vst [vmem:[#allocation24_spill] sm:$0xff] %v16223_v39  ;;  %v8937_v1 = vrot.slane %v16184_v6, 5  ;;  %v13372_v39 = vld [vmem:[#allocation3 + $0x54] sm:$0xff]  }
 0x45a   : > { %17574 = vst [vmem:[#allocation5_spill] sm:$0xff] %v16192_v27  ;;  %v11646_v27 = vrot.slane %v8793_v57, 9  ;;  %v8946_v22 = vrot.slane %v8944_v53, 4  ;;  %v16254_v58 = vsel %vm14037_vm2, %v11647_v49, %v8944_v53  ;;  %v13369_v49 = vld [vmem:[#allocation3 + $0x30] sm:$0xff]  }
 0x45b   : > { %v16230_v30 = vsel %vm14037_vm2, %v8932_v46, %v8933_v11  ;;  %v8939_v42 = vrot.slane %v8937_v1, 4  ;;  %v17581_v11 = vcombine.low %v15904_v23, %v15908_v36  ;;  %17584 = vst [vmem:[#allocation29_spill] sm:$0xff] %v16254_v58 }
 0x45c   : > { %17579 = vst [vmem:[#allocation25_spill] sm:$0xff] %v16230_v30  ;;  %v16246_v57 = vsel %vm14037_vm2, %v11646_v27, %v8937_v1  ;;  %v17585_v30 = vcombine.low %v15916_v21, %v15920_v34  ;;  %v16264_v36 = vsel %vm14037_vm2, %v8946_v22, %v8947_v40  ;;  %v8954_v1 = vrot.slane %v16233_v13, 5  ;;  %v13367_v40 = vld [vmem:[#allocation3 + $0x18] sm:$0xff]   ;;  %v10340_v13 = vld [vmem:[#allocation3 + $0x54] sm:$0xe] }
 0x45d   : > { %12570 = vmatmul.mubr.msk.bf16.gmra.mrb[20].mxu1 %vm1545_vm9, %v17570_v0  ;;  %v8926_v0 = vrot.slane %v16154_v19, 5  ;;  %17582 = vst [vmem:[#allocation27_spill] sm:$0xff] %v16246_v57  ;;  %17586 = vst [vmem:[#allocation30_spill] sm:$0xff] %v16264_v36  ;;  %v17589_v22 = vcombine.low %v15928_v8, %v15932_v37  ;;  %v16293_v8 = vld [vmem:[#allocation3 + $0x10] sm:$0xf]  ;;  %v13371_v57 = vld [vmem:[#allocation3 + $0x48] sm:$0xff]  }
 0x45e   : > { %12573 = vmatprep.mubr.msk.bf16.mxu1 %vm1545_vm9, %v17572_v25  ;;  %v16204_v25 = vld [vmem:[#allocation3 + $0xb0] sm:$0x1]  ;;  %v8054_v37 = vld [vmem:[#allocation3 + $0xc] sm:$0xf]  ;;  %v8060_v36 = vld [vmem:[#allocation3 + $0x24] sm:$0xf] }
 0x45f   : > { %v16219_v3 = vsel %vm14037_vm2, %v8925_v41, %v8926_v0  ;;  %v8940_v41 = vrot.slane %v16204_v25, 5  ;;  %v11648_v0 = vrot.slane %v8795_v51, 9 }
 0x460   : > { %17577 = vst [vmem:[#allocation23_spill] sm:$0xff] %v16219_v3  ;;  %v8951_v3 = vrot.slane %v16211_v56, 5 }
 0x461   : > { %v16250_v46 = vsel %vm14037_vm2, %v8939_v42, %v8940_v41  ;;  %v16289_v42 = vld [vmem:[%s17342_s4 + $0xa] sm:$0x3]  ;;  %v8112_v41 = vshll.u32 %v16293_v8, 16 }
 0x462   : > { %17583 = vst [vmem:[#allocation28_spill] sm:$0xff] %v16250_v46  ;;  %v8953_v27 = vrot.slane %v8951_v3, 4  ;;  %v16271_v51 = vsel %vm14037_vm2, %v11648_v0, %v8951_v3  ;;  %v8585_v3 = vsel %vm1594_vm0, %v15993_v29, 0  ;;  %v13368_v0 = vld [vmem:[#allocation3 + $0x24] sm:$0xff]   ;;  %v8116_v29 = vshrl.u32 %v16293_v8, 16 }
 0x463   : > { %17587 = vst [vmem:[#allocation31_spill] sm:$0xff] %v16271_v51 }
 0x464   : > { %v16275_v21 = vsel %vm14037_vm2, %v8953_v27, %v8954_v1  ;;  %v8106_v27 = vshll.u32 %v8054_v37, 16  ;;  %v8057_v1 = vld [vmem:[#allocation3 + $0x18] sm:$0xf] }
 0x465   : > { %12574 = vmatmul.mubr.msk.bf16.gmra.mrb[24].mxu1 %vm1545_vm9, %v17581_v11  ;;  %17588 = vst [vmem:[#allocation32_spill] sm:$0xff] %v16275_v21  ;;  %v8103_v11 = vshrl.u32 %v8054_v37, 16  ;;  %v8130_v34 = vshll.u32 %v8057_v1, 16  ;;  %v16303_v21 = vld [vmem:[#allocation3 + $0x14] sm:$0x1] }
 0x466   : > { %12577 = vmatprep.mubr.msk.bf16.mxu1 %vm1545_vm9, %v17585_v30  ;;  %v13366_v30 = vld [vmem:[#allocation3 + $0xc] sm:$0xff]   ;;  %v8108_v23 = vrot.slane %v8106_v27, 5  ;;  %17591 = vst [vmem:[#allocation34_spill] sm:$0xff] %v16303_v21  ;;  %v8151_v27 = vshrl.u32 %v8060_v36, 16 }
 0x467   : > { %v8105_v53 = vrot.slane %v8103_v11, 4 }
 0x468   : > { %v8153_v50 = vrot.slane %v8151_v27, 4 }
 0x469   : > { %v8109_v10 = vor.u32 %v8108_v23, %v8105_v53 }
 0x46b   : > { %v8110_v23 = vrot.slane %v8109_v10, 4  ;;  %v8066_v10 = vld [vmem:[#allocation3 + $0x3c] sm:$0xf] }
 0x46d   : > { %12578 = vmatmul.mubr.msk.bf16.gmra.mrb[28].mxu1 %vm1545_vm9, %v17589_v22  ;;  %v16300_v22 = vld [vmem:[#allocation3 + $0x1c] sm:$0xf] }
 0x46e   : > { %12583 = vmatprep.mubr.msk.bf16.mxu1 %vm1545_vm9, %v13366_v30  ;;  %v13370_v30 = vld [vmem:[#allocation3 + $0x3c] sm:$0xff]   ;;  %17590 = vst [vmem:[#allocation33_spill] sm:$0xff] %v16300_v22  ;;  %v8136_v51 = vshll.u32 %v16300_v22, 16  ;;  %v8140_v37 = vshrl.u32 %v16300_v22, 16 }
 0x470   : > { %v8142_v11 = vrot.slane %v8140_v37, 4 }
 0x475   : > { %12584 = vmatmul.mubr.msk.bf16.vlgmr.msra.gmra.mrb[0].mxu1 %vm1545_vm9, %v13367_v40  ;;  %v8114_v40 = vrot.slane %v8112_v41, 5  ;;  %v8122_v41 = vshll.u32 %v16303_v21, 16 }
 0x476   : > { %12616 = vmatpush3.bf16.msra.mxu1 %v8585_v3  ;;  %12587 = vmatprep.mubr.msk.bf16.mxu1 %vm1545_vm9, %v13368_v0  ;;  %v8118_v3 = vrot.slane %v8116_v29, 4  ;;  %v8127_v0 = vshrl.u32 %v8057_v1, 16  ;;  %v16308_v29 = vld [vmem:[#allocation3 + $0x20] sm:$0x1]  ;;  %v16310_v1 = vrot.slane %v8136_v51, 5 }
 0x477   : > { %13311 = vmatprep.subr.msk.bf16.mxu1 %vm1594_vm0, %v16289_v42  ;;  %17592 = vst [vmem:[#allocation35_spill] sm:$0xff] %v16308_v29  ;;  %v8146_v53 = vshll.u32 %v16308_v29, 16  ;;  %v8124_v33 = vrot.slane %v8122_v41, 5 }
 0x478   : > { %v8119_v58 = vor.u32 %v8118_v3, %v8114_v40  ;;  %v8129_v46 = vrot.slane %v8127_v0, 4  ;;  %v8164_v3 = vshrl.u32 %v16023_v2, 16  ;;  %v8143_v51 = vor.u32 %v8142_v11, %v16310_v1  ;;  %v13374_v11 = vld [vmem:[#allocation3 + $0x6c] sm:$0xff]  }
 0x479   : > { %v8148_v41 = vrot.slane %v8146_v53, 5  ;;  %v8202_v53 = vshll.u32 %v8066_v10, 16 }
 0x47a   : > { %v8144_v27 = vrot.slane %v8143_v51, 4  ;;  %v8212_v51 = vshrl.u32 %v16034_v14, 16 }
 0x47d   : > { %12588 = vmatmul.mubr.msk.bf16.gmra.mrb[4].mxu1 %vm1545_vm9, %v13369_v49  ;;  %v8132_v49 = vrot.slane %v8130_v34, 5  ;;  %v8120_v34 = vrot.slane %v8119_v58, 4  ;;  %v13373_v58 = vld [vmem:[#allocation3 + $0x60] sm:$0xff]  }
 0x47e   : > { %12591 = vmatprep.mubr.msk.bf16.mxu1 %vm1545_vm9, %v13370_v30  ;;  %v8154_v30 = vshll.u32 %v8060_v36, 16  ;;  %v8166_v36 = vrot.slane %v8164_v3, 4 }
 0x47f   : > { %v8133_v0 = vor.u32 %v8132_v49, %v8129_v46  ;;  %v8125_v7 = vsel %vm13571_vm11, %v8120_v34, %v8124_v33  ;;  %v8188_v46 = vshrl.u32 %v16027_v35, 16  ;;  %v8115_v49 = vsel %vm13571_vm11, %v8110_v23, %v8114_v40 }
 0x480   : > { %v8156_v37 = vrot.slane %v8154_v30, 5  ;;  %v8170_v30 = vshll.u32 %v16025_v26, 16  ;;  %v16328_v33 = vcombine.low %v8115_v49, %v8125_v7  ;;  %v8167_v34 = vor.u32 %v8166_v36, %v16318_v20  ;;  %v8069_v7 = vld [vmem:[#allocation3 + $0x48] sm:$0xf] }
 0x481   : > { %v8134_v2 = vrot.slane %v8133_v0, 4  ;;  %v8208_v26 = vshll.u32 %v16034_v14, 16  ;;  %v8236_v36 = vshrl.u32 %v16044_v47, 16  ;;  %v8204_v14 = vrot.slane %v8202_v53, 5  ;;  %v8075_v53 = vld [vmem:[#allocation3 + $0x60] sm:$0xf] }
 0x482   : > { %v8157_v45 = vor.u32 %v8156_v37, %v8153_v50  ;;  %v8190_v50 = vrot.slane %v8188_v46, 4  ;;  %v8232_v37 = vshll.u32 %v16044_v47, 16  ;;  %v8172_v49 = vrot.slane %v8170_v30, 5 }
 0x483   : > { %v8139_v40 = vsel %vm13571_vm11, %v8134_v2, %v16310_v1  ;;  %v8168_v1 = vrot.slane %v8167_v34, 4  ;;  %v8223_v16 = vshrl.u32 %v8069_v7, 16  ;;  %v8226_v15 = vshll.u32 %v8069_v7, 16 }
 0x484   : > { %v16345_v29 = vrot.slane %v8208_v26, 5  ;;  %v8214_v47 = vrot.slane %v8212_v51, 4  ;;  %v16347_v22 = vrot.slane %v8232_v37, 5  ;;  %v8218_v26 = vshll.u32 %v16042_v55, 16 }
 0x485   : > { %12592 = vmatmul.mubr.msk.bf16.gmra.mrb[8].mxu1 %vm1545_vm9, %v13371_v57  ;;  %v8063_v57 = vld [vmem:[#allocation3 + $0x30] sm:$0xf]  ;;  %v8225_v51 = vrot.slane %v8223_v16, 4 }
 0x486   : > { %12595 = vmatprep.mubr.msk.bf16.mxu1 %vm1545_vm9, %v13372_v39  ;;  %v8184_v39 = vshll.u32 %v16027_v35, 16  ;;  %v8175_v3 = vshrl.u32 %v8063_v57, 16  ;;  %v8178_v0 = vshll.u32 %v8063_v57, 16  ;;  %v8199_v35 = vshrl.u32 %v8066_v10, 16  ;;  %v8072_v10 = vld [vmem:[#allocation3 + $0x54] sm:$0xf] }
 0x487   : > { %v8149_v57 = vsel %vm13571_vm11, %v8144_v27, %v8148_v41  ;;  %v8238_v41 = vrot.slane %v8236_v36, 4  ;;  %v13376_v27 = vld [vmem:[#allocation3 + $0x84] sm:$0xff]   ;;  %v8247_v30 = vshrl.u32 %v8072_v10, 16 }
 0x488   : > { %v16335_v23 = vrot.slane %v8184_v39, 5  ;;  %v8180_v2 = vrot.slane %v8178_v0, 5  ;;  %v8194_v39 = vshll.u32 %v16040_v28, 16  ;;  %v8201_v46 = vrot.slane %v8199_v35, 4 }
 0x489   : > { %v8256_v35 = vshll.u32 %v16055_v52, 16  ;;  %v8239_v36 = vor.u32 %v8238_v41, %v16347_v22 }
 0x48a   : > { %v8191_v5 = vor.u32 %v8190_v50, %v16335_v23  ;;  %v8196_v0 = vrot.slane %v8194_v39, 5  ;;  %v8260_v50 = vshrl.u32 %v16055_v52, 16  ;;  %v8205_v37 = vor.u32 %v8204_v14, %v8201_v46  ;;  %v13377_v46 = vld [vmem:[#allocation3 + $0x90] sm:$0xff]  }
 0x48b   : > { %v8274_v52 = vshll.u32 %v8075_v53, 16  ;;  %v8242_v39 = vshll.u32 %v16048_v12, 16 }
 0x48c   : > { %v8192_v7 = vrot.slane %v8191_v5, 4  ;;  %v8284_v5 = vshrl.u32 %v16071_v18, 16 }
 0x48d   : > { %12596 = vmatmul.mubr.msk.bf16.gmra.mrb[12].mxu1 %vm1545_vm9, %v13373_v58  ;;  %v8158_v58 = vrot.slane %v8157_v45, 4  ;;  %v16349_v45 = vcombine.low %v8139_v40, %v8149_v57  ;;  %v8173_v40 = vsel %vm13571_vm11, %v8168_v1, %v8172_v49  ;;  %v8249_v57 = vrot.slane %v8247_v30, 4  ;;  %v8078_v1 = vld [vmem:[#allocation3 + $0x6c] sm:$0xf] }
 0x48e   : > { %12599 = vmatprep.mubr.msk.bf16.mxu1 %vm1545_vm9, %v13374_v11  ;;  %v8177_v11 = vrot.slane %v8175_v3, 4  ;;  %v8250_v3 = vshll.u32 %v8072_v10, 16  ;;  %v16366_v10 = vrot.slane %v8256_v35, 5  ;;  %v8262_v49 = vrot.slane %v8260_v50, 4 }
 0x48f   : > { %v8163_v28 = vsel %vm13571_vm11, %v8158_v58, %v16318_v20  ;;  %v8228_v20 = vrot.slane %v8226_v15, 5  ;;  %v8280_v15 = vshll.u32 %v16071_v18, 16  ;;  %v8197_v14 = vsel %vm13571_vm11, %v8192_v7, %v8196_v0 }
 0x490   : > { %v8181_v34 = vor.u32 %v8180_v2, %v8177_v11  ;;  %v8252_v58 = vrot.slane %v8250_v3, 5  ;;  %v8271_v11 = vshrl.u32 %v8075_v53, 16  ;;  %v16363_v2 = vcombine.low %v8163_v28, %v8173_v40  ;;  %v13378_v28 = vld [vmem:[#allocation3 + $0x9c] sm:$0xff]  }
 0x491   : > { %v8229_v16 = vor.u32 %v8228_v20, %v8225_v51  ;;  %v8240_v30 = vrot.slane %v8239_v36, 4  ;;  %v8276_v35 = vrot.slane %v8274_v52, 5  ;;  %v8263_v50 = vor.u32 %v8262_v49, %v16366_v10 }
 0x492   : > { %v8182_v55 = vrot.slane %v8181_v34, 4  ;;  %v8253_v12 = vor.u32 %v8252_v58, %v8249_v57  ;;  %v8273_v3 = vrot.slane %v8271_v11, 4  ;;  %v8244_v34 = vrot.slane %v8242_v39, 5  ;;  %v8081_v11 = vld [vmem:[#allocation3 + $0x78] sm:$0xf] }
 0x493   : > { %v8295_v53 = vshrl.u32 %v8078_v1, 16  ;;  %v8298_v18 = vshll.u32 %v8078_v1, 16  ;;  %v8230_v40 = vrot.slane %v8229_v16, 4  ;;  %v8266_v0 = vshll.u32 %v16062_v62, 16  ;;  %v16410_v1 = vld [vmem:[#allocation3 + $0x20] sm:$0x1] }
 0x494   : > { %v16376_v51 = vrot.slane %v8280_v15, 5  ;;  %v8187_v20 = vsel %vm13571_vm11, %v8182_v55, %v16335_v23  ;;  %v8245_v57 = vsel %vm13571_vm11, %v8240_v30, %v8244_v34  ;;  %v16389_v62 = vrot.slane %v8253_v12, 4  ;;  %17594 = vst [vmem:[#allocation37_spill] sm:$0xff] %v16410_v1  ;;  %v13380_v30 = vld [vmem:[#allocation3 + $0xb4] sm:$0xff]  }
 0x495   : > { %12600 = vmatmul.mubr.msk.bf16.gmra.mrb[16].mxu1 %vm1545_vm9, %v13375_v32  ;;  %v8215_v32 = vor.u32 %v8214_v47, %v16345_v29  ;;  %v8206_v47 = vrot.slane %v8205_v37, 4  ;;  %v8304_v37 = vshll.u32 %v16084_v9, 16  ;;  %v16385_v36 = vcombine.low %v8187_v20, %v8197_v14 }
 0x496   : > { %12603 = vmatprep.mubr.msk.bf16.mxu1 %vm1545_vm9, %v13376_v27  ;;  %v8220_v27 = vrot.slane %v8218_v26, 5  ;;  %v8286_v26 = vrot.slane %v8284_v5, 4  ;;  %v8277_v58 = vor.u32 %v8276_v35, %v8273_v3  ;;  %v16394_v52 = vrot.slane %v8263_v50, 4  ;;  %v16427_v35 = vld [vmem:[#allocation3 + $0x28] sm:$0xf] }
 0x497   : > { %v8216_v41 = vrot.slane %v8215_v32, 4  ;;  %v8308_v32 = vshrl.u32 %v16084_v9, 16  ;;  %v8211_v23 = vsel %vm13571_vm11, %v8206_v47, %v16345_v29  ;;  %v16396_v39 = vrot.slane %v8295_v53, 4  ;;  %v16400_v9 = vld [vmem:[#allocation3 + $0x1c] sm:$0xf]  ;;  %17596 = vst [vmem:[#allocation39_spill] sm:$0xff] %v16427_v35 }
 0x498   : > { %v16398_v49 = vrot.slane %v8298_v18, 5  ;;  %17593 = vst [vmem:[#allocation36_spill] sm:$0xff] %v16400_v9  ;;  %v8235_v16 = vsel %vm13571_vm11, %v8230_v40, %v16347_v22  ;;  %v16407_v15 = vrot.slane %v8266_v0, 5  ;;  %v8287_v5 = vor.u32 %v8286_v26, %v16376_v51  ;;  %v10335_v29 = vld [vmem:[#allocation3 + $0x18] sm:$0xe] }
 0x499   : > { %v8221_v7 = vsel %vm13571_vm11, %v8216_v41, %v8220_v27  ;;  %v16412_v14 = vcombine.low %v8235_v16, %v8245_v57  ;;  %v16415_v41 = vrot.slane %v8304_v37, 5  ;;  %v16417_v27 = vrot.slane %v8308_v32, 4  ;;  %v16438_v0 = vld [vmem:[#allocation3 + $0x2c] sm:$0x1]  ;;  %v10337_v26 = vld [vmem:[#allocation3 + $0x30] sm:$0xe] }
 0x49a   : > { %v16402_v55 = vcombine.low %v8211_v23, %v8221_v7  ;;  %v16425_v12 = vrot.slane %v8277_v58, 4  ;;  %v8319_v3 = vshrl.u32 %v8081_v11, 16  ;;  %v10401_v34 = vrot.slane %v16400_v9, 5  ;;  %17597 = vst [vmem:[#allocation40_spill] sm:$0xff] %v16438_v0  ;;  %v16443_v7 = vld [vmem:[#allocation3 + $0x38] sm:$0x1] }
 0x49b   : > { %v8322_v40 = vshll.u32 %v8081_v11, 16  ;;  %v16441_v20 = vrot.slane %v8287_v5, 4  ;;  %17598 = vst [vmem:[#allocation41_spill] sm:$0xff] %v16443_v7  ;;  %v11748_v37 = vrot.slane %v10335_v29, 9  ;;  %v10404_v57 = vrot.slane %v16410_v1, 5  ;;  %v13381_v23 = vld [vmem:[#allocation3 + $0xc0] sm:$0xff]  }
 0x49c   : > { %v10403_v32 = vrot.slane %v10401_v34, 4  ;;  %v10336_v58 = vld [vmem:[#allocation3 + $0x24] sm:$0xe]  ;;  %v16453_v5 = vrot.slane %v8319_v3, 4  ;;  %v16455_v18 = vld [vmem:[#allocation3 + $0x40] sm:$0xf] }
 0x49d   : > { %12604 = vmatmul.mubr.msk.bf16.gmra.mrb[20].mxu1 %vm1545_vm9, %v13377_v46  ;;  %v13379_v46 = vld [vmem:[#allocation3 + $0xa8] sm:$0xff]   ;;  %v16457_v29 = vld [vmem:[#allocation3 + $0x44] sm:$0x1]  ;;  %v16461_v47 = vsel %vm14037_vm2, %v11748_v37, %v10401_v34  ;;  %v16468_v53 = vrot.slane %v8322_v40, 5  ;;  %v16470_v11 = vld [vmem:[#allocation3 + $0x50] sm:$0x1] }
 0x49e   : > { %12607 = vmatprep.mubr.msk.bf16.mxu1 %vm1545_vm9, %v13378_v28  ;;  %v16419_v28 = vld [vmem:[#allocation3 + $0x34] sm:$0xf]  ;;  %17600 = vst [vmem:[#allocation43_spill] sm:$0xff] %v16457_v29  ;;  %17601 = vst [vmem:[#allocation44_spill] sm:$0xff] %v16461_v47  ;;  %v16465_v22 = vsel %vm14037_vm2, %v10403_v32, %v10404_v57  ;;  %v11749_v16 = vrot.slane %v10336_v58, 9  ;;  %v11750_v1 = vrot.slane %v10337_v26, 9 }
 0x49f   : > { %17595 = vst [vmem:[#allocation38_spill] sm:$0xff] %v16419_v28  ;;  %17602 = vst [vmem:[#allocation45_spill] sm:$0xff] %v16465_v22  ;;  %v10415_v50 = vrot.slane %v16419_v28, 5  ;;  %v16476_v34 = vsel %vm1594_vm0, %v16289_v42, 0  ;;  %v10411_v32 = vrot.slane %v16438_v0, 5  ;;  %v10418_v42 = vrot.slane %v16443_v7, 5 }
 0x4a0   : > { %17603 = vst [vmem:[#allocation46_spill] sm:$0xff] %v16470_v11  ;;  %v10339_v28 = vld [vmem:[#allocation3 + $0x48] sm:$0xe]  ;;  %v16479_v9 = vld [vmem:[#allocation3 + $0x58] sm:$0xf]  ;;  %v10422_v58 = vrot.slane %v16455_v18, 5 }
 0x4a1   : > { %v10417_v57 = vrot.slane %v10415_v50, 4  ;;  %17604 = vst [vmem:[#allocation47_spill] sm:$0xff] %v16479_v9  ;;  %v16481_v40 = vld [vmem:[#allocation3 + $0x64] sm:$0xf]  ;;  %v16489_v26 = vsel %vm14037_vm2, %v11750_v1, %v10415_v50  ;;  %v10425_v47 = vrot.slane %v16457_v29, 5  ;;  %v10432_v50 = vrot.slane %v16470_v11, 5 }
 0x4a2   : > { %17606 = vst [vmem:[#allocation49_spill] sm:$0xff] %v16489_v26  ;;  %v16502_v1 = vld [vmem:[#allocation3 + $0x68] sm:$0x1]  ;;  %v16547_v7 = vld [vmem:[#allocation3 + $0x94] sm:$0xf] }
 0x4a3   : > { %17609 = vst [vmem:[#allocation52_spill] sm:$0xff] %v16502_v1  ;;  %v10446_v11 = vrot.slane %v16502_v1, 5  ;;  %17619 = vst [vmem:[#allocation62_spill] sm:$0xff] %v16547_v7 }
 0x4a5   : > { %12608 = vmatmul.mubr.msk.bf16.gmra.mrb[24].mxu1 %vm1545_vm9, %v13379_v46  ;;  %v16450_v46 = vld [vmem:[#allocation3 + $0x4c] sm:$0xf] }
 0x4a6   : > { %12611 = vmatprep.mubr.msk.bf16.mxu1 %vm1545_vm9, %v13380_v30  ;;  %17599 = vst [vmem:[#allocation42_spill] sm:$0xff] %v16450_v46  ;;  %v10408_v30 = vrot.slane %v16427_v35, 5  ;;  %v10338_v35 = vld [vmem:[#allocation3 + $0x3c] sm:$0xe]  ;;  %v10429_v0 = vrot.slane %v16450_v46, 5 }
 0x4a7   : > { %v11751_v22 = vrot.slane %v10338_v35, 9  ;;  %v11752_v35 = vrot.slane %v10339_v28, 9 }
 0x4a8   : > { %v10410_v37 = vrot.slane %v10408_v30, 4  ;;  %v16485_v21 = vsel %vm14037_vm2, %v11749_v16, %v10408_v30  ;;  %v16500_v16 = vld [vmem:[#allocation3 + $0x5c] sm:$0x1]  ;;  %v16508_v30 = vsel %vm14037_vm2, %v10417_v57, %v10418_v42  ;;  %v10431_v46 = vrot.slane %v10429_v0, 4  ;;  %v16521_v57 = vld [vmem:[#allocation3 + $0x70] sm:$0xf] }
 0x4a9   : > { %17605 = vst [vmem:[#allocation48_spill] sm:$0xff] %v16485_v21  ;;  %17608 = vst [vmem:[#allocation51_spill] sm:$0xff] %v16500_v16  ;;  %v16518_v29 = vsel %vm14037_vm2, %v11751_v22, %v10422_v58  ;;  %v11753_v42 = vrot.slane %v10340_v13, 9  ;;  %v16532_v22 = vld [vmem:[#allocation3 + $0x74] sm:$0x1] }
 0x4aa   : > { %v16495_v3 = vsel %vm14037_vm2, %v10410_v37, %v10411_v32  ;;  %17610 = vst [vmem:[#allocation53_spill] sm:$0xff] %v16508_v30  ;;  %v10424_v37 = vrot.slane %v10422_v58, 4  ;;  %v16512_v32 = vld [vmem:[#allocation3 + $0x7c] sm:$0xf]  ;;  %17612 = vst [vmem:[#allocation55_spill] sm:$0xff] %v16518_v29  ;;  %v16540_v21 = vsel %vm14037_vm2, %v10431_v46, %v10432_v50 }
 0x4ab   : > { %17607 = vst [vmem:[#allocation50_spill] sm:$0xff] %v16495_v3  ;;  %17611 = vst [vmem:[#allocation54_spill] sm:$0xff] %v16512_v32  ;;  %v10341_v3 = vld [vmem:[#allocation3 + $0x60] sm:$0xe]  ;;  %v10342_v30 = vld [vmem:[#allocation3 + $0x6c] sm:$0xe] }
 0x4ac   : > { %17613 = vst [vmem:[#allocation56_spill] sm:$0xff] %v16521_v57  ;;  %v16525_v28 = vsel %vm14037_vm2, %v10424_v37, %v10425_v47  ;;  %17616 = vst [vmem:[#allocation59_spill] sm:$0xff] %v16532_v22  ;;  %v16534_v58 = vld [vmem:[#allocation3 + $0x80] sm:$0x1]  ;;  %v10439_v47 = vrot.slane %v16500_v16, 5  ;;  %v11755_v50 = vrot.slane %v10342_v30, 9 }
 0x4ad   : > { %12612 = vmatmul.mubr.msk.bf16.gmra.mrb[28].mxu1 %vm1545_vm9, %v13381_v23  ;;  %17614 = vst [vmem:[#allocation57_spill] sm:$0xff] %v16525_v28  ;;  %v10436_v23 = vrot.slane %v16479_v9, 5  ;;  %17617 = vst [vmem:[#allocation60_spill] sm:$0xff] %v16534_v58  ;;  %v10343_v9 = vld [vmem:[#allocation3 + $0x78] sm:$0xe]  ;;  %v10450_v28 = vrot.slane %v16521_v57, 5 }
 0x4ae   : > { %12617 = vmatprep.mubr.msk.bf16.mxu1 %vm1545_vm9, %v16328_v33  ;;  %v16529_v33 = vsel %vm14037_vm2, %v11752_v35, %v10429_v0  ;;  %17618 = vst [vmem:[#allocation61_spill] sm:$0xff] %v16540_v21  ;;  %v10443_v0 = vrot.slane %v16481_v40, 5  ;;  %v11754_v35 = vrot.slane %v10341_v3, 9  ;;  %v16554_v29 = vld [vmem:[#allocation3 + $0x88] sm:$0xf]  ;;  %v10453_v21 = vrot.slane %v16532_v22, 5 }
 0x4af   : > { %17615 = vst [vmem:[#allocation58_spill] sm:$0xff] %v16529_v33  ;;  %v10438_v37 = vrot.slane %v10436_v23, 4  ;;  %v16551_v26 = vsel %vm14037_vm2, %v11753_v42, %v10436_v23  ;;  %v16556_v16 = vld [vmem:[#allocation3 + $0x8c] sm:$0x1]  ;;  %v10457_v23 = vrot.slane %v16512_v32, 5  ;;  %v17626_v22 = vshll.u32 %v16112_v60, 16 }
 0x4b0   : > { %17620 = vst [vmem:[#allocation63_spill] sm:$0xff] %v16551_v26  ;;  %v10445_v46 = vrot.slane %v10443_v0, 4  ;;  %17621 = vst [vmem:[#allocation64_spill] sm:$0xff] %v16556_v16  ;;  %v16564_v13 = vsel %vm14037_vm2, %v11754_v35, %v10443_v0  ;;  %v16571_v30 = vld [vmem:[%s17342_s4 + $0xc] sm:$0x3]  ;;  %v10452_v0 = vrot.slane %v10450_v28, 4 }
 0x4b1   : > { %v16560_v3 = vsel %vm14037_vm2, %v10438_v37, %v10439_v47  ;;  %17623 = vst [vmem:[#allocation66_spill] sm:$0xff] %v16564_v13  ;;  %v16573_v42 = vld [vmem:[#allocation3 + $0x98] sm:$0x1]  ;;  %v11756_v37 = vrot.slane %v10343_v9, 9  ;;  %v10344_v35 = vld [vmem:[#allocation3 + $0x84] sm:$0xe] }
 0x4b2   : > { %17622 = vst [vmem:[#allocation65_spill] sm:$0xff] %v16560_v3  ;;  %17624 = vst [vmem:[#allocation67_spill] sm:$0xff] %v16573_v42  ;;  %v16579_v47 = vsel %vm14037_vm2, %v10445_v46, %v10446_v11  ;;  %v16585_v1 = vrot.slane %v17626_v22, 5  ;;  %v10459_v57 = vrot.slane %v10457_v23, 4  ;;  %v10460_v33 = vrot.slane %v16534_v58, 5  ;;  %v17720_v44 = vld [vmem:[#allocation55_spill] sm:$0xff] }
 0x4b3   : > { %17625 = vst [vmem:[#allocation68_spill] sm:$0xff] %v16579_v47  ;;  %v10345_v3 = vld [vmem:[#allocation3 + $0x90] sm:$0xe]  ;;  %v16593_v9 = vld [vmem:[#allocation3 + $0xa0] sm:$0xf]  ;;  %v16603_v22 = vsel %vm14037_vm2, %v10452_v0, %v10453_v21  ;;  %v16607_v46 = vsel %vm14037_vm2, %v11756_v37, %v10457_v23  ;;  %v11757_v21 = vrot.slane %v10344_v35, 9 }
 0x4b4   : > { %17627 = vst [vmem:[#allocation69_spill] sm:$0xff] %v16593_v9  ;;  %v16595_v11 = vld [vmem:[#allocation3 + $0xac] sm:$0xf]  ;;  %17630 = vst [vmem:[#allocation72_spill] sm:$0xff] %v16603_v22  ;;  %v10346_v0 = vld [vmem:[#allocation3 + $0x9c] sm:$0xe] }
 0x4b5   : > { %12618 = vmatmul.mubr.msk.bf16.vlgmr.msra.gmra.mrb[0].mxu1 %vm1545_vm9, %v16349_v45  ;;  %17628 = vst [vmem:[#allocation70_spill] sm:$0xff] %v16595_v11  ;;  %v16599_v45 = vsel %vm14037_vm2, %v11755_v50, %v10450_v28  ;;  %17631 = vst [vmem:[#allocation73_spill] sm:$0xff] %v16607_v46  ;;  %v16618_v28 = vsel %vm14037_vm2, %v10459_v57, %v10460_v33  ;;  %v10471_v50 = vrot.slane %v16547_v7, 5  ;;  %v9647_v23 = vld [vmem:[#allocation3 + $0xb0] sm:$0x1]  ;;  %v10467_v13 = vrot.slane %v16556_v16, 5 }
 0x4b6   : > { %12650 = vmatpush3.bf16.msra.mxu1 %v16476_v34  ;;  %12621 = vmatprep.mubr.msk.bf16.mxu1 %vm1545_vm9, %v16363_v2  ;;  %17629 = vst [vmem:[#allocation71_spill] sm:$0xff] %v16599_v45  ;;  %v10464_v34 = vrot.slane %v16554_v29, 5  ;;  %v16612_v2 = vld [vmem:[#allocation3 + $0xa4] sm:$0x1]  ;;  %17632 = vst [vmem:[#allocation74_spill] sm:$0xff] %v16618_v28  ;;  %v11758_v26 = vrot.slane %v10345_v3, 9 }
 0x4b7   : > { %13312 = vmatprep.subr.msk.bf16.mxu1 %vm1594_vm0, %v16571_v30  ;;  %v10473_v32 = vrot.slane %v10471_v50, 4  ;;  %v10474_v57 = vrot.slane %v16573_v42, 5  ;;  %v10478_v33 = vrot.slane %v16593_v9, 5  ;;  %v10347_v35 = vld [vmem:[#allocation3 + $0xa8] sm:$0xe]  ;;  %v11759_v3 = vrot.slane %v10346_v0, 9 }
 0x4b8   : > { %v10466_v47 = vrot.slane %v10464_v34, 4  ;;  %v16626_v58 = vsel %vm14037_vm2, %v11757_v21, %v10464_v34  ;;  %v16630_v22 = vld [vmem:[#allocation3 + $0xb8] sm:$0xf]  ;;  %v16638_v37 = vsel %vm14037_vm2, %v11758_v26, %v10471_v50  ;;  %v10485_v34 = vrot.slane %v16595_v11, 5  ;;  %v8084_v21 = vld [vmem:[#allocation3 + $0x84] sm:$0xf] }
 0x4b9   : > { %17634 = vst [vmem:[#allocation76_spill] sm:$0xff] %v16638_v37  ;;  %v9650_v28 = vld [vmem:[#allocation3 + $0xbc] sm:$0x1]  ;;  %v16641_v46 = vld [vmem:[#allocation3 + $0xc4] sm:$0xf]  ;;  %v16647_v9 = vsel %vm14037_vm2, %v10473_v32, %v10474_v57  ;;  %v11760_v50 = vrot.slane %v10347_v35, 9  ;;  %v16658_v32 = vsel %vm14037_vm2, %v11759_v3, %v10478_v33 }
 0x4ba   : > { %v16634_v45 = vsel %vm14037_vm2, %v10466_v47, %v10467_v13  ;;  %17635 = vst [vmem:[#allocation77_spill] sm:$0xff] %v16647_v9  ;;  %v10480_v13 = vrot.slane %v10478_v33, 4  ;;  %v10481_v47 = vrot.slane %v16612_v2, 5  ;;  %v10487_v0 = vrot.slane %v10485_v34, 4  ;;  %v10348_v16 = vld [vmem:[#allocation3 + $0xb4] sm:$0xe] }
 0x4bb   : > { %17633 = vst [vmem:[#allocation75_spill] sm:$0xff] %v16634_v45  ;;  %v10488_v11 = vrot.slane %v9647_v23, 5  ;;  %v17636_v7 = vshrl.u32 %v16112_v60, 16  ;;  %v9653_v45 = vld [vmem:[#allocation3 + $0xc8] sm:$0x1]  ;;  %v10492_v35 = vrot.slane %v16630_v22, 5  ;;  %v16671_v60 = vsel %vm14037_vm2, %v11760_v50, %v10485_v34 }
 0x4bc   : > { %v16662_v57 = vsel %vm14037_vm2, %v10480_v13, %v10481_v47  ;;  %v10349_v26 = vld [vmem:[#allocation3 + $0xc0] sm:$0xe]  ;;  %v10499_v23 = vrot.slane %v16641_v46, 5  ;;  %v11761_v3 = vrot.slane %v10348_v16, 9  ;;  %v10495_v47 = vrot.slane %v9650_v28, 5 }
 0x4bd   : > { %12622 = vmatmul.mubr.msk.bf16.gmra.mrb[4].mxu1 %vm1545_vm9, %v16385_v36  ;;  %v8334_v42 = vrot.slane %v17636_v7, 4  ;;  %17637 = vst [vmem:[#allocation78_spill] sm:$0xff] %v16662_v57  ;;  %v16675_v7 = vsel %vm14037_vm2, %v10487_v0, %v10488_v11  ;;  %v10494_v13 = vrot.slane %v10492_v35, 4  ;;  %v11762_v9 = vrot.slane %v10349_v26, 9 }
 0x4be   : > { %12625 = vmatprep.mubr.msk.bf16.mxu1 %vm1545_vm9, %v16402_v55  ;;  %v11777_v33 = vcombine.low %v16671_v60, %v16675_v7  ;;  %v8343_v55 = vshrl.u32 %v8084_v21, 16  ;;  %v10501_v37 = vrot.slane %v10499_v23, 4  ;;  %v10502_v36 = vrot.slane %v9653_v45, 5  ;;  %v17166_v60 = vld [vmem:[%s17344_s6] ss:$0 sm:$0xff] }
 0x4bf   : > { %v8352_v57 = vshll.u32 %v16126_v48, 16  ;;  %v8356_v34 = vshrl.u32 %v16126_v48, 16  ;;  %v16684_v11 = vsel %vm14037_vm2, %v11761_v3, %v10492_v35  ;;  %v16688_v50 = vsel %vm14037_vm2, %v10494_v13, %v10495_v47 }
 0x4c0   : > { %v8346_v0 = vshll.u32 %v8084_v21, 16  ;;  %v11778_v16 = vcombine.low %v16684_v11, %v16688_v50  ;;  %v16694_v28 = vsel %vm14037_vm2, %v11762_v9, %v10499_v23  ;;  %v16698_v45 = vsel %vm14037_vm2, %v10501_v37, %v10502_v36  ;;  %v10885_v11 = vld [vmem:[%s13562_s10 + $0x10] sm:$0xff] }
 0x4c1   : > { %v17638_v48 = vor.u32 %v16398_v49, %v16396_v39  ;;  %v17639_v35 = vor.u32 %v16417_v27, %v16415_v41  ;;  %v8335_v21 = vor.u32 %v8334_v42, %v16585_v1  ;;  %v11779_v13 = vcombine.low %v16694_v28, %v16698_v45  ;;  %v10883_v45 = vld [vmem:[%s13562_s10] sm:$0xff] }
 0x4c2   : > { %v17640_v9 = vsel %vm13571_vm11, %v16394_v52, %v16407_v15  ;;  %v17641_v39 = vsel %vm13571_vm11, %v16389_v62, %v16366_v10  ;;  %v17642_v37 = vshll.u32 %v16082_v31, 16  ;;  %v17643_v42 = vshll.u32 %v16105_v38, 16  ;;  %v8087_v15 = vld [vmem:[#allocation3 + $0x90] sm:$0xf] }
 0x4c3   : > { %v8302_v26 = vrot.slane %v17638_v48, 4  ;;  %v8312_v3 = vrot.slane %v17639_v35, 4  ;;  %v11607_v49 = vcombine.low %v17641_v39, %v17640_v9  ;;  %v8338_v23 = vshll.u32 %v16124_v63, 16 }
 0x4c4   : > { %v8292_v27 = vrot.slane %v17642_v37, 5  ;;  %v8316_v36 = vrot.slane %v17643_v42, 5  ;;  %v16726_v47 = vrot.slane %v8352_v57, 5  ;;  %v8358_v52 = vrot.slane %v8356_v34, 4 }
 0x4c5   : > { %12626 = vmatmul.mubr.msk.bf16.gmra.mrb[8].mxu1 %vm1545_vm9, %v16412_v14  ;;  %v8283_v31 = vsel %vm13571_vm11, %v16425_v12, %v16376_v51  ;;  %v8325_v10 = vor.u32 %v16468_v53, %v16453_v5  ;;  %v8345_v62 = vrot.slane %v8343_v55, 4  ;;  %v8348_v14 = vrot.slane %v8346_v0, 5  ;;  %v8090_v53 = vld [vmem:[#allocation3 + $0x9c] sm:$0xf] }
 0x4c6   : > { %12629 = vmatprep.mubr.msk.bf16.mxu1 %vm1545_vm9, %v11607_v49  ;;  %v8293_v38 = vsel %vm13571_vm11, %v16441_v20, %v8292_v27  ;;  %v8307_v63 = vsel %vm13571_vm11, %v8302_v26, %v16415_v41  ;;  %v8317_v57 = vsel %vm13571_vm11, %v8312_v3, %v8316_v36  ;;  %v8336_v34 = vrot.slane %v8335_v21, 4 }
 0x4c7   : > { %v8367_v48 = vshrl.u32 %v8087_v15, 16  ;;  %v8370_v35 = vshll.u32 %v8087_v15, 16  ;;  %v8376_v51 = vshll.u32 %v16143_v24, 16  ;;  %v8380_v12 = vshrl.u32 %v16143_v24, 16 }
 0x4c8   : > { %v8340_v5 = vrot.slane %v8338_v23, 5  ;;  %v8359_v55 = vor.u32 %v8358_v52, %v16726_v47  ;;  %v8400_v20 = vshll.u32 %v16156_v61, 16  ;;  %v8404_v0 = vshrl.u32 %v16156_v61, 16 }
 0x4c9   : > { %v11608_v9 = vcombine.low %v8283_v31, %v8293_v38  ;;  %v11609_v41 = vcombine.low %v8307_v63, %v8317_v57  ;;  %v8326_v26 = vrot.slane %v8325_v10, 4  ;;  %v8349_v39 = vor.u32 %v8348_v14, %v8345_v62  ;;  %v8093_v38 = vld [vmem:[#allocation3 + $0xa8] sm:$0xf] }
 0x4ca   : > { %v8341_v3 = vsel %vm13571_vm11, %v8336_v34, %v8340_v5  ;;  %v8362_v21 = vshll.u32 %v16134_v59, 16  ;;  %v8391_v49 = vshrl.u32 %v8090_v53, 16  ;;  %v8394_v37 = vshll.u32 %v8090_v53, 16 }
 0x4cb   : > { %v8369_v24 = vrot.slane %v8367_v48, 4  ;;  %v8372_v27 = vrot.slane %v8370_v35, 5  ;;  %v8378_v42 = vrot.slane %v8376_v51, 5  ;;  %v8382_v36 = vrot.slane %v8380_v12, 4  ;;  %v8096_v35 = vld [vmem:[#allocation3 + $0xb4] sm:$0xf] }
 0x4cc   : > { %v8360_v23 = vrot.slane %v8359_v55, 4  ;;  %v8402_v52 = vrot.slane %v8400_v20, 5  ;;  %v8406_v61 = vrot.slane %v8404_v0, 4  ;;  %v8331_v15 = vsel %vm13571_vm11, %v8326_v26, %v16585_v1 }
 0x4cd   : > { %12630 = vmatmul.mubr.msk.bf16.gmra.mrb[12].mxu1 %vm1545_vm9, %v11608_v9  ;;  %v8350_v31 = vrot.slane %v8349_v39, 4  ;;  %v11610_v10 = vcombine.low %v8331_v15, %v8341_v3  ;;  %v8364_v59 = vrot.slane %v8362_v21, 5  ;;  %v8393_v62 = vrot.slane %v8391_v49, 4 }
 0x4ce   : > { %12633 = vmatprep.mubr.msk.bf16.mxu1 %vm1545_vm9, %v11609_v41  ;;  %v8396_v14 = vrot.slane %v8394_v37, 5  ;;  %v8373_v63 = vor.u32 %v8372_v27, %v8369_v24  ;;  %v8383_v57 = vor.u32 %v8382_v36, %v8378_v42  ;;  %v8424_v34 = vshll.u32 %v16184_v6, 16 }
 0x4cf   : > { %v8428_v48 = vshrl.u32 %v16184_v6, 16  ;;  %v8365_v51 = vsel %vm13571_vm11, %v8360_v23, %v8364_v59  ;;  %v8407_v12 = vor.u32 %v8406_v61, %v8402_v52  ;;  %v8448_v53 = vshll.u32 %v16196_v17, 16 }
 0x4d0   : > { %v8452_v1 = vshrl.u32 %v16196_v17, 16  ;;  %v8355_v5 = vsel %vm13571_vm11, %v8350_v31, %v16726_v47  ;;  %v8386_v55 = vshll.u32 %v16154_v19, 16  ;;  %v8415_v20 = vshrl.u32 %v8093_v38, 16  ;;  %v8099_v31 = vld [vmem:[#allocation3 + $0xc0] sm:$0xf] }
 0x4d1   : > { %v8418_v0 = vshll.u32 %v8093_v38, 16  ;;  %v8397_v9 = vor.u32 %v8396_v14, %v8393_v62  ;;  %v8410_v6 = vshll.u32 %v16173_v4, 16  ;;  %v8439_v41 = vshrl.u32 %v8096_v35, 16 }
 0x4d2   : > { %v8442_v26 = vshll.u32 %v8096_v35, 16  ;;  %v11611_v39 = vcombine.low %v8355_v5, %v8365_v51  ;;  %v8384_v3 = vrot.slane %v8383_v57, 4  ;;  %v8426_v21 = vrot.slane %v8424_v34, 5 }
 0x4d3   : > { %v8430_v49 = vrot.slane %v8428_v48, 4  ;;  %v8374_v17 = vrot.slane %v8373_v63, 4  ;;  %v8408_v37 = vrot.slane %v8407_v12, 4  ;;  %v8450_v24 = vrot.slane %v8448_v53, 5 }
 0x4d4   : > { %v8454_v27 = vrot.slane %v8452_v1, 4  ;;  %v8388_v19 = vrot.slane %v8386_v55, 5  ;;  %v8417_v47 = vrot.slane %v8415_v20, 4  ;;  %v8420_v36 = vrot.slane %v8418_v0, 5 }
 0x4d5   : > { %12634 = vmatmul.mubr.msk.bf16.gmra.mrb[16].mxu1 %vm1545_vm9, %v11610_v10  ;;  %v8398_v23 = vrot.slane %v8397_v9, 4  ;;  %v8412_v61 = vrot.slane %v8410_v6, 5  ;;  %v8441_v4 = vrot.slane %v8439_v41, 4  ;;  %v8444_v15 = vrot.slane %v8442_v26, 5 }
 0x4d6   : > { %12637 = vmatprep.mubr.msk.bf16.mxu1 %vm1545_vm9, %v11611_v39  ;;  %v8389_v59 = vsel %vm13571_vm11, %v8384_v3, %v8388_v19  ;;  %v8431_v62 = vor.u32 %v8430_v49, %v8426_v21  ;;  %v8472_v10 = vshll.u32 %v16211_v56, 16  ;;  %v8476_v14 = vshrl.u32 %v16211_v56, 16 }
 0x4d7   : > { %v8379_v38 = vsel %vm13571_vm11, %v8374_v17, %v8378_v42  ;;  %v8413_v63 = vsel %vm13571_vm11, %v8408_v37, %v8412_v61  ;;  %v8455_v57 = vor.u32 %v8454_v27, %v8450_v24  ;;  %v8421_v34 = vor.u32 %v8420_v36, %v8417_v47  ;;  %v17644_v27 = vld [vmem:[#allocation26_spill] sm:$0xff] }
 0x4d8   : > { %v8434_v48 = vshll.u32 %v16204_v25, 16  ;;  %v8463_v35 = vshrl.u32 %v8099_v31, 16  ;;  %v8466_v51 = vshll.u32 %v8099_v31, 16  ;;  %v11612_v12 = vcombine.low %v8379_v38, %v8389_v59  ;;  %v17645_v59 = vld [vmem:[#allocation34_spill] sm:$0xff] }
 0x4d9   : > { %v8403_v53 = vsel %vm13571_vm11, %v8398_v23, %v8402_v52  ;;  %v8445_v1 = vor.u32 %v8444_v15, %v8441_v4  ;;  %v8458_v5 = vshll.u32 %v16209_v54, 16  ;;  %v8432_v55 = vrot.slane %v8431_v62, 4 }
 0x4da   : > { %v11613_v56 = vcombine.low %v8403_v53, %v8413_v63  ;;  %v8474_v20 = vrot.slane %v8472_v10, 5  ;;  %v8478_v42 = vrot.slane %v8476_v14, 4  ;;  %v8456_v0 = vrot.slane %v8455_v57, 4  ;;  %v17646_v10 = vld [vmem:[#allocation33_spill] sm:$0xff] }
 0x4db   : > { %v8422_v9 = vrot.slane %v8421_v34, 4  ;;  %v8436_v25 = vrot.slane %v8434_v48, 5  ;;  %v8465_v6 = vrot.slane %v8463_v35, 4  ;;  %v8468_v41 = vrot.slane %v8466_v51, 5  ;;  %v8781_v51 = vld [vmem:[#allocation3 + $0x18] sm:$0xe] }
 0x4dc   : > { %v8446_v26 = vrot.slane %v8445_v1, 4  ;;  %v8460_v39 = vrot.slane %v8458_v5, 5  ;;  %v8479_v3 = vor.u32 %v8478_v42, %v8474_v20  ;;  %v8846_v49 = vrot.slane %v16293_v8, 5  ;;  %v8780_v8 = vld [vmem:[#allocation3 + $0xc] sm:$0xe] }
 0x4dd   : > { %12638 = vmatmul.mubr.msk.bf16.gmra.mrb[20].mxu1 %vm1545_vm9, %v11612_v12  ;;  %v8437_v52 = vsel %vm13571_vm11, %v8432_v55, %v8436_v25  ;;  %v8427_v17 = vsel %vm13571_vm11, %v8422_v9, %v8426_v21  ;;  %v8469_v37 = vor.u32 %v8468_v41, %v8465_v6  ;;  %v8482_v19 = vshll.u32 %v17644_v27, 16  ;;  %v17647_v12 = vld [vmem:[#allocation35_spill] sm:$0xff]  ;;  %v17649_v9 = vld [vmem:[#allocation18_spill] sm:$0xff]  ;;  %v17652_v41 = vld [vmem:[#allocation20_spill] sm:$0xff] }
 0x4de   : > { %12641 = vmatprep.mubr.msk.bf16.mxu1 %vm1545_vm9, %v11613_v56  ;;  %v8461_v54 = vsel %vm13571_vm11, %v8456_v0, %v8460_v39  ;;  %v11614_v47 = vcombine.low %v8427_v17, %v8437_v52  ;;  %v8451_v36 = vsel %vm13571_vm11, %v8446_v26, %v8450_v24  ;;  %v8480_v61 = vrot.slane %v8479_v3, 4  ;;  %v11715_v42 = vld [vmem:[%s17342_s4 + $0xe] sm:$0x3]  ;;  %v17648_v0 = vld [vmem:[#allocation17_spill] sm:$0xff]  ;;  %v17655_v39 = vld [vmem:[#allocation22_spill] sm:$0xff] }
 0x4df   : > { %v11615_v23 = vcombine.low %v8451_v36, %v8461_v54  ;;  %v8848_v4 = vrot.slane %v8846_v49, 4  ;;  %v8470_v15 = vrot.slane %v8469_v37, 4  ;;  %v8484_v31 = vrot.slane %v8482_v19, 5  ;;  %v17651_v6 = vld [vmem:[#allocation19_spill] sm:$0xff]  ;;  %v17657_v3 = vld [vmem:[#allocation8_spill] sm:$0xff]  ;;  %v17658_v54 = vld [vmem:[#allocation9_spill] sm:$0xff] }
 0x4e0   : > { %v8849_v62 = vrot.slane %v17645_v59, 5  ;;  %v8853_v14 = vrot.slane %v17646_v10, 5  ;;  %v11633_v38 = vrot.slane %v8780_v8, 9  ;;  %v8856_v53 = vrot.slane %v17647_v12, 5  ;;  %v17660_v17 = vld [vmem:[#allocation10_spill] sm:$0xff]  ;;  %v17661_v37 = vld [vmem:[#allocation11_spill] sm:$0xff] }
 0x4e1   : > { %v8485_v21 = vsel %vm13571_vm11, %v8480_v61, %v8484_v31  ;;  %v8475_v63 = vsel %vm13571_vm11, %v8470_v15, %v8474_v20  ;;  %v11634_v1 = vrot.slane %v8781_v51, 9  ;;  %v9414_v20 = vsel %vm1594_vm0, %v16571_v30, 0  ;;  %v17654_v30 = vld [vmem:[#allocation21_spill] sm:$0xff]  ;;  %v17663_v19 = vld [vmem:[#allocation12_spill] sm:$0xff]  ;;  %v17667_v61 = vld [vmem:[#allocation15_spill] sm:$0xff] }
 0x4e2   : > { %v8850_v24 = vsel %vm14037_vm2, %v8848_v4, %v8849_v62  ;;  %v11616_v57 = vcombine.low %v8475_v63, %v8485_v21  ;;  %v8847_v34 = vsel %vm14037_vm2, %v11633_v38, %v8846_v49  ;;  %v8855_v35 = vrot.slane %v8853_v14, 4  ;;  %v17669_v15 = vld [vmem:[#allocation16_spill] sm:$0xff]  ;;  %v17672_v59 = vld [vmem:[#allocation5_spill] sm:$0xff]  ;;  %v17673_v62 = vld [vmem:[#allocation7_spill] sm:$0xff] }
 0x4e3   : > { %v11650_v48 = vcombine.low %v8847_v34, %v8850_v24  ;;  %v8854_v56 = vsel %vm14037_vm2, %v11634_v1, %v8853_v14  ;;  %v17650_v25 = vcombine.low %v17648_v0, %v17649_v9  ;;  %v17653_v26 = vcombine.low %v17651_v6, %v17652_v41  ;;  %v17670_v31 = vld [vmem:[#allocation4_spill] sm:$0xff]  ;;  %v17675_v10 = vld [vmem:[#allocation6_spill] sm:$0xff]  ;;  %v17676_v14 = vld [vmem:[#allocation23_spill] sm:$0xff] }
 0x4e4   : > { %v8857_v5 = vsel %vm14037_vm2, %v8855_v35, %v8856_v53  ;;  %v17656_v52 = vcombine.low %v17654_v30, %v17655_v39  ;;  %v17659_v49 = vcombine.low %v17657_v3, %v17658_v54  ;;  %v17662_v27 = vcombine.low %v17660_v17, %v17661_v37  ;;  %v17678_v24 = vld [vmem:[#allocation24_spill] sm:$0xff]  ;;  %v17679_v63 = vld [vmem:[#allocation25_spill] sm:$0xff]  ;;  %v17681_v34 = vld [vmem:[#allocation27_spill] sm:$0xff] }
 0x4e5   : > { %12642 = vmatmul.mubr.msk.bf16.gmra.mrb[24].mxu1 %vm1545_vm9, %v11614_v47  ;;  %v11651_v55 = vcombine.low %v8854_v56, %v8857_v5  ;;  %v17664_v47 = vld [vmem:[#allocation13_spill] sm:$0xff]  ;;  %v17671_v8 = vcombine.low %v17669_v15, %v17670_v31  ;;  %v17674_v21 = vcombine.low %v17672_v59, %v17673_v62  ;;  %v17677_v38 = vcombine.low %v17675_v10, %v17676_v14  ;;  %v17685_v12 = vld [vmem:[#allocation30_spill] sm:$0xff]  ;;  %v13382_v1 = vld [vmem:[#allocation3 + $0x18] sm:$0xff]  }
 0x4e6   : > { %12645 = vmatprep.mubr.msk.bf16.mxu1 %vm1545_vm9, %v11615_v23  ;;  %v17665_v36 = vcombine.low %v17663_v19, %v17664_v47  ;;  %v17666_v23 = vld [vmem:[#allocation14_spill] sm:$0xff]  ;;  %v17684_v51 = vld [vmem:[#allocation29_spill] sm:$0xff]  ;;  %v17687_v5 = vld [vmem:[#allocation31_spill] sm:$0xff]  ;;  %v10140_v0 = vsel %vm1594_vm0, %v11715_v42, 0 }
 0x4e7   : > { %v17668_v4 = vcombine.low %v17666_v23, %v17667_v61  ;;  %v17686_v53 = vcombine.low %v17684_v51, %v17685_v12  ;;  %v17688_v56 = vld [vmem:[#allocation32_spill] sm:$0xff]  ;;  %v13384_v9 = vld [vmem:[#allocation3 + $0x30] sm:$0xff]   ;;  %v13386_v41 = vld [vmem:[#allocation3 + $0x48] sm:$0xff]  }
 0x4e8   : > { %v13385_v6 = vld [vmem:[#allocation3 + $0x3c] sm:$0xff]   ;;  %v13389_v30 = vld [vmem:[#allocation3 + $0x6c] sm:$0xff]   ;;  %v9612_v47 = vld [vmem:[#allocation3 + $0x24] sm:$0xf] }
 0x4e9   : > { %v13390_v39 = vld [vmem:[#allocation3 + $0x78] sm:$0xff]   ;;  %v13392_v17 = vld [vmem:[#allocation3 + $0x90] sm:$0xff]   ;;  %v9682_v15 = vshrl.u32 %v9612_v47, 16  ;;  %v9685_v31 = vshll.u32 %v9612_v47, 16  ;;  %v9739_v47 = vshll.u32 %v16455_v18, 16 }
 0x4ea   : > { %v17690_v37 = vld [vmem:[#allocation36_spill] sm:$0xff]  ;;  %v9615_v10 = vld [vmem:[#allocation3 + $0x30] sm:$0xf] }
 0x4eb   : > { %v9671_v19 = vshrl.u32 %v17690_v37, 16  ;;  %v13393_v14 = vld [vmem:[#allocation3 + $0x9c] sm:$0xff]  }
 0x4ed   : > { %12646 = vmatmul.mubr.msk.bf16.gmra.mrb[28].mxu1 %vm1545_vm9, %v11616_v57  ;;  %v17680_v57 = vcombine.low %v17678_v24, %v17679_v63 }
 0x4ee   : > { %12651 = vmatprep.mubr.msk.bf16.mxu1 %vm1545_vm9, %v11650_v48  ;;  %v17682_v48 = vld [vmem:[#allocation28_spill] sm:$0xff] }
 0x4ef   : > { %v17683_v35 = vcombine.low %v17681_v34, %v17682_v48  ;;  %v9684_v48 = vrot.slane %v9682_v15, 4 }
 0x4f5   : > { %12652 = vmatmul.mubr.msk.bf16.vlgmr.msra.gmra.mrb[0].mxu1 %vm1545_vm9, %v11651_v55  ;;  %v17689_v55 = vcombine.low %v17687_v5, %v17688_v56  ;;  %v17693_v56 = vld [vmem:[#allocation37_spill] sm:$0xff] }
 0x4f6   : > { %12684 = vmatpush3.bf16.msra.mxu1 %v9414_v20  ;;  %12655 = vmatprep.mubr.msk.bf16.mxu1 %vm1545_vm9, %v17650_v25  ;;  %v13383_v20 = vld [vmem:[#allocation3 + $0x24] sm:$0xff]   ;;  %v16880_v25 = vld [vmem:[%s17342_s4 + $0x10] sm:$0x3] }
 0x4f7   : > { %13313 = vmatprep.subr.msk.bf16.mxu1 %vm1594_vm0, %v11715_v42  ;;  %v13387_v42 = vld [vmem:[#allocation3 + $0x54] sm:$0xff]  }
 0x4fd   : > { %12656 = vmatmul.mubr.msk.bf16.gmra.mrb[4].mxu1 %vm1545_vm9, %v17653_v26  ;;  %v13388_v26 = vld [vmem:[#allocation3 + $0x60] sm:$0xff]  }
 0x4fe   : > { %12659 = vmatprep.mubr.msk.bf16.mxu1 %vm1545_vm9, %v17656_v52  ;;  %v9609_v52 = vld [vmem:[#allocation3 + $0x18] sm:$0xf] }
 0x4ff   : > { %v9658_v3 = vshrl.u32 %v9609_v52, 16  ;;  %v9661_v54 = vshll.u32 %v9609_v52, 16 }
 0x501   : > { %v9663_v23 = vrot.slane %v9661_v54, 5 }
 0x505   : > { %12660 = vmatmul.mubr.msk.bf16.gmra.mrb[8].mxu1 %vm1545_vm9, %v17659_v49  ;;  %v13391_v49 = vld [vmem:[#allocation3 + $0x84] sm:$0xff]  }
 0x506   : > { %12663 = vmatprep.mubr.msk.bf16.mxu1 %vm1545_vm9, %v17662_v27  ;;  %v9667_v27 = vshll.u32 %v17690_v37, 16  ;;  %v13395_v37 = vld [vmem:[#allocation3 + $0xb4] sm:$0xff]  }
 0x508   : > { %v16896_v61 = vrot.slane %v9667_v27, 5 }
 0x50d   : > { %12664 = vmatmul.mubr.msk.bf16.gmra.mrb[12].mxu1 %vm1545_vm9, %v17665_v36  ;;  %v9660_v36 = vrot.slane %v9658_v3, 4 }
 0x50e   : > { %12667 = vmatprep.mubr.msk.bf16.mxu1 %vm1545_vm9, %v17668_v4  ;;  %v9673_v4 = vrot.slane %v9671_v19, 4 }
 0x510   : > { %v9674_v34 = vor.u32 %v9673_v4, %v16896_v61  ;;  %v13396_v4 = vld [vmem:[#allocation3 + $0xc0] sm:$0xff]  }
 0x515   : > { %12668 = vmatmul.mubr.msk.bf16.gmra.mrb[16].mxu1 %vm1545_vm9, %v17671_v8  ;;  %v17691_v8 = vld [vmem:[#allocation39_spill] sm:$0xff] }
 0x516   : > { %12671 = vmatprep.mubr.msk.bf16.mxu1 %vm1545_vm9, %v17674_v21  ;;  %v9691_v59 = vshll.u32 %v17691_v8, 16  ;;  %v9695_v62 = vshrl.u32 %v17691_v8, 16  ;;  %v9664_v21 = vor.u32 %v9663_v23, %v9660_v36  ;;  %v9743_v36 = vshrl.u32 %v16455_v18, 16  ;;  %v9621_v23 = vld [vmem:[#allocation3 + $0x48] sm:$0xf] }
 0x517   : > { %v16926_v18 = vld [vmem:[#allocation3 + $0xd4] sm:$0x1] }
 0x518   : > { %v16904_v51 = vrot.slane %v9691_v59, 5  ;;  %v9697_v12 = vrot.slane %v9695_v62, 4  ;;  %v9665_v5 = vrot.slane %v9664_v21, 4  ;;  %v17696_v59 = vld [vmem:[#allocation42_spill] sm:$0xff] }
 0x519   : > { %v9763_v62 = vshll.u32 %v17696_v59, 16  ;;  %v9767_v21 = vshrl.u32 %v17696_v59, 16 }
 0x51a   : > { %v9670_v54 = vsel %vm13571_vm11, %v9665_v5, %v16896_v61 }
 0x51d   : > { %12672 = vmatmul.mubr.msk.bf16.gmra.mrb[20].mxu1 %vm1545_vm9, %v17677_v38  ;;  %v17692_v38 = vld [vmem:[#allocation38_spill] sm:$0xff] }
 0x51e   : > { %12675 = vmatprep.mubr.msk.bf16.mxu1 %vm1545_vm9, %v17680_v57  ;;  %v9715_v24 = vshll.u32 %v17692_v38, 16  ;;  %v9719_v63 = vshrl.u32 %v17692_v38, 16  ;;  %v13394_v57 = vld [vmem:[#allocation3 + $0xa8] sm:$0xff]  }
 0x525   : > { %12676 = vmatmul.mubr.msk.bf16.gmra.mrb[24].mxu1 %vm1545_vm9, %v17683_v35  ;;  %v9687_v35 = vrot.slane %v9685_v31, 5  ;;  %v17695_v31 = vld [vmem:[#allocation41_spill] sm:$0xff] }
 0x526   : > { %12679 = vmatprep.mubr.msk.bf16.mxu1 %vm1545_vm9, %v17686_v53  ;;  %v9706_v53 = vshrl.u32 %v9615_v10, 16  ;;  %v9725_v8 = vshll.u32 %v17695_v31, 16 }
 0x52d   : > { %12680 = vmatmul.mubr.msk.bf16.gmra.mrb[28].mxu1 %vm1545_vm9, %v17689_v55  ;;  %v9677_v55 = vshll.u32 %v17693_v56, 16  ;;  %v9757_v56 = vshll.u32 %v9621_v23, 16 }
 0x52e   : > { %12685 = vmatprep.mubr.msk.bf16.mxu1 %vm1545_vm9, %v13382_v1  ;;  %v9709_v1 = vshll.u32 %v9615_v10, 16 }
 0x530   : > { %v9711_v52 = vrot.slane %v9709_v1, 5  ;;  %v9745_v1 = vrot.slane %v9743_v36, 4 }
 0x535   : > { %12686 = vmatmul.mubr.msk.bf16.vlgmr.msra.gmra.mrb[0].mxu1 %vm1545_vm9, %v13383_v20  ;;  %v9618_v20 = vld [vmem:[#allocation3 + $0x3c] sm:$0xf] }
 0x536   : > { %12718 = vmatpush3.bf16.msra.mxu1 %v10140_v0  ;;  %12689 = vmatprep.mubr.msk.bf16.mxu1 %vm1545_vm9, %v13384_v9  ;;  %v17694_v0 = vld [vmem:[#allocation40_spill] sm:$0xff]  ;;  %v9730_v3 = vshrl.u32 %v9618_v20, 16 }
 0x537   : > { %13314 = vmatprep.subr.msk.bf16.mxu1 %vm1594_vm0, %v16880_v25  ;;  %v9701_v9 = vshll.u32 %v17694_v0, 16  ;;  %v9624_v0 = vld [vmem:[#allocation3 + $0x54] sm:$0xf] }
 0x538   : > { %v9732_v38 = vrot.slane %v9730_v3, 4  ;;  %v9781_v36 = vshll.u32 %v9624_v0, 16 }
 0x539   : > { %v9703_v27 = vrot.slane %v9701_v9, 5 }
 0x53d   : > { %12690 = vmatmul.mubr.msk.bf16.gmra.mrb[4].mxu1 %vm1545_vm9, %v13385_v6  ;;  %v16909_v6 = vrot.slane %v9715_v24, 5  ;;  %v16924_v24 = vld [vmem:[#allocation3 + $0xd0] sm:$0xf] }
 0x53e   : > { %12693 = vmatprep.mubr.msk.bf16.mxu1 %vm1545_vm9, %v13386_v41  ;;  %v9721_v41 = vrot.slane %v9719_v63, 4 }
 0x540   : > { %v9722_v19 = vor.u32 %v9721_v41, %v16909_v6  ;;  %v13397_v41 = vld [vmem:[#allocation3 + $0xcc] sm:$0xff]  }
 0x545   : > { %12694 = vmatmul.mubr.msk.bf16.gmra.mrb[8].mxu1 %vm1545_vm9, %v13387_v42  ;;  %v9675_v42 = vrot.slane %v9674_v34, 4  ;;  %v10350_v34 = vld [vmem:[#allocation3 + $0xcc] sm:$0xe] }
 0x546   : > { %12697 = vmatprep.mubr.msk.bf16.mxu1 %vm1545_vm9, %v13388_v26  ;;  %v9688_v26 = vor.u32 %v9687_v35, %v9684_v48  ;;  %v10506_v48 = vrot.slane %v16924_v24, 5  ;;  %v10509_v35 = vrot.slane %v16926_v18, 5  ;;  %v11763_v5 = vrot.slane %v10350_v34, 9 }
 0x547   : > { %v9783_v34 = vrot.slane %v9781_v36, 5  ;;  %v17701_v36 = vld [vmem:[#allocation51_spill] sm:$0xff] }
 0x548   : > { %v9689_v15 = vrot.slane %v9688_v26, 4  ;;  %v10508_v9 = vrot.slane %v10506_v48, 4 }
 0x54a   : > { %v9694_v43 = vsel %vm13571_vm11, %v9689_v15, %v16904_v51 }
 0x54d   : > { %12698 = vmatmul.mubr.msk.bf16.gmra.mrb[12].mxu1 %vm1545_vm9, %v13389_v30  ;;  %v9698_v30 = vor.u32 %v9697_v12, %v16904_v51  ;;  %v9723_v12 = vrot.slane %v9722_v19, 4 }
 0x54e   : > { %12701 = vmatprep.mubr.msk.bf16.mxu1 %vm1545_vm9, %v13390_v39  ;;  %v9708_v39 = vrot.slane %v9706_v53, 4  ;;  %v16931_v53 = vrot.slane %v9739_v47, 5  ;;  %v9778_v47 = vshrl.u32 %v9624_v0, 16 }
 0x54f   : > { %v9699_v10 = vrot.slane %v9698_v30, 4  ;;  %v9727_v30 = vrot.slane %v9725_v8, 5  ;;  %v17698_v8 = vld [vmem:[#allocation47_spill] sm:$0xff] }
 0x550   : > { %v9787_v59 = vshll.u32 %v17698_v8, 16 }
 0x551   : > { %v9704_v26 = vsel %vm13571_vm11, %v9699_v10, %v9703_v27  ;;  %v9728_v27 = vsel %vm13571_vm11, %v9723_v12, %v9727_v30  ;;  %v9791_v10 = vshrl.u32 %v17698_v8, 16  ;;  %v17699_v12 = vld [vmem:[#allocation46_spill] sm:$0xff] }
 0x553   : > { %v9793_v0 = vrot.slane %v9791_v10, 4 }
 0x555   : > { %12702 = vmatmul.mubr.msk.bf16.gmra.mrb[16].mxu1 %vm1545_vm9, %v13391_v49  ;;  %v9679_v49 = vrot.slane %v9677_v55, 5  ;;  %v16933_v55 = vrot.slane %v9763_v62, 5  ;;  %v11717_v62 = vcombine.low %v9694_v43, %v9704_v26  ;;  %v10610_v26 = vsel %vm1594_vm0, %v16880_v25, 0 }
 0x556   : > { %12705 = vmatprep.mubr.msk.bf16.mxu1 %vm1545_vm9, %v13392_v17  ;;  %v9733_v17 = vshll.u32 %v9618_v20, 16  ;;  %v9769_v20 = vrot.slane %v9767_v21, 4 }
 0x557   : > { %v9680_v61 = vsel %vm13571_vm11, %v9675_v42, %v9679_v49  ;;  %v17697_v49 = vld [vmem:[#allocation43_spill] sm:$0xff] }
 0x558   : > { %v9735_v63 = vrot.slane %v9733_v17, 5  ;;  %v11716_v42 = vcombine.low %v9670_v54, %v9680_v61  ;;  %v9749_v17 = vshll.u32 %v17697_v49, 16  ;;  %v9770_v31 = vor.u32 %v9769_v20, %v16933_v55 }
 0x559   : > { %v9811_v20 = vshll.u32 %v16481_v40, 16 }
 0x55a   : > { %v9736_v3 = vor.u32 %v9735_v63, %v9732_v38  ;;  %v9751_v61 = vrot.slane %v9749_v17, 5  ;;  %v9771_v15 = vrot.slane %v9770_v31, 4 }
 0x55b   : > { %v16978_v25 = vrot.slane %v9811_v20, 5 }
 0x55c   : > { %v9737_v63 = vrot.slane %v9736_v3, 4 }
 0x55d   : > { %12706 = vmatmul.mubr.msk.bf16.gmra.mrb[20].mxu1 %vm1545_vm9, %v13393_v14  ;;  %v9712_v14 = vor.u32 %v9711_v52, %v9708_v39  ;;  %v16939_v39 = vsel %vm14037_vm2, %v11763_v5, %v10506_v48  ;;  %v9630_v48 = vld [vmem:[#allocation3 + $0x6c] sm:$0xf]  ;;  %v16963_v5 = vrot.slane %v9787_v59, 5 }
 0x55e   : > { %12709 = vmatprep.mubr.msk.bf16.mxu1 %vm1545_vm9, %v13394_v57  ;;  %v9754_v57 = vshrl.u32 %v9621_v23, 16  ;;  %v9746_v23 = vor.u32 %v9745_v1, %v16931_v53  ;;  %v9773_v1 = vshll.u32 %v17699_v12, 16  ;;  %v9742_v17 = vsel %vm13571_vm11, %v9737_v63, %v16931_v53  ;;  %v17702_v63 = vld [vmem:[#allocation54_spill] sm:$0xff] }
 0x55f   : > { %v9713_v52 = vrot.slane %v9712_v14, 4  ;;  %v9627_v14 = vld [vmem:[#allocation3 + $0x60] sm:$0xf]  ;;  %v9794_v31 = vor.u32 %v9793_v0, %v16963_v5 }
 0x560   : > { %v9756_v19 = vrot.slane %v9754_v57, 4  ;;  %v9780_v57 = vrot.slane %v9778_v47, 4  ;;  %v9775_v47 = vrot.slane %v9773_v1, 5 }
 0x561   : > { %v9718_v21 = vsel %vm13571_vm11, %v9713_v52, %v16909_v6  ;;  %v9815_v6 = vshrl.u32 %v16481_v40, 16  ;;  %v17700_v52 = vld [vmem:[#allocation56_spill] sm:$0xff]  ;;  %v9795_v1 = vrot.slane %v9794_v31, 4  ;;  %v9639_v31 = vld [vmem:[#allocation3 + $0x90] sm:$0xf] }
 0x562   : > { %v11718_v38 = vcombine.low %v9718_v21, %v9728_v27  ;;  %v9784_v30 = vor.u32 %v9783_v34, %v9780_v57  ;;  %v9835_v3 = vshll.u32 %v17700_v52, 16  ;;  %v9839_v49 = vshrl.u32 %v17700_v52, 16 }
 0x563   : > { %v9797_v27 = vshll.u32 %v17701_v36, 16  ;;  %v9776_v59 = vsel %vm13571_vm11, %v9771_v15, %v9775_v47  ;;  %v9859_v57 = vshll.u32 %v17702_v63, 16  ;;  %v9863_v34 = vshrl.u32 %v17702_v63, 16  ;;  %v17704_v36 = vld [vmem:[#allocation59_spill] sm:$0xff] }
 0x564   : > { %v9785_v21 = vrot.slane %v9784_v30, 4  ;;  %v9883_v30 = vshll.u32 %v16554_v29, 16  ;;  %v9887_v52 = vshrl.u32 %v16554_v29, 16 }
 0x565   : > { %12710 = vmatmul.mubr.msk.bf16.gmra.mrb[24].mxu1 %vm1545_vm9, %v13395_v37  ;;  %v16944_v37 = vsel %vm14037_vm2, %v10508_v9, %v10509_v35  ;;  %v9747_v35 = vrot.slane %v9746_v23, 4  ;;  %v9805_v9 = vshll.u32 %v9627_v14, 16 }
 0x566   : > { %12713 = vmatprep.mubr.msk.bf16.mxu1 %vm1545_vm9, %v13396_v4  ;;  %v11780_v54 = vcombine.low %v16939_v39, %v16944_v37  ;;  %v9759_v4 = vrot.slane %v9757_v56, 5  ;;  %v9802_v56 = vshrl.u32 %v9627_v14, 16  ;;  %v9633_v14 = vld [vmem:[#allocation3 + $0x78] sm:$0xf]  ;;  %v9790_v0 = vsel %vm13571_vm11, %v9785_v21, %v16963_v5 }
 0x567   : > { %v9807_v43 = vrot.slane %v9805_v9, 5  ;;  %v17009_v21 = vrot.slane %v9883_v30, 5  ;;  %v17707_v30 = vld [vmem:[#allocation64_spill] sm:$0xff] }
 0x568   : > { %v9760_v51 = vor.u32 %v9759_v4, %v9756_v19  ;;  %v9752_v19 = vsel %vm13571_vm11, %v9747_v35, %v9751_v61  ;;  %v9804_v23 = vrot.slane %v9802_v56, 4  ;;  %v9817_v4 = vrot.slane %v9815_v6, 4  ;;  %v9636_v6 = vld [vmem:[#allocation3 + $0x84] sm:$0xf] }
 0x569   : > { %v16984_v61 = vrot.slane %v9835_v3, 5  ;;  %v11719_v10 = vcombine.low %v9742_v17, %v9752_v19  ;;  %v9874_v17 = vshrl.u32 %v9636_v6, 16  ;;  %v9877_v19 = vshll.u32 %v9636_v6, 16 }
 0x56a   : > { %v9761_v40 = vrot.slane %v9760_v51, 4  ;;  %v9818_v35 = vor.u32 %v9817_v4, %v16978_v25  ;;  %v17703_v51 = vld [vmem:[#allocation52_spill] sm:$0xff]  ;;  %v9808_v56 = vor.u32 %v9807_v43, %v9804_v23  ;;  %v17705_v43 = vld [vmem:[#allocation62_spill] sm:$0xff] }
 0x56b   : > { %v9821_v12 = vshll.u32 %v17703_v51, 16  ;;  %v9907_v29 = vshll.u32 %v17705_v43, 16  ;;  %v9901_v51 = vshll.u32 %v9639_v31, 16 }
 0x56c   : > { %v9819_v3 = vrot.slane %v9818_v35, 4  ;;  %v9898_v35 = vshrl.u32 %v9639_v31, 16  ;;  %v9645_v31 = vld [vmem:[#allocation3 + $0xa8] sm:$0xf] }
 0x56d   : > { %12714 = vmatmul.mubr.msk.bf16.gmra.mrb[28].mxu1 %vm1545_vm9, %v13397_v41  ;;  %v9826_v41 = vshrl.u32 %v9630_v48, 16 }
 0x56e   : > { %12719 = vmatprep.mubr.msk.bf16.mxu1 %vm1545_vm9, %v11716_v42  ;;  %v9829_v42 = vshll.u32 %v9630_v48, 16  ;;  %v9799_v48 = vrot.slane %v9797_v27, 5  ;;  %v9845_v27 = vshll.u32 %v17704_v36, 16 }
 0x56f   : > { %v9828_v53 = vrot.slane %v9826_v41, 4  ;;  %v9850_v41 = vshrl.u32 %v9633_v14, 16 }
 0x570   : > { %v9831_v8 = vrot.slane %v9829_v42, 5  ;;  %v9853_v42 = vshll.u32 %v9633_v14, 16  ;;  %v9800_v5 = vsel %vm13571_vm11, %v9795_v1, %v9799_v48  ;;  %v17706_v14 = vld [vmem:[#allocation60_spill] sm:$0xff]  ;;  %v9847_v48 = vrot.slane %v9845_v27, 5 }
 0x571   : > { %v9852_v23 = vrot.slane %v9850_v41, 4  ;;  %v9869_v63 = vshll.u32 %v17706_v14, 16  ;;  %v17017_v1 = vrot.slane %v9907_v29, 5  ;;  %v17709_v29 = vld [vmem:[#allocation67_spill] sm:$0xff] }
 0x572   : > { %v9832_v20 = vor.u32 %v9831_v8, %v9828_v53  ;;  %v9855_v4 = vrot.slane %v9853_v42, 5  ;;  %v9911_v53 = vshrl.u32 %v17705_v43, 16 }
 0x574   : > { %v9833_v47 = vrot.slane %v9832_v20, 4  ;;  %v9642_v20 = vld [vmem:[#allocation3 + $0x9c] sm:$0xf] }
 0x575   : > { %12720 = vmatmul.mubr.msk.bf16.vlgmr.msra.gmra.mrb[0].mxu1 %vm1545_vm9, %v11717_v62  ;;  %v9841_v62 = vrot.slane %v9839_v49, 4  ;;  %v9823_v49 = vrot.slane %v9821_v12, 5 }
 0x576   : > { %12752 = vmatpush3.bf16.msra.mxu1 %v10610_v26  ;;  %12723 = vmatprep.mubr.msk.bf16.mxu1 %vm1545_vm9, %v11718_v38  ;;  %v9766_v38 = vsel %vm13571_vm11, %v9761_v40, %v16933_v55  ;;  %v16997_v26 = vrot.slane %v9859_v57, 5  ;;  %v9865_v55 = vrot.slane %v9863_v34, 4  ;;  %v9809_v40 = vrot.slane %v9808_v56, 4 }
 0x577   : > { %v11720_v15 = vcombine.low %v9766_v38, %v9776_v59  ;;  %v9842_v9 = vor.u32 %v9841_v62, %v16984_v61  ;;  %v9889_v62 = vrot.slane %v9887_v52, 4  ;;  %v9876_v57 = vrot.slane %v9874_v17, 4 }
 0x578   : > { %v9866_v59 = vor.u32 %v9865_v55, %v16997_v26  ;;  %v9879_v34 = vrot.slane %v9877_v19, 5  ;;  %v11721_v38 = vcombine.low %v9790_v0, %v9800_v5  ;;  %v9814_v12 = vsel %vm13571_vm11, %v9809_v40, %v16978_v25 }
 0x579   : > { %v9843_v8 = vrot.slane %v9842_v9, 4  ;;  %v9913_v56 = vrot.slane %v9911_v53, 4  ;;  %v9890_v42 = vor.u32 %v9889_v62, %v17009_v21  ;;  %v9838_v0 = vsel %vm13571_vm11, %v9833_v47, %v16984_v61 }
 0x57a   : > { %v9867_v41 = vrot.slane %v9866_v59, 4  ;;  %v9871_v55 = vrot.slane %v9869_v63, 5  ;;  %v9880_v25 = vor.u32 %v9879_v34, %v9876_v57  ;;  %v9893_v52 = vshll.u32 %v17707_v30, 16 }
 0x57b   : > { %v9848_v9 = vsel %vm13571_vm11, %v9843_v8, %v9847_v48  ;;  %v9922_v17 = vshrl.u32 %v9642_v20, 16  ;;  %v9925_v19 = vshll.u32 %v9642_v20, 16  ;;  %v9914_v36 = vor.u32 %v9913_v56, %v17017_v1  ;;  %v17710_v8 = vld [vmem:[#allocation70_spill] sm:$0xff] }
 0x57c   : > { %v11723_v5 = vcombine.low %v9838_v0, %v9848_v9  ;;  %v9872_v27 = vsel %vm13571_vm11, %v9867_v41, %v9871_v55  ;;  %v9895_v43 = vrot.slane %v9893_v52, 5  ;;  %v9917_v53 = vshll.u32 %v17709_v29, 16  ;;  %v9648_v41 = vld [vmem:[#allocation3 + $0xb4] sm:$0xf] }
 0x57d   : > { %12724 = vmatmul.mubr.msk.bf16.gmra.mrb[4].mxu1 %vm1545_vm9, %v11719_v10  ;;  %v9824_v10 = vsel %vm13571_vm11, %v9819_v3, %v9823_v49  ;;  %v9900_v3 = vrot.slane %v9898_v35, 4  ;;  %v9903_v49 = vrot.slane %v9901_v51, 5  ;;  %v9955_v59 = vshll.u32 %v17710_v8, 16 }
 0x57e   : > { %12727 = vmatprep.mubr.msk.bf16.mxu1 %vm1545_vm9, %v11720_v15  ;;  %v9856_v15 = vor.u32 %v9855_v4, %v9852_v23  ;;  %v11722_v6 = vcombine.low %v9814_v12, %v9824_v10  ;;  %v9891_v23 = vrot.slane %v9890_v42, 4  ;;  %v17708_v4 = vld [vmem:[#allocation69_spill] sm:$0xff]  ;;  %v9959_v62 = vshrl.u32 %v17710_v8, 16  ;;  %v9654_v8 = vld [vmem:[#allocation3 + $0xcc] sm:$0xf] }
 0x57f   : > { %v9931_v61 = vshll.u32 %v17708_v4, 16  ;;  %v9935_v47 = vshrl.u32 %v17708_v4, 16  ;;  %v9881_v10 = vrot.slane %v9880_v25, 4  ;;  %v9904_v14 = vor.u32 %v9903_v49, %v9900_v3 }
 0x580   : > { %v9857_v40 = vrot.slane %v9856_v15, 4  ;;  %v9924_v63 = vrot.slane %v9922_v17, 4  ;;  %v9927_v57 = vrot.slane %v9925_v19, 5  ;;  %v9946_v48 = vshrl.u32 %v9645_v31, 16 }
 0x581   : > { %v9949_v35 = vshll.u32 %v9645_v31, 16  ;;  %v9896_v12 = vsel %vm13571_vm11, %v9891_v23, %v9895_v43  ;;  %v17041_v15 = vrot.slane %v9931_v61, 5  ;;  %v9937_v56 = vrot.slane %v9935_v47, 4  ;;  %v13440_v47 = vld [vmem:[#allocation3 + $0xb0] sm:$0x1] }
 0x582   : > { %v9862_v34 = vsel %vm13571_vm11, %v9857_v40, %v16997_v26  ;;  %v9919_v20 = vrot.slane %v9917_v53, 5  ;;  %v9961_v9 = vrot.slane %v9959_v62, 4  ;;  %v9886_v26 = vsel %vm13571_vm11, %v9881_v10, %v17009_v21  ;;  %v9651_v40 = vld [vmem:[#allocation3 + $0xc0] sm:$0xf] }
 0x583   : > { %v11724_v51 = vcombine.low %v9862_v34, %v9872_v27  ;;  %v9905_v42 = vrot.slane %v9904_v14, 4  ;;  %v9928_v0 = vor.u32 %v9927_v57, %v9924_v63  ;;  %v9941_v55 = vshll.u32 %v16612_v2, 16 }
 0x584   : > { %v11725_v25 = vcombine.low %v9886_v26, %v9896_v12  ;;  %v9948_v52 = vrot.slane %v9946_v48, 4  ;;  %v9951_v3 = vrot.slane %v9949_v35, 5  ;;  %v9938_v49 = vor.u32 %v9937_v56, %v17041_v15 }
 0x585   : > { %12728 = vmatmul.mubr.msk.bf16.gmra.mrb[8].mxu1 %vm1545_vm9, %v11721_v38  ;;  %v9915_v38 = vrot.slane %v9914_v36, 4  ;;  %v9970_v17 = vshrl.u32 %v9648_v41, 16  ;;  %v9979_v19 = vshll.u32 %v16630_v22, 16  ;;  %v9973_v36 = vshll.u32 %v9648_v41, 16 }
 0x586   : > { %12731 = vmatprep.mubr.msk.bf16.mxu1 %vm1545_vm9, %v11722_v6  ;;  %v17044_v6 = vrot.slane %v9955_v59, 5  ;;  %v10003_v27 = vshll.u32 %v16641_v46, 16  ;;  %v10007_v2 = vshrl.u32 %v16641_v46, 16  ;;  %v9910_v23 = vsel %vm13571_vm11, %v9905_v42, %v17017_v1 }
 0x587   : > { %v9920_v30 = vsel %vm13571_vm11, %v9915_v38, %v9919_v20  ;;  %v9929_v4 = vrot.slane %v9928_v0, 4  ;;  %v9943_v61 = vrot.slane %v9941_v55, 5  ;;  %v9965_v31 = vshll.u32 %v13440_v47, 16  ;;  %v13441_v55 = vld [vmem:[#allocation3 + $0xbc] sm:$0x1] }
 0x588   : > { %v9962_v21 = vor.u32 %v9961_v9, %v17044_v6  ;;  %v11726_v43 = vcombine.low %v9910_v23, %v9920_v30  ;;  %v9952_v29 = vor.u32 %v9951_v3, %v9948_v52  ;;  %v9994_v53 = vshrl.u32 %v9651_v40, 16 }
 0x589   : > { %v9939_v59 = vrot.slane %v9938_v49, 4  ;;  %v9972_v62 = vrot.slane %v9970_v17, 4  ;;  %v9981_v10 = vrot.slane %v9979_v19, 5  ;;  %v9975_v63 = vrot.slane %v9973_v36, 5 }
 0x58a   : > { %v9963_v46 = vrot.slane %v9962_v21, 4  ;;  %v10005_v57 = vrot.slane %v10003_v27, 5  ;;  %v10009_v34 = vrot.slane %v10007_v2, 4  ;;  %v10018_v1 = vshrl.u32 %v9654_v8, 16 }
 0x58b   : > { %v10021_v38 = vshll.u32 %v9654_v8, 16  ;;  %v10027_v48 = vshll.u32 %v16924_v24, 16  ;;  %v10031_v35 = vshrl.u32 %v16924_v24, 16  ;;  %v9967_v12 = vrot.slane %v9965_v31, 5 }
 0x58c   : > { %v9996_v56 = vrot.slane %v9994_v53, 4  ;;  %v9934_v9 = vsel %vm13571_vm11, %v9929_v4, %v17041_v15  ;;  %v9944_v41 = vsel %vm13571_vm11, %v9939_v59, %v9943_v61  ;;  %v9976_v0 = vor.u32 %v9975_v63, %v9972_v62 }
 0x58d   : > { %12732 = vmatmul.mubr.msk.bf16.gmra.mrb[12].mxu1 %vm1545_vm9, %v11723_v5  ;;  %v9983_v5 = vshrl.u32 %v16630_v22, 16  ;;  %v9997_v22 = vshll.u32 %v9651_v40, 16  ;;  %v9968_v42 = vsel %vm13571_vm11, %v9963_v46, %v9967_v12  ;;  %v10010_v30 = vor.u32 %v10009_v34, %v10005_v57  ;;  %v17718_v12 = vld [vmem:[#allocation53_spill] sm:$0xff] }
 0x58e   : > { %12735 = vmatprep.mubr.msk.bf16.mxu1 %vm1545_vm9, %v11724_v51  ;;  %v9953_v51 = vrot.slane %v9952_v29, 4  ;;  %v10020_v24 = vrot.slane %v10018_v1, 4  ;;  %v10023_v52 = vrot.slane %v10021_v38, 5  ;;  %v10029_v3 = vrot.slane %v10027_v48, 5  ;;  %v17712_v1 = vld [vmem:[#allocation45_spill] sm:$0xff]  ;;  %v17715_v48 = vld [vmem:[#allocation50_spill] sm:$0xff] }
 0x58f   : > { %v9985_v14 = vrot.slane %v9983_v5, 4  ;;  %v9999_v20 = vrot.slane %v9997_v22, 5  ;;  %v10033_v49 = vrot.slane %v10031_v35, 4  ;;  %v11727_v17 = vcombine.low %v9934_v9, %v9944_v41  ;;  %v13442_v5 = vld [vmem:[#allocation3 + $0xc8] sm:$0x1] }
 0x590   : > { %v9958_v15 = vsel %vm13571_vm11, %v9953_v51, %v17044_v6  ;;  %v10013_v40 = vshll.u32 %v13442_v5, 16  ;;  %v10011_v2 = vrot.slane %v10010_v30, 4  ;;  %v9977_v23 = vrot.slane %v9976_v0, 4  ;;  %v17717_v51 = vld [vmem:[#allocation49_spill] sm:$0xff]  ;;  %v17723_v41 = vld [vmem:[#allocation58_spill] sm:$0xff]  ;;  %v17726_v0 = vld [vmem:[#allocation63_spill] sm:$0xff] }
 0x591   : > { %v9986_v26 = vor.u32 %v9985_v14, %v9981_v10  ;;  %v10000_v19 = vor.u32 %v9999_v20, %v9996_v56  ;;  %v11728_v21 = vcombine.low %v9958_v15, %v9968_v42  ;;  %v10024_v4 = vor.u32 %v10023_v52, %v10020_v24  ;;  %v17721_v20 = vld [vmem:[#allocation57_spill] sm:$0xff]  ;;  %v17729_v30 = vld [vmem:[#allocation66_spill] sm:$0xff]  ;;  %v17730_v24 = vld [vmem:[#allocation68_spill] sm:$0xff] }
 0x592   : > { %v10034_v61 = vor.u32 %v10033_v49, %v10029_v3  ;;  %v10037_v47 = vshll.u32 %v16926_v18, 16  ;;  %v9982_v53 = vsel %vm13571_vm11, %v9977_v23, %v9981_v10  ;;  %v17711_v10 = vld [vmem:[#allocation44_spill] sm:$0xff]  ;;  %v17719_v56 = vcombine.low %v17717_v51, %v17718_v12  ;;  %v17735_v15 = vld [vmem:[#allocation73_spill] sm:$0xff]  ;;  %v17743_v23 = vld [vmem:[#allocation78_spill] sm:$0xff] }
 0x593   : > { %v9987_v36 = vrot.slane %v9986_v26, 4  ;;  %v10001_v31 = vrot.slane %v10000_v19, 4  ;;  %v10025_v22 = vrot.slane %v10024_v4, 4  ;;  %v17713_v38 = vcombine.low %v17711_v10, %v17712_v1  ;;  %v17724_v26 = vld [vmem:[#allocation61_spill] sm:$0xff]  ;;  %v17733_v49 = vld [vmem:[#allocation72_spill] sm:$0xff]  ;;  %v17736_v19 = vld [vmem:[#allocation74_spill] sm:$0xff] }
 0x594   : > { %v10035_v8 = vrot.slane %v10034_v61, 4  ;;  %v10039_v59 = vrot.slane %v10037_v47, 5  ;;  %v17722_v9 = vcombine.low %v17720_v44, %v17721_v20  ;;  %v17725_v42 = vcombine.low %v17723_v41, %v17724_v26  ;;  %v10888_v12 = vld [vmem:[%s13562_s10 + $0x28] sm:$0xff] }
 0x595   : > { %12736 = vmatmul.mubr.msk.bf16.gmra.mrb[16].mxu1 %vm1545_vm9, %v11725_v25  ;;  %v9989_v25 = vshll.u32 %v13441_v55, 16  ;;  %v10006_v14 = vsel %vm13571_vm11, %v10001_v31, %v10005_v57  ;;  %v10030_v18 = vsel %vm13571_vm11, %v10025_v22, %v10029_v3  ;;  %v17714_v57 = vld [vmem:[#allocation48_spill] sm:$0xff]  ;;  %v17727_v55 = vld [vmem:[#allocation65_spill] sm:$0xff]  ;;  %v17731_v52 = vcombine.low %v17729_v30, %v17730_v24  ;;  %v17732_v3 = vld [vmem:[#allocation71_spill] sm:$0xff] }
 0x596   : > { %12739 = vmatprep.mubr.msk.bf16.mxu1 %vm1545_vm9, %v11726_v43  ;;  %v10015_v43 = vrot.slane %v10013_v40, 5  ;;  %v10040_v63 = vsel %vm13571_vm11, %v10035_v8, %v10039_v59  ;;  %v17716_v35 = vcombine.low %v17714_v57, %v17715_v48  ;;  %v17737_v5 = vcombine.low %v17735_v15, %v17736_v19  ;;  %v17738_v40 = vld [vmem:[#allocation75_spill] sm:$0xff]  ;;  %v10890_v57 = vld [vmem:[%s13562_s10 + $0x38] sm:$0xff]  ;;  %v10891_v24 = vld [vmem:[%s13562_s10 + $0x40] sm:$0xff] }
 0x597   : > { %v9991_v27 = vrot.slane %v9989_v25, 5  ;;  %v11731_v34 = vcombine.low %v10030_v18, %v10040_v63  ;;  %v17728_v25 = vcombine.low %v17726_v0, %v17727_v55  ;;  %v17744_v4 = vcombine.low %v16658_v32, %v17743_v23  ;;  %v10893_v0 = vld [vmem:[%s13562_s10 + $0x50] sm:$0xff] }
 0x598   : > { %v10016_v29 = vsel %vm13571_vm11, %v10011_v2, %v10015_v43  ;;  %v10884_v43 = vld [vmem:[%s13562_s10 + $0x8] sm:$0xff] }
 0x599   : > { %v9992_v6 = vsel %vm13571_vm11, %v9987_v36, %v9991_v27  ;;  %v11730_v46 = vcombine.low %v10006_v14, %v10016_v29  ;;  %v17740_v36 = vld [vmem:[#allocation76_spill] sm:$0xff]  ;;  %v17741_v27 = vld [vmem:[#allocation77_spill] sm:$0xff] }
 0x59a   : > { %v11729_v62 = vcombine.low %v9982_v53, %v9992_v6  ;;  %v17742_v2 = vcombine.low %v17740_v36, %v17741_v27  ;;  %v10889_v14 = vld [vmem:[%s13562_s10 + $0x30] sm:$0xff] }
 0x59d   : > { %12740 = vmatmul.mubr.msk.bf16.gmra.mrb[20].mxu1 %vm1545_vm9, %v11727_v17  ;;  %v17734_v17 = vcombine.low %v17732_v3, %v17733_v49 }
 0x59e   : > { %12743 = vmatprep.mubr.msk.bf16.mxu1 %vm1545_vm9, %v11728_v21  ;;  %v17739_v21 = vcombine.low %v16626_v58, %v17738_v40  ;;  %v17161_v58 = vld [vmem:[%s17343_s5] ss:$0 sm:$0xff]  ;;  %v10892_v40 = vld [vmem:[%s13562_s10 + $0x48] sm:$0xff] }
 0x5a5   : > { %12744 = vmatmul.mubr.msk.bf16.gmra.mrb[24].mxu1 %vm1545_vm9, %v11729_v62 }
 0x5a6   : > { %12747 = vmatprep.mubr.msk.bf16.mxu1 %vm1545_vm9, %v11730_v46 }
 0x5ad   : > { %12748 = vmatmul.mubr.msk.bf16.gmra.mrb[28].mxu1 %vm1545_vm9, %v11731_v34  ;;  %v10887_v34 = vld [vmem:[%s13562_s10 + $0x20] sm:$0xff] }
 0x5ae   : > { %12753 = vmatprep.mubr.msk.bf16.mxu1 %vm1545_vm9, %v17713_v38 }
 0x5b5   : > { %12754 = vmatmul.mubr.msk.bf16.vlgmr.msra.gmra.mrb[0].mxu1 %vm1545_vm9, %v17716_v35 }
 0x5b6   : > { %12757 = vmatprep.mubr.msk.bf16.mxu1 %vm1545_vm9, %v17719_v56 }
 0x5bd   : > { %12758 = vmatmul.mubr.msk.bf16.gmra.mrb[4].mxu1 %vm1545_vm9, %v17722_v9 }
 0x5be   : > { %12761 = vmatprep.mubr.msk.bf16.mxu1 %vm1545_vm9, %v17725_v42 }
 0x5c5   : > { %12762 = vmatmul.mubr.msk.bf16.gmra.mrb[8].mxu1 %vm1545_vm9, %v17728_v25 }
 0x5c6   : > { %12765 = vmatprep.mubr.msk.bf16.mxu1 %vm1545_vm9, %v17731_v52 }
 0x5cd   : > { %12766 = vmatmul.mubr.msk.bf16.gmra.mrb[12].mxu1 %vm1545_vm9, %v17734_v17  ;;  %v10894_v17 = vld [vmem:[%s13562_s10 + $0x58] sm:$0xff] }
 0x5ce   : > { %12769 = vmatprep.mubr.msk.bf16.mxu1 %vm1545_vm9, %v17737_v5 }
 0x5d5   : > { %12770 = vmatmul.mubr.msk.bf16.gmra.mrb[16].mxu1 %vm1545_vm9, %v17739_v21 }
 0x5d6   : > { %12773 = vmatprep.mubr.msk.bf16.mxu1 %vm1545_vm9, %v17742_v2 }
 0x5dd   : > { %12774 = vmatmul.mubr.msk.bf16.gmra.mrb[20].mxu1 %vm1545_vm9, %v17744_v4 }
 0x5de   : > { %12777 = vmatprep.mubr.msk.bf16.mxu1 %vm1545_vm9, %v11777_v33 }
 0x5e5   : > { %12778 = vmatmul.mubr.msk.bf16.gmra.mrb[24].mxu1 %vm1545_vm9, %v11778_v16 }
 0x5e6   : > { %12781 = vmatprep.mubr.msk.bf16.mxu1 %vm1545_vm9, %v11779_v13 }
 0x5ed   : > { %12782 = vmatmul.mubr.msk.bf16.gmra.mrb[28].mxu1 %vm1545_vm9, %v11780_v54  ;;  %v10886_v54 = vld [vmem:[%s13562_s10 + $0x18] sm:$0xff] }
 0x688   : > { %v12755_v32 = vpop.f32.mrb[0].mxu1 }
 0x689   : > { %v10814_v7 = vmul.f32 %v12755_v32, %v17161_v58  ;;  %v10646_v33 = vpop.f32.mrb[1].mxu1 }
 0x68a   : > { %v10812_v50 = vmul.f32 %v17161_v58, %v10646_v33  ;;  %v12756_v16 = vpop.f32.mrb[2].mxu1 }
 0x68b   : > { %v10853_v28 = vadd.f32 %v17166_v60, %v10814_v7  ;;  %v10815_v13 = vmul.f32 %v12756_v16, %v17161_v58  ;;  %v10649_v39 = vpop.f32.mrb[3].mxu1  ;;  %v10897_v7 = vld [vmem:[%s13562_s10 + $0x70] sm:$0xff]  ;;  %v10895_v16 = vld [vmem:[%s13562_s10 + $0x60] sm:$0xff] }
 0x68c   : > { %v10851_v37 = vadd.f32 %v17166_v60, %v10812_v50  ;;  %v10813_v61 = vmul.f32 %v17161_v58, %v10649_v39  ;;  %v10898_v39 = vld [vmem:[%s13562_s10 + $0x78] sm:$0xff] }
 0x68d   : > { %v10917_v47 = vadd.f32 %v10885_v11, %v10853_v28  ;;  %v10854_v31 = vadd.f32 %v17166_v60, %v10815_v13 }
 0x68e   : > { %v10915_v6 = vadd.f32 %v10883_v45, %v10851_v37  ;;  %v10852_v29 = vadd.f32 %v17166_v60, %v10813_v61 }
 0x68f   : > { %10949 = vst.msk [vmem:[%s17179_s21 + $0x10] sm:$0xff] %vm1545_vm9, %v10917_v47  ;;  %v10918_v53 = vadd.f32 %v10886_v54, %v10854_v31  ;;  %v10896_v47 = vld [vmem:[%s13562_s10 + $0x68] sm:$0xff] }
 0x690   : > { %10947 = vst.msk [vmem:[%s17179_s21] sm:$0xff] %vm1545_vm9, %v10915_v6  ;;  %v10916_v22 = vadd.f32 %v10884_v43, %v10852_v29  ;;  %v12759_v8 = vpop.f32.mrb[4].mxu1 }
 0x691   : > { %10950 = vst.msk [vmem:[%s17179_s21 + $0x18] sm:$0xff] %vm1545_vm9, %v10918_v53  ;;  %v10818_v59 = vmul.f32 %v12759_v8, %v17161_v58  ;;  %v10662_v62 = vpop.f32.mrb[5].mxu1 }
 0x692   : > { %10948 = vst.msk [vmem:[%s17179_s21 + $0x8] sm:$0xff] %vm1545_vm9, %v10916_v22  ;;  %v10816_v46 = vmul.f32 %v17161_v58, %v10662_v62  ;;  %v12760_v18 = vpop.f32.mrb[6].mxu1 }
 0x693   : > { %v10857_v63 = vadd.f32 %v17166_v60, %v10818_v59  ;;  %v10819_v10 = vmul.f32 %v12760_v18, %v17161_v58  ;;  %v10665_v1 = vpop.f32.mrb[7].mxu1  ;;  %v10901_v59 = vld [vmem:[%s13562_s10 + $0x90] sm:$0xff]  ;;  %v10899_v18 = vld [vmem:[%s13562_s10 + $0x80] sm:$0xff] }
 0x694   : > { %v10855_v38 = vadd.f32 %v17166_v60, %v10816_v46  ;;  %v10817_v48 = vmul.f32 %v17161_v58, %v10665_v1  ;;  %v10902_v1 = vld [vmem:[%s13562_s10 + $0x98] sm:$0xff] }
 0x695   : > { %v10921_v35 = vadd.f32 %v10889_v14, %v10857_v63  ;;  %v10858_v51 = vadd.f32 %v17166_v60, %v10819_v10 }
 0x696   : > { %v10919_v56 = vadd.f32 %v10887_v34, %v10855_v38  ;;  %v10856_v44 = vadd.f32 %v17166_v60, %v10817_v48 }
 0x697   : > { %10953 = vst.msk [vmem:[%s17179_s21 + $0x30] sm:$0xff] %vm1545_vm9, %v10921_v35  ;;  %v10922_v20 = vadd.f32 %v10890_v57, %v10858_v51  ;;  %v10900_v35 = vld [vmem:[%s13562_s10 + $0x88] sm:$0xff] }
 0x698   : > { %10951 = vst.msk [vmem:[%s17179_s21 + $0x20] sm:$0xff] %vm1545_vm9, %v10919_v56  ;;  %v10920_v9 = vadd.f32 %v10888_v12, %v10856_v44  ;;  %v12763_v41 = vpop.f32.mrb[8].mxu1 }
 0x699   : > { %10954 = vst.msk [vmem:[%s17179_s21 + $0x38] sm:$0xff] %vm1545_vm9, %v10922_v20  ;;  %v10822_v26 = vmul.f32 %v12763_v41, %v17161_v58  ;;  %v10678_v42 = vpop.f32.mrb[9].mxu1 }
 0x69a   : > { %10952 = vst.msk [vmem:[%s17179_s21 + $0x28] sm:$0xff] %vm1545_vm9, %v10920_v9  ;;  %v10820_v55 = vmul.f32 %v17161_v58, %v10678_v42  ;;  %v12764_v25 = vpop.f32.mrb[10].mxu1 }
 0x69b   : > { %v10861_v30 = vadd.f32 %v17166_v60, %v10822_v26  ;;  %v10823_v52 = vmul.f32 %v12764_v25, %v17161_v58  ;;  %v10681_v3 = vpop.f32.mrb[11].mxu1  ;;  %v10905_v26 = vld [vmem:[%s13562_s10 + $0xb0] sm:$0xff]  ;;  %v10903_v25 = vld [vmem:[%s13562_s10 + $0xa0] sm:$0xff] }
 0x69c   : > { %v10859_v49 = vadd.f32 %v17166_v60, %v10820_v55  ;;  %v10821_v15 = vmul.f32 %v17161_v58, %v10681_v3  ;;  %v10906_v3 = vld [vmem:[%s13562_s10 + $0xb8] sm:$0xff] }
 0x69d   : > { %v10925_v19 = vadd.f32 %v10893_v0, %v10861_v30  ;;  %v10862_v5 = vadd.f32 %v17166_v60, %v10823_v52 }
 0x69e   : > { %v10923_v21 = vadd.f32 %v10891_v24, %v10859_v49  ;;  %v10860_v36 = vadd.f32 %v17166_v60, %v10821_v15 }
 0x69f   : > { %10957 = vst.msk [vmem:[%s17179_s21 + $0x50] sm:$0xff] %vm1545_vm9, %v10925_v19  ;;  %v10926_v27 = vadd.f32 %v10894_v17, %v10862_v5  ;;  %v10904_v19 = vld [vmem:[%s13562_s10 + $0xa8] sm:$0xff] }
 0x6a0   : > { %10955 = vst.msk [vmem:[%s17179_s21 + $0x40] sm:$0xff] %vm1545_vm9, %v10923_v21  ;;  %v10924_v2 = vadd.f32 %v10892_v40, %v10860_v36  ;;  %v12767_v23 = vpop.f32.mrb[12].mxu1 }
 0x6a1   : > { %10958 = vst.msk [vmem:[%s17179_s21 + $0x58] sm:$0xff] %vm1545_vm9, %v10926_v27  ;;  %v10826_v4 = vmul.f32 %v12767_v23, %v17161_v58  ;;  %v10694_v32 = vpop.f32.mrb[13].mxu1 }
 0x6a2   : > { %10956 = vst.msk [vmem:[%s17179_s21 + $0x48] sm:$0xff] %vm1545_vm9, %v10924_v2  ;;  %v10824_v33 = vmul.f32 %v17161_v58, %v10694_v32  ;;  %v12768_v11 = vpop.f32.mrb[14].mxu1 }
 0x6a3   : > { %v10865_v50 = vadd.f32 %v17166_v60, %v10826_v4  ;;  %v10827_v28 = vmul.f32 %v12768_v11, %v17161_v58  ;;  %v10697_v45 = vpop.f32.mrb[15].mxu1  ;;  %v10909_v4 = vld [vmem:[%s13562_s10 + $0xd0] sm:$0xff]  ;;  %v10907_v11 = vld [vmem:[%s13562_s10 + $0xc0] sm:$0xff] }
 0x6a4   : > { %v10863_v13 = vadd.f32 %v17166_v60, %v10824_v33  ;;  %v10825_v37 = vmul.f32 %v17161_v58, %v10697_v45  ;;  %v10910_v45 = vld [vmem:[%s13562_s10 + $0xd8] sm:$0xff] }
 0x6a5   : > { %v10929_v54 = vadd.f32 %v10897_v7, %v10865_v50  ;;  %v10866_v61 = vadd.f32 %v17166_v60, %v10827_v28 }
 0x6a6   : > { %v10927_v31 = vadd.f32 %v10895_v16, %v10863_v13  ;;  %v10864_v43 = vadd.f32 %v17166_v60, %v10825_v37 }
 0x6a7   : > { %10961 = vst.msk [vmem:[%s17179_s21 + $0x70] sm:$0xff] %vm1545_vm9, %v10929_v54  ;;  %v10930_v6 = vadd.f32 %v10898_v39, %v10866_v61  ;;  %v10908_v54 = vld [vmem:[%s13562_s10 + $0xc8] sm:$0xff] }
 0x6a8   : > { %10959 = vst.msk [vmem:[%s17179_s21 + $0x60] sm:$0xff] %vm1545_vm9, %v10927_v31  ;;  %v10928_v29 = vadd.f32 %v10896_v47, %v10864_v43  ;;  %v12771_v53 = vpop.f32.mrb[16].mxu1 }
 0x6a9   : > { %10962 = vst.msk [vmem:[%s17179_s21 + $0x78] sm:$0xff] %vm1545_vm9, %v10930_v6  ;;  %v10830_v22 = vmul.f32 %v12771_v53, %v17161_v58  ;;  %v10710_v8 = vpop.f32.mrb[17].mxu1 }
 0x6aa   : > { %10960 = vst.msk [vmem:[%s17179_s21 + $0x68] sm:$0xff] %vm1545_vm9, %v10928_v29  ;;  %v10828_v62 = vmul.f32 %v17161_v58, %v10710_v8  ;;  %v12772_v14 = vpop.f32.mrb[18].mxu1 }
 0x6ab   : > { %v10869_v46 = vadd.f32 %v17166_v60, %v10830_v22  ;;  %v10831_v63 = vmul.f32 %v12772_v14, %v17161_v58  ;;  %v10713_v34 = vpop.f32.mrb[19].mxu1  ;;  %v10913_v22 = vld [vmem:[%s13562_s10 + $0xf0] sm:$0xff]  ;;  %v10911_v14 = vld [vmem:[%s13562_s10 + $0xe0] sm:$0xff] }
 0x6ac   : > { %v10867_v10 = vadd.f32 %v17166_v60, %v10828_v62  ;;  %v10829_v38 = vmul.f32 %v17161_v58, %v10713_v34  ;;  %v10914_v34 = vld [vmem:[%s13562_s10 + $0xf8] sm:$0xff] }
 0x6ad   : > { %v10933_v57 = vadd.f32 %v10901_v59, %v10869_v46  ;;  %v10870_v48 = vadd.f32 %v17166_v60, %v10831_v63 }
 0x6ae   : > { %v10931_v51 = vadd.f32 %v10899_v18, %v10867_v10  ;;  %v10868_v12 = vadd.f32 %v17166_v60, %v10829_v38 }
 0x6af   : > { %10965 = vst.msk [vmem:[%s17179_s21 + $0x90] sm:$0xff] %vm1545_vm9, %v10933_v57  ;;  %v10934_v56 = vadd.f32 %v10902_v1, %v10870_v48  ;;  %v10912_v57 = vld [vmem:[%s13562_s10 + $0xe8] sm:$0xff] }
 0x6b0   : > { %10963 = vst.msk [vmem:[%s17179_s21 + $0x80] sm:$0xff] %vm1545_vm9, %v10931_v51  ;;  %v10932_v44 = vadd.f32 %v10900_v35, %v10868_v12  ;;  %v12775_v20 = vpop.f32.mrb[20].mxu1 }
 0x6b1   : > { %10966 = vst.msk [vmem:[%s17179_s21 + $0x98] sm:$0xff] %vm1545_vm9, %v10934_v56  ;;  %v10834_v9 = vmul.f32 %v12775_v20, %v17161_v58  ;;  %v10726_v41 = vpop.f32.mrb[21].mxu1 }
 0x6b2   : > { %10964 = vst.msk [vmem:[%s17179_s21 + $0x88] sm:$0xff] %vm1545_vm9, %v10932_v44  ;;  %v10832_v42 = vmul.f32 %v17161_v58, %v10726_v41  ;;  %v12776_v0 = vpop.f32.mrb[22].mxu1 }
 0x6b3   : > { %v10873_v55 = vadd.f32 %v17166_v60, %v10834_v9  ;;  %v10835_v30 = vmul.f32 %v12776_v0, %v17161_v58  ;;  %v10729_v24 = vpop.f32.mrb[23].mxu1 }
 0x6b4   : > { %v10871_v52 = vadd.f32 %v17166_v60, %v10832_v42  ;;  %v10833_v49 = vmul.f32 %v17161_v58, %v10729_v24 }
 0x6b5   : > { %v10937_v17 = vadd.f32 %v10905_v26, %v10873_v55  ;;  %v10874_v15 = vadd.f32 %v17166_v60, %v10835_v30 }
 0x6b6   : > { %v10935_v5 = vadd.f32 %v10903_v25, %v10871_v52  ;;  %v10872_v40 = vadd.f32 %v17166_v60, %v10833_v49 }
 0x6b7   : > { %10969 = vst.msk [vmem:[%s17179_s21 + $0xb0] sm:$0xff] %vm1545_vm9, %v10937_v17  ;;  %v10938_v21 = vadd.f32 %v10906_v3, %v10874_v15 }
 0x6b8   : > { %10967 = vst.msk [vmem:[%s17179_s21 + $0xa0] sm:$0xff] %vm1545_vm9, %v10935_v5  ;;  %v10936_v36 = vadd.f32 %v10904_v19, %v10872_v40  ;;  %v12779_v27 = vpop.f32.mrb[24].mxu1 }
 0x6b9   : > { %10970 = vst.msk [vmem:[%s17179_s21 + $0xb8] sm:$0xff] %vm1545_vm9, %v10938_v21  ;;  %v10838_v2 = vmul.f32 %v12779_v27, %v17161_v58  ;;  %v10742_v23 = vpop.f32.mrb[25].mxu1 }
 0x6ba   : > { %10968 = vst.msk [vmem:[%s17179_s21 + $0xa8] sm:$0xff] %vm1545_vm9, %v10936_v36  ;;  %v10836_v32 = vmul.f32 %v17161_v58, %v10742_v23  ;;  %v12780_v7 = vpop.f32.mrb[26].mxu1 }
 0x6bb   : > { %v10877_v33 = vadd.f32 %v17166_v60, %v10838_v2  ;;  %v10839_v50 = vmul.f32 %v12780_v7, %v17161_v58  ;;  %v10745_v16 = vpop.f32.mrb[27].mxu1 }
 0x6bc   : > { %v10875_v28 = vadd.f32 %v17166_v60, %v10836_v32  ;;  %v10837_v13 = vmul.f32 %v17161_v58, %v10745_v16 }
 0x6bd   : > { %v10941_v39 = vadd.f32 %v10909_v4, %v10877_v33  ;;  %v10878_v37 = vadd.f32 %v17166_v60, %v10839_v50 }
 0x6be   : > { %v10939_v61 = vadd.f32 %v10907_v11, %v10875_v28  ;;  %v10876_v47 = vadd.f32 %v17166_v60, %v10837_v13 }
 0x6bf   : > { %10973 = vst.msk [vmem:[%s17179_s21 + $0xd0] sm:$0xff] %vm1545_vm9, %v10941_v39  ;;  %v10942_v31 = vadd.f32 %v10910_v45, %v10878_v37 }
 0x6c0   : > { %10971 = vst.msk [vmem:[%s17179_s21 + $0xc0] sm:$0xff] %vm1545_vm9, %v10939_v61  ;;  %v10940_v43 = vadd.f32 %v10908_v54, %v10876_v47  ;;  %v12783_v6 = vpop.f32.mrb[28].mxu1 }
 0x6c1   : > { %10974 = vst.msk [vmem:[%s17179_s21 + $0xd8] sm:$0xff] %vm1545_vm9, %v10942_v31  ;;  %v10842_v29 = vmul.f32 %v12783_v6, %v17161_v58  ;;  %v10758_v53 = vpop.f32.mrb[29].mxu1 }
 0x6c2   : > { %10972 = vst.msk [vmem:[%s17179_s21 + $0xc8] sm:$0xff] %vm1545_vm9, %v10940_v43  ;;  %v10840_v8 = vmul.f32 %v17161_v58, %v10758_v53  ;;  %v12784_v59 = vpop.f32.mrb[30].mxu1 }
 0x6c3   : > { %v10881_v62 = vadd.f32 %v17166_v60, %v10842_v29  ;;  %v10843_v46 = vmul.f32 %v12784_v59, %v17161_v58  ;;  %v10761_v18 = vpop.f32.mrb[31].mxu1 }
 0x6c4   : > { %v10879_v63 = vadd.f32 %v17166_v60, %v10840_v8  ;;  %v10841_v10 = vmul.f32 %v17161_v58, %v10761_v18 }
 0x6c5   : > { %v10945_v1 = vadd.f32 %v10913_v22, %v10881_v62  ;;  %v10882_v38 = vadd.f32 %v17166_v60, %v10843_v46 }
 0x6c6   : > { %v10943_v48 = vadd.f32 %v10911_v14, %v10879_v63  ;;  %v10880_v35 = vadd.f32 %v17166_v60, %v10841_v10 }
 0x6c7   : > { %10977 = vst.msk [vmem:[%s17179_s21 + $0xf0] sm:$0xff] %vm1545_vm9, %v10945_v1  ;;  %v10946_v51 = vadd.f32 %v10914_v34, %v10882_v38 }
 0x6c8   : > { %10975 = vst.msk [vmem:[%s17179_s21 + $0xe0] sm:$0xff] %vm1545_vm9, %v10943_v48  ;;  %v10944_v12 = vadd.f32 %v10912_v57, %v10880_v35 }
 0x6c9   : > { %10978 = vst.msk [vmem:[%s17179_s21 + $0xf8] sm:$0xff] %vm1545_vm9, %v10946_v51 }
 0x6ca   : > { %10976 = vst.msk [vmem:[%s17179_s21 + $0xe8] sm:$0xff] %vm1545_vm9, %v10944_v12 }
 0x6cb PF: > { %s17_s24 = sadd.s32 1, %s13449_s24  }
 0x6cc   : > { %p14_p4 = scmp.ge.s32.totalorder %s17_s24, 4  }
 0x6ce   :  { %16 = sbr.rel (!%p14_p4) target bundleno = 1 (0x1), region = 100 }

</bundles_post_ra>
